<compile_context>
chip_gen: v7x
topology: tpu7x:2x2x1
jax: 0.10.0
libtpu: 0.0.40
codegen_flags: <defaults>
</compile_context>

<pallas_src>
import functools

import jax
import jax.numpy as jnp
from jax.experimental import pallas as pl
from jax.experimental.pallas import tpu as pltpu


def _linear_kernel(x_ref, w_ref, b_ref, o_ref, acc_ref, *, activation, cls_w):
    """Fused Linear (+bias) with ReLU / fused-head (masked softmax) epilogue.

    Grid = (1, K_tiles); K is the reduction axis (last, "arbitrary").
    acc_ref is a VMEM f32 accumulator resident across the K axis.
    """
    k = pl.program_id(1)

    @pl.when(k == 0)
    def _():
        acc_ref[...] = jnp.zeros_like(acc_ref)

    # bf16 x bf16 -> f32 accumulate on the MXU.
    acc_ref[...] += jnp.dot(
        x_ref[...], w_ref[...], preferred_element_type=jnp.float32
    )

    @pl.when(k == pl.num_programs(1) - 1)
    def _():
        y = acc_ref[...] + b_ref[...]
        if activation == "relu":
            y = jnp.maximum(y, 0.0)
        elif activation == "head":
            # Fused classifier + box_reg head (output padded to 128 lanes):
            #   columns [0, cls_w)        -> row softmax (torch Softmax, dim=1)
            #   columns [cls_w, ...)      -> plain linear (box regression + pad)
            cols = jax.lax.broadcasted_iota(jnp.int32, y.shape, 1)
            is_cls = cols < cls_w
            m = jnp.max(jnp.where(is_cls, y, -jnp.inf), axis=-1, keepdims=True)
            e = jnp.exp(jnp.where(is_cls, y - m, -jnp.inf))   # exp(-inf) == 0
            s = jnp.sum(e, axis=-1, keepdims=True)
            y = jnp.where(is_cls, e / s, y)
        o_ref[...] = y.astype(o_ref.dtype)


def pallas_linear(x, w, b, *, activation="none", out_dtype=None, cls_w=0,
                  tk=1024):
    """y = epilogue(x @ w + b).  x:(M,K) bf16  w:(K,N) bf16  b:(1,N) f32.

    Full output width (tn = N) is kept resident in a VMEM f32 accumulator;
    only the K reduction is tiled.
    """
    M, K = x.shape
    Kw, N = w.shape
    assert K == Kw
    tk = min(tk, K)
    if K % tk != 0:
        tk = K  # fall back to a single K tile (legal: equals full dim)
    tn = N      # full output width: accumulator-resident, lane-dense stores
    grid = (1, K // tk)
    out_dtype = out_dtype if out_dtype is not None else x.dtype

    kernel = functools.partial(_linear_kernel, activation=activation,
                               cls_w=cls_w)
    return pl.pallas_call(
        kernel,
        out_shape=jax.ShapeDtypeStruct((M, N), out_dtype),
        grid_spec=pltpu.PrefetchScalarGridSpec(
            num_scalar_prefetch=0,
            grid=grid,
            in_specs=[
                pl.BlockSpec((M, tk), lambda j, k: (0, k)),   # x tile (bf16)
                pl.BlockSpec((tk, tn), lambda j, k: (k, j)),  # w tile (bf16)
                pl.BlockSpec((1, tn), lambda j, k: (0, j)),   # bias (f32)
            ],
            out_specs=pl.BlockSpec((M, tn), lambda j, k: (0, j)),
            scratch_shapes=[pltpu.VMEM((M, tn), jnp.float32)],
        ),
        compiler_params=pltpu.CompilerParams(
            dimension_semantics=("parallel", "arbitrary"),
            # ~16.3 MiB actually used (2 x 8 MiB weight buffers + small rest);
            # 48 MiB keeps headroom yet stays under v7x's 64 MiB physical VMEM.
            vmem_limit_bytes=48 << 20,
        ),
    )(x, w, b)


class DetectorBlockPallas:
    """JAX/Pallas port of DetectorBlock.forward."""

    def __init__(self, input_dim, classes, key, hidden=4096):
        n_cls = len(classes)
        self.cls_w = n_cls + 1
        self.box_w = 4 * n_cls
        ks = jax.random.split(key, 8)

        def normal(k, shape, std, dtype=jnp.float32):
            return (std * jax.random.normal(k, shape, jnp.float32)).astype(dtype)

        # fc_3_4: fc3 (input_dim->4096) + ReLU, fc4 (4096->4096) + ReLU,
        # all params ~ N(0, 0.01).  Weights stored as (in, out) = W.T, bf16.
        self.w3 = normal(ks[0], (input_dim, hidden), 0.01, jnp.bfloat16)
        self.b3 = normal(ks[1], (1, hidden), 0.01)
        self.w4 = normal(ks[2], (hidden, hidden), 0.01, jnp.bfloat16)
        self.b4 = normal(ks[3], (1, hidden), 0.01)

        # classifier: Linear(4096, n_cls+1), std=0.01, then Softmax(dim=1)
        w5_1 = normal(ks[4], (hidden, self.cls_w), 0.01)
        b5_1 = normal(ks[5], (1, self.cls_w), 0.01)
        # box_reg: Linear(4096, 4*n_cls), std=0.001
        w5_2 = normal(ks[6], (hidden, self.box_w), 0.001)
        b5_2 = normal(ks[7], (1, self.box_w), 0.001)

        # Fuse the two heads into one weight matrix, padded to 128 lanes so
        # the output store is lane-dense (unmasked vst).
        n_heads = self.cls_w + self.box_w
        self.n_pad = max(128, ((n_heads + 127) // 128) * 128)
        w_heads = jnp.concatenate([w5_1, w5_2], axis=1)
        b_heads = jnp.concatenate([b5_1, b5_2], axis=1)
        self.w_heads = (
            jnp.zeros((hidden, self.n_pad), jnp.float32)
            .at[:, :n_heads].set(w_heads)
            .astype(jnp.bfloat16)
        )
        self.b_heads = (
            jnp.zeros((1, self.n_pad), jnp.float32).at[:, :n_heads].set(b_heads)
        )

    def __call__(self, x):
        b, c, h, w = x.shape
        xf = x.reshape(b, -1)  # same as torch .view(b, -1) on NCHW

        # Pad rows to a multiple of 8 for sublane density (sliced off below).
        m_pad = ((b + 7) // 8) * 8
        if m_pad != b:
            xf = jnp.pad(xf, ((0, m_pad - b), (0, 0)))
        xf = xf.astype(jnp.bfloat16)

        h1 = pallas_linear(xf, self.w3, self.b3, activation="relu",
                           out_dtype=jnp.bfloat16)
        h2 = pallas_linear(h1, self.w4, self.b4, activation="relu",
                           out_dtype=jnp.bfloat16)
        # Fused classifier + box_reg head (single pallas_call, one K tile).
        y = pallas_linear(h2, self.w_heads, self.b_heads, activation="head",
                          out_dtype=jnp.float32, cls_w=self.cls_w,
                          tk=h2.shape[1])
        x1 = y[:b, :self.cls_w]
        x2 = y[:b, self.cls_w:self.cls_w + self.box_w]
        # TODO(synk): optionally fuse fc3->fc4->heads into one pallas_call with
        # VMEM-resident activations once the bf16 weight streaming dominates.
        return x1, x2


if __name__ == "__main__":
    key = jax.random.PRNGKey(0)
    k_params, k_x = jax.random.split(key)

    classes = ("cat", "dog", "person")     # 3 classes -> cls out 4, box out 12
    b, c, h, w = 2, 4, 16, 16              # input_dim = c*h*w = 1024
    input_dim = c * h * w

    x = jax.random.normal(k_x, (b, c, h, w), jnp.float32)
    model = DetectorBlockPallas(input_dim, classes, k_params)

    x1, x2 = model(x)
    jax.block_until_ready((x1, x2))

    assert x1.shape == (b, len(classes) + 1)
    assert x2.shape == (b, 4 * len(classes))
    # softmax rows must sum to 1
    assert jnp.allclose(jnp.sum(x1, axis=-1), 1.0, atol=1e-5)

    print("KERNEL_OK")
</pallas_src>

<mosaic_0001>
module attributes {stable_mosaic.version = 11 : i64} {
  func.func @_linear_kernel(%arg0: i32, %arg1: i32, %arg2: memref<8x1024xbf16, #tpu.memory_space<vmem>>, %arg3: memref<1024x4096xbf16, #tpu.memory_space<vmem>>, %arg4: memref<1x4096xf32, #tpu.memory_space<vmem>>, %arg5: memref<8x4096xbf16, #tpu.memory_space<vmem>>, %arg6: memref<8x4096xf32, #tpu.memory_space<vmem>>) attributes {dimension_semantics = [#tpu.dimension_semantics<parallel>, #tpu.dimension_semantics<arbitrary>], iteration_bounds = array<i64: 1, 1>, scalar_prefetch = 0 : i64, scratch_operands = 1 : i64, tpu.core_type = #tpu.core_type<tc>, window_params = [{transform_indices = @transform_0, window_bounds = array<i64: 8, 1024>}, {transform_indices = @transform_1, window_bounds = array<i64: 1024, 4096>}, {transform_indices = @transform_2, window_bounds = array<i64: 1, 4096>}, {transform_indices = @transform_3, window_bounds = array<i64: 8, 4096>}]} {
    %c0_i32 = arith.constant 0 : i32
    %0 = arith.cmpi eq, %arg1, %c0_i32 : i32
    %1 = arith.extui %0 : i1 to i32
    %c0_i32_0 = arith.constant 0 : i32
    %2 = arith.cmpi ne, %1, %c0_i32_0 : i32
    scf.if %2 {
      %cst_10 = arith.constant 0.000000e+00 : f32
      %12 = vector.broadcast %cst_10 : f32 to vector<8x4096xf32>
      %c0_11 = arith.constant 0 : index
      %c0_12 = arith.constant 0 : index
      %13 = vector.load %arg6[%c0_11, %c0_12] : memref<8x4096xf32, #tpu.memory_space<vmem>>, vector<8x4096xf32>
      tpu.vector_store %arg6[%c0_11, %c0_12], %12 {strides = array<i32>} : memref<8x4096xf32, #tpu.memory_space<vmem>>, vector<8x4096xf32>,
    } else {
    }
    %c0 = arith.constant 0 : index
    %c0_1 = arith.constant 0 : index
    %3 = vector.load %arg6[%c0, %c0_1] : memref<8x4096xf32, #tpu.memory_space<vmem>>, vector<8x4096xf32>
    %c0_2 = arith.constant 0 : index
    %c0_3 = arith.constant 0 : index
    %4 = vector.load %arg2[%c0_2, %c0_3] : memref<8x1024xbf16, #tpu.memory_space<vmem>>, vector<8x1024xbf16>
    %c0_4 = arith.constant 0 : index
    %c0_5 = arith.constant 0 : index
    %5 = vector.load %arg3[%c0_4, %c0_5] : memref<1024x4096xbf16, #tpu.memory_space<vmem>>, vector<1024x4096xbf16>
    %cst = arith.constant dense<0.000000e+00> : vector<8x4096xf32>
    %6 = tpu.matmul %4, %5, %cst {dimension_numbers = #tpu.dot_dimension_numbers<[1], [0], [0], [1], [0, 0, 1, 1], [], []>} : vector<8x1024xbf16>, vector<1024x4096xbf16>, vector<8x4096xf32> -> vector<8x4096xf32>
    %7 = arith.addf %3, %6 : vector<8x4096xf32>
    %c0_6 = arith.constant 0 : index
    %c0_7 = arith.constant 0 : index
    %8 = vector.load %arg6[%c0_6, %c0_7] : memref<8x4096xf32, #tpu.memory_space<vmem>>, vector<8x4096xf32>
    tpu.vector_store %arg6[%c0_6, %c0_7], %7 {strides = array<i32>} : memref<8x4096xf32, #tpu.memory_space<vmem>>, vector<8x4096xf32>,
    %c0_i32_8 = arith.constant 0 : i32
    %9 = arith.cmpi eq, %arg1, %c0_i32_8 : i32
    %10 = arith.extui %9 : i1 to i32
    %c0_i32_9 = arith.constant 0 : i32
    %11 = arith.cmpi ne, %10, %c0_i32_9 : i32
    scf.if %11 {
      %c0_10 = arith.constant 0 : index
      %c0_11 = arith.constant 0 : index
      %12 = vector.load %arg6[%c0_10, %c0_11] : memref<8x4096xf32, #tpu.memory_space<vmem>>, vector<8x4096xf32>
      %c0_12 = arith.constant 0 : index
      %c0_13 = arith.constant 0 : index
      %13 = vector.load %arg4[%c0_12, %c0_13] : memref<1x4096xf32, #tpu.memory_space<vmem>>, vector<1x4096xf32>
      %14 = vector.broadcast %13 : vector<1x4096xf32> to vector<8x4096xf32>
      %15 = arith.addf %12, %14 : vector<8x4096xf32>
      %cst_14 = arith.constant 0.000000e+00 : f32
      %16 = vector.broadcast %cst_14 : f32 to vector<8x4096xf32>
      %17 = arith.maximumf %15, %16 : vector<8x4096xf32>
      %18 = arith.truncf %17 : vector<8x4096xf32> to vector<8x4096xbf16>
      %c0_15 = arith.constant 0 : index
      %c0_16 = arith.constant 0 : index
      %19 = vector.load %arg5[%c0_15, %c0_16] : memref<8x4096xbf16, #tpu.memory_space<vmem>>, vector<8x4096xbf16>
      tpu.vector_store %arg5[%c0_15, %c0_16], %18 {strides = array<i32>} : memref<8x4096xbf16, #tpu.memory_space<vmem>>, vector<8x4096xbf16>,
    } else {
    }
    return
  }
  func.func @transform_0(%arg0: i32, %arg1: i32) -> (i32, i32) {
    %c0_i32 = arith.constant 0 : i32
    %c0_i32_0 = arith.constant 0 : i32
    return %c0_i32, %arg1 : i32, i32
  }
  func.func @transform_1(%arg0: i32, %arg1: i32) -> (i32, i32) {
    %c0_i32 = arith.constant 0 : i32
    return %arg1, %arg0 : i32, i32
  }
  func.func @transform_2(%arg0: i32, %arg1: i32) -> (i32, i32) {
    %c0_i32 = arith.constant 0 : i32
    %c0_i32_0 = arith.constant 0 : i32
    return %c0_i32, %arg0 : i32, i32
  }
  func.func @transform_3(%arg0: i32, %arg1: i32) -> (i32, i32) {
    %c0_i32 = arith.constant 0 : i32
    %c0_i32_0 = arith.constant 0 : i32
    return %c0_i32, %arg0 : i32, i32
  }
}

</mosaic_0001>

<bundles_post_ra>
// kernel: tpu_custom_call.1
= control target key start
LH: loop header
LB: loop body
LE: loop exit
PB: predicated region body
PF: predicated region fallthrough
CT: control target
= control target key end

     0   :  { %8 = vsyncpa [#allocation4], 0  ;;  %s18181_s0 = inlined_call_operand.hbm [shape: bf16[8,1024], index: 0, kind: input, shape index: {}]   ;;  %s18182_s1 = inlined_call_operand.hbm [shape: bf16[1024,4096], index: 1, kind: input, shape index: {}]   ;;  %s18183_s2 = inlined_call_operand.hbm [shape: f32[1,4096], index: 2, kind: input, shape index: {}]   ;;  %s18184_s3 = inlined_call_operand.hbm [shape: bf16[8,4096], index: 3, kind: output, shape index: {}]  }
   0x1   :  { %9 = vsyncpa [#allocation7], 0 }
   0x2   :  { %10 = vsyncpa [#allocation5], 0  ;;  %s17755_s12 = smov [#allocation6]   ;;  %s17661_s16 = scalar_lea.hbm %s18182_s1, 262144 }
   0x3   :  { %s26_s13 = sshll.u32 %s17755_s12, 4  ;;  %p17662_p0 = scmp.ne.s32.totalorder %s18182_s1, %s17661_s16  ;;  %s27_s13 = int_to_ptr.vmem [resolvable:$true] %s26_s13 }
   0x4   :  { %p17665_p1 = scmp.lt.u32.totalorder %s17661_s16, %s18182_s1 }
   0x6   :  { %p17667_p2 = pnand %p17665_p1, %p17662_p0 }
   0x8   :  { %17670 = shalt.err (!%p17667_p2)
}
   0x9   :  { %s17671_s21 = scalar_lea.vmem %s27_s13, 262144  ;;  %p17676_p4 = scmp.lt.s32.totalorder %s27_s13, %s27_s13 }
   0xa   :  { %p17672_p3 = scmp.ne.s32.totalorder %s27_s13, %s17671_s21  ;;  %p17677_p5 = scmp.lt.s32.totalorder %s17671_s21, %s17671_s21 }
   0xc   :  { %p17678_p6 = por %p17677_p5, %p17676_p4 }
   0xe   :  { %p17679_p7 = pnand %p17678_p6, %p17672_p3 }
  0x10   :  { %17682 = shalt.err (!%p17679_p7)
}
  0x11   :  { %s17756_s22 = smov 2048   ;;  %s17757_s23 = smov 128  }
  0x12   :  { %32 = dma.hbm_to_vmem [thread:$0]  %s18182_s1, 262144, %s27_s13, [#allocation7], %s17756_s22, %s17756_s22, %s17757_s23  }
  0x13   :  { %s17758_s26 = smov [#allocation3]   ;;  %s17759_s28 = smov [#allocation8]  }
  0x14   :  { %s17_s27 = sshll.u32 %s17758_s26, 4  ;;  %s39_s29 = sshll.u32 %s17759_s28, 4  ;;  %s18_s27 = int_to_ptr.vmem [resolvable:$true] %s17_s27  ;;  %s40_s29 = int_to_ptr.vmem [resolvable:$true] %s39_s29 }
  0x15   :  { %s17683_s5 = scalar_lea.hbm %s18181_s0, 512 }
  0x16   :  { %p17684_p8 = scmp.ne.s32.totalorder %s18181_s0, %s17683_s5  ;;  %p17687_p9 = scmp.lt.u32.totalorder %s17683_s5, %s18181_s0 }
  0x18   :  { %p17689_p10 = pnand %p17687_p9, %p17684_p8 }
  0x1a   :  { %17692 = shalt.err (!%p17689_p10)
}
  0x1b   :  { %s17693_s1 = scalar_lea.vmem %s18_s27, 512  ;;  %p17698_p12 = scmp.lt.s32.totalorder %s18_s27, %s18_s27 }
  0x1c   :  { %p17694_p11 = scmp.ne.s32.totalorder %s18_s27, %s17693_s1  ;;  %p17699_p13 = scmp.lt.s32.totalorder %s17693_s1, %s17693_s1 }
  0x1e   :  { %p17700_p0 = por %p17699_p13, %p17698_p12 }
  0x20   :  { %p17701_p1 = pnand %p17700_p0, %p17694_p11 }
  0x22   :  { %17704 = shalt.err (!%p17701_p1)
}
  0x23   :  { %20 = dma.hbm_to_vmem [thread:$0]  %s18181_s0, 512, %s18_s27, [#allocation4]  }
  0x24   :  { %s17705_s14 = scalar_lea.hbm %s18183_s2, 512 }
  0x25   :  { %p17706_p2 = scmp.ne.s32.totalorder %s18183_s2, %s17705_s14  ;;  %p17709_p3 = scmp.lt.u32.totalorder %s17705_s14, %s18183_s2 }
  0x27   :  { %p17711_p4 = pnand %p17709_p3, %p17706_p2 }
  0x29   :  { %17714 = shalt.err (!%p17711_p4)
}
  0x2a   :  { %s17715_s19 = scalar_lea.vmem %s40_s29, 512  ;;  %p17720_p6 = scmp.lt.s32.totalorder %s40_s29, %s40_s29 }
  0x2b   :  { %p17716_p5 = scmp.ne.s32.totalorder %s40_s29, %s17715_s19  ;;  %p17721_p7 = scmp.lt.s32.totalorder %s17715_s19, %s17715_s19 }
  0x2d   :  { %p17722_p8 = por %p17721_p7, %p17720_p6 }
  0x2f   :  { %p17723_p9 = pnand %p17722_p8, %p17716_p5 }
  0x31   :  { %17726 = shalt.err (!%p17723_p9)
}
  0x32   :  { %42 = dma.hbm_to_vmem [thread:$0]  %s18183_s2, 512, %s40_s29, [#allocation7]  }
  0x33   :  { %17749 = dma.done.wait [#allocation4], 512  }
  0x34   :  { %17750 = vsyncadd [#allocation4], 4294966784 }
  0x35   :  { %17751 = dma.done.wait [#allocation7], 262656  }
  0x36   :  { %17752 = vsyncadd [#allocation7], 4294704640  ;;  %v124_v0 = vld [vmem:[#allocation6] sm:$0xff]  ;;  %v17819_v54 = vld [vmem:[#allocation3 + $0x8] sm:$0xff]  ;;  %s17760_s2 = smov [#allocation9]  }
  0x37   :  { %v140_v1 = vld [vmem:[#allocation6 + $0x80] sm:$0xff]  ;;  %v17827_v59 = vcombine.high %v17819_v54, %v17819_v54  ;;  %s15545_s21 = sshll.u32 %s17760_s2, 4  ;;  %s15546_s21 = int_to_ptr.vmem [resolvable:$true] %s15545_s21 }
  0x38   :  { %v636_v2 = vld [vmem:[#allocation6 + $0x1000] sm:$0xff]  ;;  %v15564_v3 = vcombine.high %v124_v0, %v140_v1  ;;  %v15563_v5 = vcombine.low %v124_v0, %v140_v1  ;;  %s17727_s22 = scalar_lea.vmem %s15546_s21, 2048  ;;  %p17732_p11 = scmp.lt.s32.totalorder %s15546_s21, %s15546_s21 }
  0x39   :  { %v652_v4 = vld [vmem:[#allocation6 + $0x1080] sm:$0xff]  ;;  %12513 = vmatprep.mubr.bf16.mxu1 %v17827_v59  ;;  %p17728_p10 = scmp.ne.s32.totalorder %s15546_s21, %s17727_s22  ;;  %p17733_p12 = scmp.lt.s32.totalorder %s17727_s22, %s17727_s22 }
  0x3a   :  { %v156_v6 = vld [vmem:[#allocation6 + $0x100] sm:$0xff]  ;;  %v16076_v8 = vcombine.high %v636_v2, %v652_v4  ;;  %v16075_v9 = vcombine.low %v636_v2, %v652_v4  ;;  %12440 = vmatprep.subr.bf16.mxu0 %v15564_v3 }
  0x3b   :  { %v172_v7 = vld [vmem:[#allocation6 + $0x180] sm:$0xff]  ;;  %12441 = vmatpush1.bf16.msra.mxu0 %v15563_v5  ;;  %p17734_p13 = por %p17733_p12, %p17732_p11 }
  0x3c   :  { %v15596_v10 = vcombine.high %v156_v6, %v172_v7  ;;  %v668_v11 = vld [vmem:[#allocation6 + $0x1100] sm:$0xff]  ;;  %12481 = vmatprep.subr.bf16.mxu1 %v16076_v8  ;;  %v15595_v18 = vcombine.low %v156_v6, %v172_v7 }
  0x3d   :  { %v684_v12 = vld [vmem:[#allocation6 + $0x1180] sm:$0xff]  ;;  %12482 = vmatpush1.bf16.msra.mxu1 %v16075_v9  ;;  %p17735_p0 = pnand %p17734_p13, %p17728_p10 }
  0x3e   :  { %v188_v13 = vld [vmem:[#allocation6 + $0x200] sm:$0xff]  ;;  %v16108_v14 = vcombine.high %v668_v11, %v684_v12  ;;  %12442 = vmatprep.subr.bf16.mxu0 %v15596_v10  ;;  %v16107_v19 = vcombine.low %v668_v11, %v684_v12 }
  0x3f   :  { %v204_v15 = vld [vmem:[#allocation6 + $0x280] sm:$0xff]  ;;  %12443 = vmatpush1.bf16.msra.mxu0 %v15595_v18 }
  0x40   :  { %v700_v16 = vld [vmem:[#allocation6 + $0x1200] sm:$0xff]  ;;  %v15628_v20 = vcombine.high %v188_v13, %v204_v15  ;;  %12483 = vmatprep.subr.bf16.mxu1 %v16108_v14  ;;  %v15627_v26 = vcombine.low %v188_v13, %v204_v15 }
  0x41   :  { %v716_v17 = vld [vmem:[#allocation6 + $0x1280] sm:$0xff]  ;;  %12484 = vmatpush1.bf16.msra.mxu1 %v16107_v19 }
  0x42   :  { %v16140_v21 = vcombine.high %v700_v16, %v716_v17  ;;  %v220_v22 = vld [vmem:[#allocation6 + $0x300] sm:$0xff]  ;;  %12444 = vmatprep.subr.bf16.mxu0 %v15628_v20  ;;  %v16139_v27 = vcombine.low %v700_v16, %v716_v17 }
  0x43   :  { %v236_v23 = vld [vmem:[#allocation6 + $0x380] sm:$0xff]  ;;  %12445 = vmatpush1.bf16.msra.mxu0 %v15627_v26 }
  0x44   :  { %v732_v24 = vld [vmem:[#allocation6 + $0x1300] sm:$0xff]  ;;  %v15660_v28 = vcombine.high %v220_v22, %v236_v23  ;;  %12485 = vmatprep.subr.bf16.mxu1 %v16140_v21  ;;  %v15659_v34 = vcombine.low %v220_v22, %v236_v23 }
  0x45   :  { %v748_v25 = vld [vmem:[#allocation6 + $0x1380] sm:$0xff]  ;;  %12486 = vmatpush1.bf16.msra.mxu1 %v16139_v27 }
  0x46   :  { %v16172_v29 = vcombine.high %v732_v24, %v748_v25  ;;  %v252_v30 = vld [vmem:[#allocation6 + $0x400] sm:$0xff]  ;;  %12446 = vmatprep.subr.bf16.mxu0 %v15660_v28  ;;  %v16171_v35 = vcombine.low %v732_v24, %v748_v25 }
  0x47   :  { %v268_v31 = vld [vmem:[#allocation6 + $0x480] sm:$0xff]  ;;  %12447 = vmatpush1.bf16.msra.mxu0 %v15659_v34 }
  0x48   :  { %v764_v32 = vld [vmem:[#allocation6 + $0x1400] sm:$0xff]  ;;  %v15692_v36 = vcombine.high %v252_v30, %v268_v31  ;;  %12487 = vmatprep.subr.bf16.mxu1 %v16172_v29  ;;  %v15691_v42 = vcombine.low %v252_v30, %v268_v31 }
  0x49   :  { %v780_v33 = vld [vmem:[#allocation6 + $0x1480] sm:$0xff]  ;;  %12488 = vmatpush1.bf16.msra.mxu1 %v16171_v35 }
  0x4a   :  { %v16204_v37 = vcombine.high %v764_v32, %v780_v33  ;;  %v284_v38 = vld [vmem:[#allocation6 + $0x500] sm:$0xff]  ;;  %12448 = vmatprep.subr.bf16.mxu0 %v15692_v36  ;;  %v16203_v43 = vcombine.low %v764_v32, %v780_v33 }
  0x4b   :  { %v300_v39 = vld [vmem:[#allocation6 + $0x580] sm:$0xff]  ;;  %12449 = vmatpush1.bf16.msra.mxu0 %v15691_v42 }
  0x4c   :  { %v796_v40 = vld [vmem:[#allocation6 + $0x1500] sm:$0xff]  ;;  %v15724_v44 = vcombine.high %v284_v38, %v300_v39  ;;  %12489 = vmatprep.subr.bf16.mxu1 %v16204_v37  ;;  %v15723_v50 = vcombine.low %v284_v38, %v300_v39 }
  0x4d   :  { %v812_v41 = vld [vmem:[#allocation6 + $0x1580] sm:$0xff]  ;;  %12490 = vmatpush1.bf16.msra.mxu1 %v16203_v43 }
  0x4e   :  { %v16236_v45 = vcombine.high %v796_v40, %v812_v41  ;;  %v316_v46 = vld [vmem:[#allocation6 + $0x600] sm:$0xff]  ;;  %12450 = vmatprep.subr.bf16.mxu0 %v15724_v44  ;;  %v16235_v51 = vcombine.low %v796_v40, %v812_v41 }
  0x4f   :  { %v332_v47 = vld [vmem:[#allocation6 + $0x680] sm:$0xff]  ;;  %12451 = vmatpush1.bf16.msra.mxu0 %v15723_v50 }
  0x50   :  { %v828_v48 = vld [vmem:[#allocation6 + $0x1600] sm:$0xff]  ;;  %v15756_v52 = vcombine.high %v316_v46, %v332_v47  ;;  %12491 = vmatprep.subr.bf16.mxu1 %v16236_v45  ;;  %v15755_v62 = vcombine.low %v316_v46, %v332_v47 }
  0x51   :  { %v844_v49 = vld [vmem:[#allocation6 + $0x1680] sm:$0xff]  ;;  %12492 = vmatpush1.bf16.msra.mxu1 %v16235_v51 }
  0x52   :  { %v17817_v53 = vld [vmem:[#allocation3] sm:$0xff]  ;;  %v16268_v55 = vcombine.high %v828_v48, %v844_v49  ;;  %12452 = vmatprep.subr.bf16.mxu0 %v15756_v52  ;;  %v16267_v63 = vcombine.low %v828_v48, %v844_v49 }
  0x53   :  { %v348_v56 = vld [vmem:[#allocation6 + $0x700] sm:$0xff]  ;;  %v17823_v58 = vcombine.high %v17817_v53, %v17817_v53  ;;  %12453 = vmatpush1.bf16.msra.mxu0 %v15755_v62 }
  0x54   :  { %v364_v57 = vld [vmem:[#allocation6 + $0x780] sm:$0xff]  ;;  %12493 = vmatprep.subr.bf16.mxu1 %v16268_v55 }
  0x55   :  { %v860_v60 = vld [vmem:[#allocation6 + $0x1700] sm:$0xff]  ;;  %12472 = vmatprep.mubr.bf16.mxu0 %v17823_v58  ;;  %v15788_v0 = vcombine.high %v348_v56, %v364_v57  ;;  %v15787_v6 = vcombine.low %v348_v56, %v364_v57  ;;  %12494 = vmatpush1.bf16.msra.mxu1 %v16267_v63 }
  0x56   :  { %v876_v61 = vld [vmem:[#allocation6 + $0x1780] sm:$0xff] }
  0x57   :  { %v16300_v1 = vcombine.high %v860_v60, %v876_v61  ;;  %v380_v2 = vld [vmem:[#allocation6 + $0x800] sm:$0xff]  ;;  %12454 = vmatprep.subr.bf16.mxu0 %v15788_v0  ;;  %v16299_v7 = vcombine.low %v860_v60, %v876_v61 }
  0x58   :  { %v396_v3 = vld [vmem:[#allocation6 + $0x880] sm:$0xff]  ;;  %12455 = vmatpush1.bf16.msra.mxu0 %v15787_v6 }
  0x59   :  { %v892_v4 = vld [vmem:[#allocation6 + $0x1800] sm:$0xff]  ;;  %v15820_v8 = vcombine.high %v380_v2, %v396_v3  ;;  %12495 = vmatprep.subr.bf16.mxu1 %v16300_v1  ;;  %v15819_v14 = vcombine.low %v380_v2, %v396_v3 }
  0x5a   :  { %v908_v5 = vld [vmem:[#allocation6 + $0x1880] sm:$0xff]  ;;  %12496 = vmatpush1.bf16.msra.mxu1 %v16299_v7 }
  0x5b   :  { %v16332_v9 = vcombine.high %v892_v4, %v908_v5  ;;  %v412_v10 = vld [vmem:[#allocation6 + $0x900] sm:$0xff]  ;;  %12456 = vmatprep.subr.bf16.mxu0 %v15820_v8  ;;  %v16331_v15 = vcombine.low %v892_v4, %v908_v5 }
  0x5c   :  { %v428_v11 = vld [vmem:[#allocation6 + $0x980] sm:$0xff]  ;;  %12457 = vmatpush1.bf16.msra.mxu0 %v15819_v14 }
  0x5d   :  { %v924_v12 = vld [vmem:[#allocation6 + $0x1900] sm:$0xff]  ;;  %v15852_v16 = vcombine.high %v412_v10, %v428_v11  ;;  %12497 = vmatprep.subr.bf16.mxu1 %v16332_v9  ;;  %v15851_v22 = vcombine.low %v412_v10, %v428_v11 }
  0x5e   :  { %v940_v13 = vld [vmem:[#allocation6 + $0x1980] sm:$0xff]  ;;  %12498 = vmatpush1.bf16.msra.mxu1 %v16331_v15 }
  0x5f   :  { %v16364_v17 = vcombine.high %v924_v12, %v940_v13  ;;  %v444_v18 = vld [vmem:[#allocation6 + $0xa00] sm:$0xff]  ;;  %12458 = vmatprep.subr.bf16.mxu0 %v15852_v16  ;;  %v16363_v23 = vcombine.low %v924_v12, %v940_v13  ;;  %v17833_v16 = vcombine.low %v17817_v53, %v17817_v53 }
  0x60   :  { %v460_v19 = vld [vmem:[#allocation6 + $0xa80] sm:$0xff]  ;;  %12459 = vmatpush1.bf16.msra.mxu0 %v15851_v22  ;;  %v17841_v22 = vld [vmem:[#allocation3 + $0x18] sm:$0xff] }
  0x61   :  { %v956_v20 = vld [vmem:[#allocation6 + $0x1a00] sm:$0xff]  ;;  %v15884_v24 = vcombine.high %v444_v18, %v460_v19  ;;  %12499 = vmatprep.subr.bf16.mxu1 %v16364_v17  ;;  %v15883_v30 = vcombine.low %v444_v18, %v460_v19  ;;  %v17835_v19 = vld [vmem:[#allocation3 + $0x10] sm:$0xff] }
  0x62   :  { %v972_v21 = vld [vmem:[#allocation6 + $0x1a80] sm:$0xff]  ;;  %12500 = vmatpush1.bf16.msra.mxu1 %v16363_v23 }
  0x63   :  { %v16396_v25 = vcombine.high %v956_v20, %v972_v21  ;;  %v476_v26 = vld [vmem:[#allocation6 + $0xb00] sm:$0xff]  ;;  %12460 = vmatprep.subr.bf16.mxu0 %v15884_v24  ;;  %v16395_v31 = vcombine.low %v956_v20, %v972_v21  ;;  %v17839_v20 = vcombine.low %v17819_v54, %v17819_v54 }
  0x64   :  { %v492_v27 = vld [vmem:[#allocation6 + $0xb80] sm:$0xff]  ;;  %12461 = vmatpush1.bf16.msra.mxu0 %v15883_v30 }
  0x65   :  { %v988_v28 = vld [vmem:[#allocation6 + $0x1b00] sm:$0xff]  ;;  %v15916_v32 = vcombine.high %v476_v26, %v492_v27  ;;  %12501 = vmatprep.subr.bf16.mxu1 %v16396_v25  ;;  %v15915_v38 = vcombine.low %v476_v26, %v492_v27  ;;  %v17845_v27 = vcombine.high %v17835_v19, %v17835_v19 }
  0x66   :  { %v1004_v29 = vld [vmem:[#allocation6 + $0x1b80] sm:$0xff]  ;;  %12502 = vmatpush1.bf16.msra.mxu1 %v16395_v31 }
  0x67   :  { %v16428_v33 = vcombine.high %v988_v28, %v1004_v29  ;;  %v508_v34 = vld [vmem:[#allocation6 + $0xc00] sm:$0xff]  ;;  %12462 = vmatprep.subr.bf16.mxu0 %v15916_v32  ;;  %v16427_v39 = vcombine.low %v988_v28, %v1004_v29  ;;  %v17850_v29 = vcombine.high %v17841_v22, %v17841_v22 }
  0x68   :  { %v524_v35 = vld [vmem:[#allocation6 + $0xc80] sm:$0xff]  ;;  %12463 = vmatpush1.bf16.msra.mxu0 %v15915_v38 }
  0x69   :  { %v1020_v36 = vld [vmem:[#allocation6 + $0x1c00] sm:$0xff]  ;;  %v15948_v40 = vcombine.high %v508_v34, %v524_v35  ;;  %12503 = vmatprep.subr.bf16.mxu1 %v16428_v33  ;;  %v15947_v46 = vcombine.low %v508_v34, %v524_v35 }
  0x6a   :  { %v1036_v37 = vld [vmem:[#allocation6 + $0x1c80] sm:$0xff]  ;;  %12504 = vmatpush1.bf16.msra.mxu1 %v16427_v39 }
  0x6b   :  { %v16460_v41 = vcombine.high %v1020_v36, %v1036_v37  ;;  %v540_v42 = vld [vmem:[#allocation6 + $0xd00] sm:$0xff]  ;;  %12464 = vmatprep.subr.bf16.mxu0 %v15948_v40  ;;  %v16459_v47 = vcombine.low %v1020_v36, %v1036_v37 }
  0x6c   :  { %v556_v43 = vld [vmem:[#allocation6 + $0xd80] sm:$0xff]  ;;  %12465 = vmatpush1.bf16.msra.mxu0 %v15947_v46 }
  0x6d   :  { %v1052_v44 = vld [vmem:[#allocation6 + $0x1d00] sm:$0xff]  ;;  %v15980_v48 = vcombine.high %v540_v42, %v556_v43  ;;  %12505 = vmatprep.subr.bf16.mxu1 %v16460_v41  ;;  %v15979_v56 = vcombine.low %v540_v42, %v556_v43 }
  0x6e   :  { %v1068_v45 = vld [vmem:[#allocation6 + $0x1d80] sm:$0xff]  ;;  %12506 = vmatpush1.bf16.msra.mxu1 %v16459_v47 }
  0x6f   :  { %v16492_v49 = vcombine.high %v1052_v44, %v1068_v45  ;;  %v572_v50 = vld [vmem:[#allocation6 + $0xe00] sm:$0xff]  ;;  %12466 = vmatprep.subr.bf16.mxu0 %v15980_v48  ;;  %v16491_v57 = vcombine.low %v1052_v44, %v1068_v45 }
  0x70   :  { %v588_v51 = vld [vmem:[#allocation6 + $0xe80] sm:$0xff]  ;;  %12467 = vmatpush1.bf16.msra.mxu0 %v15979_v56 }
  0x71   :  { %v1084_v52 = vld [vmem:[#allocation6 + $0x1e00] sm:$0xff]  ;;  %v16012_v60 = vcombine.high %v572_v50, %v588_v51  ;;  %12507 = vmatprep.subr.bf16.mxu1 %v16492_v49  ;;  %v16011_v2 = vcombine.low %v572_v50, %v588_v51 }
  0x72   :  { %v1100_v55 = vld [vmem:[#allocation6 + $0x1e80] sm:$0xff]  ;;  %12508 = vmatpush1.bf16.msra.mxu1 %v16491_v57 }
  0x73   :  { %v16524_v61 = vcombine.high %v1084_v52, %v1100_v55  ;;  %v604_v62 = vld [vmem:[#allocation6 + $0xf00] sm:$0xff]  ;;  %12468 = vmatprep.subr.bf16.mxu0 %v16012_v60  ;;  %v16523_v3 = vcombine.low %v1084_v52, %v1100_v55 }
  0x74   :  { %v620_v63 = vld [vmem:[#allocation6 + $0xf80] sm:$0xff]  ;;  %12469 = vmatpush1.bf16.msra.mxu0 %v16011_v2 }
  0x75   :  { %v1116_v0 = vld [vmem:[#allocation6 + $0x1f00] sm:$0xff]  ;;  %v16044_v4 = vcombine.high %v604_v62, %v620_v63  ;;  %12509 = vmatprep.subr.bf16.mxu1 %v16524_v61  ;;  %v16043_v10 = vcombine.low %v604_v62, %v620_v63 }
  0x76   :  { %v1132_v1 = vld [vmem:[#allocation6 + $0x1f80] sm:$0xff]  ;;  %12510 = vmatpush1.bf16.msra.mxu1 %v16523_v3 }
  0x77   :  { %v16556_v5 = vcombine.high %v1116_v0, %v1132_v1  ;;  %v1148_v6 = vld [vmem:[#allocation6 + $0x2000] sm:$0xff]  ;;  %12470 = vmatprep.subr.bf16.mxu0 %v16044_v4  ;;  %v16555_v11 = vcombine.low %v1116_v0, %v1132_v1 }
  0x78   :  { %v1164_v7 = vld [vmem:[#allocation6 + $0x2080] sm:$0xff]  ;;  %12471 = vmatpush1.bf16.msra.mxu0 %v16043_v10 }
  0x79   :  { %v1660_v8 = vld [vmem:[#allocation6 + $0x3000] sm:$0xff]  ;;  %v16588_v12 = vcombine.high %v1148_v6, %v1164_v7  ;;  %12511 = vmatprep.subr.bf16.mxu1 %v16556_v5  ;;  %v16587_v21 = vcombine.low %v1148_v6, %v1164_v7 }
  0x7a   :  { %v1676_v9 = vld [vmem:[#allocation6 + $0x3080] sm:$0xff]  ;;  %12512 = vmatpush1.bf16.msra.mxu1 %v16555_v11 }
  0x7b   :  { %v17100_v13 = vcombine.high %v1660_v8, %v1676_v9  ;;  %v1180_v14 = vld [vmem:[#allocation6 + $0x2100] sm:$0xff]  ;;  %12522 = vmatprep.subr.bf16.mxu0 %v16588_v12  ;;  %v17099_v23 = vcombine.low %v1660_v8, %v1676_v9  ;;  %12473 = vmatmul.mubr.bf16.vlgmr.msra.gmra.mrb[0].mxu0 %v17833_v16 }
  0x7c   :  { %v1196_v15 = vld [vmem:[#allocation6 + $0x2180] sm:$0xff]  ;;  %12523 = vmatpush1.bf16.msra.mxu0 %v16587_v21  ;;  %12554 = vmatprep.mubr.bf16.mxu0 %v17845_v27 }
  0x7d   :  { %v1692_v17 = vld [vmem:[#allocation6 + $0x3100] sm:$0xff]  ;;  %v16620_v24 = vcombine.high %v1180_v14, %v1196_v15  ;;  %12563 = vmatprep.subr.bf16.mxu1 %v17100_v13  ;;  %12514 = vmatmul.mubr.bf16.vlgmr.msra.gmra.mrb[0].mxu1 %v17839_v20  ;;  %v16619_v30 = vcombine.low %v1180_v14, %v1196_v15 }
  0x7e   :  { %v1708_v18 = vld [vmem:[#allocation6 + $0x3180] sm:$0xff]  ;;  %12564 = vmatpush1.bf16.msra.mxu1 %v17099_v23  ;;  %12595 = vmatprep.mubr.bf16.mxu1 %v17850_v29 }
  0x7f   :  { %v17132_v25 = vcombine.high %v1692_v17, %v1708_v18  ;;  %v1212_v53 = vld [vmem:[#allocation6 + $0x2200] sm:$0xff]  ;;  %12524 = vmatprep.subr.bf16.mxu0 %v16620_v24  ;;  %v17131_v31 = vcombine.low %v1692_v17, %v1708_v18 }
  0x80   :  { %v1228_v26 = vld [vmem:[#allocation6 + $0x2280] sm:$0xff]  ;;  %12525 = vmatpush1.bf16.msra.mxu0 %v16619_v30 }
  0x81   :  { %v1724_v28 = vld [vmem:[#allocation6 + $0x3200] sm:$0xff]  ;;  %v16652_v32 = vcombine.high %v1212_v53, %v1228_v26  ;;  %12565 = vmatprep.subr.bf16.mxu1 %v17132_v25  ;;  %v16651_v38 = vcombine.low %v1212_v53, %v1228_v26 }
  0x82   :  { %v1740_v54 = vld [vmem:[#allocation6 + $0x3280] sm:$0xff]  ;;  %12566 = vmatpush1.bf16.msra.mxu1 %v17131_v31 }
  0x83   :  { %v17164_v33 = vcombine.high %v1724_v28, %v1740_v54  ;;  %v1244_v34 = vld [vmem:[#allocation6 + $0x2300] sm:$0xff]  ;;  %12526 = vmatprep.subr.bf16.mxu0 %v16652_v32  ;;  %v17163_v39 = vcombine.low %v1724_v28, %v1740_v54 }
  0x84   :  { %v1260_v35 = vld [vmem:[#allocation6 + $0x2380] sm:$0xff]  ;;  %12527 = vmatpush1.bf16.msra.mxu0 %v16651_v38 }
  0x85   :  { %v1756_v36 = vld [vmem:[#allocation6 + $0x3300] sm:$0xff]  ;;  %v16684_v40 = vcombine.high %v1244_v34, %v1260_v35  ;;  %12567 = vmatprep.subr.bf16.mxu1 %v17164_v33  ;;  %v16683_v46 = vcombine.low %v1244_v34, %v1260_v35 }
  0x86   :  { %v1772_v37 = vld [vmem:[#allocation6 + $0x3380] sm:$0xff]  ;;  %12568 = vmatpush1.bf16.msra.mxu1 %v17163_v39 }
  0x87   :  { %v17196_v41 = vcombine.high %v1756_v36, %v1772_v37  ;;  %v1276_v42 = vld [vmem:[#allocation6 + $0x2400] sm:$0xff]  ;;  %12528 = vmatprep.subr.bf16.mxu0 %v16684_v40  ;;  %v17195_v47 = vcombine.low %v1756_v36, %v1772_v37 }
  0x88   :  { %v1292_v43 = vld [vmem:[#allocation6 + $0x2480] sm:$0xff]  ;;  %12529 = vmatpush1.bf16.msra.mxu0 %v16683_v46 }
  0x89   :  { %v1788_v44 = vld [vmem:[#allocation6 + $0x3400] sm:$0xff]  ;;  %v16716_v48 = vcombine.high %v1276_v42, %v1292_v43  ;;  %12569 = vmatprep.subr.bf16.mxu1 %v17196_v41  ;;  %v16715_v56 = vcombine.low %v1276_v42, %v1292_v43 }
  0x8a   :  { %v1804_v45 = vld [vmem:[#allocation6 + $0x3480] sm:$0xff]  ;;  %12570 = vmatpush1.bf16.msra.mxu1 %v17195_v47 }
  0x8b   :  { %v17228_v49 = vcombine.high %v1788_v44, %v1804_v45  ;;  %v1308_v50 = vld [vmem:[#allocation6 + $0x2500] sm:$0xff]  ;;  %12530 = vmatprep.subr.bf16.mxu0 %v16716_v48  ;;  %v17227_v57 = vcombine.low %v1788_v44, %v1804_v45 }
  0x8c   :  { %v1324_v51 = vld [vmem:[#allocation6 + $0x2580] sm:$0xff]  ;;  %12531 = vmatpush1.bf16.msra.mxu0 %v16715_v56 }
  0x8d   :  { %v1820_v52 = vld [vmem:[#allocation6 + $0x3500] sm:$0xff]  ;;  %v16748_v60 = vcombine.high %v1308_v50, %v1324_v51  ;;  %12571 = vmatprep.subr.bf16.mxu1 %v17228_v49  ;;  %v16747_v2 = vcombine.low %v1308_v50, %v1324_v51 }
  0x8e   :  { %v1836_v55 = vld [vmem:[#allocation6 + $0x3580] sm:$0xff]  ;;  %12572 = vmatpush1.bf16.msra.mxu1 %v17227_v57 }
  0x8f   :  { %v17260_v61 = vcombine.high %v1820_v52, %v1836_v55  ;;  %v1340_v62 = vld [vmem:[#allocation6 + $0x2600] sm:$0xff]  ;;  %12532 = vmatprep.subr.bf16.mxu0 %v16748_v60  ;;  %v17259_v3 = vcombine.low %v1820_v52, %v1836_v55 }
  0x90   :  { %v1356_v63 = vld [vmem:[#allocation6 + $0x2680] sm:$0xff]  ;;  %12533 = vmatpush1.bf16.msra.mxu0 %v16747_v2 }
  0x91   :  { %v1852_v0 = vld [vmem:[#allocation6 + $0x3600] sm:$0xff]  ;;  %v16780_v4 = vcombine.high %v1340_v62, %v1356_v63  ;;  %12573 = vmatprep.subr.bf16.mxu1 %v17260_v61  ;;  %v16779_v10 = vcombine.low %v1340_v62, %v1356_v63 }
  0x92   :  { %v1868_v1 = vld [vmem:[#allocation6 + $0x3680] sm:$0xff]  ;;  %12574 = vmatpush1.bf16.msra.mxu1 %v17259_v3 }
  0x93   :  { %v17292_v5 = vcombine.high %v1852_v0, %v1868_v1  ;;  %v1372_v6 = vld [vmem:[#allocation6 + $0x2700] sm:$0xff]  ;;  %12534 = vmatprep.subr.bf16.mxu0 %v16780_v4  ;;  %v17291_v11 = vcombine.low %v1852_v0, %v1868_v1 }
  0x94   :  { %v1388_v7 = vld [vmem:[#allocation6 + $0x2780] sm:$0xff]  ;;  %12535 = vmatpush1.bf16.msra.mxu0 %v16779_v10 }
  0x95   :  { %v1884_v8 = vld [vmem:[#allocation6 + $0x3700] sm:$0xff]  ;;  %v16812_v12 = vcombine.high %v1372_v6, %v1388_v7  ;;  %12575 = vmatprep.subr.bf16.mxu1 %v17292_v5  ;;  %v16811_v21 = vcombine.low %v1372_v6, %v1388_v7 }
  0x96   :  { %v1900_v9 = vld [vmem:[#allocation6 + $0x3780] sm:$0xff]  ;;  %12576 = vmatpush1.bf16.msra.mxu1 %v17291_v11 }
  0x97   :  { %v17324_v13 = vcombine.high %v1884_v8, %v1900_v9  ;;  %v1404_v14 = vld [vmem:[#allocation6 + $0x2800] sm:$0xff]  ;;  %12536 = vmatprep.subr.bf16.mxu0 %v16812_v12  ;;  %v17323_v23 = vcombine.low %v1884_v8, %v1900_v9 }
  0x98   :  { %v1420_v15 = vld [vmem:[#allocation6 + $0x2880] sm:$0xff]  ;;  %12537 = vmatpush1.bf16.msra.mxu0 %v16811_v21 }
  0x99   :  { %v1916_v17 = vld [vmem:[#allocation6 + $0x3800] sm:$0xff]  ;;  %v16844_v24 = vcombine.high %v1404_v14, %v1420_v15  ;;  %12577 = vmatprep.subr.bf16.mxu1 %v17324_v13  ;;  %v16843_v30 = vcombine.low %v1404_v14, %v1420_v15 }
  0x9a   :  { %v1932_v18 = vld [vmem:[#allocation6 + $0x3880] sm:$0xff]  ;;  %12578 = vmatpush1.bf16.msra.mxu1 %v17323_v23 }
  0x9b   :  { %v17356_v25 = vcombine.high %v1916_v17, %v1932_v18  ;;  %v1436_v53 = vld [vmem:[#allocation6 + $0x2900] sm:$0xff]  ;;  %12538 = vmatprep.subr.bf16.mxu0 %v16844_v24  ;;  %v17355_v31 = vcombine.low %v1916_v17, %v1932_v18 }
  0x9c   :  { %v1452_v26 = vld [vmem:[#allocation6 + $0x2980] sm:$0xff]  ;;  %12539 = vmatpush1.bf16.msra.mxu0 %v16843_v30 }
  0x9d   :  { %v1948_v28 = vld [vmem:[#allocation6 + $0x3900] sm:$0xff]  ;;  %v16876_v32 = vcombine.high %v1436_v53, %v1452_v26  ;;  %12579 = vmatprep.subr.bf16.mxu1 %v17356_v25  ;;  %v16875_v38 = vcombine.low %v1436_v53, %v1452_v26  ;;  %v125_v53 = vld [vmem:[#allocation6 + $0x8] sm:$0xff] }
  0x9e   :  { %v1964_v54 = vld [vmem:[#allocation6 + $0x3980] sm:$0xff]  ;;  %12580 = vmatpush1.bf16.msra.mxu1 %v17355_v31  ;;  %v141_v26 = vld [vmem:[#allocation6 + $0x88] sm:$0xff] }
  0x9f   :  { %v17388_v33 = vcombine.high %v1948_v28, %v1964_v54  ;;  %v1468_v34 = vld [vmem:[#allocation6 + $0x2a00] sm:$0xff]  ;;  %12540 = vmatprep.subr.bf16.mxu0 %v16876_v32  ;;  %v17387_v39 = vcombine.low %v1948_v28, %v1964_v54  ;;  %v637_v28 = vld [vmem:[#allocation6 + $0x1008] sm:$0xff]  ;;  %v15566_v32 = vcombine.high %v125_v53, %v141_v26 }
  0xa0   :  { %v1484_v35 = vld [vmem:[#allocation6 + $0x2a80] sm:$0xff]  ;;  %12541 = vmatpush1.bf16.msra.mxu0 %v16875_v38  ;;  %v653_v54 = vld [vmem:[#allocation6 + $0x1088] sm:$0xff] }
  0xa1   :  { %v1980_v36 = vld [vmem:[#allocation6 + $0x3a00] sm:$0xff]  ;;  %v16908_v40 = vcombine.high %v1468_v34, %v1484_v35  ;;  %12581 = vmatprep.subr.bf16.mxu1 %v17388_v33  ;;  %v16907_v46 = vcombine.low %v1468_v34, %v1484_v35  ;;  %v16078_v33 = vcombine.high %v637_v28, %v653_v54  ;;  %v157_v34 = vld [vmem:[#allocation6 + $0x108] sm:$0xff] }
  0xa2   :  { %v1996_v37 = vld [vmem:[#allocation6 + $0x3a80] sm:$0xff]  ;;  %12582 = vmatpush1.bf16.msra.mxu1 %v17387_v39  ;;  %v173_v35 = vld [vmem:[#allocation6 + $0x188] sm:$0xff]  ;;  %v17861_v39 = vcombine.low %v17841_v22, %v17841_v22 }
  0xa3   :  { %v17420_v41 = vcombine.high %v1980_v36, %v1996_v37  ;;  %v1500_v42 = vld [vmem:[#allocation6 + $0x2b00] sm:$0xff]  ;;  %12542 = vmatprep.subr.bf16.mxu0 %v16908_v40  ;;  %v17419_v47 = vcombine.low %v1980_v36, %v1996_v37  ;;  %v17857_v36 = vcombine.low %v17835_v19, %v17835_v19  ;;  %v669_v37 = vld [vmem:[#allocation6 + $0x1108] sm:$0xff]  ;;  %v15565_v40 = vcombine.low %v125_v53, %v141_v26 }
  0xa4   :  { %v1516_v43 = vld [vmem:[#allocation6 + $0x2b80] sm:$0xff]  ;;  %12543 = vmatpush1.bf16.msra.mxu0 %v16907_v46  ;;  %v685_v38 = vld [vmem:[#allocation6 + $0x1188] sm:$0xff] }
  0xa5   :  { %v2012_v44 = vld [vmem:[#allocation6 + $0x3b00] sm:$0xff]  ;;  %v16940_v48 = vcombine.high %v1500_v42, %v1516_v43  ;;  %12583 = vmatprep.subr.bf16.mxu1 %v17420_v41  ;;  %v16939_v56 = vcombine.low %v1500_v42, %v1516_v43  ;;  %v16077_v41 = vcombine.low %v637_v28, %v653_v54  ;;  %v15598_v42 = vcombine.high %v157_v34, %v173_v35  ;;  %v701_v19 = vld [vmem:[#allocation6 + $0x1208] sm:$0xff] }
  0xa6   :  { %v2028_v45 = vld [vmem:[#allocation6 + $0x3b80] sm:$0xff]  ;;  %12584 = vmatpush1.bf16.msra.mxu1 %v17419_v47  ;;  %v16110_v43 = vcombine.high %v669_v37, %v685_v38  ;;  %v717_v46 = vld [vmem:[#allocation6 + $0x1288] sm:$0xff]  ;;  %v15597_v47 = vcombine.low %v157_v34, %v173_v35  ;;  %v16109_v22 = vcombine.low %v669_v37, %v685_v38 }
  0xa7   :  { %v17452_v49 = vcombine.high %v2012_v44, %v2028_v45  ;;  %v1532_v50 = vld [vmem:[#allocation6 + $0x2c00] sm:$0xff]  ;;  %12544 = vmatprep.subr.bf16.mxu0 %v16940_v48  ;;  %v17451_v57 = vcombine.low %v2012_v44, %v2028_v45  ;;  %v189_v44 = vld [vmem:[#allocation6 + $0x208] sm:$0xff] }
  0xa8   :  { %v1548_v51 = vld [vmem:[#allocation6 + $0x2c80] sm:$0xff]  ;;  %12545 = vmatpush1.bf16.msra.mxu0 %v16939_v56  ;;  %v205_v45 = vld [vmem:[#allocation6 + $0x288] sm:$0xff] }
  0xa9   :  { %v2044_v52 = vld [vmem:[#allocation6 + $0x3c00] sm:$0xff]  ;;  %v16972_v60 = vcombine.high %v1532_v50, %v1548_v51  ;;  %12585 = vmatprep.subr.bf16.mxu1 %v17452_v49  ;;  %v16971_v2 = vcombine.low %v1532_v50, %v1548_v51  ;;  %v15630_v48 = vcombine.high %v189_v44, %v205_v45  ;;  %v16142_v49 = vcombine.high %v701_v19, %v717_v46  ;;  %v221_v50 = vld [vmem:[#allocation6 + $0x308] sm:$0xff] }
  0xaa   :  { %v2060_v55 = vld [vmem:[#allocation6 + $0x3c80] sm:$0xff]  ;;  %12586 = vmatpush1.bf16.msra.mxu1 %v17451_v57  ;;  %v237_v51 = vld [vmem:[#allocation6 + $0x388] sm:$0xff]  ;;  %v15629_v56 = vcombine.low %v189_v44, %v205_v45  ;;  %v16141_v57 = vcombine.low %v701_v19, %v717_v46 }
  0xab   :  { %v17484_v61 = vcombine.high %v2044_v52, %v2060_v55  ;;  %v1564_v62 = vld [vmem:[#allocation6 + $0x2d00] sm:$0xff]  ;;  %12546 = vmatprep.subr.bf16.mxu0 %v16972_v60  ;;  %v17483_v3 = vcombine.low %v2044_v52, %v2060_v55  ;;  %v733_v52 = vld [vmem:[#allocation6 + $0x1308] sm:$0xff]  ;;  %v15662_v60 = vcombine.high %v221_v50, %v237_v51 }
  0xac   :  { %v1580_v63 = vld [vmem:[#allocation6 + $0x2d80] sm:$0xff]  ;;  %12547 = vmatpush1.bf16.msra.mxu0 %v16971_v2  ;;  %v749_v55 = vld [vmem:[#allocation6 + $0x1388] sm:$0xff]  ;;  %v15661_v2 = vcombine.low %v221_v50, %v237_v51 }
  0xad   :  { %v2076_v0 = vld [vmem:[#allocation6 + $0x3d00] sm:$0xff]  ;;  %v17004_v4 = vcombine.high %v1564_v62, %v1580_v63  ;;  %12587 = vmatprep.subr.bf16.mxu1 %v17484_v61  ;;  %v17003_v10 = vcombine.low %v1564_v62, %v1580_v63  ;;  %v16174_v61 = vcombine.high %v733_v52, %v749_v55  ;;  %v253_v62 = vld [vmem:[#allocation6 + $0x408] sm:$0xff] }
  0xae   :  { %v2092_v1 = vld [vmem:[#allocation6 + $0x3d80] sm:$0xff]  ;;  %12588 = vmatpush1.bf16.msra.mxu1 %v17483_v3  ;;  %v269_v63 = vld [vmem:[#allocation6 + $0x488] sm:$0xff]  ;;  %v16173_v3 = vcombine.low %v733_v52, %v749_v55 }
  0xaf   :  { %v17516_v5 = vcombine.high %v2076_v0, %v2092_v1  ;;  %v1596_v6 = vld [vmem:[#allocation6 + $0x2e00] sm:$0xff]  ;;  %12548 = vmatprep.subr.bf16.mxu0 %v17004_v4  ;;  %v17515_v11 = vcombine.low %v2076_v0, %v2092_v1  ;;  %v765_v0 = vld [vmem:[#allocation6 + $0x1408] sm:$0xff]  ;;  %v15694_v4 = vcombine.high %v253_v62, %v269_v63 }
  0xb0   :  { %v1612_v7 = vld [vmem:[#allocation6 + $0x2e80] sm:$0xff]  ;;  %12549 = vmatpush1.bf16.msra.mxu0 %v17003_v10  ;;  %v781_v1 = vld [vmem:[#allocation6 + $0x1488] sm:$0xff]  ;;  %v15693_v10 = vcombine.low %v253_v62, %v269_v63 }
  0xb1   :  { %v2108_v8 = vld [vmem:[#allocation6 + $0x3e00] sm:$0xff]  ;;  %v17036_v12 = vcombine.high %v1596_v6, %v1612_v7  ;;  %12589 = vmatprep.subr.bf16.mxu1 %v17516_v5  ;;  %v17035_v21 = vcombine.low %v1596_v6, %v1612_v7  ;;  %v16206_v5 = vcombine.high %v765_v0, %v781_v1  ;;  %v285_v6 = vld [vmem:[#allocation6 + $0x508] sm:$0xff] }
  0xb2   :  { %v2124_v9 = vld [vmem:[#allocation6 + $0x3e80] sm:$0xff]  ;;  %12590 = vmatpush1.bf16.msra.mxu1 %v17515_v11  ;;  %v301_v7 = vld [vmem:[#allocation6 + $0x588] sm:$0xff]  ;;  %v16205_v11 = vcombine.low %v765_v0, %v781_v1 }
  0xb3   :  { %v17548_v13 = vcombine.high %v2108_v8, %v2124_v9  ;;  %v1628_v14 = vld [vmem:[#allocation6 + $0x2f00] sm:$0xff]  ;;  %12550 = vmatprep.subr.bf16.mxu0 %v17036_v12  ;;  %v17547_v23 = vcombine.low %v2108_v8, %v2124_v9  ;;  %v797_v8 = vld [vmem:[#allocation6 + $0x1508] sm:$0xff]  ;;  %v15726_v12 = vcombine.high %v285_v6, %v301_v7 }
  0xb4   :  { %v1644_v15 = vld [vmem:[#allocation6 + $0x2f80] sm:$0xff]  ;;  %12551 = vmatpush1.bf16.msra.mxu0 %v17035_v21  ;;  %v813_v9 = vld [vmem:[#allocation6 + $0x1588] sm:$0xff]  ;;  %v15725_v21 = vcombine.low %v285_v6, %v301_v7 }
  0xb5   :  { %v2140_v17 = vld [vmem:[#allocation6 + $0x3f00] sm:$0xff]  ;;  %v17068_v24 = vcombine.high %v1628_v14, %v1644_v15  ;;  %12591 = vmatprep.subr.bf16.mxu1 %v17548_v13  ;;  %v17067_v30 = vcombine.low %v1628_v14, %v1644_v15  ;;  %v16238_v13 = vcombine.high %v797_v8, %v813_v9  ;;  %v317_v14 = vld [vmem:[#allocation6 + $0x608] sm:$0xff] }
  0xb6   :  { %v2156_v18 = vld [vmem:[#allocation6 + $0x3f80] sm:$0xff]  ;;  %12592 = vmatpush1.bf16.msra.mxu1 %v17547_v23  ;;  %v333_v15 = vld [vmem:[#allocation6 + $0x688] sm:$0xff]  ;;  %v16237_v23 = vcombine.low %v797_v8, %v813_v9 }
  0xb7   :  { %v17580_v25 = vcombine.high %v2140_v17, %v2156_v18  ;;  %12552 = vmatprep.subr.bf16.mxu0 %v17068_v24  ;;  %v17579_v31 = vcombine.low %v2140_v17, %v2156_v18  ;;  %v829_v17 = vld [vmem:[#allocation6 + $0x1608] sm:$0xff]  ;;  %v15758_v24 = vcombine.high %v317_v14, %v333_v15 }
  0xb8   :  { %12553 = vmatpush1.bf16.msra.mxu0 %v17067_v30  ;;  %v845_v18 = vld [vmem:[#allocation6 + $0x1688] sm:$0xff]  ;;  %v15757_v30 = vcombine.low %v317_v14, %v333_v15 }
  0xb9   :  { %12593 = vmatprep.subr.bf16.mxu1 %v17580_v25  ;;  %12604 = vmatprep.subr.bf16.mxu0 %v15566_v32  ;;  %v16270_v25 = vcombine.high %v829_v17, %v845_v18  ;;  %v349_v53 = vld [vmem:[#allocation6 + $0x708] sm:$0xff] }
  0xba   :  { %12594 = vmatpush1.bf16.msra.mxu1 %v17579_v31  ;;  %v365_v26 = vld [vmem:[#allocation6 + $0x788] sm:$0xff]  ;;  %v16269_v31 = vcombine.low %v829_v17, %v845_v18 }
  0xbb   :  { %12645 = vmatprep.subr.bf16.mxu1 %v16078_v33  ;;  %12555 = vmatmul.mubr.bf16.vlgmr.msra.gmra.mrb[4].mxu0 %v17857_v36  ;;  %v861_v28 = vld [vmem:[#allocation6 + $0x1708] sm:$0xff]  ;;  %v15790_v32 = vcombine.high %v349_v53, %v365_v26 }
  0xbc   :  { %12605 = vmatpush1.bf16.msra.mxu0 %v15565_v40  ;;  %12636 = vmatprep.mubr.bf16.mxu0 %v17823_v58  ;;  %v877_v54 = vld [vmem:[#allocation6 + $0x1788] sm:$0xff]  ;;  %v15789_v40 = vcombine.low %v349_v53, %v365_v26 }
  0xbd   :  { %12596 = vmatmul.mubr.bf16.vlgmr.msra.gmra.mrb[4].mxu1 %v17861_v39  ;;  %12606 = vmatprep.subr.bf16.mxu0 %v15598_v42  ;;  %v16302_v33 = vcombine.high %v861_v28, %v877_v54  ;;  %v381_v34 = vld [vmem:[#allocation6 + $0x808] sm:$0xff] }
  0xbe   :  { %12646 = vmatpush1.bf16.msra.mxu1 %v16077_v41  ;;  %12677 = vmatprep.mubr.bf16.mxu1 %v17827_v59  ;;  %v397_v35 = vld [vmem:[#allocation6 + $0x888] sm:$0xff]  ;;  %v16301_v41 = vcombine.low %v861_v28, %v877_v54 }
  0xbf   :  { %12647 = vmatprep.subr.bf16.mxu1 %v16110_v43  ;;  %v893_v37 = vld [vmem:[#allocation6 + $0x1808] sm:$0xff]  ;;  %v15822_v42 = vcombine.high %v381_v34, %v397_v35 }
  0xc0   :  { %12607 = vmatpush1.bf16.msra.mxu0 %v15597_v47  ;;  %v909_v38 = vld [vmem:[#allocation6 + $0x1888] sm:$0xff]  ;;  %v15821_v47 = vcombine.low %v381_v34, %v397_v35 }
  0xc1   :  { %12608 = vmatprep.subr.bf16.mxu0 %v15630_v48  ;;  %v16334_v43 = vcombine.high %v893_v37, %v909_v38  ;;  %v413_v44 = vld [vmem:[#allocation6 + $0x908] sm:$0xff] }
  0xc2   :  { %12648 = vmatpush1.bf16.msra.mxu1 %v16109_v22  ;;  %v429_v45 = vld [vmem:[#allocation6 + $0x988] sm:$0xff]  ;;  %v16333_v22 = vcombine.low %v893_v37, %v909_v38 }
  0xc3   :  { %12649 = vmatprep.subr.bf16.mxu1 %v16142_v49  ;;  %v925_v19 = vld [vmem:[#allocation6 + $0x1908] sm:$0xff]  ;;  %v15854_v48 = vcombine.high %v413_v44, %v429_v45 }
  0xc4   :  { %12609 = vmatpush1.bf16.msra.mxu0 %v15629_v56  ;;  %v941_v46 = vld [vmem:[#allocation6 + $0x1988] sm:$0xff]  ;;  %v15853_v56 = vcombine.low %v413_v44, %v429_v45 }
  0xc5   :  { %12610 = vmatprep.subr.bf16.mxu0 %v15662_v60  ;;  %v16366_v49 = vcombine.high %v925_v19, %v941_v46  ;;  %v445_v50 = vld [vmem:[#allocation6 + $0xa08] sm:$0xff] }
  0xc6   :  { %12650 = vmatpush1.bf16.msra.mxu1 %v16141_v57  ;;  %v461_v51 = vld [vmem:[#allocation6 + $0xa88] sm:$0xff]  ;;  %v16365_v57 = vcombine.low %v925_v19, %v941_v46 }
  0xc7   :  { %12651 = vmatprep.subr.bf16.mxu1 %v16174_v61  ;;  %v957_v52 = vld [vmem:[#allocation6 + $0x1a08] sm:$0xff]  ;;  %v15886_v60 = vcombine.high %v445_v50, %v461_v51 }
  0xc8   :  { %12611 = vmatpush1.bf16.msra.mxu0 %v15661_v2  ;;  %v973_v55 = vld [vmem:[#allocation6 + $0x1a88] sm:$0xff]  ;;  %v15885_v2 = vcombine.low %v445_v50, %v461_v51 }
  0xc9   :  { %12612 = vmatprep.subr.bf16.mxu0 %v15694_v4  ;;  %v16398_v61 = vcombine.high %v957_v52, %v973_v55  ;;  %v477_v62 = vld [vmem:[#allocation6 + $0xb08] sm:$0xff] }
  0xca   :  { %12652 = vmatpush1.bf16.msra.mxu1 %v16173_v3  ;;  %v493_v63 = vld [vmem:[#allocation6 + $0xb88] sm:$0xff]  ;;  %v16397_v3 = vcombine.low %v957_v52, %v973_v55 }
  0xcb   :  { %12653 = vmatprep.subr.bf16.mxu1 %v16206_v5  ;;  %v989_v0 = vld [vmem:[#allocation6 + $0x1b08] sm:$0xff]  ;;  %v15918_v4 = vcombine.high %v477_v62, %v493_v63 }
  0xcc   :  { %12613 = vmatpush1.bf16.msra.mxu0 %v15693_v10  ;;  %v1005_v1 = vld [vmem:[#allocation6 + $0x1b88] sm:$0xff]  ;;  %v15917_v10 = vcombine.low %v477_v62, %v493_v63 }
  0xcd   :  { %12614 = vmatprep.subr.bf16.mxu0 %v15726_v12  ;;  %v16430_v5 = vcombine.high %v989_v0, %v1005_v1  ;;  %v509_v6 = vld [vmem:[#allocation6 + $0xc08] sm:$0xff] }
  0xce   :  { %12654 = vmatpush1.bf16.msra.mxu1 %v16205_v11  ;;  %v525_v7 = vld [vmem:[#allocation6 + $0xc88] sm:$0xff]  ;;  %v16429_v11 = vcombine.low %v989_v0, %v1005_v1 }
  0xcf   :  { %12655 = vmatprep.subr.bf16.mxu1 %v16238_v13  ;;  %v1021_v8 = vld [vmem:[#allocation6 + $0x1c08] sm:$0xff]  ;;  %v15950_v12 = vcombine.high %v509_v6, %v525_v7 }
  0xd0   :  { %12615 = vmatpush1.bf16.msra.mxu0 %v15725_v21  ;;  %v1037_v9 = vld [vmem:[#allocation6 + $0x1c88] sm:$0xff]  ;;  %v15949_v21 = vcombine.low %v509_v6, %v525_v7 }
  0xd1   :  { %12616 = vmatprep.subr.bf16.mxu0 %v15758_v24  ;;  %v16462_v13 = vcombine.high %v1021_v8, %v1037_v9  ;;  %v541_v14 = vld [vmem:[#allocation6 + $0xd08] sm:$0xff] }
  0xd2   :  { %12656 = vmatpush1.bf16.msra.mxu1 %v16237_v23  ;;  %v557_v15 = vld [vmem:[#allocation6 + $0xd88] sm:$0xff]  ;;  %v16461_v23 = vcombine.low %v1021_v8, %v1037_v9 }
  0xd3   :  { %12657 = vmatprep.subr.bf16.mxu1 %v16270_v25  ;;  %v1053_v17 = vld [vmem:[#allocation6 + $0x1d08] sm:$0xff]  ;;  %v15982_v24 = vcombine.high %v541_v14, %v557_v15 }
  0xd4   :  { %12617 = vmatpush1.bf16.msra.mxu0 %v15757_v30  ;;  %v1069_v18 = vld [vmem:[#allocation6 + $0x1d88] sm:$0xff]  ;;  %v15981_v30 = vcombine.low %v541_v14, %v557_v15 }
  0xd5   :  { %12618 = vmatprep.subr.bf16.mxu0 %v15790_v32  ;;  %v16494_v25 = vcombine.high %v1053_v17, %v1069_v18  ;;  %v573_v53 = vld [vmem:[#allocation6 + $0xe08] sm:$0xff] }
  0xd6   :  { %12658 = vmatpush1.bf16.msra.mxu1 %v16269_v31  ;;  %v589_v26 = vld [vmem:[#allocation6 + $0xe88] sm:$0xff]  ;;  %v16493_v31 = vcombine.low %v1053_v17, %v1069_v18 }
  0xd7   :  { %12659 = vmatprep.subr.bf16.mxu1 %v16302_v33  ;;  %v1085_v28 = vld [vmem:[#allocation6 + $0x1e08] sm:$0xff]  ;;  %v16014_v32 = vcombine.high %v573_v53, %v589_v26 }
  0xd8   :  { %12619 = vmatpush1.bf16.msra.mxu0 %v15789_v40  ;;  %v1101_v54 = vld [vmem:[#allocation6 + $0x1e88] sm:$0xff]  ;;  %v16013_v40 = vcombine.low %v573_v53, %v589_v26 }
  0xd9   :  { %12620 = vmatprep.subr.bf16.mxu0 %v15822_v42  ;;  %v16526_v33 = vcombine.high %v1085_v28, %v1101_v54  ;;  %v605_v34 = vld [vmem:[#allocation6 + $0xf08] sm:$0xff] }
  0xda   :  { %12660 = vmatpush1.bf16.msra.mxu1 %v16301_v41  ;;  %v621_v35 = vld [vmem:[#allocation6 + $0xf88] sm:$0xff]  ;;  %v16525_v41 = vcombine.low %v1085_v28, %v1101_v54 }
  0xdb   :  { %12661 = vmatprep.subr.bf16.mxu1 %v16334_v43  ;;  %v1117_v37 = vld [vmem:[#allocation6 + $0x1f08] sm:$0xff]  ;;  %v16046_v42 = vcombine.high %v605_v34, %v621_v35 }
  0xdc   :  { %12621 = vmatpush1.bf16.msra.mxu0 %v15821_v47  ;;  %v1133_v38 = vld [vmem:[#allocation6 + $0x1f88] sm:$0xff]  ;;  %v16045_v47 = vcombine.low %v605_v34, %v621_v35 }
  0xdd   :  { %12622 = vmatprep.subr.bf16.mxu0 %v15854_v48  ;;  %v16558_v43 = vcombine.high %v1117_v37, %v1133_v38  ;;  %v1149_v44 = vld [vmem:[#allocation6 + $0x2008] sm:$0xff] }
  0xde   :  { %12662 = vmatpush1.bf16.msra.mxu1 %v16333_v22  ;;  %v1165_v45 = vld [vmem:[#allocation6 + $0x2088] sm:$0xff]  ;;  %v16557_v22 = vcombine.low %v1117_v37, %v1133_v38 }
  0xdf   :  { %12663 = vmatprep.subr.bf16.mxu1 %v16366_v49  ;;  %v1661_v19 = vld [vmem:[#allocation6 + $0x3008] sm:$0xff]  ;;  %v16590_v48 = vcombine.high %v1149_v44, %v1165_v45 }
  0xe0   :  { %12623 = vmatpush1.bf16.msra.mxu0 %v15853_v56  ;;  %v1677_v46 = vld [vmem:[#allocation6 + $0x3088] sm:$0xff]  ;;  %v16589_v56 = vcombine.low %v1149_v44, %v1165_v45 }
  0xe1   :  { %12624 = vmatprep.subr.bf16.mxu0 %v15886_v60  ;;  %v17102_v49 = vcombine.high %v1661_v19, %v1677_v46  ;;  %v1181_v50 = vld [vmem:[#allocation6 + $0x2108] sm:$0xff] }
  0xe2   :  { %12664 = vmatpush1.bf16.msra.mxu1 %v16365_v57  ;;  %v1197_v51 = vld [vmem:[#allocation6 + $0x2188] sm:$0xff]  ;;  %v17101_v57 = vcombine.low %v1661_v19, %v1677_v46 }
  0xe3   :  { %12665 = vmatprep.subr.bf16.mxu1 %v16398_v61  ;;  %v1693_v52 = vld [vmem:[#allocation6 + $0x3108] sm:$0xff]  ;;  %v16622_v60 = vcombine.high %v1181_v50, %v1197_v51 }
  0xe4   :  { %12625 = vmatpush1.bf16.msra.mxu0 %v15885_v2  ;;  %v1709_v55 = vld [vmem:[#allocation6 + $0x3188] sm:$0xff]  ;;  %v16621_v2 = vcombine.low %v1181_v50, %v1197_v51 }
  0xe5   :  { %12626 = vmatprep.subr.bf16.mxu0 %v15918_v4  ;;  %v17134_v61 = vcombine.high %v1693_v52, %v1709_v55  ;;  %v1213_v62 = vld [vmem:[#allocation6 + $0x2208] sm:$0xff] }
  0xe6   :  { %12666 = vmatpush1.bf16.msra.mxu1 %v16397_v3  ;;  %v1229_v63 = vld [vmem:[#allocation6 + $0x2288] sm:$0xff]  ;;  %v17133_v3 = vcombine.low %v1693_v52, %v1709_v55 }
  0xe7   :  { %12667 = vmatprep.subr.bf16.mxu1 %v16430_v5  ;;  %v1725_v0 = vld [vmem:[#allocation6 + $0x3208] sm:$0xff]  ;;  %v16654_v4 = vcombine.high %v1213_v62, %v1229_v63 }
  0xe8   :  { %12627 = vmatpush1.bf16.msra.mxu0 %v15917_v10  ;;  %v1741_v1 = vld [vmem:[#allocation6 + $0x3288] sm:$0xff]  ;;  %v16653_v10 = vcombine.low %v1213_v62, %v1229_v63 }
  0xe9   :  { %12628 = vmatprep.subr.bf16.mxu0 %v15950_v12  ;;  %v17166_v5 = vcombine.high %v1725_v0, %v1741_v1  ;;  %v1245_v6 = vld [vmem:[#allocation6 + $0x2308] sm:$0xff] }
  0xea   :  { %12668 = vmatpush1.bf16.msra.mxu1 %v16429_v11  ;;  %v1261_v7 = vld [vmem:[#allocation6 + $0x2388] sm:$0xff]  ;;  %v17165_v11 = vcombine.low %v1725_v0, %v1741_v1 }
  0xeb   :  { %12669 = vmatprep.subr.bf16.mxu1 %v16462_v13  ;;  %v1757_v8 = vld [vmem:[#allocation6 + $0x3308] sm:$0xff]  ;;  %v16686_v12 = vcombine.high %v1245_v6, %v1261_v7 }
  0xec   :  { %12629 = vmatpush1.bf16.msra.mxu0 %v15949_v21  ;;  %v1773_v9 = vld [vmem:[#allocation6 + $0x3388] sm:$0xff]  ;;  %v16685_v21 = vcombine.low %v1245_v6, %v1261_v7 }
  0xed   :  { %12630 = vmatprep.subr.bf16.mxu0 %v15982_v24  ;;  %v17198_v13 = vcombine.high %v1757_v8, %v1773_v9  ;;  %v1277_v14 = vld [vmem:[#allocation6 + $0x2408] sm:$0xff] }
  0xee   :  { %12670 = vmatpush1.bf16.msra.mxu1 %v16461_v23  ;;  %v1293_v15 = vld [vmem:[#allocation6 + $0x2488] sm:$0xff]  ;;  %v17197_v23 = vcombine.low %v1757_v8, %v1773_v9 }
  0xef   :  { %12671 = vmatprep.subr.bf16.mxu1 %v16494_v25  ;;  %v1789_v17 = vld [vmem:[#allocation6 + $0x3408] sm:$0xff]  ;;  %v16718_v24 = vcombine.high %v1277_v14, %v1293_v15 }
  0xf0   :  { %12631 = vmatpush1.bf16.msra.mxu0 %v15981_v30  ;;  %v1805_v18 = vld [vmem:[#allocation6 + $0x3488] sm:$0xff]  ;;  %v16717_v30 = vcombine.low %v1277_v14, %v1293_v15 }
  0xf1   :  { %12632 = vmatprep.subr.bf16.mxu0 %v16014_v32  ;;  %v17230_v25 = vcombine.high %v1789_v17, %v1805_v18  ;;  %v1309_v53 = vld [vmem:[#allocation6 + $0x2508] sm:$0xff] }
  0xf2   :  { %12672 = vmatpush1.bf16.msra.mxu1 %v16493_v31  ;;  %v1325_v26 = vld [vmem:[#allocation6 + $0x2588] sm:$0xff]  ;;  %v17229_v31 = vcombine.low %v1789_v17, %v1805_v18 }
  0xf3   :  { %12673 = vmatprep.subr.bf16.mxu1 %v16526_v33  ;;  %v1821_v28 = vld [vmem:[#allocation6 + $0x3508] sm:$0xff]  ;;  %v16750_v32 = vcombine.high %v1309_v53, %v1325_v26 }
  0xf4   :  { %12633 = vmatpush1.bf16.msra.mxu0 %v16013_v40  ;;  %v1837_v54 = vld [vmem:[#allocation6 + $0x3588] sm:$0xff]  ;;  %v16749_v40 = vcombine.low %v1309_v53, %v1325_v26 }
  0xf5   :  { %12634 = vmatprep.subr.bf16.mxu0 %v16046_v42  ;;  %v17262_v33 = vcombine.high %v1821_v28, %v1837_v54  ;;  %v1341_v34 = vld [vmem:[#allocation6 + $0x2608] sm:$0xff] }
  0xf6   :  { %12674 = vmatpush1.bf16.msra.mxu1 %v16525_v41  ;;  %v1357_v35 = vld [vmem:[#allocation6 + $0x2688] sm:$0xff]  ;;  %v17261_v41 = vcombine.low %v1821_v28, %v1837_v54 }
  0xf7   :  { %12675 = vmatprep.subr.bf16.mxu1 %v16558_v43  ;;  %v1853_v37 = vld [vmem:[#allocation6 + $0x3608] sm:$0xff]  ;;  %v16782_v42 = vcombine.high %v1341_v34, %v1357_v35 }
  0xf8   :  { %12635 = vmatpush1.bf16.msra.mxu0 %v16045_v47  ;;  %v1869_v38 = vld [vmem:[#allocation6 + $0x3688] sm:$0xff]  ;;  %v16781_v47 = vcombine.low %v1341_v34, %v1357_v35 }
  0xf9   :  { %12686 = vmatprep.subr.bf16.mxu0 %v16590_v48  ;;  %v17294_v43 = vcombine.high %v1853_v37, %v1869_v38  ;;  %v1373_v44 = vld [vmem:[#allocation6 + $0x2708] sm:$0xff] }
  0xfa   :  { %12676 = vmatpush1.bf16.msra.mxu1 %v16557_v22  ;;  %v1389_v45 = vld [vmem:[#allocation6 + $0x2788] sm:$0xff]  ;;  %v17293_v22 = vcombine.low %v1853_v37, %v1869_v38 }
  0xfb   :  { %12727 = vmatprep.subr.bf16.mxu1 %v17102_v49  ;;  %12637 = vmatmul.mubr.bf16.vlgmr.msra.gmra.mrb[8].mxu0 %v17833_v16  ;;  %v1885_v19 = vld [vmem:[#allocation6 + $0x3708] sm:$0xff]  ;;  %v16814_v48 = vcombine.high %v1373_v44, %v1389_v45 }
  0xfc   :  { %12687 = vmatpush1.bf16.msra.mxu0 %v16589_v56  ;;  %12718 = vmatprep.mubr.bf16.mxu0 %v17845_v27  ;;  %v1901_v46 = vld [vmem:[#allocation6 + $0x3788] sm:$0xff]  ;;  %v16813_v56 = vcombine.low %v1373_v44, %v1389_v45 }
  0xfd   :  { %12678 = vmatmul.mubr.bf16.vlgmr.msra.gmra.mrb[8].mxu1 %v17839_v20  ;;  %12688 = vmatprep.subr.bf16.mxu0 %v16622_v60  ;;  %v17326_v49 = vcombine.high %v1885_v19, %v1901_v46  ;;  %v1405_v50 = vld [vmem:[#allocation6 + $0x2808] sm:$0xff] }
  0xfe   :  { %12728 = vmatpush1.bf16.msra.mxu1 %v17101_v57  ;;  %12759 = vmatprep.mubr.bf16.mxu1 %v17850_v29  ;;  %v1421_v51 = vld [vmem:[#allocation6 + $0x2888] sm:$0xff]  ;;  %v17325_v57 = vcombine.low %v1885_v19, %v1901_v46 }
  0xff   :  { %12729 = vmatprep.subr.bf16.mxu1 %v17134_v61  ;;  %v1917_v52 = vld [vmem:[#allocation6 + $0x3808] sm:$0xff]  ;;  %v16846_v60 = vcombine.high %v1405_v50, %v1421_v51 }
 0x100   :  { %12689 = vmatpush1.bf16.msra.mxu0 %v16621_v2  ;;  %v1933_v55 = vld [vmem:[#allocation6 + $0x3888] sm:$0xff]  ;;  %v16845_v2 = vcombine.low %v1405_v50, %v1421_v51 }
 0x101   :  { %12690 = vmatprep.subr.bf16.mxu0 %v16654_v4  ;;  %v17358_v61 = vcombine.high %v1917_v52, %v1933_v55  ;;  %v1437_v62 = vld [vmem:[#allocation6 + $0x2908] sm:$0xff] }
 0x102   :  { %12730 = vmatpush1.bf16.msra.mxu1 %v17133_v3  ;;  %v1453_v63 = vld [vmem:[#allocation6 + $0x2988] sm:$0xff]  ;;  %v17357_v3 = vcombine.low %v1917_v52, %v1933_v55 }
 0x103   :  { %12731 = vmatprep.subr.bf16.mxu1 %v17166_v5  ;;  %v1949_v0 = vld [vmem:[#allocation6 + $0x3908] sm:$0xff]  ;;  %v16878_v4 = vcombine.high %v1437_v62, %v1453_v63 }
 0x104   :  { %12691 = vmatpush1.bf16.msra.mxu0 %v16653_v10  ;;  %v1965_v1 = vld [vmem:[#allocation6 + $0x3988] sm:$0xff]  ;;  %v16877_v10 = vcombine.low %v1437_v62, %v1453_v63  ;;  %v126_v62 = vld [vmem:[#allocation6 + $0x10] sm:$0xff] }
 0x105   :  { %12692 = vmatprep.subr.bf16.mxu0 %v16686_v12  ;;  %v17390_v5 = vcombine.high %v1949_v0, %v1965_v1  ;;  %v1469_v6 = vld [vmem:[#allocation6 + $0x2a08] sm:$0xff]  ;;  %v142_v63 = vld [vmem:[#allocation6 + $0x90] sm:$0xff] }
 0x106   :  { %12732 = vmatpush1.bf16.msra.mxu1 %v17165_v11  ;;  %v1485_v7 = vld [vmem:[#allocation6 + $0x2a88] sm:$0xff]  ;;  %v17389_v11 = vcombine.low %v1949_v0, %v1965_v1  ;;  %v638_v0 = vld [vmem:[#allocation6 + $0x1010] sm:$0xff] }
 0x107   :  { %12733 = vmatprep.subr.bf16.mxu1 %v17198_v13  ;;  %v1981_v8 = vld [vmem:[#allocation6 + $0x3a08] sm:$0xff]  ;;  %v16910_v12 = vcombine.high %v1469_v6, %v1485_v7  ;;  %v654_v1 = vld [vmem:[#allocation6 + $0x1090] sm:$0xff] }
 0x108   :  { %12693 = vmatpush1.bf16.msra.mxu0 %v16685_v21  ;;  %v1997_v9 = vld [vmem:[#allocation6 + $0x3a88] sm:$0xff]  ;;  %v16909_v21 = vcombine.low %v1469_v6, %v1485_v7  ;;  %v158_v6 = vld [vmem:[#allocation6 + $0x110] sm:$0xff] }
 0x109   :  { %12694 = vmatprep.subr.bf16.mxu0 %v16718_v24  ;;  %v17422_v13 = vcombine.high %v1981_v8, %v1997_v9  ;;  %v1501_v14 = vld [vmem:[#allocation6 + $0x2b08] sm:$0xff]  ;;  %v174_v7 = vld [vmem:[#allocation6 + $0x190] sm:$0xff] }
 0x10a   :  { %12734 = vmatpush1.bf16.msra.mxu1 %v17197_v23  ;;  %v1517_v15 = vld [vmem:[#allocation6 + $0x2b88] sm:$0xff]  ;;  %v17421_v23 = vcombine.low %v1981_v8, %v1997_v9  ;;  %v670_v8 = vld [vmem:[#allocation6 + $0x1110] sm:$0xff] }
 0x10b   :  { %12735 = vmatprep.subr.bf16.mxu1 %v17230_v25  ;;  %v2013_v17 = vld [vmem:[#allocation6 + $0x3b08] sm:$0xff]  ;;  %v16942_v24 = vcombine.high %v1501_v14, %v1517_v15  ;;  %v686_v9 = vld [vmem:[#allocation6 + $0x1190] sm:$0xff] }
 0x10c   :  { %12695 = vmatpush1.bf16.msra.mxu0 %v16717_v30  ;;  %v2029_v18 = vld [vmem:[#allocation6 + $0x3b88] sm:$0xff]  ;;  %v16941_v30 = vcombine.low %v1501_v14, %v1517_v15  ;;  %v190_v14 = vld [vmem:[#allocation6 + $0x210] sm:$0xff] }
 0x10d   :  { %12696 = vmatprep.subr.bf16.mxu0 %v16750_v32  ;;  %v17454_v25 = vcombine.high %v2013_v17, %v2029_v18  ;;  %v1533_v53 = vld [vmem:[#allocation6 + $0x2c08] sm:$0xff]  ;;  %v206_v15 = vld [vmem:[#allocation6 + $0x290] sm:$0xff] }
 0x10e   :  { %12736 = vmatpush1.bf16.msra.mxu1 %v17229_v31  ;;  %v1549_v26 = vld [vmem:[#allocation6 + $0x2c88] sm:$0xff]  ;;  %v17453_v31 = vcombine.low %v2013_v17, %v2029_v18  ;;  %v702_v17 = vld [vmem:[#allocation6 + $0x1210] sm:$0xff] }
 0x10f   :  { %12737 = vmatprep.subr.bf16.mxu1 %v17262_v33  ;;  %v2045_v28 = vld [vmem:[#allocation6 + $0x3c08] sm:$0xff]  ;;  %v16974_v32 = vcombine.high %v1533_v53, %v1549_v26  ;;  %v718_v18 = vld [vmem:[#allocation6 + $0x1290] sm:$0xff] }
 0x110   :  { %12697 = vmatpush1.bf16.msra.mxu0 %v16749_v40  ;;  %v2061_v54 = vld [vmem:[#allocation6 + $0x3c88] sm:$0xff]  ;;  %v16973_v40 = vcombine.low %v1533_v53, %v1549_v26  ;;  %v222_v53 = vld [vmem:[#allocation6 + $0x310] sm:$0xff] }
 0x111   :  { %12698 = vmatprep.subr.bf16.mxu0 %v16782_v42  ;;  %v17486_v33 = vcombine.high %v2045_v28, %v2061_v54  ;;  %v1565_v34 = vld [vmem:[#allocation6 + $0x2d08] sm:$0xff]  ;;  %v238_v26 = vld [vmem:[#allocation6 + $0x390] sm:$0xff] }
 0x112   :  { %12738 = vmatpush1.bf16.msra.mxu1 %v17261_v41  ;;  %v1581_v35 = vld [vmem:[#allocation6 + $0x2d88] sm:$0xff]  ;;  %v17485_v41 = vcombine.low %v2045_v28, %v2061_v54  ;;  %v734_v28 = vld [vmem:[#allocation6 + $0x1310] sm:$0xff] }
 0x113   :  { %12739 = vmatprep.subr.bf16.mxu1 %v17294_v43  ;;  %v2077_v37 = vld [vmem:[#allocation6 + $0x3d08] sm:$0xff]  ;;  %v17006_v42 = vcombine.high %v1565_v34, %v1581_v35  ;;  %v750_v54 = vld [vmem:[#allocation6 + $0x1390] sm:$0xff] }
 0x114   :  { %12699 = vmatpush1.bf16.msra.mxu0 %v16781_v47  ;;  %v2093_v38 = vld [vmem:[#allocation6 + $0x3d88] sm:$0xff]  ;;  %v17005_v47 = vcombine.low %v1565_v34, %v1581_v35  ;;  %v254_v34 = vld [vmem:[#allocation6 + $0x410] sm:$0xff] }
 0x115   :  { %12700 = vmatprep.subr.bf16.mxu0 %v16814_v48  ;;  %v17518_v43 = vcombine.high %v2077_v37, %v2093_v38  ;;  %v1597_v44 = vld [vmem:[#allocation6 + $0x2e08] sm:$0xff]  ;;  %v270_v35 = vld [vmem:[#allocation6 + $0x490] sm:$0xff] }
 0x116   :  { %12740 = vmatpush1.bf16.msra.mxu1 %v17293_v22  ;;  %v1613_v45 = vld [vmem:[#allocation6 + $0x2e88] sm:$0xff]  ;;  %v17517_v22 = vcombine.low %v2077_v37, %v2093_v38  ;;  %v766_v37 = vld [vmem:[#allocation6 + $0x1410] sm:$0xff] }
 0x117   :  { %12741 = vmatprep.subr.bf16.mxu1 %v17326_v49  ;;  %v2109_v19 = vld [vmem:[#allocation6 + $0x3e08] sm:$0xff]  ;;  %v17038_v48 = vcombine.high %v1597_v44, %v1613_v45  ;;  %v782_v38 = vld [vmem:[#allocation6 + $0x1490] sm:$0xff] }
 0x118   :  { %12701 = vmatpush1.bf16.msra.mxu0 %v16813_v56  ;;  %v2125_v46 = vld [vmem:[#allocation6 + $0x3e88] sm:$0xff]  ;;  %v17037_v56 = vcombine.low %v1597_v44, %v1613_v45  ;;  %v286_v44 = vld [vmem:[#allocation6 + $0x510] sm:$0xff] }
 0x119   :  { %12702 = vmatprep.subr.bf16.mxu0 %v16846_v60  ;;  %v17550_v49 = vcombine.high %v2109_v19, %v2125_v46  ;;  %v1629_v50 = vld [vmem:[#allocation6 + $0x2f08] sm:$0xff]  ;;  %v302_v45 = vld [vmem:[#allocation6 + $0x590] sm:$0xff] }
 0x11a   :  { %12742 = vmatpush1.bf16.msra.mxu1 %v17325_v57  ;;  %v1645_v51 = vld [vmem:[#allocation6 + $0x2f88] sm:$0xff]  ;;  %v17549_v57 = vcombine.low %v2109_v19, %v2125_v46  ;;  %v798_v19 = vld [vmem:[#allocation6 + $0x1510] sm:$0xff] }
 0x11b   :  { %12743 = vmatprep.subr.bf16.mxu1 %v17358_v61  ;;  %v2141_v52 = vld [vmem:[#allocation6 + $0x3f08] sm:$0xff]  ;;  %v17070_v60 = vcombine.high %v1629_v50, %v1645_v51  ;;  %v814_v46 = vld [vmem:[#allocation6 + $0x1590] sm:$0xff] }
 0x11c   :  { %12703 = vmatpush1.bf16.msra.mxu0 %v16845_v2  ;;  %v2157_v55 = vld [vmem:[#allocation6 + $0x3f88] sm:$0xff]  ;;  %v17069_v2 = vcombine.low %v1629_v50, %v1645_v51  ;;  %v318_v50 = vld [vmem:[#allocation6 + $0x610] sm:$0xff] }
 0x11d   :  { %12704 = vmatprep.subr.bf16.mxu0 %v16878_v4  ;;  %v17582_v61 = vcombine.high %v2141_v52, %v2157_v55  ;;  %v15568_v4 = vcombine.high %v126_v62, %v142_v63  ;;  %v334_v51 = vld [vmem:[#allocation6 + $0x690] sm:$0xff] }
 0x11e   :  { %12744 = vmatpush1.bf16.msra.mxu1 %v17357_v3  ;;  %v17581_v3 = vcombine.low %v2141_v52, %v2157_v55  ;;  %v830_v52 = vld [vmem:[#allocation6 + $0x1610] sm:$0xff] }
 0x11f   :  { %12745 = vmatprep.subr.bf16.mxu1 %v17390_v5  ;;  %v16080_v5 = vcombine.high %v638_v0, %v654_v1  ;;  %v846_v55 = vld [vmem:[#allocation6 + $0x1690] sm:$0xff] }
 0x120   :  { %12705 = vmatpush1.bf16.msra.mxu0 %v16877_v10  ;;  %v15567_v10 = vcombine.low %v126_v62, %v142_v63  ;;  %v16272_v62 = vcombine.high %v830_v52, %v846_v55  ;;  %v350_v63 = vld [vmem:[#allocation6 + $0x710] sm:$0xff] }
 0x121   :  { %12706 = vmatprep.subr.bf16.mxu0 %v16910_v12  ;;  %v15600_v12 = vcombine.high %v158_v6, %v174_v7 }
 0x122   :  { %12746 = vmatpush1.bf16.msra.mxu1 %v17389_v11  ;;  %v16079_v11 = vcombine.low %v638_v0, %v654_v1  ;;  %v366_v0 = vld [vmem:[#allocation6 + $0x790] sm:$0xff] }
 0x123   :  { %12747 = vmatprep.subr.bf16.mxu1 %v17422_v13  ;;  %v16112_v13 = vcombine.high %v670_v8, %v686_v9 }
 0x124   :  { %12707 = vmatpush1.bf16.msra.mxu0 %v16909_v21  ;;  %v15599_v21 = vcombine.low %v158_v6, %v174_v7 }
 0x125   :  { %12708 = vmatprep.subr.bf16.mxu0 %v16942_v24  ;;  %v15632_v24 = vcombine.high %v190_v14, %v206_v15 }
 0x126   :  { %12748 = vmatpush1.bf16.msra.mxu1 %v17421_v23  ;;  %v16111_v23 = vcombine.low %v670_v8, %v686_v9  ;;  %v15759_v8 = vcombine.low %v318_v50, %v334_v51 }
 0x127   :  { %12749 = vmatprep.subr.bf16.mxu1 %v17454_v25  ;;  %v16144_v25 = vcombine.high %v702_v17, %v718_v18 }
 0x128   :  { %12709 = vmatpush1.bf16.msra.mxu0 %v16941_v30  ;;  %v15631_v30 = vcombine.low %v190_v14, %v206_v15 }
 0x129   :  { %12710 = vmatprep.subr.bf16.mxu0 %v16974_v32  ;;  %v15664_v32 = vcombine.high %v222_v53, %v238_v26 }
 0x12a   :  { %12750 = vmatpush1.bf16.msra.mxu1 %v17453_v31  ;;  %v16143_v31 = vcombine.low %v702_v17, %v718_v18  ;;  %v382_v17 = vld [vmem:[#allocation6 + $0x810] sm:$0xff] }
 0x12b   :  { %12751 = vmatprep.subr.bf16.mxu1 %v17486_v33  ;;  %v16176_v33 = vcombine.high %v734_v28, %v750_v54  ;;  %v398_v18 = vld [vmem:[#allocation6 + $0x890] sm:$0xff] }
 0x12c   :  { %12711 = vmatpush1.bf16.msra.mxu0 %v16973_v40  ;;  %v15663_v40 = vcombine.low %v222_v53, %v238_v26  ;;  %v15824_v53 = vcombine.high %v382_v17, %v398_v18 }
 0x12d   :  { %12712 = vmatprep.subr.bf16.mxu0 %v17006_v42  ;;  %v15696_v42 = vcombine.high %v254_v34, %v270_v35 }
 0x12e   :  { %12752 = vmatpush1.bf16.msra.mxu1 %v17485_v41  ;;  %v16175_v41 = vcombine.low %v734_v28, %v750_v54  ;;  %v414_v28 = vld [vmem:[#allocation6 + $0x910] sm:$0xff] }
 0x12f   :  { %12753 = vmatprep.subr.bf16.mxu1 %v17518_v43  ;;  %v16208_v43 = vcombine.high %v766_v37, %v782_v38  ;;  %v430_v54 = vld [vmem:[#allocation6 + $0x990] sm:$0xff] }
 0x130   :  { %12713 = vmatpush1.bf16.msra.mxu0 %v17005_v47  ;;  %v15695_v47 = vcombine.low %v254_v34, %v270_v35  ;;  %v15856_v34 = vcombine.high %v414_v28, %v430_v54 }
 0x131   :  { %12714 = vmatprep.subr.bf16.mxu0 %v17038_v48  ;;  %v15728_v48 = vcombine.high %v286_v44, %v302_v45 }
 0x132   :  { %12754 = vmatpush1.bf16.msra.mxu1 %v17517_v22  ;;  %v16207_v22 = vcombine.low %v766_v37, %v782_v38  ;;  %v446_v37 = vld [vmem:[#allocation6 + $0xa10] sm:$0xff] }
 0x133   :  { %12755 = vmatprep.subr.bf16.mxu1 %v17550_v49  ;;  %v16240_v49 = vcombine.high %v798_v19, %v814_v46  ;;  %v462_v38 = vld [vmem:[#allocation6 + $0xa90] sm:$0xff] }
 0x134   :  { %12715 = vmatpush1.bf16.msra.mxu0 %v17037_v56  ;;  %v15727_v56 = vcombine.low %v286_v44, %v302_v45  ;;  %v15888_v44 = vcombine.high %v446_v37, %v462_v38 }
 0x135   :  { %12716 = vmatprep.subr.bf16.mxu0 %v17070_v60  ;;  %v15760_v60 = vcombine.high %v318_v50, %v334_v51 }
 0x136   :  { %12756 = vmatpush1.bf16.msra.mxu1 %v17549_v57  ;;  %v16239_v57 = vcombine.low %v798_v19, %v814_v46  ;;  %v478_v19 = vld [vmem:[#allocation6 + $0xb10] sm:$0xff] }
 0x137   :  { %12757 = vmatprep.subr.bf16.mxu1 %v17582_v61  ;;  %v494_v46 = vld [vmem:[#allocation6 + $0xb90] sm:$0xff] }
 0x138   :  { %12717 = vmatpush1.bf16.msra.mxu0 %v17069_v2  ;;  %v15920_v50 = vcombine.high %v478_v19, %v494_v46 }
 0x139   :  { %12768 = vmatprep.subr.bf16.mxu0 %v15568_v4  ;;  %v878_v4 = vld [vmem:[#allocation6 + $0x1790] sm:$0xff] }
 0x13a   :  { %12758 = vmatpush1.bf16.msra.mxu1 %v17581_v3  ;;  %v862_v3 = vld [vmem:[#allocation6 + $0x1710] sm:$0xff] }
 0x13b   :  { %12809 = vmatprep.subr.bf16.mxu1 %v16080_v5  ;;  %12719 = vmatmul.mubr.bf16.vlgmr.msra.gmra.mrb[12].mxu0 %v17857_v36  ;;  %v16304_v15 = vcombine.high %v862_v3, %v878_v4 }
 0x13c   :  { %12769 = vmatpush1.bf16.msra.mxu0 %v15567_v10  ;;  %12800 = vmatprep.mubr.bf16.mxu0 %v17823_v58 }
 0x13d   :  { %12760 = vmatmul.mubr.bf16.vlgmr.msra.gmra.mrb[12].mxu1 %v17861_v39  ;;  %12770 = vmatprep.subr.bf16.mxu0 %v15600_v12  ;;  %v16271_v12 = vcombine.low %v830_v52, %v846_v55  ;;  %v510_v52 = vld [vmem:[#allocation6 + $0xc10] sm:$0xff] }
 0x13e   :  { %12810 = vmatpush1.bf16.msra.mxu1 %v16079_v11  ;;  %12841 = vmatprep.mubr.bf16.mxu1 %v17827_v59  ;;  %v526_v55 = vld [vmem:[#allocation6 + $0xc90] sm:$0xff] }
 0x13f   :  { %12811 = vmatprep.subr.bf16.mxu1 %v16112_v13  ;;  %v15792_v13 = vcombine.high %v350_v63, %v366_v0 }
 0x140   :  { %12771 = vmatpush1.bf16.msra.mxu0 %v15599_v21  ;;  %v894_v21 = vld [vmem:[#allocation6 + $0x1810] sm:$0xff] }
 0x141   :  { %12772 = vmatprep.subr.bf16.mxu0 %v15632_v24  ;;  %v15791_v24 = vcombine.low %v350_v63, %v366_v0  ;;  %v542_v0 = vld [vmem:[#allocation6 + $0xd10] sm:$0xff] }
 0x142   :  { %12812 = vmatpush1.bf16.msra.mxu1 %v16111_v23  ;;  %v910_v23 = vld [vmem:[#allocation6 + $0x1890] sm:$0xff] }
 0x143   :  { %12813 = vmatprep.subr.bf16.mxu1 %v16144_v25  ;;  %v16303_v25 = vcombine.low %v862_v3, %v878_v4  ;;  %v16336_v26 = vcombine.high %v894_v21, %v910_v23  ;;  %v1070_v3 = vld [vmem:[#allocation6 + $0x1d90] sm:$0xff]  ;;  %v15951_v4 = vcombine.low %v510_v52, %v526_v55 }
 0x144   :  { %12773 = vmatpush1.bf16.msra.mxu0 %v15631_v30  ;;  %v926_v30 = vld [vmem:[#allocation6 + $0x1910] sm:$0xff] }
 0x145   :  { %12774 = vmatprep.subr.bf16.mxu0 %v15664_v32  ;;  %v15823_v32 = vcombine.low %v382_v17, %v398_v18 }
 0x146   :  { %12814 = vmatpush1.bf16.msra.mxu1 %v16143_v31  ;;  %v942_v31 = vld [vmem:[#allocation6 + $0x1990] sm:$0xff] }
 0x147   :  { %12815 = vmatprep.subr.bf16.mxu1 %v16176_v33  ;;  %v16335_v33 = vcombine.low %v894_v21, %v910_v23  ;;  %v16368_v35 = vcombine.high %v926_v30, %v942_v31  ;;  %v606_v21 = vld [vmem:[#allocation6 + $0xf10] sm:$0xff] }
 0x148   :  { %12775 = vmatpush1.bf16.msra.mxu0 %v15663_v40  ;;  %v958_v40 = vld [vmem:[#allocation6 + $0x1a10] sm:$0xff] }
 0x149   :  { %12776 = vmatprep.subr.bf16.mxu0 %v15696_v42  ;;  %v15855_v42 = vcombine.low %v414_v28, %v430_v54  ;;  %v622_v23 = vld [vmem:[#allocation6 + $0xf90] sm:$0xff] }
 0x14a   :  { %12816 = vmatpush1.bf16.msra.mxu1 %v16175_v41  ;;  %v974_v41 = vld [vmem:[#allocation6 + $0x1a90] sm:$0xff]  ;;  %v16048_v28 = vcombine.high %v606_v21, %v622_v23 }
 0x14b   :  { %12817 = vmatprep.subr.bf16.mxu1 %v16208_v43  ;;  %v16367_v43 = vcombine.low %v926_v30, %v942_v31  ;;  %v16400_v45 = vcombine.high %v958_v40, %v974_v41  ;;  %v1150_v30 = vld [vmem:[#allocation6 + $0x2010] sm:$0xff] }
 0x14c   :  { %12777 = vmatpush1.bf16.msra.mxu0 %v15695_v47  ;;  %v990_v47 = vld [vmem:[#allocation6 + $0x1b10] sm:$0xff] }
 0x14d   :  { %12778 = vmatprep.subr.bf16.mxu0 %v15728_v48  ;;  %v15887_v48 = vcombine.low %v446_v37, %v462_v38  ;;  %v1166_v31 = vld [vmem:[#allocation6 + $0x2090] sm:$0xff] }
 0x14e   :  { %12818 = vmatpush1.bf16.msra.mxu1 %v16207_v22  ;;  %v12474_v61 = vpop.f32.mrb[0].mxu0  ;;  %v1006_v22 = vld [vmem:[#allocation6 + $0x1b90] sm:$0xff]  ;;  %v16592_v37 = vcombine.high %v1150_v30, %v1166_v31 }
 0x14f   :  { %12819 = vmatprep.subr.bf16.mxu1 %v16240_v49  ;;  %v12476_v2 = vpop.f32.mrb[1].mxu0  ;;  %v16399_v49 = vcombine.low %v958_v40, %v974_v41  ;;  %v16432_v51 = vcombine.high %v990_v47, %v1006_v22  ;;  %v1182_v40 = vld [vmem:[#allocation6 + $0x2110] sm:$0xff] }
 0x150   :  { %v12515_v1 = vpop.f32.mrb[0].mxu1  ;;  %v12478_v7 = vpop.f32.mrb[2].mxu0  ;;  %12779 = vmatpush1.bf16.msra.mxu0 %v15727_v56  ;;  %v1022_v56 = vld [vmem:[#allocation6 + $0x1c10] sm:$0xff] }
 0x151   :  { %v17875_v5 = vadd.f32 %v12515_v1, %v12474_v61  ;;  %v12517_v6 = vpop.f32.mrb[1].mxu1  ;;  %v12479_v11 = vpop.f32.mrb[3].mxu0  ;;  %12780 = vmatprep.subr.bf16.mxu0 %v15760_v60  ;;  %v15919_v60 = vcombine.low %v478_v19, %v494_v46  ;;  %v16431_v61 = vcombine.low %v990_v47, %v1006_v22  ;;  %v558_v1 = vld [vmem:[#allocation6 + $0xd90] sm:$0xff] }
 0x152   :  { %v17877_v9 = vadd.f32 %v12517_v6, %v12476_v2  ;;  %v12519_v10 = vpop.f32.mrb[2].mxu1  ;;  %12820 = vmatpush1.bf16.msra.mxu1 %v16239_v57  ;;  %v1038_v57 = vld [vmem:[#allocation6 + $0x1c90] sm:$0xff]  ;;  %v15984_v7 = vcombine.high %v542_v0, %v558_v1 }
 0x153   :  { %v12520_v14 = vpop.f32.mrb[3].mxu1  ;;  %12821 = vmatprep.subr.bf16.mxu1 %v16272_v62  ;;  %v15952_v62 = vcombine.high %v510_v52, %v526_v55  ;;  %v16464_v63 = vcombine.high %v1022_v56, %v1038_v57  ;;  %v1054_v2 = vld [vmem:[#allocation6 + $0x1d10] sm:$0xff]  ;;  %v16463_v6 = vcombine.low %v1022_v56, %v1038_v57 }
 0x154   :  { %12781 = vmatpush1.bf16.msra.mxu0 %v15759_v8  ;;  %v16496_v8 = vcombine.high %v1054_v2, %v1070_v3  ;;  %v574_v10 = vld [vmem:[#allocation6 + $0xe10] sm:$0xff]  ;;  %v15983_v14 = vcombine.low %v542_v0, %v558_v1 }
 0x155   :  { %12782 = vmatprep.subr.bf16.mxu0 %v15792_v13  ;;  %v590_v11 = vld [vmem:[#allocation6 + $0xe90] sm:$0xff] }
 0x156   :  { %12822 = vmatpush1.bf16.msra.mxu1 %v16271_v12  ;;  %v1086_v12 = vld [vmem:[#allocation6 + $0x1e10] sm:$0xff]  ;;  %v16016_v17 = vcombine.high %v574_v10, %v590_v11 }
 0x157   :  { %12823 = vmatprep.subr.bf16.mxu1 %v16304_v15  ;;  %v1102_v13 = vld [vmem:[#allocation6 + $0x1e90] sm:$0xff]  ;;  %v16495_v15 = vcombine.low %v1054_v2, %v1070_v3 }
 0x158   :  { %12783 = vmatpush1.bf16.msra.mxu0 %v15791_v24  ;;  %v16528_v18 = vcombine.high %v1086_v12, %v1102_v13  ;;  %v1118_v24 = vld [vmem:[#allocation6 + $0x1f10] sm:$0xff] }
 0x159   :  { %12784 = vmatprep.subr.bf16.mxu0 %v15824_v53  ;;  %v16015_v53 = vcombine.low %v574_v10, %v590_v11  ;;  %v1198_v41 = vld [vmem:[#allocation6 + $0x2190] sm:$0xff] }
 0x15a   :  { %12824 = vmatpush1.bf16.msra.mxu1 %v16303_v25  ;;  %v1134_v25 = vld [vmem:[#allocation6 + $0x1f90] sm:$0xff]  ;;  %v16624_v19 = vcombine.high %v1182_v40, %v1198_v41 }
 0x15b   :  { %12825 = vmatprep.subr.bf16.mxu1 %v16336_v26  ;;  %v16527_v26 = vcombine.low %v1086_v12, %v1102_v13  ;;  %v16560_v54 = vcombine.high %v1118_v24, %v1134_v25  ;;  %v1214_v47 = vld [vmem:[#allocation6 + $0x2210] sm:$0xff] }
 0x15c   :  { %12785 = vmatpush1.bf16.msra.mxu0 %v15823_v32  ;;  %v1662_v32 = vld [vmem:[#allocation6 + $0x3010] sm:$0xff] }
 0x15d   :  { %12786 = vmatprep.subr.bf16.mxu0 %v15856_v34  ;;  %v16047_v34 = vcombine.low %v606_v21, %v622_v23  ;;  %v1230_v22 = vld [vmem:[#allocation6 + $0x2290] sm:$0xff] }
 0x15e   :  { %12826 = vmatpush1.bf16.msra.mxu1 %v16335_v33  ;;  %v1678_v33 = vld [vmem:[#allocation6 + $0x3090] sm:$0xff]  ;;  %v16656_v52 = vcombine.high %v1214_v47, %v1230_v22 }
 0x15f   :  { %12827 = vmatprep.subr.bf16.mxu1 %v16368_v35  ;;  %v16559_v35 = vcombine.low %v1118_v24, %v1134_v25  ;;  %v17104_v38 = vcombine.high %v1662_v32, %v1678_v33  ;;  %v1246_v56 = vld [vmem:[#allocation6 + $0x2310] sm:$0xff] }
 0x160   :  { %12787 = vmatpush1.bf16.msra.mxu0 %v15855_v42  ;;  %v1694_v42 = vld [vmem:[#allocation6 + $0x3110] sm:$0xff] }
 0x161   :  { %12788 = vmatprep.subr.bf16.mxu0 %v15888_v44  ;;  %v16591_v44 = vcombine.low %v1150_v30, %v1166_v31  ;;  %v1262_v57 = vld [vmem:[#allocation6 + $0x2390] sm:$0xff]  ;;  %v17888_v31 = vld [vmem:[#allocation8] sm:$0xff] }
 0x162   :  { %12828 = vmatpush1.bf16.msra.mxu1 %v16367_v43  ;;  %v1710_v43 = vld [vmem:[#allocation6 + $0x3190] sm:$0xff]  ;;  %v16688_v0 = vcombine.high %v1246_v56, %v1262_v57 }
 0x163   :  { %12829 = vmatprep.subr.bf16.mxu1 %v16400_v45  ;;  %v17103_v45 = vcombine.low %v1662_v32, %v1678_v33  ;;  %v17136_v46 = vcombine.high %v1694_v42, %v1710_v43  ;;  %v1278_v2 = vld [vmem:[#allocation6 + $0x2410] sm:$0xff] }
 0x164   :  { %12789 = vmatpush1.bf16.msra.mxu0 %v15887_v48  ;;  %v1726_v48 = vld [vmem:[#allocation6 + $0x3210] sm:$0xff] }
 0x165   :  { %12790 = vmatprep.subr.bf16.mxu0 %v15920_v50  ;;  %v16623_v50 = vcombine.low %v1182_v40, %v1198_v41  ;;  %v1294_v3 = vld [vmem:[#allocation6 + $0x2490] sm:$0xff] }
 0x166   :  { %12830 = vmatpush1.bf16.msra.mxu1 %v16399_v49  ;;  %v1742_v49 = vld [vmem:[#allocation6 + $0x3290] sm:$0xff]  ;;  %v16720_v11 = vcombine.high %v1278_v2, %v1294_v3  ;;  %v16719_v21 = vcombine.low %v1278_v2, %v1294_v3 }
 0x167   :  { %12831 = vmatprep.subr.bf16.mxu1 %v16432_v51  ;;  %v17135_v51 = vcombine.low %v1694_v42, %v1710_v43  ;;  %v17168_v55 = vcombine.high %v1726_v48, %v1742_v49  ;;  %v1310_v13 = vld [vmem:[#allocation6 + $0x2510] sm:$0xff] }
 0x168   :  { %12791 = vmatpush1.bf16.msra.mxu0 %v15919_v60  ;;  %v1758_v60 = vld [vmem:[#allocation6 + $0x3310] sm:$0xff] }
 0x169   :  { %12792 = vmatprep.subr.bf16.mxu0 %v15952_v62  ;;  %v16655_v62 = vcombine.low %v1214_v47, %v1230_v22  ;;  %v1870_v30 = vld [vmem:[#allocation6 + $0x3690] sm:$0xff] }
 0x16a   :  { %12832 = vmatpush1.bf16.msra.mxu1 %v16431_v61  ;;  %v1774_v61 = vld [vmem:[#allocation6 + $0x3390] sm:$0xff] }
 0x16b   :  { %12833 = vmatprep.subr.bf16.mxu1 %v16464_v63  ;;  %v17167_v63 = vcombine.low %v1726_v48, %v1742_v49  ;;  %v17200_v1 = vcombine.high %v1758_v60, %v1774_v61  ;;  %v17199_v10 = vcombine.low %v1758_v60, %v1774_v61  ;;  %v1374_v40 = vld [vmem:[#allocation6 + $0x2710] sm:$0xff] }
 0x16c   :  { %12793 = vmatpush1.bf16.msra.mxu0 %v15951_v4  ;;  %v1790_v4 = vld [vmem:[#allocation6 + $0x3410] sm:$0xff] }
 0x16d   :  { %12794 = vmatprep.subr.bf16.mxu0 %v15984_v7  ;;  %v15171_v7 = vlaneseq  ;;  %v1390_v41 = vld [vmem:[#allocation6 + $0x2790] sm:$0xff] }
 0x16e   :  { %12834 = vmatpush1.bf16.msra.mxu1 %v16463_v6  ;;  %v1806_v6 = vld [vmem:[#allocation6 + $0x3490] sm:$0xff]  ;;  %v16815_v3 = vcombine.low %v1374_v40, %v1390_v41 }
 0x16f   :  { %12835 = vmatprep.subr.bf16.mxu1 %v16496_v8  ;;  %v16687_v8 = vcombine.low %v1246_v56, %v1262_v57  ;;  %v17232_v12 = vcombine.high %v1790_v4, %v1806_v6  ;;  %v17231_v23 = vcombine.low %v1790_v4, %v1806_v6  ;;  %v16816_v56 = vcombine.high %v1374_v40, %v1390_v41  ;;  %v2014_v40 = vld [vmem:[#allocation6 + $0x3b10] sm:$0xff] }
 0x170   :  { %12795 = vmatpush1.bf16.msra.mxu0 %v15983_v14  ;;  %v1326_v14 = vld [vmem:[#allocation6 + $0x2590] sm:$0xff] }
 0x171   :  { %12796 = vmatprep.subr.bf16.mxu0 %v16016_v17  ;;  %v1822_v17 = vld [vmem:[#allocation6 + $0x3510] sm:$0xff]  ;;  %v16752_v24 = vcombine.high %v1310_v13, %v1326_v14  ;;  %v16751_v33 = vcombine.low %v1310_v13, %v1326_v14 }
 0x172   :  { %12836 = vmatpush1.bf16.msra.mxu1 %v16495_v15  ;;  %v17883_v15 = vshrl.u32 %v15171_v7, 7  ;;  %v1950_v13 = vld [vmem:[#allocation6 + $0x3910] sm:$0xff] }
 0x173   :  { %12837 = vmatprep.subr.bf16.mxu1 %v16528_v18  ;;  %v1838_v18 = vld [vmem:[#allocation6 + $0x3590] sm:$0xff] }
 0x174   :  { %12797 = vmatpush1.bf16.msra.mxu0 %v16015_v53  ;;  %v17264_v25 = vcombine.high %v1822_v17, %v1838_v18  ;;  %v1342_v53 = vld [vmem:[#allocation6 + $0x2610] sm:$0xff]  ;;  %v17891_v32 = vsub.s32 1, %v17883_v15 }
 0x175   :  { %12798 = vmatprep.subr.bf16.mxu0 %v16048_v28  ;;  %v17886_v28 = vsub.s32 0, %v17883_v15  ;;  %v1966_v14 = vld [vmem:[#allocation6 + $0x3990] sm:$0xff] }
 0x176   :  { %12838 = vmatpush1.bf16.msra.mxu1 %v16527_v26  ;;  %v1358_v26 = vld [vmem:[#allocation6 + $0x2690] sm:$0xff]  ;;  %v15178_v48 = vrot.slane %v17888_v31, %v17891_v32 }
 0x177   :  { %12839 = vmatprep.subr.bf16.mxu1 %v16560_v54  ;;  %v1854_v54 = vld [vmem:[#allocation6 + $0x3610] sm:$0xff] }
 0x178   :  { %12799 = vmatpush1.bf16.msra.mxu0 %v16047_v34  ;;  %v17263_v34 = vcombine.low %v1822_v17, %v1838_v18  ;;  %v2030_v41 = vld [vmem:[#allocation6 + $0x3b90] sm:$0xff] }
 0x179   :  { %12850 = vmatprep.subr.bf16.mxu0 %v16592_v37 }
 0x17a   :  { %12840 = vmatpush1.bf16.msra.mxu1 %v16559_v35  ;;  %v16784_v35 = vcombine.high %v1342_v53, %v1358_v26 }
 0x17b   :  { %12891 = vmatprep.subr.bf16.mxu1 %v17104_v38  ;;  %12801 = vmatmul.mubr.bf16.vlgmr.msra.gmra.mrb[16].mxu0 %v17833_v16  ;;  %v17296_v38 = vcombine.high %v1854_v54, %v1870_v30 }
 0x17c   :  { %12851 = vmatpush1.bf16.msra.mxu0 %v16591_v44  ;;  %12882 = vmatprep.mubr.bf16.mxu0 %v17845_v27  ;;  %v15174_v44 = vrot.slane %v17888_v31, %v17886_v28 }
 0x17d   :  { %12842 = vmatmul.mubr.bf16.vlgmr.msra.gmra.mrb[16].mxu1 %v17839_v20  ;;  %12852 = vmatprep.subr.bf16.mxu0 %v16624_v19  ;;  %v1886_v19 = vld [vmem:[#allocation6 + $0x3710] sm:$0xff] }
 0x17e   :  { %12892 = vmatpush1.bf16.msra.mxu1 %v17103_v45  ;;  %12923 = vmatprep.mubr.bf16.mxu1 %v17850_v29 }
 0x17f   :  { %12893 = vmatprep.subr.bf16.mxu1 %v17136_v46  ;;  %v1902_v46 = vld [vmem:[#allocation6 + $0x3790] sm:$0xff] }
 0x180   :  { %12853 = vmatpush1.bf16.msra.mxu0 %v16623_v50  ;;  %v16783_v50 = vcombine.low %v1342_v53, %v1358_v26  ;;  %v17328_v61 = vcombine.high %v1886_v19, %v1902_v46  ;;  %v17327_v6 = vcombine.low %v1886_v19, %v1902_v46  ;;  %v1486_v53 = vld [vmem:[#allocation6 + $0x2a90] sm:$0xff] }
 0x181   :  { %12854 = vmatprep.subr.bf16.mxu0 %v16656_v52  ;;  %v1982_v26 = vld [vmem:[#allocation6 + $0x3a10] sm:$0xff] }
 0x182   :  { %12894 = vmatpush1.bf16.msra.mxu1 %v17135_v51  ;;  %v1534_v19 = vld [vmem:[#allocation6 + $0x2c10] sm:$0xff] }
 0x183   :  { %12895 = vmatprep.subr.bf16.mxu1 %v17168_v55  ;;  %v17295_v55 = vcombine.low %v1854_v54, %v1870_v30  ;;  %v1998_v54 = vld [vmem:[#allocation6 + $0x3a90] sm:$0xff] }
 0x184   :  { %12855 = vmatpush1.bf16.msra.mxu0 %v16655_v62  ;;  %v1406_v62 = vld [vmem:[#allocation6 + $0x2810] sm:$0xff] }
 0x185   :  { %12856 = vmatprep.subr.bf16.mxu0 %v16688_v0  ;;  %v1918_v0 = vld [vmem:[#allocation6 + $0x3810] sm:$0xff] }
 0x186   :  { %12896 = vmatpush1.bf16.msra.mxu1 %v17167_v63  ;;  %v1550_v46 = vld [vmem:[#allocation6 + $0x2c90] sm:$0xff] }
 0x187   :  { %12897 = vmatprep.subr.bf16.mxu1 %v17200_v1  ;;  %v1934_v1 = vld [vmem:[#allocation6 + $0x3890] sm:$0xff] }
 0x188   :  { %12857 = vmatpush1.bf16.msra.mxu0 %v16687_v8 }
 0x189   :  { %12858 = vmatprep.subr.bf16.mxu0 %v16720_v11  ;;  %v1438_v11 = vld [vmem:[#allocation6 + $0x2910] sm:$0xff] }
 0x18a   :  { %12898 = vmatpush1.bf16.msra.mxu1 %v17199_v10  ;;  %v17360_v10 = vcombine.high %v1918_v0, %v1934_v1 }
 0x18b   :  { %12899 = vmatprep.subr.bf16.mxu1 %v17232_v12  ;;  %v1454_v12 = vld [vmem:[#allocation6 + $0x2990] sm:$0xff] }
 0x18c   :  { %12859 = vmatpush1.bf16.msra.mxu0 %v16719_v21  ;;  %v17359_v21 = vcombine.low %v1918_v0, %v1934_v1  ;;  %v16879_v30 = vcombine.low %v1438_v11, %v1454_v12  ;;  %v2110_v0 = vld [vmem:[#allocation6 + $0x3e10] sm:$0xff] }
 0x18d   :  { %12860 = vmatprep.subr.bf16.mxu0 %v16752_v24  ;;  %v17392_v24 = vcombine.high %v1950_v13, %v1966_v14  ;;  %v2126_v1 = vld [vmem:[#allocation6 + $0x3e90] sm:$0xff] }
 0x18e   :  { %12900 = vmatpush1.bf16.msra.mxu1 %v17231_v23  ;;  %v12556_v37 = vpop.f32.mrb[4].mxu0  ;;  %v16880_v23 = vcombine.high %v1438_v11, %v1454_v12  ;;  %v2158_v11 = vld [vmem:[#allocation6 + $0x3f90] sm:$0xff] }
 0x18f   :  { %12901 = vmatprep.subr.bf16.mxu1 %v17264_v25  ;;  %v12557_v42 = vadd.f32 %v12556_v37, %v17875_v5  ;;  %v12558_v45 = vpop.f32.mrb[5].mxu0  ;;  %v1470_v25 = vld [vmem:[#allocation6 + $0x2a10] sm:$0xff] }
 0x190   :  { %v12597_v43 = vpop.f32.mrb[4].mxu1  ;;  %v12559_v47 = vadd.f32 %v12558_v45, %v17877_v9  ;;  %v12560_v49 = vpop.f32.mrb[6].mxu0  ;;  %12861 = vmatpush1.bf16.msra.mxu0 %v16751_v33  ;;  %v1422_v9 = vld [vmem:[#allocation6 + $0x2890] sm:$0xff]  ;;  %v17391_v33 = vcombine.low %v1950_v13, %v1966_v14  ;;  %v17456_v45 = vcombine.high %v2014_v40, %v2030_v41  ;;  %v17551_v13 = vcombine.low %v2110_v0, %v2126_v1 }
 0x191   :  { %v12599_v22 = vpop.f32.mrb[5].mxu1  ;;  %v12598_v51 = vadd.f32 %v12597_v43, %v12557_v42  ;;  %v12561_v5 = vpop.f32.mrb[7].mxu0  ;;  %12862 = vmatprep.subr.bf16.mxu0 %v16784_v35  ;;  %v16848_v7 = vcombine.high %v1406_v62, %v1422_v9  ;;  %v16847_v18 = vcombine.low %v1406_v62, %v1422_v9  ;;  %v17424_v35 = vcombine.high %v1982_v26, %v1998_v54  ;;  %v1502_v37 = vld [vmem:[#allocation6 + $0x2b10] sm:$0xff] }
 0x192   :  { %v12601_v52 = vpop.f32.mrb[6].mxu1  ;;  %12902 = vmatpush1.bf16.msra.mxu1 %v17263_v34  ;;  %v12600_v57 = vadd.f32 %v12599_v22, %v12559_v47  ;;  %v16912_v34 = vcombine.high %v1470_v25, %v1486_v53  ;;  %v16911_v42 = vcombine.low %v1470_v25, %v1486_v53  ;;  %v17423_v43 = vcombine.low %v1982_v26, %v1998_v54  ;;  %v2046_v47 = vld [vmem:[#allocation6 + $0x3c10] sm:$0xff] }
 0x193   :  { %v12602_v60 = vpop.f32.mrb[7].mxu1  ;;  %12903 = vmatprep.subr.bf16.mxu1 %v17296_v38  ;;  %v15331_v63 = vadd.f32 %v15174_v44, %v12598_v51  ;;  %v1518_v38 = vld [vmem:[#allocation6 + $0x2b90] sm:$0xff]  ;;  %v17455_v49 = vcombine.low %v2014_v40, %v2030_v41 }
 0x194   :  { %v15332_v2 = vadd.f32 %v15178_v48, %v12600_v57  ;;  %12863 = vmatpush1.bf16.msra.mxu0 %v16783_v50  ;;  %v16944_v44 = vcombine.high %v1502_v37, %v1518_v38  ;;  %v2062_v22 = vld [vmem:[#allocation6 + $0x3c90] sm:$0xff]  ;;  %v16943_v48 = vcombine.low %v1502_v37, %v1518_v38  ;;  %v16976_v50 = vcombine.high %v1534_v19, %v1550_v46 }
 0x195   :  { %v15363_v4 = vmax.f32 %v15331_v63, 0.0  ;;  %12864 = vmatprep.subr.bf16.mxu0 %v16816_v56  ;;  %v17488_v51 = vcombine.high %v2046_v47, %v2062_v22  ;;  %v1566_v52 = vld [vmem:[#allocation6 + $0x2d10] sm:$0xff]  ;;  %v16975_v57 = vcombine.low %v1534_v19, %v1550_v46  ;;  %v17487_v60 = vcombine.low %v2046_v47, %v2062_v22 }
 0x196   :  { %12904 = vmatpush1.bf16.msra.mxu1 %v17295_v55  ;;  %v15364_v8 = vmax.f32 %v15332_v2, 0.0  ;;  %v1582_v5 = vld [vmem:[#allocation6 + $0x2d90] sm:$0xff] }
 0x197   :  { %12905 = vmatprep.subr.bf16.mxu1 %v17328_v61  ;;  %v2078_v55 = vld [vmem:[#allocation6 + $0x3d10] sm:$0xff]  ;;  %v17008_v61 = vcombine.high %v1566_v52, %v1582_v5  ;;  %v17007_v2 = vcombine.low %v1566_v52, %v1582_v5 }
 0x198   :  { %v17627_v17 = vpack.c.bf16 %v15364_v8, %v15363_v4  ;;  %12865 = vmatpush1.bf16.msra.mxu0 %v16815_v3  ;;  %v2094_v56 = vld [vmem:[#allocation6 + $0x3d90] sm:$0xff] }
 0x199   :  { %12866 = vmatprep.subr.bf16.mxu0 %v16848_v7  ;;  %v17520_v62 = vcombine.high %v2078_v55, %v2094_v56  ;;  %v1598_v9 = vld [vmem:[#allocation6 + $0x2e10] sm:$0xff]  ;;  %v17519_v3 = vcombine.low %v2078_v55, %v2094_v56 }
 0x19a   :  { %12906 = vmatpush1.bf16.msra.mxu1 %v17327_v6  ;;  %15523 = vst [vmem:[#allocation9] sm:$0xff] %v17627_v17  ;;  %v1614_v63 = vld [vmem:[#allocation6 + $0x2e90] sm:$0xff]  ;;  %v17552_v6 = vcombine.high %v2110_v0, %v2126_v1 }
 0x19b   :  { %12907 = vmatprep.subr.bf16.mxu1 %v17360_v10  ;;  %v17040_v4 = vcombine.high %v1598_v9, %v1614_v63  ;;  %v1630_v7 = vld [vmem:[#allocation6 + $0x2f10] sm:$0xff]  ;;  %v17039_v12 = vcombine.low %v1598_v9, %v1614_v63 }
 0x19c   :  { %12867 = vmatpush1.bf16.msra.mxu0 %v16847_v18  ;;  %v1646_v8 = vld [vmem:[#allocation6 + $0x2f90] sm:$0xff]  ;;  %v127_v18 = vld [vmem:[#allocation6 + $0x18] sm:$0xff] }
 0x19d   :  { %12868 = vmatprep.subr.bf16.mxu0 %v16880_v23  ;;  %v2142_v10 = vld [vmem:[#allocation6 + $0x3f10] sm:$0xff]  ;;  %v17072_v14 = vcombine.high %v1630_v7, %v1646_v8  ;;  %v639_v23 = vld [vmem:[#allocation6 + $0x1018] sm:$0xff]  ;;  %v17071_v25 = vcombine.low %v1630_v7, %v1646_v8 }
 0x19e   :  { %12908 = vmatpush1.bf16.msra.mxu1 %v17359_v21  ;;  %v17584_v17 = vcombine.high %v2142_v10, %v2158_v11  ;;  %v143_v21 = vld [vmem:[#allocation6 + $0x98] sm:$0xff]  ;;  %v17583_v53 = vcombine.low %v2142_v10, %v2158_v11 }
 0x19f   :  { %12909 = vmatprep.subr.bf16.mxu1 %v17392_v24  ;;  %v655_v24 = vld [vmem:[#allocation6 + $0x1098] sm:$0xff]  ;;  %v15570_v26 = vcombine.high %v127_v18, %v143_v21  ;;  %v15569_v37 = vcombine.low %v127_v18, %v143_v21 }
 0x1a0   :  { %12869 = vmatpush1.bf16.msra.mxu0 %v16879_v30  ;;  %v16082_v54 = vcombine.high %v639_v23, %v655_v24  ;;  %v159_v30 = vld [vmem:[#allocation6 + $0x118] sm:$0xff]  ;;  %v16081_v38 = vcombine.low %v639_v23, %v655_v24 }
 0x1a1   :  { %12870 = vmatprep.subr.bf16.mxu0 %v16912_v34  ;;  %v671_v34 = vld [vmem:[#allocation6 + $0x1118] sm:$0xff] }
 0x1a2   :  { %12910 = vmatpush1.bf16.msra.mxu1 %v17391_v33  ;;  %v175_v33 = vld [vmem:[#allocation6 + $0x198] sm:$0xff] }
 0x1a3   :  { %12911 = vmatprep.subr.bf16.mxu1 %v17424_v35  ;;  %v687_v35 = vld [vmem:[#allocation6 + $0x1198] sm:$0xff]  ;;  %v15602_v40 = vcombine.high %v159_v30, %v175_v33  ;;  %v15601_v19 = vcombine.low %v159_v30, %v175_v33 }
 0x1a4   :  { %12871 = vmatpush1.bf16.msra.mxu0 %v16911_v42  ;;  %v16114_v41 = vcombine.high %v671_v34, %v687_v35  ;;  %v191_v42 = vld [vmem:[#allocation6 + $0x218] sm:$0xff]  ;;  %v16113_v46 = vcombine.low %v671_v34, %v687_v35 }
 0x1a5   :  { %12872 = vmatprep.subr.bf16.mxu0 %v16944_v44  ;;  %v703_v44 = vld [vmem:[#allocation6 + $0x1218] sm:$0xff] }
 0x1a6   :  { %12912 = vmatpush1.bf16.msra.mxu1 %v17423_v43  ;;  %v207_v43 = vld [vmem:[#allocation6 + $0x298] sm:$0xff] }
 0x1a7   :  { %12913 = vmatprep.subr.bf16.mxu1 %v17456_v45  ;;  %v719_v45 = vld [vmem:[#allocation6 + $0x1298] sm:$0xff]  ;;  %v15634_v47 = vcombine.high %v191_v42, %v207_v43  ;;  %v15633_v52 = vcombine.low %v191_v42, %v207_v43 }
 0x1a8   :  { %12873 = vmatpush1.bf16.msra.mxu0 %v16943_v48  ;;  %v16146_v22 = vcombine.high %v703_v44, %v719_v45  ;;  %v223_v48 = vld [vmem:[#allocation6 + $0x318] sm:$0xff]  ;;  %v16145_v5 = vcombine.low %v703_v44, %v719_v45 }
 0x1a9   :  { %12874 = vmatprep.subr.bf16.mxu0 %v16976_v50  ;;  %v735_v50 = vld [vmem:[#allocation6 + $0x1318] sm:$0xff] }
 0x1aa   :  { %12914 = vmatpush1.bf16.msra.mxu1 %v17455_v49  ;;  %v239_v49 = vld [vmem:[#allocation6 + $0x398] sm:$0xff] }
 0x1ab   :  { %12915 = vmatprep.subr.bf16.mxu1 %v17488_v51  ;;  %v751_v51 = vld [vmem:[#allocation6 + $0x1398] sm:$0xff]  ;;  %v15666_v55 = vcombine.high %v223_v48, %v239_v49  ;;  %v15665_v9 = vcombine.low %v223_v48, %v239_v49 }
 0x1ac   :  { %12875 = vmatpush1.bf16.msra.mxu0 %v16975_v57  ;;  %v16178_v56 = vcombine.high %v735_v50, %v751_v51  ;;  %v255_v57 = vld [vmem:[#allocation6 + $0x418] sm:$0xff]  ;;  %v16177_v63 = vcombine.low %v735_v50, %v751_v51 }
 0x1ad   :  { %12876 = vmatprep.subr.bf16.mxu0 %v17008_v61  ;;  %v767_v61 = vld [vmem:[#allocation6 + $0x1418] sm:$0xff] }
 0x1ae   :  { %12916 = vmatpush1.bf16.msra.mxu1 %v17487_v60  ;;  %v271_v60 = vld [vmem:[#allocation6 + $0x498] sm:$0xff] }
 0x1af   :  { %12917 = vmatprep.subr.bf16.mxu1 %v17520_v62  ;;  %v783_v62 = vld [vmem:[#allocation6 + $0x1498] sm:$0xff]  ;;  %v15698_v0 = vcombine.high %v255_v57, %v271_v60  ;;  %v15697_v7 = vcombine.low %v255_v57, %v271_v60 }
 0x1b0   :  { %12877 = vmatpush1.bf16.msra.mxu0 %v17007_v2  ;;  %v16210_v1 = vcombine.high %v767_v61, %v783_v62  ;;  %v287_v2 = vld [vmem:[#allocation6 + $0x518] sm:$0xff]  ;;  %v16209_v8 = vcombine.low %v767_v61, %v783_v62 }
 0x1b1   :  { %12878 = vmatprep.subr.bf16.mxu0 %v17040_v4  ;;  %v799_v4 = vld [vmem:[#allocation6 + $0x1518] sm:$0xff] }
 0x1b2   :  { %12918 = vmatpush1.bf16.msra.mxu1 %v17519_v3  ;;  %v303_v3 = vld [vmem:[#allocation6 + $0x598] sm:$0xff] }
 0x1b3   :  { %12919 = vmatprep.subr.bf16.mxu1 %v17552_v6  ;;  %v815_v6 = vld [vmem:[#allocation6 + $0x1598] sm:$0xff]  ;;  %v15730_v10 = vcombine.high %v287_v2, %v303_v3  ;;  %v15729_v18 = vcombine.low %v287_v2, %v303_v3 }
 0x1b4   :  { %12879 = vmatpush1.bf16.msra.mxu0 %v17039_v12  ;;  %v16242_v11 = vcombine.high %v799_v4, %v815_v6  ;;  %v319_v12 = vld [vmem:[#allocation6 + $0x618] sm:$0xff]  ;;  %v16241_v21 = vcombine.low %v799_v4, %v815_v6 }
 0x1b5   :  { %12880 = vmatprep.subr.bf16.mxu0 %v17072_v14  ;;  %v831_v14 = vld [vmem:[#allocation6 + $0x1618] sm:$0xff] }
 0x1b6   :  { %12920 = vmatpush1.bf16.msra.mxu1 %v17551_v13  ;;  %v335_v13 = vld [vmem:[#allocation6 + $0x698] sm:$0xff] }
 0x1b7   :  { %12921 = vmatprep.subr.bf16.mxu1 %v17584_v17  ;;  %v847_v17 = vld [vmem:[#allocation6 + $0x1698] sm:$0xff]  ;;  %v15762_v23 = vcombine.high %v319_v12, %v335_v13 }
 0x1b8   :  { %12881 = vmatpush1.bf16.msra.mxu0 %v17071_v25  ;;  %v16274_v25 = vcombine.high %v831_v14, %v847_v17  ;;  %v863_v33 = vld [vmem:[#allocation6 + $0x1718] sm:$0xff]  ;;  %v16273_v44 = vcombine.low %v831_v14, %v847_v17 }
 0x1b9   :  { %12932 = vmatprep.subr.bf16.mxu0 %v15570_v26  ;;  %v367_v26 = vld [vmem:[#allocation6 + $0x798] sm:$0xff] }
 0x1ba   :  { %12922 = vmatpush1.bf16.msra.mxu1 %v17583_v53  ;;  %v351_v53 = vld [vmem:[#allocation6 + $0x718] sm:$0xff] }
 0x1bb   :  { %12973 = vmatprep.subr.bf16.mxu1 %v16082_v54  ;;  %12883 = vmatmul.mubr.bf16.vlgmr.msra.gmra.mrb[20].mxu0 %v17857_v36  ;;  %v879_v34 = vld [vmem:[#allocation6 + $0x1798] sm:$0xff]  ;;  %v15794_v45 = vcombine.high %v351_v53, %v367_v26  ;;  %v15793_v50 = vcombine.low %v351_v53, %v367_v26 }
 0x1bc   :  { %12933 = vmatpush1.bf16.msra.mxu0 %v15569_v37  ;;  %12964 = vmatprep.mubr.bf16.mxu0 %v17823_v58  ;;  %v895_v48 = vld [vmem:[#allocation6 + $0x1818] sm:$0xff]  ;;  %v16305_v51 = vcombine.low %v863_v33, %v879_v34 }
 0x1bd   :  { %12924 = vmatmul.mubr.bf16.vlgmr.msra.gmra.mrb[20].mxu1 %v17861_v39  ;;  %12934 = vmatprep.subr.bf16.mxu0 %v15602_v40  ;;  %v15761_v40 = vcombine.low %v319_v12, %v335_v13  ;;  %v911_v49 = vld [vmem:[#allocation6 + $0x1898] sm:$0xff] }
 0x1be   :  { %12974 = vmatpush1.bf16.msra.mxu1 %v16081_v38  ;;  %13005 = vmatprep.mubr.bf16.mxu1 %v17827_v59  ;;  %v927_v57 = vld [vmem:[#allocation6 + $0x1918] sm:$0xff]  ;;  %v16337_v62 = vcombine.low %v895_v48, %v911_v49 }
 0x1bf   :  { %12975 = vmatprep.subr.bf16.mxu1 %v16114_v41  ;;  %v943_v60 = vld [vmem:[#allocation6 + $0x1998] sm:$0xff] }
 0x1c0   :  { %12935 = vmatpush1.bf16.msra.mxu0 %v15601_v19  ;;  %v959_v2 = vld [vmem:[#allocation6 + $0x1a18] sm:$0xff]  ;;  %v16369_v6 = vcombine.low %v927_v57, %v943_v60 }
 0x1c1   :  { %12936 = vmatprep.subr.bf16.mxu0 %v15634_v47  ;;  %v383_v47 = vld [vmem:[#allocation6 + $0x818] sm:$0xff] }
 0x1c2   :  { %12976 = vmatpush1.bf16.msra.mxu1 %v16113_v46  ;;  %v16306_v46 = vcombine.high %v863_v33, %v879_v34  ;;  %v975_v3 = vld [vmem:[#allocation6 + $0x1a98] sm:$0xff] }
 0x1c3   :  { %12977 = vmatprep.subr.bf16.mxu1 %v16146_v22  ;;  %v399_v22 = vld [vmem:[#allocation6 + $0x898] sm:$0xff]  ;;  %v16401_v17 = vcombine.low %v959_v2, %v975_v3 }
 0x1c4   :  { %12937 = vmatpush1.bf16.msra.mxu0 %v15633_v52  ;;  %v15826_v52 = vcombine.high %v383_v47, %v399_v22  ;;  %v15825_v61 = vcombine.low %v383_v47, %v399_v22  ;;  %v991_v12 = vld [vmem:[#allocation6 + $0x1b18] sm:$0xff] }
 0x1c5   :  { %12938 = vmatprep.subr.bf16.mxu0 %v15666_v55  ;;  %v415_v55 = vld [vmem:[#allocation6 + $0x918] sm:$0xff] }
 0x1c6   :  { %12978 = vmatpush1.bf16.msra.mxu1 %v16145_v5  ;;  %v16338_v5 = vcombine.high %v895_v48, %v911_v49  ;;  %v1007_v13 = vld [vmem:[#allocation6 + $0x1b98] sm:$0xff] }
 0x1c7   :  { %12979 = vmatprep.subr.bf16.mxu1 %v16178_v56  ;;  %v431_v56 = vld [vmem:[#allocation6 + $0x998] sm:$0xff] }
 0x1c8   :  { %12939 = vmatpush1.bf16.msra.mxu0 %v15665_v9  ;;  %v15858_v9 = vcombine.high %v415_v55, %v431_v56  ;;  %v15857_v4 = vcombine.low %v415_v55, %v431_v56  ;;  %v1039_v53 = vld [vmem:[#allocation6 + $0x1c98] sm:$0xff] }
 0x1c9   :  { %12940 = vmatprep.subr.bf16.mxu0 %v15698_v0  ;;  %v447_v0 = vld [vmem:[#allocation6 + $0xa18] sm:$0xff] }
 0x1ca   :  { %12980 = vmatpush1.bf16.msra.mxu1 %v16177_v63  ;;  %v16370_v63 = vcombine.high %v927_v57, %v943_v60  ;;  %v543_v34 = vld [vmem:[#allocation6 + $0xd18] sm:$0xff] }
 0x1cb   :  { %12981 = vmatprep.subr.bf16.mxu1 %v16210_v1  ;;  %v463_v1 = vld [vmem:[#allocation6 + $0xa98] sm:$0xff] }
 0x1cc   :  { %12941 = vmatpush1.bf16.msra.mxu0 %v15697_v7  ;;  %v15890_v7 = vcombine.high %v447_v0, %v463_v1  ;;  %v15889_v14 = vcombine.low %v447_v0, %v463_v1  ;;  %v1087_v47 = vld [vmem:[#allocation6 + $0x1e18] sm:$0xff] }
 0x1cd   :  { %12942 = vmatprep.subr.bf16.mxu0 %v15730_v10  ;;  %v479_v10 = vld [vmem:[#allocation6 + $0xb18] sm:$0xff] }
 0x1ce   :  { %12982 = vmatpush1.bf16.msra.mxu1 %v16209_v8  ;;  %v12638_v24 = vpop.f32.mrb[8].mxu0  ;;  %v16402_v8 = vcombine.high %v959_v2, %v975_v3  ;;  %v1103_v22 = vld [vmem:[#allocation6 + $0x1e98] sm:$0xff] }
 0x1cf   :  { %12983 = vmatprep.subr.bf16.mxu1 %v16242_v11  ;;  %v12640_v30 = vpop.f32.mrb[9].mxu0  ;;  %v495_v11 = vld [vmem:[#allocation6 + $0xb98] sm:$0xff]  ;;  %v16529_v60 = vcombine.low %v1087_v47, %v1103_v22 }
 0x1d0   :  { %v12679_v54 = vpop.f32.mrb[8].mxu1  ;;  %v12642_v38 = vpop.f32.mrb[10].mxu0  ;;  %12943 = vmatpush1.bf16.msra.mxu0 %v15729_v18  ;;  %v15922_v18 = vcombine.high %v479_v10, %v495_v11  ;;  %v15921_v26 = vcombine.low %v479_v10, %v495_v11  ;;  %v1119_v55 = vld [vmem:[#allocation6 + $0x1f18] sm:$0xff] }
 0x1d1   :  { %v17903_v35 = vadd.f32 %v12679_v54, %v12638_v24  ;;  %v12681_v37 = vpop.f32.mrb[9].mxu1  ;;  %v12643_v43 = vpop.f32.mrb[11].mxu0  ;;  %12944 = vmatprep.subr.bf16.mxu0 %v15762_v23  ;;  %v511_v23 = vld [vmem:[#allocation6 + $0xc18] sm:$0xff]  ;;  %v16433_v54 = vcombine.low %v991_v12, %v1007_v13 }
 0x1d2   :  { %v17905_v41 = vadd.f32 %v12681_v37, %v12640_v30  ;;  %v12683_v42 = vpop.f32.mrb[10].mxu1  ;;  %12984 = vmatpush1.bf16.msra.mxu1 %v16241_v21  ;;  %v16434_v21 = vcombine.high %v991_v12, %v1007_v13  ;;  %v527_v24 = vld [vmem:[#allocation6 + $0xc98] sm:$0xff] }
 0x1d3   :  { %v12684_v19 = vpop.f32.mrb[11].mxu1  ;;  %12985 = vmatprep.subr.bf16.mxu1 %v16274_v25  ;;  %v1023_v25 = vld [vmem:[#allocation6 + $0x1c18] sm:$0xff]  ;;  %v15954_v30 = vcombine.high %v511_v23, %v527_v24  ;;  %v15953_v42 = vcombine.low %v511_v23, %v527_v24 }
 0x1d4   :  { %12945 = vmatpush1.bf16.msra.mxu0 %v15761_v40  ;;  %v16466_v33 = vcombine.high %v1023_v25, %v1039_v53  ;;  %v559_v37 = vld [vmem:[#allocation6 + $0xd98] sm:$0xff]  ;;  %v16465_v43 = vcombine.low %v1023_v25, %v1039_v53 }
 0x1d5   :  { %12946 = vmatprep.subr.bf16.mxu0 %v15794_v45  ;;  %v1055_v38 = vld [vmem:[#allocation6 + $0x1d18] sm:$0xff]  ;;  %v15985_v48 = vcombine.low %v543_v34, %v559_v37 }
 0x1d6   :  { %12986 = vmatpush1.bf16.msra.mxu1 %v16273_v44  ;;  %v1071_v40 = vld [vmem:[#allocation6 + $0x1d98] sm:$0xff]  ;;  %v15986_v44 = vcombine.high %v543_v34, %v559_v37 }
 0x1d7   :  { %12987 = vmatprep.subr.bf16.mxu1 %v16306_v46  ;;  %v16498_v45 = vcombine.high %v1055_v38, %v1071_v40  ;;  %v575_v19 = vld [vmem:[#allocation6 + $0xe18] sm:$0xff]  ;;  %v16497_v49 = vcombine.low %v1055_v38, %v1071_v40 }
 0x1d8   :  { %12947 = vmatpush1.bf16.msra.mxu0 %v15793_v50  ;;  %v591_v46 = vld [vmem:[#allocation6 + $0xe98] sm:$0xff] }
 0x1d9   :  { %12948 = vmatprep.subr.bf16.mxu0 %v15826_v52  ;;  %v16018_v50 = vcombine.high %v575_v19, %v591_v46  ;;  %v607_v52 = vld [vmem:[#allocation6 + $0xf18] sm:$0xff]  ;;  %v16017_v57 = vcombine.low %v575_v19, %v591_v46 }
 0x1da   :  { %12988 = vmatpush1.bf16.msra.mxu1 %v16305_v51  ;;  %v16530_v51 = vcombine.high %v1087_v47, %v1103_v22  ;;  %v1135_v56 = vld [vmem:[#allocation6 + $0x1f98] sm:$0xff] }
 0x1db   :  { %12989 = vmatprep.subr.bf16.mxu1 %v16338_v5  ;;  %v623_v5 = vld [vmem:[#allocation6 + $0xf98] sm:$0xff]  ;;  %v16561_v3 = vcombine.low %v1119_v55, %v1135_v56 }
 0x1dc   :  { %12949 = vmatpush1.bf16.msra.mxu0 %v15825_v61  ;;  %v16050_v61 = vcombine.high %v607_v52, %v623_v5  ;;  %v1663_v0 = vld [vmem:[#allocation6 + $0x3018] sm:$0xff]  ;;  %v16049_v2 = vcombine.low %v607_v52, %v623_v5 }
 0x1dd   :  { %12950 = vmatprep.subr.bf16.mxu0 %v15858_v9  ;;  %v1151_v9 = vld [vmem:[#allocation6 + $0x2018] sm:$0xff] }
 0x1de   :  { %12990 = vmatpush1.bf16.msra.mxu1 %v16337_v62  ;;  %v16562_v62 = vcombine.high %v1119_v55, %v1135_v56  ;;  %v1679_v1 = vld [vmem:[#allocation6 + $0x3098] sm:$0xff] }
 0x1df   :  { %12991 = vmatprep.subr.bf16.mxu1 %v16370_v63  ;;  %v1167_v63 = vld [vmem:[#allocation6 + $0x2098] sm:$0xff]  ;;  %v17105_v13 = vcombine.low %v1663_v0, %v1679_v1 }
 0x1e0   :  { %12951 = vmatpush1.bf16.msra.mxu0 %v15857_v4  ;;  %v16594_v4 = vcombine.high %v1151_v9, %v1167_v63  ;;  %v1695_v10 = vld [vmem:[#allocation6 + $0x3118] sm:$0xff]  ;;  %v16593_v12 = vcombine.low %v1151_v9, %v1167_v63  ;;  %v17912_v9 = vsub.s32 2, %v17883_v15 }
 0x1e1   :  { %12952 = vmatprep.subr.bf16.mxu0 %v15890_v7  ;;  %v1183_v7 = vld [vmem:[#allocation6 + $0x2118] sm:$0xff] }
 0x1e2   :  { %12992 = vmatpush1.bf16.msra.mxu1 %v16369_v6  ;;  %v17106_v6 = vcombine.high %v1663_v0, %v1679_v1  ;;  %v1711_v11 = vld [vmem:[#allocation6 + $0x3198] sm:$0xff]  ;;  %v17915_v1 = vsub.s32 3, %v17883_v15 }
 0x1e3   :  { %12993 = vmatprep.subr.bf16.mxu1 %v16402_v8  ;;  %v1199_v8 = vld [vmem:[#allocation6 + $0x2198] sm:$0xff]  ;;  %v17137_v53 = vcombine.low %v1695_v10, %v1711_v11 }
 0x1e4   :  { %12953 = vmatpush1.bf16.msra.mxu0 %v15889_v14  ;;  %v16626_v14 = vcombine.high %v1183_v7, %v1199_v8  ;;  %v1727_v23 = vld [vmem:[#allocation6 + $0x3218] sm:$0xff]  ;;  %v16625_v25 = vcombine.low %v1183_v7, %v1199_v8 }
 0x1e5   :  { %12954 = vmatprep.subr.bf16.mxu0 %v15922_v18  ;;  %v1215_v18 = vld [vmem:[#allocation6 + $0x2218] sm:$0xff] }
 0x1e6   :  { %12994 = vmatpush1.bf16.msra.mxu1 %v16401_v17  ;;  %v17138_v17 = vcombine.high %v1695_v10, %v1711_v11  ;;  %v1743_v24 = vld [vmem:[#allocation6 + $0x3298] sm:$0xff] }
 0x1e7   :  { %12995 = vmatprep.subr.bf16.mxu1 %v16434_v21  ;;  %v1231_v21 = vld [vmem:[#allocation6 + $0x2298] sm:$0xff]  ;;  %v17169_v40 = vcombine.low %v1727_v23, %v1743_v24 }
 0x1e8   :  { %12955 = vmatpush1.bf16.msra.mxu0 %v15921_v26  ;;  %v16658_v26 = vcombine.high %v1215_v18, %v1231_v21  ;;  %v1759_v34 = vld [vmem:[#allocation6 + $0x3318] sm:$0xff]  ;;  %v16657_v38 = vcombine.low %v1215_v18, %v1231_v21 }
 0x1e9   :  { %12956 = vmatprep.subr.bf16.mxu0 %v15954_v30  ;;  %v1247_v30 = vld [vmem:[#allocation6 + $0x2318] sm:$0xff] }
 0x1ea   :  { %12996 = vmatpush1.bf16.msra.mxu1 %v16433_v54  ;;  %v17170_v54 = vcombine.high %v1727_v23, %v1743_v24  ;;  %v1775_v37 = vld [vmem:[#allocation6 + $0x3398] sm:$0xff]  ;;  %v15186_v24 = vrot.slane %v17888_v31, %v17915_v1 }
 0x1eb   :  { %12997 = vmatprep.subr.bf16.mxu1 %v16466_v33  ;;  %v1263_v33 = vld [vmem:[#allocation6 + $0x2398] sm:$0xff]  ;;  %v17201_v22 = vcombine.low %v1759_v34, %v1775_v37 }
 0x1ec   :  { %12957 = vmatpush1.bf16.msra.mxu0 %v15953_v42  ;;  %v16690_v42 = vcombine.high %v1247_v30, %v1263_v33  ;;  %v1791_v19 = vld [vmem:[#allocation6 + $0x3418] sm:$0xff]  ;;  %v16689_v47 = vcombine.low %v1247_v30, %v1263_v33 }
 0x1ed   :  { %12958 = vmatprep.subr.bf16.mxu0 %v15986_v44  ;;  %v1279_v44 = vld [vmem:[#allocation6 + $0x2418] sm:$0xff] }
 0x1ee   :  { %12998 = vmatpush1.bf16.msra.mxu1 %v16465_v43  ;;  %v17202_v43 = vcombine.high %v1759_v34, %v1775_v37  ;;  %v1807_v46 = vld [vmem:[#allocation6 + $0x3498] sm:$0xff] }
 0x1ef   :  { %12999 = vmatprep.subr.bf16.mxu1 %v16498_v45  ;;  %v1295_v45 = vld [vmem:[#allocation6 + $0x2498] sm:$0xff]  ;;  %v17233_v56 = vcombine.low %v1791_v19, %v1807_v46 }
 0x1f0   :  { %12959 = vmatpush1.bf16.msra.mxu0 %v15985_v48  ;;  %v16722_v48 = vcombine.high %v1279_v44, %v1295_v45  ;;  %v1823_v52 = vld [vmem:[#allocation6 + $0x3518] sm:$0xff]  ;;  %v16721_v55 = vcombine.low %v1279_v44, %v1295_v45 }
 0x1f1   :  { %12960 = vmatprep.subr.bf16.mxu0 %v16018_v50  ;;  %v1311_v50 = vld [vmem:[#allocation6 + $0x2518] sm:$0xff] }
 0x1f2   :  { %13000 = vmatpush1.bf16.msra.mxu1 %v16497_v49  ;;  %v17234_v49 = vcombine.high %v1791_v19, %v1807_v46  ;;  %v1839_v5 = vld [vmem:[#allocation6 + $0x3598] sm:$0xff] }
 0x1f3   :  { %13001 = vmatprep.subr.bf16.mxu1 %v16530_v51  ;;  %v1327_v51 = vld [vmem:[#allocation6 + $0x2598] sm:$0xff] }
 0x1f4   :  { %12961 = vmatpush1.bf16.msra.mxu0 %v16017_v57  ;;  %v16754_v57 = vcombine.high %v1311_v50, %v1327_v51  ;;  %v1855_v63 = vld [vmem:[#allocation6 + $0x3618] sm:$0xff] }
 0x1f5   :  { %12962 = vmatprep.subr.bf16.mxu0 %v16050_v61  ;;  %v1343_v61 = vld [vmem:[#allocation6 + $0x2618] sm:$0xff] }
 0x1f6   :  { %13002 = vmatpush1.bf16.msra.mxu1 %v16529_v60  ;;  %v17266_v60 = vcombine.high %v1823_v52, %v1839_v5  ;;  %v1871_v0 = vld [vmem:[#allocation6 + $0x3698] sm:$0xff] }
 0x1f7   :  { %13003 = vmatprep.subr.bf16.mxu1 %v16562_v62  ;;  %v1359_v62 = vld [vmem:[#allocation6 + $0x2698] sm:$0xff]  ;;  %v17298_v7 = vcombine.high %v1855_v63, %v1871_v0  ;;  %v17297_v30 = vcombine.low %v1855_v63, %v1871_v0 }
 0x1f8   :  { %12963 = vmatpush1.bf16.msra.mxu0 %v16049_v2  ;;  %v16753_v2 = vcombine.low %v1311_v50, %v1327_v51  ;;  %v1375_v8 = vld [vmem:[#allocation6 + $0x2718] sm:$0xff] }
 0x1f9   :  { %13014 = vmatprep.subr.bf16.mxu0 %v16594_v4  ;;  %v16786_v4 = vcombine.high %v1343_v61, %v1359_v62  ;;  %v1391_v10 = vld [vmem:[#allocation6 + $0x2798] sm:$0xff] }
 0x1fa   :  { %13004 = vmatpush1.bf16.msra.mxu1 %v16561_v3  ;;  %v17265_v3 = vcombine.low %v1823_v52, %v1839_v5  ;;  %v1903_v18 = vld [vmem:[#allocation6 + $0x3798] sm:$0xff]  ;;  %v16818_v33 = vcombine.high %v1375_v8, %v1391_v10  ;;  %v16817_v45 = vcombine.low %v1375_v8, %v1391_v10 }
 0x1fb   :  { %13055 = vmatprep.subr.bf16.mxu1 %v17106_v6  ;;  %12965 = vmatmul.mubr.bf16.vlgmr.msra.gmra.mrb[24].mxu0 %v17833_v16  ;;  %v1935_v44 = vld [vmem:[#allocation6 + $0x3898] sm:$0xff] }
 0x1fc   :  { %13015 = vmatpush1.bf16.msra.mxu0 %v16593_v12  ;;  %13046 = vmatprep.mubr.bf16.mxu0 %v17845_v27  ;;  %v1455_v50 = vld [vmem:[#allocation6 + $0x2998] sm:$0xff] }
 0x1fd   :  { %13006 = vmatmul.mubr.bf16.vlgmr.msra.gmra.mrb[24].mxu1 %v17839_v20  ;;  %13016 = vmatprep.subr.bf16.mxu0 %v16626_v14  ;;  %v1951_v51 = vld [vmem:[#allocation6 + $0x3918] sm:$0xff] }
 0x1fe   :  { %13056 = vmatpush1.bf16.msra.mxu1 %v17105_v13  ;;  %13087 = vmatprep.mubr.bf16.mxu1 %v17850_v29  ;;  %v15182_v13 = vrot.slane %v17888_v31, %v17912_v9  ;;  %v1967_v52 = vld [vmem:[#allocation6 + $0x3998] sm:$0xff] }
 0x1ff   :  { %13057 = vmatprep.subr.bf16.mxu1 %v17138_v17  ;;  %v1887_v17 = vld [vmem:[#allocation6 + $0x3718] sm:$0xff] }
 0x200   :  { %13017 = vmatpush1.bf16.msra.mxu0 %v16625_v25  ;;  %v17329_v46 = vcombine.low %v1887_v17, %v1903_v18  ;;  %v1983_v63 = vld [vmem:[#allocation6 + $0x3a18] sm:$0xff] }
 0x201   :  { %13018 = vmatprep.subr.bf16.mxu0 %v16658_v26  ;;  %v1999_v0 = vld [vmem:[#allocation6 + $0x3a98] sm:$0xff] }
 0x202   :  { %13058 = vmatpush1.bf16.msra.mxu1 %v17137_v53  ;;  %v16785_v53 = vcombine.low %v1343_v61, %v1359_v62  ;;  %v1471_v61 = vld [vmem:[#allocation6 + $0x2a18] sm:$0xff] }
 0x203   :  { %13059 = vmatprep.subr.bf16.mxu1 %v17170_v54  ;;  %v1487_v62 = vld [vmem:[#allocation6 + $0x2a98] sm:$0xff] }
 0x204   :  { %13019 = vmatpush1.bf16.msra.mxu0 %v16657_v38  ;;  %v17330_v38 = vcombine.high %v1887_v17, %v1903_v18  ;;  %v1519_v8 = vld [vmem:[#allocation6 + $0x2b98] sm:$0xff] }
 0x205   :  { %13020 = vmatprep.subr.bf16.mxu0 %v16690_v42  ;;  %v2015_v10 = vld [vmem:[#allocation6 + $0x3b18] sm:$0xff] }
 0x206   :  { %13060 = vmatpush1.bf16.msra.mxu1 %v17169_v40  ;;  %v1407_v40 = vld [vmem:[#allocation6 + $0x2818] sm:$0xff] }
 0x207   :  { %13061 = vmatprep.subr.bf16.mxu1 %v17202_v43  ;;  %v1919_v43 = vld [vmem:[#allocation6 + $0x3818] sm:$0xff] }
 0x208   :  { %13021 = vmatpush1.bf16.msra.mxu0 %v16689_v47  ;;  %v1535_v18 = vld [vmem:[#allocation6 + $0x2c18] sm:$0xff] }
 0x209   :  { %13022 = vmatprep.subr.bf16.mxu0 %v16722_v48  ;;  %v17362_v48 = vcombine.high %v1919_v43, %v1935_v44 }
 0x20a   :  { %13062 = vmatpush1.bf16.msra.mxu1 %v17201_v22 }
 0x20b   :  { %13063 = vmatprep.subr.bf16.mxu1 %v17234_v49  ;;  %v1439_v49 = vld [vmem:[#allocation6 + $0x2918] sm:$0xff] }
 0x20c   :  { %13023 = vmatpush1.bf16.msra.mxu0 %v16721_v55 }
 0x20d   :  { %13024 = vmatprep.subr.bf16.mxu0 %v16754_v57  ;;  %v16882_v57 = vcombine.high %v1439_v49, %v1455_v50 }
 0x20e   :  { %13064 = vmatpush1.bf16.msra.mxu1 %v17233_v56  ;;  %v12720_v6 = vpop.f32.mrb[12].mxu0  ;;  %v17361_v56 = vcombine.low %v1919_v43, %v1935_v44  ;;  %v1615_v43 = vld [vmem:[#allocation6 + $0x2e98] sm:$0xff] }
 0x20f   :  { %13065 = vmatprep.subr.bf16.mxu1 %v17266_v60  ;;  %v12721_v11 = vadd.f32 %v12720_v6, %v17903_v35  ;;  %v12722_v14 = vpop.f32.mrb[13].mxu0  ;;  %v17394_v60 = vcombine.high %v1951_v51, %v1967_v52  ;;  %v17426_v6 = vcombine.high %v1983_v63, %v1999_v0  ;;  %v2111_v44 = vld [vmem:[#allocation6 + $0x3e18] sm:$0xff] }
 0x210   :  { %v12761_v12 = vpop.f32.mrb[12].mxu1  ;;  %v12723_v21 = vadd.f32 %v12722_v14, %v17905_v41  ;;  %v12724_v25 = vpop.f32.mrb[14].mxu0  ;;  %13025 = vmatpush1.bf16.msra.mxu0 %v16753_v2  ;;  %v1423_v41 = vld [vmem:[#allocation6 + $0x2898] sm:$0xff]  ;;  %v16881_v2 = vcombine.low %v1439_v49, %v1455_v50 }
 0x211   :  { %v12763_v23 = vpop.f32.mrb[13].mxu1  ;;  %v12762_v26 = vadd.f32 %v12761_v12, %v12721_v11  ;;  %v12725_v35 = vpop.f32.mrb[15].mxu0  ;;  %13026 = vmatprep.subr.bf16.mxu0 %v16786_v4  ;;  %v16850_v47 = vcombine.high %v1407_v40, %v1423_v41  ;;  %v16849_v55 = vcombine.low %v1407_v40, %v1423_v41  ;;  %v16914_v4 = vcombine.high %v1471_v61, %v1487_v62  ;;  %v2031_v11 = vld [vmem:[#allocation6 + $0x3b98] sm:$0xff] }
 0x212   :  { %v12765_v54 = vpop.f32.mrb[14].mxu1  ;;  %13066 = vmatpush1.bf16.msra.mxu1 %v17265_v3  ;;  %v12764_v34 = vadd.f32 %v12763_v23, %v12723_v21  ;;  %v17393_v3 = vcombine.low %v1951_v51, %v1967_v52  ;;  %v16913_v12 = vcombine.low %v1471_v61, %v1487_v62  ;;  %v17458_v17 = vcombine.high %v2015_v10, %v2031_v11  ;;  %v1551_v21 = vld [vmem:[#allocation6 + $0x2c98] sm:$0xff]  ;;  %v656_v61 = vld [vmem:[#allocation6 + $0x10a0] sm:$0xff] }
 0x213   :  { %v12766_v37 = vpop.f32.mrb[15].mxu1  ;;  %13067 = vmatprep.subr.bf16.mxu1 %v17298_v7  ;;  %v15333_v42 = vadd.f32 %v15182_v13, %v12762_v26  ;;  %v1503_v7 = vld [vmem:[#allocation6 + $0x2b18] sm:$0xff]  ;;  %v17425_v13 = vcombine.low %v1983_v63, %v1999_v0  ;;  %v16978_v26 = vcombine.high %v1535_v18, %v1551_v21 }
 0x214   :  { %v15334_v31 = vadd.f32 %v15186_v24, %v12764_v34  ;;  %13027 = vmatpush1.bf16.msra.mxu0 %v16785_v53  ;;  %v16946_v14 = vcombine.high %v1503_v7, %v1519_v8  ;;  %v2047_v23 = vld [vmem:[#allocation6 + $0x3c18] sm:$0xff]  ;;  %v16945_v25 = vcombine.low %v1503_v7, %v1519_v8  ;;  %v17457_v53 = vcombine.low %v2015_v10, %v2031_v11  ;;  %v688_v7 = vld [vmem:[#allocation6 + $0x11a0] sm:$0xff] }
 0x215   :  { %v15365_v19 = vmax.f32 %v15333_v42, 0.0  ;;  %13028 = vmatprep.subr.bf16.mxu0 %v16818_v33  ;;  %v2063_v24 = vld [vmem:[#allocation6 + $0x3c98] sm:$0xff]  ;;  %v16977_v37 = vcombine.low %v1535_v18, %v1551_v21  ;;  %v720_v18 = vld [vmem:[#allocation6 + $0x12a0] sm:$0xff] }
 0x216   :  { %13068 = vmatpush1.bf16.msra.mxu1 %v17297_v30  ;;  %v15366_v22 = vmax.f32 %v15334_v31, 0.0  ;;  %v17490_v54 = vcombine.high %v2047_v23, %v2063_v24  ;;  %v1567_v35 = vld [vmem:[#allocation6 + $0x2d18] sm:$0xff] }
 0x217   :  { %13069 = vmatprep.subr.bf16.mxu1 %v17330_v38  ;;  %v1583_v30 = vld [vmem:[#allocation6 + $0x2d98] sm:$0xff]  ;;  %v17489_v38 = vcombine.low %v2047_v23, %v2063_v24 }
 0x218   :  { %v17628_v5 = vpack.c.bf16 %v15366_v22, %v15365_v19  ;;  %13029 = vmatpush1.bf16.msra.mxu0 %v16817_v45  ;;  %v2079_v33 = vld [vmem:[#allocation6 + $0x3d18] sm:$0xff]  ;;  %v17010_v40 = vcombine.high %v1567_v35, %v1583_v30  ;;  %v17009_v45 = vcombine.low %v1567_v35, %v1583_v30  ;;  %v752_v35 = vld [vmem:[#allocation6 + $0x13a0] sm:$0xff] }
 0x219   :  { %13030 = vmatprep.subr.bf16.mxu0 %v16850_v47  ;;  %v2095_v34 = vld [vmem:[#allocation6 + $0x3d98] sm:$0xff] }
 0x21a   :  { %13070 = vmatpush1.bf16.msra.mxu1 %v17329_v46  ;;  %15524 = vst [vmem:[#allocation9 + $0x8] sm:$0xff] %v17628_v5  ;;  %v17522_v41 = vcombine.high %v2079_v33, %v2095_v34  ;;  %v1599_v42 = vld [vmem:[#allocation6 + $0x2e18] sm:$0xff]  ;;  %v17521_v19 = vcombine.low %v2079_v33, %v2095_v34 }
 0x21b   :  { %13071 = vmatprep.subr.bf16.mxu1 %v17362_v48  ;;  %v2127_v31 = vld [vmem:[#allocation6 + $0x3e98] sm:$0xff]  ;;  %v17042_v46 = vcombine.high %v1599_v42, %v1615_v43  ;;  %v17041_v51 = vcombine.low %v1599_v42, %v1615_v43  ;;  %v784_v42 = vld [vmem:[#allocation6 + $0x14a0] sm:$0xff] }
 0x21c   :  { %13031 = vmatpush1.bf16.msra.mxu0 %v16849_v55  ;;  %v17554_v47 = vcombine.high %v2111_v44, %v2127_v31  ;;  %v1631_v22 = vld [vmem:[#allocation6 + $0x2f18] sm:$0xff]  ;;  %v17553_v52 = vcombine.low %v2111_v44, %v2127_v31 }
 0x21d   :  { %13032 = vmatprep.subr.bf16.mxu0 %v16882_v57  ;;  %v1647_v48 = vld [vmem:[#allocation6 + $0x2f98] sm:$0xff]  ;;  %v144_v57 = vld [vmem:[#allocation6 + $0xa0] sm:$0xff] }
 0x21e   :  { %13072 = vmatpush1.bf16.msra.mxu1 %v17361_v56  ;;  %v2143_v49 = vld [vmem:[#allocation6 + $0x3f18] sm:$0xff]  ;;  %v17074_v5 = vcombine.high %v1631_v22, %v1647_v48  ;;  %v128_v56 = vld [vmem:[#allocation6 + $0x20] sm:$0xff]  ;;  %v17073_v62 = vcombine.low %v1631_v22, %v1647_v48 }
 0x21f   :  { %13073 = vmatprep.subr.bf16.mxu1 %v17394_v60  ;;  %v2159_v50 = vld [vmem:[#allocation6 + $0x3f98] sm:$0xff]  ;;  %v640_v60 = vld [vmem:[#allocation6 + $0x1020] sm:$0xff]  ;;  %v15572_v0 = vcombine.high %v128_v56, %v144_v57  ;;  %v15571_v8 = vcombine.low %v128_v56, %v144_v57 }
 0x220   :  { %13033 = vmatpush1.bf16.msra.mxu0 %v16881_v2  ;;  %v17586_v55 = vcombine.high %v2143_v49, %v2159_v50  ;;  %v17585_v63 = vcombine.low %v2143_v49, %v2159_v50  ;;  %v16084_v2 = vcombine.high %v640_v60, %v656_v61  ;;  %v16083_v10 = vcombine.low %v640_v60, %v656_v61  ;;  %v816_v22 = vld [vmem:[#allocation6 + $0x15a0] sm:$0xff] }
 0x221   :  { %13034 = vmatprep.subr.bf16.mxu0 %v16914_v4  ;;  %v176_v4 = vld [vmem:[#allocation6 + $0x1a0] sm:$0xff] }
 0x222   :  { %13074 = vmatpush1.bf16.msra.mxu1 %v17393_v3  ;;  %v160_v3 = vld [vmem:[#allocation6 + $0x120] sm:$0xff] }
 0x223   :  { %13075 = vmatprep.subr.bf16.mxu1 %v17426_v6  ;;  %v672_v6 = vld [vmem:[#allocation6 + $0x1120] sm:$0xff]  ;;  %v15604_v11 = vcombine.high %v160_v3, %v176_v4  ;;  %v15603_v21 = vcombine.low %v160_v3, %v176_v4 }
 0x224   :  { %13035 = vmatpush1.bf16.msra.mxu0 %v16913_v12  ;;  %v16116_v12 = vcombine.high %v672_v6, %v688_v7  ;;  %v16115_v23 = vcombine.low %v672_v6, %v688_v7  ;;  %v848_v56 = vld [vmem:[#allocation6 + $0x16a0] sm:$0xff] }
 0x225   :  { %13036 = vmatprep.subr.bf16.mxu0 %v16946_v14  ;;  %v208_v14 = vld [vmem:[#allocation6 + $0x2a0] sm:$0xff] }
 0x226   :  { %13076 = vmatpush1.bf16.msra.mxu1 %v17425_v13  ;;  %v192_v13 = vld [vmem:[#allocation6 + $0x220] sm:$0xff] }
 0x227   :  { %13077 = vmatprep.subr.bf16.mxu1 %v17458_v17  ;;  %v704_v17 = vld [vmem:[#allocation6 + $0x1220] sm:$0xff]  ;;  %v15636_v24 = vcombine.high %v192_v13, %v208_v14  ;;  %v15635_v30 = vcombine.low %v192_v13, %v208_v14 }
 0x228   :  { %13037 = vmatpush1.bf16.msra.mxu0 %v16945_v25  ;;  %v16148_v25 = vcombine.high %v704_v17, %v720_v18  ;;  %v16147_v33 = vcombine.low %v704_v17, %v720_v18  ;;  %v864_v6 = vld [vmem:[#allocation6 + $0x1720] sm:$0xff] }
 0x229   :  { %13038 = vmatprep.subr.bf16.mxu0 %v16978_v26  ;;  %v240_v26 = vld [vmem:[#allocation6 + $0x3a0] sm:$0xff] }
 0x22a   :  { %13078 = vmatpush1.bf16.msra.mxu1 %v17457_v53  ;;  %v224_v53 = vld [vmem:[#allocation6 + $0x320] sm:$0xff] }
 0x22b   :  { %13079 = vmatprep.subr.bf16.mxu1 %v17490_v54  ;;  %v736_v54 = vld [vmem:[#allocation6 + $0x1320] sm:$0xff]  ;;  %v15668_v34 = vcombine.high %v224_v53, %v240_v26  ;;  %v15667_v43 = vcombine.low %v224_v53, %v240_v26 }
 0x22c   :  { %13039 = vmatpush1.bf16.msra.mxu0 %v16977_v37  ;;  %v16180_v37 = vcombine.high %v736_v54, %v752_v35  ;;  %v16179_v44 = vcombine.low %v736_v54, %v752_v35  ;;  %v880_v7 = vld [vmem:[#allocation6 + $0x17a0] sm:$0xff] }
 0x22d   :  { %13040 = vmatprep.subr.bf16.mxu0 %v17010_v40  ;;  %v272_v40 = vld [vmem:[#allocation6 + $0x4a0] sm:$0xff] }
 0x22e   :  { %13080 = vmatpush1.bf16.msra.mxu1 %v17489_v38  ;;  %v256_v38 = vld [vmem:[#allocation6 + $0x420] sm:$0xff] }
 0x22f   :  { %13081 = vmatprep.subr.bf16.mxu1 %v17522_v41  ;;  %v768_v41 = vld [vmem:[#allocation6 + $0x1420] sm:$0xff]  ;;  %v15700_v31 = vcombine.high %v256_v38, %v272_v40  ;;  %v15699_v48 = vcombine.low %v256_v38, %v272_v40 }
 0x230   :  { %13041 = vmatpush1.bf16.msra.mxu0 %v17009_v45  ;;  %v16212_v45 = vcombine.high %v768_v41, %v784_v42  ;;  %v16211_v49 = vcombine.low %v768_v41, %v784_v42  ;;  %v400_v53 = vld [vmem:[#allocation6 + $0x8a0] sm:$0xff] }
 0x231   :  { %13042 = vmatprep.subr.bf16.mxu0 %v17042_v46  ;;  %v304_v46 = vld [vmem:[#allocation6 + $0x5a0] sm:$0xff] }
 0x232   :  { %13082 = vmatpush1.bf16.msra.mxu1 %v17521_v19  ;;  %v288_v19 = vld [vmem:[#allocation6 + $0x520] sm:$0xff] }
 0x233   :  { %13083 = vmatprep.subr.bf16.mxu1 %v17554_v47  ;;  %v800_v47 = vld [vmem:[#allocation6 + $0x1520] sm:$0xff]  ;;  %v15732_v50 = vcombine.high %v288_v19, %v304_v46  ;;  %v15731_v57 = vcombine.low %v288_v19, %v304_v46 }
 0x234   :  { %13043 = vmatpush1.bf16.msra.mxu0 %v17041_v51  ;;  %v16244_v51 = vcombine.high %v800_v47, %v816_v22  ;;  %v16243_v60 = vcombine.low %v800_v47, %v816_v22  ;;  %v896_v26 = vld [vmem:[#allocation6 + $0x1820] sm:$0xff] }
 0x235   :  { %13044 = vmatprep.subr.bf16.mxu0 %v17074_v5  ;;  %v336_v5 = vld [vmem:[#allocation6 + $0x6a0] sm:$0xff] }
 0x236   :  { %13084 = vmatpush1.bf16.msra.mxu1 %v17553_v52  ;;  %v320_v52 = vld [vmem:[#allocation6 + $0x620] sm:$0xff] }
 0x237   :  { %13085 = vmatprep.subr.bf16.mxu1 %v17586_v55  ;;  %v832_v55 = vld [vmem:[#allocation6 + $0x1620] sm:$0xff]  ;;  %v15764_v61 = vcombine.high %v320_v52, %v336_v5 }
 0x238   :  { %13045 = vmatpush1.bf16.msra.mxu0 %v17073_v62  ;;  %v16275_v18 = vcombine.low %v832_v55, %v848_v56  ;;  %v912_v54 = vld [vmem:[#allocation6 + $0x18a0] sm:$0xff] }
 0x239   :  { %13096 = vmatprep.subr.bf16.mxu0 %v15572_v0  ;;  %v352_v0 = vld [vmem:[#allocation6 + $0x720] sm:$0xff] }
 0x23a   :  { %13086 = vmatpush1.bf16.msra.mxu1 %v17585_v63  ;;  %v16276_v63 = vcombine.high %v832_v55, %v848_v56  ;;  %v432_v38 = vld [vmem:[#allocation6 + $0x9a0] sm:$0xff] }
 0x23b   :  { %13137 = vmatprep.subr.bf16.mxu1 %v16084_v2  ;;  %13047 = vmatmul.mubr.bf16.vlgmr.msra.gmra.mrb[28].mxu0 %v17857_v36  ;;  %v368_v2 = vld [vmem:[#allocation6 + $0x7a0] sm:$0xff] }
 0x23c   :  { %13097 = vmatpush1.bf16.msra.mxu0 %v15571_v8  ;;  %13128 = vmatprep.mubr.bf16.mxu0 %v17823_v58  ;;  %v15795_v35 = vcombine.low %v352_v0, %v368_v2  ;;  %v928_v40 = vld [vmem:[#allocation6 + $0x1920] sm:$0xff] }
 0x23d   :  { %13088 = vmatmul.mubr.bf16.vlgmr.msra.gmra.mrb[28].mxu1 %v17861_v39  ;;  %13098 = vmatprep.subr.bf16.mxu0 %v15604_v11  ;;  %v944_v41 = vld [vmem:[#allocation6 + $0x19a0] sm:$0xff] }
 0x23e   :  { %13138 = vmatpush1.bf16.msra.mxu1 %v16083_v10  ;;  %13169 = vmatprep.mubr.bf16.mxu1 %v17827_v59  ;;  %v464_v19 = vld [vmem:[#allocation6 + $0xaa0] sm:$0xff] }
 0x23f   :  { %13139 = vmatprep.subr.bf16.mxu1 %v16116_v12  ;;  %v15763_v12 = vcombine.low %v320_v52, %v336_v5  ;;  %v960_v46 = vld [vmem:[#allocation6 + $0x1a20] sm:$0xff] }
 0x240   :  { %13099 = vmatpush1.bf16.msra.mxu0 %v15603_v21  ;;  %v15796_v21 = vcombine.high %v352_v0, %v368_v2  ;;  %v976_v47 = vld [vmem:[#allocation6 + $0x1aa0] sm:$0xff] }
 0x241   :  { %13100 = vmatprep.subr.bf16.mxu0 %v15636_v24  ;;  %v16308_v24 = vcombine.high %v864_v6, %v880_v7  ;;  %v496_v52 = vld [vmem:[#allocation6 + $0xba0] sm:$0xff] }
 0x242   :  { %13140 = vmatpush1.bf16.msra.mxu1 %v16115_v23  ;;  %v992_v5 = vld [vmem:[#allocation6 + $0x1b20] sm:$0xff] }
 0x243   :  { %13141 = vmatprep.subr.bf16.mxu1 %v16148_v25  ;;  %v384_v25 = vld [vmem:[#allocation6 + $0x820] sm:$0xff] }
 0x244   :  { %13101 = vmatpush1.bf16.msra.mxu0 %v15635_v30  ;;  %v16307_v30 = vcombine.low %v864_v6, %v880_v7  ;;  %v15827_v42 = vcombine.low %v384_v25, %v400_v53  ;;  %v1008_v55 = vld [vmem:[#allocation6 + $0x1ba0] sm:$0xff] }
 0x245   :  { %13102 = vmatprep.subr.bf16.mxu0 %v15668_v34  ;;  %v16340_v34 = vcombine.high %v896_v26, %v912_v54  ;;  %v1024_v0 = vld [vmem:[#allocation6 + $0x1c20] sm:$0xff] }
 0x246   :  { %13142 = vmatpush1.bf16.msra.mxu1 %v16147_v33  ;;  %v15828_v33 = vcombine.high %v384_v25, %v400_v53  ;;  %v1040_v2 = vld [vmem:[#allocation6 + $0x1ca0] sm:$0xff] }
 0x247   :  { %13143 = vmatprep.subr.bf16.mxu1 %v16180_v37  ;;  %v416_v37 = vld [vmem:[#allocation6 + $0x920] sm:$0xff]  ;;  %v16468_v7 = vcombine.high %v1024_v0, %v1040_v2 }
 0x248   :  { %13103 = vmatpush1.bf16.msra.mxu0 %v15667_v43  ;;  %v16339_v43 = vcombine.low %v896_v26, %v912_v54  ;;  %v15859_v22 = vcombine.low %v416_v37, %v432_v38  ;;  %v592_v25 = vld [vmem:[#allocation6 + $0xea0] sm:$0xff] }
 0x249   :  { %13104 = vmatprep.subr.bf16.mxu0 %v15700_v31  ;;  %v16372_v31 = vcombine.high %v928_v40, %v944_v41  ;;  %v1088_v53 = vld [vmem:[#allocation6 + $0x1e20] sm:$0xff] }
 0x24a   :  { %13144 = vmatpush1.bf16.msra.mxu1 %v16179_v44  ;;  %v15860_v44 = vcombine.high %v416_v37, %v432_v38  ;;  %v1104_v26 = vld [vmem:[#allocation6 + $0x1ea0] sm:$0xff] }
 0x24b   :  { %13145 = vmatprep.subr.bf16.mxu1 %v16212_v45  ;;  %v448_v45 = vld [vmem:[#allocation6 + $0xa20] sm:$0xff] }
 0x24c   :  { %13105 = vmatpush1.bf16.msra.mxu0 %v15699_v48  ;;  %v16371_v48 = vcombine.low %v928_v40, %v944_v41  ;;  %v15891_v56 = vcombine.low %v448_v45, %v464_v19  ;;  %v624_v37 = vld [vmem:[#allocation6 + $0xfa0] sm:$0xff] }
 0x24d   :  { %13106 = vmatprep.subr.bf16.mxu0 %v15732_v50  ;;  %v16404_v50 = vcombine.high %v960_v46, %v976_v47  ;;  %v1120_v38 = vld [vmem:[#allocation6 + $0x1f20] sm:$0xff] }
 0x24e   :  { %13146 = vmatpush1.bf16.msra.mxu1 %v16211_v49  ;;  %v12802_v62 = vpop.f32.mrb[16].mxu0  ;;  %v15892_v49 = vcombine.high %v448_v45, %v464_v19  ;;  %v1136_v40 = vld [vmem:[#allocation6 + $0x1fa0] sm:$0xff] }
 0x24f   :  { %13147 = vmatprep.subr.bf16.mxu1 %v16244_v51  ;;  %v12804_v4 = vpop.f32.mrb[17].mxu0  ;;  %v480_v51 = vld [vmem:[#allocation6 + $0xb20] sm:$0xff] }
 0x250   :  { %v12843_v3 = vpop.f32.mrb[16].mxu1  ;;  %v12806_v11 = vpop.f32.mrb[18].mxu0  ;;  %13107 = vmatpush1.bf16.msra.mxu0 %v15731_v57  ;;  %v16403_v57 = vcombine.low %v960_v46, %v976_v47  ;;  %v1168_v45 = vld [vmem:[#allocation6 + $0x20a0] sm:$0xff] }
 0x251   :  { %v17927_v8 = vadd.f32 %v12843_v3, %v12802_v62  ;;  %v12845_v10 = vpop.f32.mrb[17].mxu1  ;;  %v12807_v17 = vpop.f32.mrb[19].mxu0  ;;  %13108 = vmatprep.subr.bf16.mxu0 %v15764_v61  ;;  %v16436_v61 = vcombine.high %v992_v5, %v1008_v55  ;;  %v512_v62 = vld [vmem:[#allocation6 + $0xc20] sm:$0xff]  ;;  %v15923_v3 = vcombine.low %v480_v51, %v496_v52 }
 0x252   :  { %v17929_v13 = vadd.f32 %v12845_v10, %v12804_v4  ;;  %v12847_v14 = vpop.f32.mrb[18].mxu1  ;;  %13148 = vmatpush1.bf16.msra.mxu1 %v16243_v60  ;;  %v15924_v60 = vcombine.high %v480_v51, %v496_v52  ;;  %v16435_v4 = vcombine.low %v992_v5, %v1008_v55  ;;  %v544_v10 = vld [vmem:[#allocation6 + $0xd20] sm:$0xff] }
 0x253   :  { %v12848_v23 = vpop.f32.mrb[19].mxu1  ;;  %13149 = vmatprep.subr.bf16.mxu1 %v16276_v63  ;;  %v528_v63 = vld [vmem:[#allocation6 + $0xca0] sm:$0xff] }
 0x254   :  { %13109 = vmatpush1.bf16.msra.mxu0 %v15763_v12  ;;  %v15956_v6 = vcombine.high %v512_v62, %v528_v63  ;;  %v560_v11 = vld [vmem:[#allocation6 + $0xda0] sm:$0xff]  ;;  %v15955_v17 = vcombine.low %v512_v62, %v528_v63 }
 0x255   :  { %13110 = vmatprep.subr.bf16.mxu0 %v15796_v21  ;;  %v1056_v12 = vld [vmem:[#allocation6 + $0x1d20] sm:$0xff]  ;;  %v15988_v21 = vcombine.high %v544_v10, %v560_v11  ;;  %v15987_v54 = vcombine.low %v544_v10, %v560_v11 }
 0x256   :  { %13150 = vmatpush1.bf16.msra.mxu1 %v16275_v18  ;;  %v1072_v14 = vld [vmem:[#allocation6 + $0x1da0] sm:$0xff]  ;;  %v16467_v18 = vcombine.low %v1024_v0, %v1040_v2 }
 0x257   :  { %13151 = vmatprep.subr.bf16.mxu1 %v16308_v24  ;;  %v16500_v23 = vcombine.high %v1056_v12, %v1072_v14  ;;  %v576_v24 = vld [vmem:[#allocation6 + $0xe20] sm:$0xff] }
 0x258   :  { %13111 = vmatpush1.bf16.msra.mxu0 %v15795_v35  ;;  %v16499_v35 = vcombine.low %v1056_v12, %v1072_v14  ;;  %v16019_v41 = vcombine.low %v576_v24, %v592_v25  ;;  %v1664_v19 = vld [vmem:[#allocation6 + $0x3020] sm:$0xff] }
 0x259   :  { %13112 = vmatprep.subr.bf16.mxu0 %v15828_v33  ;;  %v16532_v33 = vcombine.high %v1088_v53, %v1104_v26  ;;  %v1680_v46 = vld [vmem:[#allocation6 + $0x30a0] sm:$0xff] }
 0x25a   :  { %13152 = vmatpush1.bf16.msra.mxu1 %v16307_v30  ;;  %v16020_v30 = vcombine.high %v576_v24, %v592_v25  ;;  %v1200_v51 = vld [vmem:[#allocation6 + $0x21a0] sm:$0xff] }
 0x25b   :  { %13153 = vmatprep.subr.bf16.mxu1 %v16340_v34  ;;  %v608_v34 = vld [vmem:[#allocation6 + $0xf20] sm:$0xff] }
 0x25c   :  { %13113 = vmatpush1.bf16.msra.mxu0 %v15827_v42  ;;  %v16531_v42 = vcombine.low %v1088_v53, %v1104_v26  ;;  %v16051_v47 = vcombine.low %v608_v34, %v624_v37  ;;  %v1696_v52 = vld [vmem:[#allocation6 + $0x3120] sm:$0xff] }
 0x25d   :  { %13114 = vmatprep.subr.bf16.mxu0 %v15860_v44  ;;  %v16564_v44 = vcombine.high %v1120_v38, %v1136_v40  ;;  %v1712_v5 = vld [vmem:[#allocation6 + $0x31a0] sm:$0xff] }
 0x25e   :  { %13154 = vmatpush1.bf16.msra.mxu1 %v16339_v43  ;;  %v16052_v43 = vcombine.high %v608_v34, %v624_v37  ;;  %v1232_v62 = vld [vmem:[#allocation6 + $0x22a0] sm:$0xff] }
 0x25f   :  { %13155 = vmatprep.subr.bf16.mxu1 %v16372_v31  ;;  %v1152_v31 = vld [vmem:[#allocation6 + $0x2020] sm:$0xff] }
 0x260   :  { %13115 = vmatpush1.bf16.msra.mxu0 %v15859_v22  ;;  %v16563_v22 = vcombine.low %v1120_v38, %v1136_v40  ;;  %v16595_v55 = vcombine.low %v1152_v31, %v1168_v45  ;;  %v1728_v63 = vld [vmem:[#allocation6 + $0x3220] sm:$0xff] }
 0x261   :  { %13116 = vmatprep.subr.bf16.mxu0 %v15892_v49  ;;  %v17108_v49 = vcombine.high %v1664_v19, %v1680_v46  ;;  %v1744_v0 = vld [vmem:[#allocation6 + $0x32a0] sm:$0xff] }
 0x262   :  { %13156 = vmatpush1.bf16.msra.mxu1 %v16371_v48  ;;  %v16596_v48 = vcombine.high %v1152_v31, %v1168_v45  ;;  %v1264_v10 = vld [vmem:[#allocation6 + $0x23a0] sm:$0xff]  ;;  %v17936_v45 = vsub.s32 4, %v17883_v15 }
 0x263   :  { %13157 = vmatprep.subr.bf16.mxu1 %v16404_v50  ;;  %v1184_v50 = vld [vmem:[#allocation6 + $0x2120] sm:$0xff] }
 0x264   :  { %13117 = vmatpush1.bf16.msra.mxu0 %v15891_v56  ;;  %v17107_v56 = vcombine.low %v1664_v19, %v1680_v46  ;;  %v16627_v2 = vcombine.low %v1184_v50, %v1200_v51  ;;  %v1760_v11 = vld [vmem:[#allocation6 + $0x3320] sm:$0xff] }
 0x265   :  { %13118 = vmatprep.subr.bf16.mxu0 %v15924_v60  ;;  %v17140_v60 = vcombine.high %v1696_v52, %v1712_v5  ;;  %v1776_v12 = vld [vmem:[#allocation6 + $0x33a0] sm:$0xff] }
 0x266   :  { %13158 = vmatpush1.bf16.msra.mxu1 %v16403_v57  ;;  %v16628_v57 = vcombine.high %v1184_v50, %v1200_v51  ;;  %v1296_v24 = vld [vmem:[#allocation6 + $0x24a0] sm:$0xff] }
 0x267   :  { %13159 = vmatprep.subr.bf16.mxu1 %v16436_v61  ;;  %v1216_v61 = vld [vmem:[#allocation6 + $0x2220] sm:$0xff] }
 0x268   :  { %13119 = vmatpush1.bf16.msra.mxu0 %v15923_v3  ;;  %v17139_v3 = vcombine.low %v1696_v52, %v1712_v5  ;;  %v16659_v14 = vcombine.low %v1216_v61, %v1232_v62  ;;  %v1792_v25 = vld [vmem:[#allocation6 + $0x3420] sm:$0xff] }
 0x269   :  { %13120 = vmatprep.subr.bf16.mxu0 %v15956_v6  ;;  %v17172_v6 = vcombine.high %v1728_v63, %v1744_v0  ;;  %v1808_v53 = vld [vmem:[#allocation6 + $0x34a0] sm:$0xff] }
 0x26a   :  { %13160 = vmatpush1.bf16.msra.mxu1 %v16435_v4  ;;  %v16660_v4 = vcombine.high %v1216_v61, %v1232_v62  ;;  %v1328_v34 = vld [vmem:[#allocation6 + $0x25a0] sm:$0xff] }
 0x26b   :  { %13161 = vmatprep.subr.bf16.mxu1 %v16468_v7  ;;  %v1248_v7 = vld [vmem:[#allocation6 + $0x2320] sm:$0xff] }
 0x26c   :  { %13121 = vmatpush1.bf16.msra.mxu0 %v15955_v17  ;;  %v17171_v17 = vcombine.low %v1728_v63, %v1744_v0  ;;  %v16691_v26 = vcombine.low %v1248_v7, %v1264_v10  ;;  %v1824_v37 = vld [vmem:[#allocation6 + $0x3520] sm:$0xff] }
 0x26d   :  { %13122 = vmatprep.subr.bf16.mxu0 %v15988_v21  ;;  %v17204_v21 = vcombine.high %v1760_v11, %v1776_v12  ;;  %v1840_v38 = vld [vmem:[#allocation6 + $0x35a0] sm:$0xff] }
 0x26e   :  { %13162 = vmatpush1.bf16.msra.mxu1 %v16467_v18  ;;  %v16692_v18 = vcombine.high %v1248_v7, %v1264_v10  ;;  %v1360_v31 = vld [vmem:[#allocation6 + $0x26a0] sm:$0xff] }
 0x26f   :  { %13163 = vmatprep.subr.bf16.mxu1 %v16500_v23  ;;  %v1280_v23 = vld [vmem:[#allocation6 + $0x2420] sm:$0xff] }
 0x270   :  { %13123 = vmatpush1.bf16.msra.mxu0 %v15987_v54  ;;  %v17203_v54 = vcombine.low %v1760_v11, %v1776_v12  ;;  %v16723_v40 = vcombine.low %v1280_v23, %v1296_v24  ;;  %v1856_v19 = vld [vmem:[#allocation6 + $0x3620] sm:$0xff] }
 0x271   :  { %13124 = vmatprep.subr.bf16.mxu0 %v16020_v30  ;;  %v17236_v30 = vcombine.high %v1792_v25, %v1808_v53  ;;  %v1872_v46 = vld [vmem:[#allocation6 + $0x36a0] sm:$0xff] }
 0x272   :  { %13164 = vmatpush1.bf16.msra.mxu1 %v16499_v35  ;;  %v16724_v35 = vcombine.high %v1280_v23, %v1296_v24  ;;  %v17300_v51 = vcombine.high %v1856_v19, %v1872_v46  ;;  %v1376_v52 = vld [vmem:[#allocation6 + $0x2720] sm:$0xff]  ;;  %v17299_v11 = vcombine.low %v1856_v19, %v1872_v46 }
 0x273   :  { %13165 = vmatprep.subr.bf16.mxu1 %v16532_v33  ;;  %v1312_v33 = vld [vmem:[#allocation6 + $0x2520] sm:$0xff] }
 0x274   :  { %13125 = vmatpush1.bf16.msra.mxu0 %v16019_v41  ;;  %v17235_v41 = vcombine.low %v1792_v25, %v1808_v53  ;;  %v1392_v5 = vld [vmem:[#allocation6 + $0x27a0] sm:$0xff] }
 0x275   :  { %13126 = vmatprep.subr.bf16.mxu0 %v16052_v43  ;;  %v17268_v43 = vcombine.high %v1824_v37, %v1840_v38  ;;  %v1888_v62 = vld [vmem:[#allocation6 + $0x3720] sm:$0xff]  ;;  %v16820_v12 = vcombine.high %v1376_v52, %v1392_v5 }
 0x276   :  { %13166 = vmatpush1.bf16.msra.mxu1 %v16531_v42  ;;  %v16756_v42 = vcombine.high %v1312_v33, %v1328_v34  ;;  %v1904_v63 = vld [vmem:[#allocation6 + $0x37a0] sm:$0xff] }
 0x277   :  { %13167 = vmatprep.subr.bf16.mxu1 %v16564_v44  ;;  %v1344_v44 = vld [vmem:[#allocation6 + $0x2620] sm:$0xff] }
 0x278   :  { %13127 = vmatpush1.bf16.msra.mxu0 %v16051_v47  ;;  %v17939_v47 = vsub.s32 5, %v17883_v15  ;;  %v1920_v24 = vld [vmem:[#allocation6 + $0x3820] sm:$0xff] }
 0x279   :  { %13178 = vmatprep.subr.bf16.mxu0 %v16596_v48  ;;  %v17267_v48 = vcombine.low %v1824_v37, %v1840_v38  ;;  %v1936_v25 = vld [vmem:[#allocation6 + $0x38a0] sm:$0xff] }
 0x27a   :  { %13168 = vmatpush1.bf16.msra.mxu1 %v16563_v22  ;;  %v16755_v22 = vcombine.low %v1312_v33, %v1328_v34  ;;  %v17364_v34 = vcombine.high %v1920_v24, %v1936_v25  ;;  %v1440_v37 = vld [vmem:[#allocation6 + $0x2920] sm:$0xff] }
 0x27b   :  { %13219 = vmatprep.subr.bf16.mxu1 %v17108_v49  ;;  %13129 = vmatmul.mubr.bf16.vlgmr.msra.gmra.mrb[32].mxu0 %v17833_v16  ;;  %v16788_v49 = vcombine.high %v1344_v44, %v1360_v31  ;;  %v1456_v38 = vld [vmem:[#allocation6 + $0x29a0] sm:$0xff] }
 0x27c   :  { %13179 = vmatpush1.bf16.msra.mxu0 %v16595_v55  ;;  %13210 = vmatprep.mubr.bf16.mxu0 %v17845_v27  ;;  %v1472_v46 = vld [vmem:[#allocation6 + $0x2a20] sm:$0xff] }
 0x27d   :  { %13170 = vmatmul.mubr.bf16.vlgmr.msra.gmra.mrb[32].mxu1 %v17839_v20  ;;  %13180 = vmatprep.subr.bf16.mxu0 %v16628_v57  ;;  %v17942_v57 = vld [vmem:[#allocation8] sm:$0xff] }
 0x27e   :  { %13220 = vmatpush1.bf16.msra.mxu1 %v17107_v56  ;;  %13251 = vmatprep.mubr.bf16.mxu1 %v17850_v29 }
 0x27f   :  { %13221 = vmatprep.subr.bf16.mxu1 %v17140_v60  ;;  %v15190_v60 = vrot.slane %v17942_v57, %v17936_v45 }
 0x280   :  { %13181 = vmatpush1.bf16.msra.mxu0 %v16627_v2 }
 0x281   :  { %13182 = vmatprep.subr.bf16.mxu0 %v16660_v4 }
 0x282   :  { %13222 = vmatpush1.bf16.msra.mxu1 %v17139_v3  ;;  %v15194_v3 = vrot.slane %v17942_v57, %v17939_v47 }
 0x283   :  { %13223 = vmatprep.subr.bf16.mxu1 %v17172_v6  ;;  %v16787_v6 = vcombine.low %v1344_v44, %v1360_v31  ;;  %v17363_v44 = vcombine.low %v1920_v24, %v1936_v25  ;;  %v16884_v31 = vcombine.high %v1440_v37, %v1456_v38 }
 0x284   :  { %13183 = vmatpush1.bf16.msra.mxu0 %v16659_v14 }
 0x285   :  { %13184 = vmatprep.subr.bf16.mxu0 %v16692_v18  ;;  %v17332_v18 = vcombine.high %v1888_v62, %v1904_v63 }
 0x286   :  { %13224 = vmatpush1.bf16.msra.mxu1 %v17171_v17 }
 0x287   :  { %13225 = vmatprep.subr.bf16.mxu1 %v17204_v21  ;;  %v1408_v21 = vld [vmem:[#allocation6 + $0x2820] sm:$0xff] }
 0x288   :  { %13185 = vmatpush1.bf16.msra.mxu0 %v16691_v26  ;;  %v16819_v26 = vcombine.low %v1376_v52, %v1392_v5 }
 0x289   :  { %13186 = vmatprep.subr.bf16.mxu0 %v16724_v35  ;;  %v17331_v35 = vcombine.low %v1888_v62, %v1904_v63 }
 0x28a   :  { %13226 = vmatpush1.bf16.msra.mxu1 %v17203_v54 }
 0x28b   :  { %13227 = vmatprep.subr.bf16.mxu1 %v17236_v30 }
 0x28c   :  { %13187 = vmatpush1.bf16.msra.mxu0 %v16723_v40  ;;  %v1952_v40 = vld [vmem:[#allocation6 + $0x3920] sm:$0xff] }
 0x28d   :  { %13188 = vmatprep.subr.bf16.mxu0 %v16756_v42 }
 0x28e   :  { %13228 = vmatpush1.bf16.msra.mxu1 %v17235_v41  ;;  %v12884_v50 = vpop.f32.mrb[20].mxu0  ;;  %v1968_v41 = vld [vmem:[#allocation6 + $0x39a0] sm:$0xff] }
 0x28f   :  { %13229 = vmatprep.subr.bf16.mxu1 %v17268_v43  ;;  %v12885_v55 = vadd.f32 %v12884_v50, %v17927_v8  ;;  %v12886_v61 = vpop.f32.mrb[21].mxu0  ;;  %v17396_v19 = vcombine.high %v1952_v40, %v1968_v41  ;;  %v16883_v50 = vcombine.low %v1440_v37, %v1456_v38  ;;  %v1632_v38 = vld [vmem:[#allocation6 + $0x2f20] sm:$0xff] }
 0x290   :  { %v12925_v56 = vpop.f32.mrb[20].mxu1  ;;  %v12887_v0 = vadd.f32 %v12886_v61, %v17929_v13  ;;  %v12888_v4 = vpop.f32.mrb[22].mxu0  ;;  %13189 = vmatpush1.bf16.msra.mxu0 %v16755_v22  ;;  %v1424_v13 = vld [vmem:[#allocation6 + $0x28a0] sm:$0xff] }
 0x291   :  { %v12927_v2 = vpop.f32.mrb[21].mxu1  ;;  %v12926_v7 = vadd.f32 %v12925_v56, %v12885_v55  ;;  %v12889_v10 = vpop.f32.mrb[23].mxu0  ;;  %13190 = vmatprep.subr.bf16.mxu0 %v16788_v49  ;;  %v16852_v30 = vcombine.high %v1408_v21, %v1424_v13  ;;  %v16851_v43 = vcombine.low %v1408_v21, %v1424_v13  ;;  %v1488_v22 = vld [vmem:[#allocation6 + $0x2aa0] sm:$0xff] }
 0x292   :  { %v12929_v8 = vpop.f32.mrb[22].mxu1  ;;  %13230 = vmatpush1.bf16.msra.mxu1 %v17267_v48  ;;  %v12928_v14 = vadd.f32 %v12927_v2, %v12887_v0  ;;  %v1984_v48 = vld [vmem:[#allocation6 + $0x3a20] sm:$0xff]  ;;  %v16916_v52 = vcombine.high %v1472_v46, %v1488_v22  ;;  %v16915_v62 = vcombine.low %v1472_v46, %v1488_v22  ;;  %v129_v46 = vld [vmem:[#allocation6 + $0x28] sm:$0xff] }
 0x293   :  { %v12930_v17 = vpop.f32.mrb[23].mxu1  ;;  %13231 = vmatprep.subr.bf16.mxu1 %v17300_v51  ;;  %v15335_v23 = vadd.f32 %v15190_v60, %v12926_v7  ;;  %v2000_v49 = vld [vmem:[#allocation6 + $0x3aa0] sm:$0xff]  ;;  %v17395_v51 = vcombine.low %v1952_v40, %v1968_v41  ;;  %v145_v22 = vld [vmem:[#allocation6 + $0xa8] sm:$0xff] }
 0x294   :  { %v15336_v53 = vadd.f32 %v15194_v3, %v12928_v14  ;;  %13191 = vmatpush1.bf16.msra.mxu0 %v16787_v6  ;;  %v17428_v5 = vcombine.high %v1984_v48, %v2000_v49  ;;  %v1504_v55 = vld [vmem:[#allocation6 + $0x2b20] sm:$0xff]  ;;  %v17427_v63 = vcombine.low %v1984_v48, %v2000_v49  ;;  %v641_v48 = vld [vmem:[#allocation6 + $0x1028] sm:$0xff] }
 0x295   :  { %v15367_v54 = vmax.f32 %v15335_v23, 0.0  ;;  %13192 = vmatprep.subr.bf16.mxu0 %v16820_v12  ;;  %v1520_v56 = vld [vmem:[#allocation6 + $0x2ba0] sm:$0xff]  ;;  %v657_v49 = vld [vmem:[#allocation6 + $0x10a8] sm:$0xff] }
 0x296   :  { %13232 = vmatpush1.bf16.msra.mxu1 %v17299_v11  ;;  %v15368_v33 = vmax.f32 %v15336_v53, 0.0  ;;  %v2016_v60 = vld [vmem:[#allocation6 + $0x3b20] sm:$0xff]  ;;  %v16948_v0 = vcombine.high %v1504_v55, %v1520_v56  ;;  %v16947_v8 = vcombine.low %v1504_v55, %v1520_v56  ;;  %v161_v55 = vld [vmem:[#allocation6 + $0x128] sm:$0xff] }
 0x297   :  { %13233 = vmatprep.subr.bf16.mxu1 %v17332_v18  ;;  %v2032_v61 = vld [vmem:[#allocation6 + $0x3ba0] sm:$0xff]  ;;  %v177_v56 = vld [vmem:[#allocation6 + $0x1a8] sm:$0xff] }
 0x298   :  { %v17629_v42 = vpack.c.bf16 %v15368_v33, %v15367_v54  ;;  %13193 = vmatpush1.bf16.msra.mxu0 %v16819_v26  ;;  %v17460_v2 = vcombine.high %v2016_v60, %v2032_v61  ;;  %v1536_v3 = vld [vmem:[#allocation6 + $0x2c20] sm:$0xff]  ;;  %v17459_v10 = vcombine.low %v2016_v60, %v2032_v61  ;;  %v673_v60 = vld [vmem:[#allocation6 + $0x1128] sm:$0xff] }
 0x299   :  { %13194 = vmatprep.subr.bf16.mxu0 %v16852_v30  ;;  %v1552_v4 = vld [vmem:[#allocation6 + $0x2ca0] sm:$0xff]  ;;  %v689_v61 = vld [vmem:[#allocation6 + $0x11a8] sm:$0xff] }
 0x29a   :  { %13234 = vmatpush1.bf16.msra.mxu1 %v17331_v35  ;;  %15525 = vst [vmem:[#allocation9 + $0x10] sm:$0xff] %v17629_v42  ;;  %v2048_v6 = vld [vmem:[#allocation6 + $0x3c20] sm:$0xff]  ;;  %v16980_v11 = vcombine.high %v1536_v3, %v1552_v4  ;;  %v16979_v13 = vcombine.low %v1536_v3, %v1552_v4  ;;  %v193_v3 = vld [vmem:[#allocation6 + $0x228] sm:$0xff] }
 0x29b   :  { %13235 = vmatprep.subr.bf16.mxu1 %v17364_v34  ;;  %v2064_v7 = vld [vmem:[#allocation6 + $0x3ca0] sm:$0xff]  ;;  %v209_v4 = vld [vmem:[#allocation6 + $0x2a8] sm:$0xff] }
 0x29c   :  { %13195 = vmatpush1.bf16.msra.mxu0 %v16851_v43  ;;  %v17492_v12 = vcombine.high %v2048_v6, %v2064_v7  ;;  %v1568_v14 = vld [vmem:[#allocation6 + $0x2d20] sm:$0xff]  ;;  %v17491_v23 = vcombine.low %v2048_v6, %v2064_v7  ;;  %v705_v6 = vld [vmem:[#allocation6 + $0x1228] sm:$0xff] }
 0x29d   :  { %13196 = vmatprep.subr.bf16.mxu0 %v16884_v31  ;;  %v1584_v17 = vld [vmem:[#allocation6 + $0x2da0] sm:$0xff]  ;;  %v721_v7 = vld [vmem:[#allocation6 + $0x12a8] sm:$0xff] }
 0x29e   :  { %13236 = vmatpush1.bf16.msra.mxu1 %v17363_v44  ;;  %v2080_v18 = vld [vmem:[#allocation6 + $0x3d20] sm:$0xff]  ;;  %v17012_v24 = vcombine.high %v1568_v14, %v1584_v17  ;;  %v17011_v30 = vcombine.low %v1568_v14, %v1584_v17  ;;  %v225_v14 = vld [vmem:[#allocation6 + $0x328] sm:$0xff] }
 0x29f   :  { %13237 = vmatprep.subr.bf16.mxu1 %v17396_v19  ;;  %v2096_v21 = vld [vmem:[#allocation6 + $0x3da0] sm:$0xff]  ;;  %v241_v17 = vld [vmem:[#allocation6 + $0x3a8] sm:$0xff] }
 0x2a0   :  { %13197 = vmatpush1.bf16.msra.mxu0 %v16883_v50  ;;  %v17524_v25 = vcombine.high %v2080_v18, %v2096_v21  ;;  %v1600_v53 = vld [vmem:[#allocation6 + $0x2e20] sm:$0xff]  ;;  %v17523_v33 = vcombine.low %v2080_v18, %v2096_v21  ;;  %v737_v18 = vld [vmem:[#allocation6 + $0x1328] sm:$0xff] }
 0x2a1   :  { %13198 = vmatprep.subr.bf16.mxu0 %v16916_v52  ;;  %v1616_v26 = vld [vmem:[#allocation6 + $0x2ea0] sm:$0xff]  ;;  %v15574_v52 = vcombine.high %v129_v46, %v145_v22  ;;  %v753_v21 = vld [vmem:[#allocation6 + $0x13a8] sm:$0xff] }
 0x2a2   :  { %13238 = vmatpush1.bf16.msra.mxu1 %v17395_v51  ;;  %v2112_v54 = vld [vmem:[#allocation6 + $0x3e20] sm:$0xff]  ;;  %v17044_v34 = vcombine.high %v1600_v53, %v1616_v26  ;;  %v17043_v43 = vcombine.low %v1600_v53, %v1616_v26  ;;  %v257_v53 = vld [vmem:[#allocation6 + $0x428] sm:$0xff] }
 0x2a3   :  { %13239 = vmatprep.subr.bf16.mxu1 %v17428_v5  ;;  %v2128_v35 = vld [vmem:[#allocation6 + $0x3ea0] sm:$0xff]  ;;  %v16086_v5 = vcombine.high %v641_v48, %v657_v49  ;;  %v273_v26 = vld [vmem:[#allocation6 + $0x4a8] sm:$0xff] }
 0x2a4   :  { %13199 = vmatpush1.bf16.msra.mxu0 %v16915_v62  ;;  %v17556_v37 = vcombine.high %v2112_v54, %v2128_v35  ;;  %v1648_v40 = vld [vmem:[#allocation6 + $0x2fa0] sm:$0xff]  ;;  %v17555_v44 = vcombine.low %v2112_v54, %v2128_v35  ;;  %v15573_v62 = vcombine.low %v129_v46, %v145_v22  ;;  %v769_v54 = vld [vmem:[#allocation6 + $0x1428] sm:$0xff] }
 0x2a5   :  { %13200 = vmatprep.subr.bf16.mxu0 %v16948_v0  ;;  %v2144_v41 = vld [vmem:[#allocation6 + $0x3f20] sm:$0xff]  ;;  %v17076_v31 = vcombine.high %v1632_v38, %v1648_v40  ;;  %v17075_v50 = vcombine.low %v1632_v38, %v1648_v40  ;;  %v15606_v0 = vcombine.high %v161_v55, %v177_v56  ;;  %v785_v35 = vld [vmem:[#allocation6 + $0x14a8] sm:$0xff] }
 0x2a6   :  { %13240 = vmatpush1.bf16.msra.mxu1 %v17427_v63  ;;  %v2160_v42 = vld [vmem:[#allocation6 + $0x3fa0] sm:$0xff]  ;;  %v16085_v63 = vcombine.low %v641_v48, %v657_v49  ;;  %v289_v38 = vld [vmem:[#allocation6 + $0x528] sm:$0xff] }
 0x2a7   :  { %13241 = vmatprep.subr.bf16.mxu1 %v17460_v2  ;;  %v17588_v19 = vcombine.high %v2144_v41, %v2160_v42  ;;  %v17587_v51 = vcombine.low %v2144_v41, %v2160_v42  ;;  %v16118_v2 = vcombine.high %v673_v60, %v689_v61  ;;  %v305_v40 = vld [vmem:[#allocation6 + $0x5a8] sm:$0xff] }
 0x2a8   :  { %13201 = vmatpush1.bf16.msra.mxu0 %v16947_v8  ;;  %v15605_v8 = vcombine.low %v161_v55, %v177_v56  ;;  %v801_v41 = vld [vmem:[#allocation6 + $0x1528] sm:$0xff] }
 0x2a9   :  { %13202 = vmatprep.subr.bf16.mxu0 %v16980_v11  ;;  %v15638_v11 = vcombine.high %v193_v3, %v209_v4  ;;  %v817_v42 = vld [vmem:[#allocation6 + $0x15a8] sm:$0xff] }
 0x2aa   :  { %13242 = vmatpush1.bf16.msra.mxu1 %v17459_v10  ;;  %v16117_v10 = vcombine.low %v673_v60, %v689_v61  ;;  %v321_v46 = vld [vmem:[#allocation6 + $0x628] sm:$0xff] }
 0x2ab   :  { %13243 = vmatprep.subr.bf16.mxu1 %v17492_v12  ;;  %v16150_v12 = vcombine.high %v705_v6, %v721_v7  ;;  %v337_v22 = vld [vmem:[#allocation6 + $0x6a8] sm:$0xff] }
 0x2ac   :  { %13203 = vmatpush1.bf16.msra.mxu0 %v16979_v13  ;;  %v15637_v13 = vcombine.low %v193_v3, %v209_v4  ;;  %v833_v48 = vld [vmem:[#allocation6 + $0x1628] sm:$0xff] }
 0x2ad   :  { %13204 = vmatprep.subr.bf16.mxu0 %v17012_v24  ;;  %v15670_v24 = vcombine.high %v225_v14, %v241_v17  ;;  %v849_v49 = vld [vmem:[#allocation6 + $0x16a8] sm:$0xff] }
 0x2ae   :  { %13244 = vmatpush1.bf16.msra.mxu1 %v17491_v23  ;;  %v16149_v23 = vcombine.low %v705_v6, %v721_v7  ;;  %v16278_v55 = vcombine.high %v833_v48, %v849_v49  ;;  %v353_v56 = vld [vmem:[#allocation6 + $0x728] sm:$0xff]  ;;  %v15765_v6 = vcombine.low %v321_v46, %v337_v22 }
 0x2af   :  { %13245 = vmatprep.subr.bf16.mxu1 %v17524_v25  ;;  %v16182_v25 = vcombine.high %v737_v18, %v753_v21  ;;  %v369_v60 = vld [vmem:[#allocation6 + $0x7a8] sm:$0xff] }
 0x2b0   :  { %13205 = vmatpush1.bf16.msra.mxu0 %v17011_v30  ;;  %v15669_v30 = vcombine.low %v225_v14, %v241_v17 }
 0x2b1   :  { %13206 = vmatprep.subr.bf16.mxu0 %v17044_v34  ;;  %v15702_v34 = vcombine.high %v257_v53, %v273_v26 }
 0x2b2   :  { %13246 = vmatpush1.bf16.msra.mxu1 %v17523_v33  ;;  %v16181_v33 = vcombine.low %v737_v18, %v753_v21  ;;  %v385_v18 = vld [vmem:[#allocation6 + $0x828] sm:$0xff] }
 0x2b3   :  { %13247 = vmatprep.subr.bf16.mxu1 %v17556_v37  ;;  %v16214_v37 = vcombine.high %v769_v54, %v785_v35  ;;  %v401_v21 = vld [vmem:[#allocation6 + $0x8a8] sm:$0xff] }
 0x2b4   :  { %13207 = vmatpush1.bf16.msra.mxu0 %v17043_v43  ;;  %v15701_v43 = vcombine.low %v257_v53, %v273_v26  ;;  %v15830_v53 = vcombine.high %v385_v18, %v401_v21 }
 0x2b5   :  { %13208 = vmatprep.subr.bf16.mxu0 %v17076_v31  ;;  %v15734_v31 = vcombine.high %v289_v38, %v305_v40 }
 0x2b6   :  { %13248 = vmatpush1.bf16.msra.mxu1 %v17555_v44  ;;  %v16213_v44 = vcombine.low %v769_v54, %v785_v35  ;;  %v417_v54 = vld [vmem:[#allocation6 + $0x928] sm:$0xff] }
 0x2b7   :  { %13249 = vmatprep.subr.bf16.mxu1 %v17588_v19  ;;  %v16246_v19 = vcombine.high %v801_v41, %v817_v42  ;;  %v433_v35 = vld [vmem:[#allocation6 + $0x9a8] sm:$0xff] }
 0x2b8   :  { %13209 = vmatpush1.bf16.msra.mxu0 %v17075_v50  ;;  %v15733_v50 = vcombine.low %v289_v38, %v305_v40  ;;  %v15862_v38 = vcombine.high %v417_v54, %v433_v35 }
 0x2b9   :  { %13260 = vmatprep.subr.bf16.mxu0 %v15574_v52  ;;  %v15766_v52 = vcombine.high %v321_v46, %v337_v22 }
 0x2ba   :  { %13250 = vmatpush1.bf16.msra.mxu1 %v17587_v51  ;;  %v16245_v51 = vcombine.low %v801_v41, %v817_v42  ;;  %v449_v41 = vld [vmem:[#allocation6 + $0xa28] sm:$0xff] }
 0x2bb   :  { %13301 = vmatprep.subr.bf16.mxu1 %v16086_v5  ;;  %13211 = vmatmul.mubr.bf16.vlgmr.msra.gmra.mrb[36].mxu0 %v17857_v36  ;;  %v465_v42 = vld [vmem:[#allocation6 + $0xaa8] sm:$0xff] }
 0x2bc   :  { %13261 = vmatpush1.bf16.msra.mxu0 %v15573_v62  ;;  %13292 = vmatprep.mubr.bf16.mxu0 %v17823_v58  ;;  %v15894_v46 = vcombine.high %v449_v41, %v465_v42 }
 0x2bd   :  { %13252 = vmatmul.mubr.bf16.vlgmr.msra.gmra.mrb[36].mxu1 %v17861_v39  ;;  %13262 = vmatprep.subr.bf16.mxu0 %v15606_v0  ;;  %v881_v0 = vld [vmem:[#allocation6 + $0x17a8] sm:$0xff] }
 0x2be   :  { %13302 = vmatpush1.bf16.msra.mxu1 %v16085_v63  ;;  %13333 = vmatprep.mubr.bf16.mxu1 %v17827_v59  ;;  %v865_v63 = vld [vmem:[#allocation6 + $0x1728] sm:$0xff] }
 0x2bf   :  { %13303 = vmatprep.subr.bf16.mxu1 %v16118_v2  ;;  %v16310_v17 = vcombine.high %v865_v63, %v881_v0 }
 0x2c0   :  { %13263 = vmatpush1.bf16.msra.mxu0 %v15605_v8 }
 0x2c1   :  { %13264 = vmatprep.subr.bf16.mxu0 %v15638_v11  ;;  %v16277_v11 = vcombine.low %v833_v48, %v849_v49  ;;  %v481_v48 = vld [vmem:[#allocation6 + $0xb28] sm:$0xff] }
 0x2c2   :  { %13304 = vmatpush1.bf16.msra.mxu1 %v16117_v10  ;;  %v497_v49 = vld [vmem:[#allocation6 + $0xba8] sm:$0xff] }
 0x2c3   :  { %13305 = vmatprep.subr.bf16.mxu1 %v16150_v12  ;;  %v15798_v12 = vcombine.high %v353_v56, %v369_v60 }
 0x2c4   :  { %13265 = vmatpush1.bf16.msra.mxu0 %v15637_v13  ;;  %v897_v13 = vld [vmem:[#allocation6 + $0x1828] sm:$0xff] }
 0x2c5   :  { %13266 = vmatprep.subr.bf16.mxu0 %v15670_v24  ;;  %v15797_v24 = vcombine.low %v353_v56, %v369_v60  ;;  %v513_v60 = vld [vmem:[#allocation6 + $0xc28] sm:$0xff] }
 0x2c6   :  { %13306 = vmatpush1.bf16.msra.mxu1 %v16149_v23  ;;  %v913_v23 = vld [vmem:[#allocation6 + $0x18a8] sm:$0xff] }
 0x2c7   :  { %13307 = vmatprep.subr.bf16.mxu1 %v16182_v25  ;;  %v16309_v25 = vcombine.low %v865_v63, %v881_v0  ;;  %v16342_v26 = vcombine.high %v897_v13, %v913_v23  ;;  %v1041_v63 = vld [vmem:[#allocation6 + $0x1ca8] sm:$0xff]  ;;  %v15925_v0 = vcombine.low %v481_v48, %v497_v49 }
 0x2c8   :  { %13267 = vmatpush1.bf16.msra.mxu0 %v15669_v30  ;;  %v929_v30 = vld [vmem:[#allocation6 + $0x1928] sm:$0xff] }
 0x2c9   :  { %13268 = vmatprep.subr.bf16.mxu0 %v15702_v34  ;;  %v15829_v34 = vcombine.low %v385_v18, %v401_v21 }
 0x2ca   :  { %13308 = vmatpush1.bf16.msra.mxu1 %v16181_v33  ;;  %v945_v33 = vld [vmem:[#allocation6 + $0x19a8] sm:$0xff] }
 0x2cb   :  { %13309 = vmatprep.subr.bf16.mxu1 %v16214_v37  ;;  %v16341_v37 = vcombine.low %v897_v13, %v913_v23  ;;  %v16374_v40 = vcombine.high %v929_v30, %v945_v33  ;;  %v577_v13 = vld [vmem:[#allocation6 + $0xe28] sm:$0xff] }
 0x2cc   :  { %13269 = vmatpush1.bf16.msra.mxu0 %v15701_v43  ;;  %v961_v43 = vld [vmem:[#allocation6 + $0x1a28] sm:$0xff] }
 0x2cd   :  { %13270 = vmatprep.subr.bf16.mxu0 %v15734_v31  ;;  %v15861_v31 = vcombine.low %v417_v54, %v433_v35  ;;  %v593_v23 = vld [vmem:[#allocation6 + $0xea8] sm:$0xff] }
 0x2ce   :  { %13310 = vmatpush1.bf16.msra.mxu1 %v16213_v44  ;;  %v12966_v5 = vpop.f32.mrb[24].mxu0  ;;  %v977_v44 = vld [vmem:[#allocation6 + $0x1aa8] sm:$0xff]  ;;  %v16022_v54 = vcombine.high %v577_v13, %v593_v23 }
 0x2cf   :  { %13311 = vmatprep.subr.bf16.mxu1 %v16246_v19  ;;  %v12968_v62 = vpop.f32.mrb[25].mxu0  ;;  %v16373_v19 = vcombine.low %v929_v30, %v945_v33  ;;  %v16406_v22 = vcombine.high %v961_v43, %v977_v44  ;;  %v609_v30 = vld [vmem:[#allocation6 + $0xf28] sm:$0xff] }
 0x2d0   :  { %v13007_v61 = vpop.f32.mrb[24].mxu1  ;;  %v12970_v4 = vpop.f32.mrb[26].mxu0  ;;  %13271 = vmatpush1.bf16.msra.mxu0 %v15733_v50  ;;  %v993_v50 = vld [vmem:[#allocation6 + $0x1b28] sm:$0xff] }
 0x2d1   :  { %v17953_v2 = vadd.f32 %v13007_v61, %v12966_v5  ;;  %v13009_v3 = vpop.f32.mrb[25].mxu1  ;;  %v12971_v10 = vpop.f32.mrb[27].mxu0  ;;  %13272 = vmatprep.subr.bf16.mxu0 %v15766_v52  ;;  %v15893_v52 = vcombine.low %v449_v41, %v465_v42  ;;  %v16405_v5 = vcombine.low %v961_v43, %v977_v44  ;;  %v529_v61 = vld [vmem:[#allocation6 + $0xca8] sm:$0xff] }
 0x2d2   :  { %v17955_v7 = vadd.f32 %v13009_v3, %v12968_v62  ;;  %v13011_v8 = vpop.f32.mrb[26].mxu1  ;;  %13312 = vmatpush1.bf16.msra.mxu1 %v16245_v51  ;;  %v1009_v51 = vld [vmem:[#allocation6 + $0x1ba8] sm:$0xff]  ;;  %v15958_v4 = vcombine.high %v513_v60, %v529_v61 }
 0x2d3   :  { %v13012_v14 = vpop.f32.mrb[27].mxu1  ;;  %13313 = vmatprep.subr.bf16.mxu1 %v16278_v55  ;;  %v15926_v55 = vcombine.high %v481_v48, %v497_v49  ;;  %v16438_v56 = vcombine.high %v993_v50, %v1009_v51  ;;  %v1025_v62 = vld [vmem:[#allocation6 + $0x1c28] sm:$0xff]  ;;  %v16437_v3 = vcombine.low %v993_v50, %v1009_v51 }
 0x2d4   :  { %13273 = vmatpush1.bf16.msra.mxu0 %v15765_v6  ;;  %v16470_v6 = vcombine.high %v1025_v62, %v1041_v63  ;;  %v545_v8 = vld [vmem:[#allocation6 + $0xd28] sm:$0xff]  ;;  %v15957_v14 = vcombine.low %v513_v60, %v529_v61 }
 0x2d5   :  { %13274 = vmatprep.subr.bf16.mxu0 %v15798_v12  ;;  %v561_v10 = vld [vmem:[#allocation6 + $0xda8] sm:$0xff] }
 0x2d6   :  { %13314 = vmatpush1.bf16.msra.mxu1 %v16277_v11  ;;  %v1057_v11 = vld [vmem:[#allocation6 + $0x1d28] sm:$0xff]  ;;  %v15990_v18 = vcombine.high %v545_v8, %v561_v10 }
 0x2d7   :  { %13315 = vmatprep.subr.bf16.mxu1 %v16310_v17  ;;  %v1073_v12 = vld [vmem:[#allocation6 + $0x1da8] sm:$0xff]  ;;  %v16469_v17 = vcombine.low %v1025_v62, %v1041_v63 }
 0x2d8   :  { %13275 = vmatpush1.bf16.msra.mxu0 %v15797_v24  ;;  %v16502_v21 = vcombine.high %v1057_v11, %v1073_v12  ;;  %v1089_v24 = vld [vmem:[#allocation6 + $0x1e28] sm:$0xff] }
 0x2d9   :  { %13276 = vmatprep.subr.bf16.mxu0 %v15830_v53  ;;  %v15989_v53 = vcombine.low %v545_v8, %v561_v10  ;;  %v625_v33 = vld [vmem:[#allocation6 + $0xfa8] sm:$0xff] }
 0x2da   :  { %13316 = vmatpush1.bf16.msra.mxu1 %v16309_v25  ;;  %v1105_v25 = vld [vmem:[#allocation6 + $0x1ea8] sm:$0xff]  ;;  %v16054_v41 = vcombine.high %v609_v30, %v625_v33 }
 0x2db   :  { %13317 = vmatprep.subr.bf16.mxu1 %v16342_v26  ;;  %v16501_v26 = vcombine.low %v1057_v11, %v1073_v12  ;;  %v16534_v35 = vcombine.high %v1089_v24, %v1105_v25  ;;  %v1153_v43 = vld [vmem:[#allocation6 + $0x2028] sm:$0xff] }
 0x2dc   :  { %13277 = vmatpush1.bf16.msra.mxu0 %v15829_v34  ;;  %v1121_v34 = vld [vmem:[#allocation6 + $0x1f28] sm:$0xff] }
 0x2dd   :  { %13278 = vmatprep.subr.bf16.mxu0 %v15862_v38  ;;  %v16021_v38 = vcombine.low %v577_v13, %v593_v23  ;;  %v1169_v44 = vld [vmem:[#allocation6 + $0x20a8] sm:$0xff] }
 0x2de   :  { %13318 = vmatpush1.bf16.msra.mxu1 %v16341_v37  ;;  %v1137_v37 = vld [vmem:[#allocation6 + $0x1fa8] sm:$0xff]  ;;  %v16598_v48 = vcombine.high %v1153_v43, %v1169_v44 }
 0x2df   :  { %13319 = vmatprep.subr.bf16.mxu1 %v16374_v40  ;;  %v16533_v40 = vcombine.low %v1089_v24, %v1105_v25  ;;  %v16566_v42 = vcombine.high %v1121_v34, %v1137_v37  ;;  %v1185_v50 = vld [vmem:[#allocation6 + $0x2128] sm:$0xff] }
 0x2e0   :  { %13279 = vmatpush1.bf16.msra.mxu0 %v15861_v31  ;;  %v1665_v31 = vld [vmem:[#allocation6 + $0x3028] sm:$0xff] }
 0x2e1   :  { %13280 = vmatprep.subr.bf16.mxu0 %v15894_v46  ;;  %v16053_v46 = vcombine.low %v609_v30, %v625_v33  ;;  %v1201_v51 = vld [vmem:[#allocation6 + $0x21a8] sm:$0xff] }
 0x2e2   :  { %13320 = vmatpush1.bf16.msra.mxu1 %v16373_v19  ;;  %v1681_v19 = vld [vmem:[#allocation6 + $0x30a8] sm:$0xff]  ;;  %v16630_v60 = vcombine.high %v1185_v50, %v1201_v51 }
 0x2e3   :  { %13321 = vmatprep.subr.bf16.mxu1 %v16406_v22  ;;  %v16565_v22 = vcombine.low %v1121_v34, %v1137_v37  ;;  %v17110_v49 = vcombine.high %v1665_v31, %v1681_v19  ;;  %v1217_v62 = vld [vmem:[#allocation6 + $0x2228] sm:$0xff] }
 0x2e4   :  { %13281 = vmatpush1.bf16.msra.mxu0 %v15893_v52  ;;  %v1697_v52 = vld [vmem:[#allocation6 + $0x3128] sm:$0xff] }
 0x2e5   :  { %13282 = vmatprep.subr.bf16.mxu0 %v15926_v55  ;;  %v16597_v55 = vcombine.low %v1153_v43, %v1169_v44  ;;  %v1233_v63 = vld [vmem:[#allocation6 + $0x22a8] sm:$0xff] }
 0x2e6   :  { %13322 = vmatpush1.bf16.msra.mxu1 %v16405_v5  ;;  %v1713_v5 = vld [vmem:[#allocation6 + $0x31a8] sm:$0xff]  ;;  %v16662_v8 = vcombine.high %v1217_v62, %v1233_v63 }
 0x2e7   :  { %13323 = vmatprep.subr.bf16.mxu1 %v16438_v56  ;;  %v17109_v56 = vcombine.low %v1665_v31, %v1681_v19  ;;  %v17142_v61 = vcombine.high %v1697_v52, %v1713_v5  ;;  %v1249_v11 = vld [vmem:[#allocation6 + $0x2328] sm:$0xff] }
 0x2e8   :  { %13283 = vmatpush1.bf16.msra.mxu0 %v15925_v0  ;;  %v1729_v0 = vld [vmem:[#allocation6 + $0x3228] sm:$0xff] }
 0x2e9   :  { %13284 = vmatprep.subr.bf16.mxu0 %v15958_v4  ;;  %v16629_v4 = vcombine.low %v1185_v50, %v1201_v51  ;;  %v1265_v12 = vld [vmem:[#allocation6 + $0x23a8] sm:$0xff] }
 0x2ea   :  { %13324 = vmatpush1.bf16.msra.mxu1 %v16437_v3  ;;  %v1745_v3 = vld [vmem:[#allocation6 + $0x32a8] sm:$0xff]  ;;  %v16694_v13 = vcombine.high %v1249_v11, %v1265_v12 }
 0x2eb   :  { %13325 = vmatprep.subr.bf16.mxu1 %v16470_v6  ;;  %v17141_v6 = vcombine.low %v1697_v52, %v1713_v5  ;;  %v17174_v10 = vcombine.high %v1729_v0, %v1745_v3  ;;  %v1281_v24 = vld [vmem:[#allocation6 + $0x2428] sm:$0xff] }
 0x2ec   :  { %13285 = vmatpush1.bf16.msra.mxu0 %v15957_v14  ;;  %v1761_v14 = vld [vmem:[#allocation6 + $0x3328] sm:$0xff] }
 0x2ed   :  { %13286 = vmatprep.subr.bf16.mxu0 %v15990_v18  ;;  %v16661_v18 = vcombine.low %v1217_v62, %v1233_v63  ;;  %v1297_v25 = vld [vmem:[#allocation6 + $0x24a8] sm:$0xff] }
 0x2ee   :  { %13326 = vmatpush1.bf16.msra.mxu1 %v16469_v17  ;;  %v1777_v17 = vld [vmem:[#allocation6 + $0x33a8] sm:$0xff]  ;;  %v16726_v30 = vcombine.high %v1281_v24, %v1297_v25 }
 0x2ef   :  { %13327 = vmatprep.subr.bf16.mxu1 %v16502_v21  ;;  %v17173_v21 = vcombine.low %v1729_v0, %v1745_v3  ;;  %v17206_v23 = vcombine.high %v1761_v14, %v1777_v17  ;;  %v1313_v34 = vld [vmem:[#allocation6 + $0x2528] sm:$0xff] }
 0x2f0   :  { %13287 = vmatpush1.bf16.msra.mxu0 %v15989_v53  ;;  %v1793_v53 = vld [vmem:[#allocation6 + $0x3428] sm:$0xff] }
 0x2f1   :  { %13288 = vmatprep.subr.bf16.mxu0 %v16022_v54  ;;  %v16693_v54 = vcombine.low %v1249_v11, %v1265_v12  ;;  %v1329_v37 = vld [vmem:[#allocation6 + $0x25a8] sm:$0xff] }
 0x2f2   :  { %13328 = vmatpush1.bf16.msra.mxu1 %v16501_v26  ;;  %v1809_v26 = vld [vmem:[#allocation6 + $0x34a8] sm:$0xff]  ;;  %v16758_v43 = vcombine.high %v1313_v34, %v1329_v37  ;;  %v16757_v50 = vcombine.low %v1313_v34, %v1329_v37 }
 0x2f3   :  { %13329 = vmatprep.subr.bf16.mxu1 %v16534_v35  ;;  %v17205_v35 = vcombine.low %v1761_v14, %v1777_v17  ;;  %v17238_v33 = vcombine.high %v1793_v53, %v1809_v26  ;;  %v1345_v31 = vld [vmem:[#allocation6 + $0x2628] sm:$0xff] }
 0x2f4   :  { %13289 = vmatpush1.bf16.msra.mxu0 %v16021_v38  ;;  %v1825_v38 = vld [vmem:[#allocation6 + $0x3528] sm:$0xff] }
 0x2f5   :  { %13290 = vmatprep.subr.bf16.mxu0 %v16054_v41  ;;  %v16725_v41 = vcombine.low %v1281_v24, %v1297_v25  ;;  %v1361_v19 = vld [vmem:[#allocation6 + $0x26a8] sm:$0xff] }
 0x2f6   :  { %13330 = vmatpush1.bf16.msra.mxu1 %v16533_v40  ;;  %v1841_v40 = vld [vmem:[#allocation6 + $0x35a8] sm:$0xff]  ;;  %v16790_v52 = vcombine.high %v1345_v31, %v1361_v19  ;;  %v16789_v11 = vcombine.low %v1345_v31, %v1361_v19 }
 0x2f7   :  { %13331 = vmatprep.subr.bf16.mxu1 %v16566_v42  ;;  %v17237_v42 = vcombine.low %v1793_v53, %v1809_v26  ;;  %v17270_v44 = vcombine.high %v1825_v38, %v1841_v40  ;;  %v17269_v51 = vcombine.low %v1825_v38, %v1841_v40  ;;  %v1889_v3 = vld [vmem:[#allocation6 + $0x3728] sm:$0xff] }
 0x2f8   :  { %13291 = vmatpush1.bf16.msra.mxu0 %v16053_v46  ;;  %v17962_v46 = vsub.s32 6, %v17883_v15  ;;  %v1409_v24 = vld [vmem:[#allocation6 + $0x2828] sm:$0xff] }
 0x2f9   :  { %13342 = vmatprep.subr.bf16.mxu0 %v16598_v48  ;;  %v1873_v48 = vld [vmem:[#allocation6 + $0x36a8] sm:$0xff] }
 0x2fa   :  { %13332 = vmatpush1.bf16.msra.mxu1 %v16565_v22  ;;  %v1857_v22 = vld [vmem:[#allocation6 + $0x3628] sm:$0xff]  ;;  %v15198_v63 = vrot.slane %v17942_v57, %v17962_v46 }
 0x2fb   :  { %13383 = vmatprep.subr.bf16.mxu1 %v17110_v49  ;;  %13293 = vmatmul.mubr.bf16.vlgmr.msra.gmra.mrb[40].mxu0 %v17833_v16  ;;  %v17965_v49 = vsub.s32 7, %v17883_v15  ;;  %v1905_v15 = vld [vmem:[#allocation6 + $0x37a8] sm:$0xff]  ;;  %v17301_v17 = vcombine.low %v1857_v22, %v1873_v48 }
 0x2fc   :  { %13343 = vmatpush1.bf16.msra.mxu0 %v16597_v55  ;;  %13374 = vmatprep.mubr.bf16.mxu0 %v17845_v27  ;;  %v17302_v55 = vcombine.high %v1857_v22, %v1873_v48  ;;  %v1921_v53 = vld [vmem:[#allocation6 + $0x3828] sm:$0xff] }
 0x2fd   :  { %13334 = vmatmul.mubr.bf16.vlgmr.msra.gmra.mrb[40].mxu1 %v17839_v20  ;;  %13344 = vmatprep.subr.bf16.mxu0 %v16630_v60  ;;  %v1393_v60 = vld [vmem:[#allocation6 + $0x27a8] sm:$0xff] }
 0x2fe   :  { %13384 = vmatpush1.bf16.msra.mxu1 %v17109_v56  ;;  %13415 = vmatprep.mubr.bf16.mxu1 %v17850_v29  ;;  %v1377_v56 = vld [vmem:[#allocation6 + $0x2728] sm:$0xff] }
 0x2ff   :  { %13385 = vmatprep.subr.bf16.mxu1 %v17142_v61  ;;  %v1937_v26 = vld [vmem:[#allocation6 + $0x38a8] sm:$0xff] }
 0x300   :  { %13345 = vmatpush1.bf16.msra.mxu0 %v16629_v4  ;;  %v17366_v37 = vcombine.high %v1921_v53, %v1937_v26  ;;  %v1441_v38 = vld [vmem:[#allocation6 + $0x2928] sm:$0xff]  ;;  %v17365_v31 = vcombine.low %v1921_v53, %v1937_v26 }
 0x301   :  { %13346 = vmatprep.subr.bf16.mxu0 %v16662_v8  ;;  %v15202_v8 = vrot.slane %v17942_v57, %v17965_v49  ;;  %v1457_v40 = vld [vmem:[#allocation6 + $0x29a8] sm:$0xff] }
 0x302   :  { %13386 = vmatpush1.bf16.msra.mxu1 %v17141_v6  ;;  %v16886_v19 = vcombine.high %v1441_v38, %v1457_v40  ;;  %v1473_v48 = vld [vmem:[#allocation6 + $0x2a28] sm:$0xff] }
 0x303   :  { %13387 = vmatprep.subr.bf16.mxu1 %v17174_v10 }
 0x304   :  { %13347 = vmatpush1.bf16.msra.mxu0 %v16661_v18  ;;  %v16822_v18 = vcombine.high %v1377_v56, %v1393_v60 }
 0x305   :  { %13348 = vmatprep.subr.bf16.mxu0 %v16694_v13 }
 0x306   :  { %13388 = vmatpush1.bf16.msra.mxu1 %v17173_v21 }
 0x307   :  { %13389 = vmatprep.subr.bf16.mxu1 %v17206_v23  ;;  %v17334_v23 = vcombine.high %v1889_v3, %v1905_v15 }
 0x308   :  { %13349 = vmatpush1.bf16.msra.mxu0 %v16693_v54  ;;  %v16821_v54 = vcombine.low %v1377_v56, %v1393_v60 }
 0x309   :  { %13350 = vmatprep.subr.bf16.mxu0 %v16726_v30  ;;  %v17333_v30 = vcombine.low %v1889_v3, %v1905_v15 }
 0x30a   :  { %13390 = vmatpush1.bf16.msra.mxu1 %v17205_v35 }
 0x30b   :  { %13391 = vmatprep.subr.bf16.mxu1 %v17238_v33 }
 0x30c   :  { %13351 = vmatpush1.bf16.msra.mxu0 %v16725_v41  ;;  %v1953_v41 = vld [vmem:[#allocation6 + $0x3928] sm:$0xff] }
 0x30d   :  { %13352 = vmatprep.subr.bf16.mxu0 %v16758_v43 }
 0x30e   :  { %13392 = vmatpush1.bf16.msra.mxu1 %v17237_v42  ;;  %v13048_v5 = vpop.f32.mrb[28].mxu0  ;;  %v1969_v42 = vld [vmem:[#allocation6 + $0x39a8] sm:$0xff] }
 0x30f   :  { %13393 = vmatprep.subr.bf16.mxu1 %v17270_v44  ;;  %v13049_v61 = vadd.f32 %v13048_v5, %v17953_v2  ;;  %v13050_v0 = vpop.f32.mrb[29].mxu0  ;;  %v17398_v22 = vcombine.high %v1953_v41, %v1969_v42  ;;  %v16885_v5 = vcombine.low %v1441_v38, %v1457_v40  ;;  %v1633_v40 = vld [vmem:[#allocation6 + $0x2f28] sm:$0xff] }
 0x310   :  { %v13089_v62 = vpop.f32.mrb[28].mxu1  ;;  %v13051_v4 = vadd.f32 %v13050_v0, %v17955_v7  ;;  %v13052_v10 = vpop.f32.mrb[30].mxu0  ;;  %13353 = vmatpush1.bf16.msra.mxu0 %v16757_v50  ;;  %v1425_v7 = vld [vmem:[#allocation6 + $0x28a8] sm:$0xff] }
 0x311   :  { %v13091_v6 = vpop.f32.mrb[29].mxu1  ;;  %v13090_v12 = vadd.f32 %v13089_v62, %v13049_v61  ;;  %v13053_v2 = vpop.f32.mrb[31].mxu0  ;;  %13354 = vmatprep.subr.bf16.mxu0 %v16790_v52  ;;  %v16854_v33 = vcombine.high %v1409_v24, %v1425_v7  ;;  %v16853_v44 = vcombine.low %v1409_v24, %v1425_v7  ;;  %v1489_v50 = vld [vmem:[#allocation6 + $0x2aa8] sm:$0xff] }
 0x312   :  { %v13093_v14 = vpop.f32.mrb[30].mxu1  ;;  %13394 = vmatpush1.bf16.msra.mxu1 %v17269_v51  ;;  %v13092_v21 = vadd.f32 %v13091_v6, %v13051_v4  ;;  %v1985_v51 = vld [vmem:[#allocation6 + $0x3a28] sm:$0xff]  ;;  %v16918_v56 = vcombine.high %v1473_v48, %v1489_v50  ;;  %v16917_v3 = vcombine.low %v1473_v48, %v1489_v50  ;;  %v130_v48 = vld [vmem:[#allocation6 + $0x30] sm:$0xff] }
 0x313   :  { %v13094_v13 = vpop.f32.mrb[31].mxu1  ;;  %13395 = vmatprep.subr.bf16.mxu1 %v17302_v55  ;;  %v15337_v25 = vadd.f32 %v15198_v63, %v13090_v12  ;;  %v2001_v52 = vld [vmem:[#allocation6 + $0x3aa8] sm:$0xff]  ;;  %v17397_v55 = vcombine.low %v1953_v41, %v1969_v42  ;;  %v146_v50 = vld [vmem:[#allocation6 + $0xb0] sm:$0xff] }
 0x314   :  { %v15338_v57 = vadd.f32 %v15202_v8, %v13092_v21  ;;  %13355 = vmatpush1.bf16.msra.mxu0 %v16789_v11  ;;  %v17430_v60 = vcombine.high %v1985_v51, %v2001_v52  ;;  %v1505_v61 = vld [vmem:[#allocation6 + $0x2b28] sm:$0xff]  ;;  %v17429_v15 = vcombine.low %v1985_v51, %v2001_v52  ;;  %v642_v51 = vld [vmem:[#allocation6 + $0x1030] sm:$0xff] }
 0x315   :  { %v15369_v35 = vmax.f32 %v15337_v25, 0.0  ;;  %13356 = vmatprep.subr.bf16.mxu0 %v16822_v18  ;;  %v1521_v62 = vld [vmem:[#allocation6 + $0x2ba8] sm:$0xff]  ;;  %v658_v52 = vld [vmem:[#allocation6 + $0x10b0] sm:$0xff] }
 0x316   :  { %13396 = vmatpush1.bf16.msra.mxu1 %v17301_v17  ;;  %v15370_v34 = vmax.f32 %v15338_v57, 0.0  ;;  %v2017_v63 = vld [vmem:[#allocation6 + $0x3b28] sm:$0xff]  ;;  %v16950_v4 = vcombine.high %v1505_v61, %v1521_v62  ;;  %v16949_v14 = vcombine.low %v1505_v61, %v1521_v62  ;;  %v162_v61 = vld [vmem:[#allocation6 + $0x130] sm:$0xff] }
 0x317   :  { %13397 = vmatprep.subr.bf16.mxu1 %v17334_v23  ;;  %v2033_v0 = vld [vmem:[#allocation6 + $0x3ba8] sm:$0xff]  ;;  %v178_v62 = vld [vmem:[#allocation6 + $0x1b0] sm:$0xff] }
 0x318   :  { %v17630_v43 = vpack.c.bf16 %v15370_v34, %v15369_v35  ;;  %13357 = vmatpush1.bf16.msra.mxu0 %v16821_v54  ;;  %v17462_v6 = vcombine.high %v2017_v63, %v2033_v0  ;;  %v1537_v8 = vld [vmem:[#allocation6 + $0x2c28] sm:$0xff]  ;;  %v17461_v2 = vcombine.low %v2017_v63, %v2033_v0  ;;  %v674_v63 = vld [vmem:[#allocation6 + $0x1130] sm:$0xff] }
 0x319   :  { %13358 = vmatprep.subr.bf16.mxu0 %v16854_v33  ;;  %v1553_v10 = vld [vmem:[#allocation6 + $0x2ca8] sm:$0xff]  ;;  %v690_v0 = vld [vmem:[#allocation6 + $0x11b0] sm:$0xff] }
 0x31a   :  { %13398 = vmatpush1.bf16.msra.mxu1 %v17333_v30  ;;  %15526 = vst [vmem:[#allocation9 + $0x18] sm:$0xff] %v17630_v43  ;;  %v2049_v11 = vld [vmem:[#allocation6 + $0x3c28] sm:$0xff]  ;;  %v16982_v17 = vcombine.high %v1537_v8, %v1553_v10  ;;  %v16981_v7 = vcombine.low %v1537_v8, %v1553_v10  ;;  %v194_v8 = vld [vmem:[#allocation6 + $0x230] sm:$0xff] }
 0x31b   :  { %13399 = vmatprep.subr.bf16.mxu1 %v17366_v37  ;;  %v2065_v12 = vld [vmem:[#allocation6 + $0x3ca8] sm:$0xff]  ;;  %v210_v10 = vld [vmem:[#allocation6 + $0x2b0] sm:$0xff] }
 0x31c   :  { %13359 = vmatpush1.bf16.msra.mxu0 %v16853_v44  ;;  %v17494_v18 = vcombine.high %v2049_v11, %v2065_v12  ;;  %v1569_v21 = vld [vmem:[#allocation6 + $0x2d28] sm:$0xff]  ;;  %v17493_v25 = vcombine.low %v2049_v11, %v2065_v12  ;;  %v706_v11 = vld [vmem:[#allocation6 + $0x1230] sm:$0xff] }
 0x31d   :  { %13360 = vmatprep.subr.bf16.mxu0 %v16886_v19  ;;  %v1585_v13 = vld [vmem:[#allocation6 + $0x2da8] sm:$0xff]  ;;  %v722_v12 = vld [vmem:[#allocation6 + $0x12b0] sm:$0xff] }
 0x31e   :  { %13400 = vmatpush1.bf16.msra.mxu1 %v17365_v31  ;;  %v2081_v23 = vld [vmem:[#allocation6 + $0x3d28] sm:$0xff]  ;;  %v17014_v53 = vcombine.high %v1569_v21, %v1585_v13  ;;  %v17013_v33 = vcombine.low %v1569_v21, %v1585_v13  ;;  %v226_v21 = vld [vmem:[#allocation6 + $0x330] sm:$0xff] }
 0x31f   :  { %13401 = vmatprep.subr.bf16.mxu1 %v17398_v22  ;;  %v2097_v24 = vld [vmem:[#allocation6 + $0x3da8] sm:$0xff]  ;;  %v242_v13 = vld [vmem:[#allocation6 + $0x3b0] sm:$0xff] }
 0x320   :  { %13361 = vmatpush1.bf16.msra.mxu0 %v16885_v5  ;;  %v17526_v26 = vcombine.high %v2081_v23, %v2097_v24  ;;  %v1601_v57 = vld [vmem:[#allocation6 + $0x2e28] sm:$0xff]  ;;  %v17525_v34 = vcombine.low %v2081_v23, %v2097_v24  ;;  %v738_v23 = vld [vmem:[#allocation6 + $0x1330] sm:$0xff] }
 0x321   :  { %13362 = vmatprep.subr.bf16.mxu0 %v16918_v56  ;;  %v1617_v54 = vld [vmem:[#allocation6 + $0x2ea8] sm:$0xff]  ;;  %v15576_v56 = vcombine.high %v130_v48, %v146_v50  ;;  %v754_v24 = vld [vmem:[#allocation6 + $0x13b0] sm:$0xff] }
 0x322   :  { %13402 = vmatpush1.bf16.msra.mxu1 %v17397_v55  ;;  %v2113_v35 = vld [vmem:[#allocation6 + $0x3e28] sm:$0xff]  ;;  %v17046_v37 = vcombine.high %v1601_v57, %v1617_v54  ;;  %v17045_v44 = vcombine.low %v1601_v57, %v1617_v54  ;;  %v258_v57 = vld [vmem:[#allocation6 + $0x430] sm:$0xff] }
 0x323   :  { %13403 = vmatprep.subr.bf16.mxu1 %v17430_v60  ;;  %v2129_v30 = vld [vmem:[#allocation6 + $0x3ea8] sm:$0xff]  ;;  %v16088_v60 = vcombine.high %v642_v51, %v658_v52  ;;  %v274_v54 = vld [vmem:[#allocation6 + $0x4b0] sm:$0xff] }
 0x324   :  { %13363 = vmatpush1.bf16.msra.mxu0 %v16917_v3  ;;  %v17558_v38 = vcombine.high %v2113_v35, %v2129_v30  ;;  %v1649_v41 = vld [vmem:[#allocation6 + $0x2fa8] sm:$0xff]  ;;  %v17557_v31 = vcombine.low %v2113_v35, %v2129_v30  ;;  %v15575_v3 = vcombine.low %v130_v48, %v146_v50  ;;  %v770_v35 = vld [vmem:[#allocation6 + $0x1430] sm:$0xff] }
 0x325   :  { %13364 = vmatprep.subr.bf16.mxu0 %v16950_v4  ;;  %v2145_v42 = vld [vmem:[#allocation6 + $0x3f28] sm:$0xff]  ;;  %v17078_v19 = vcombine.high %v1633_v40, %v1649_v41  ;;  %v17077_v5 = vcombine.low %v1633_v40, %v1649_v41  ;;  %v15608_v4 = vcombine.high %v162_v61, %v178_v62  ;;  %v786_v30 = vld [vmem:[#allocation6 + $0x14b0] sm:$0xff] }
 0x326   :  { %13404 = vmatpush1.bf16.msra.mxu1 %v17429_v15  ;;  %v2161_v43 = vld [vmem:[#allocation6 + $0x3fa8] sm:$0xff]  ;;  %v16087_v15 = vcombine.low %v642_v51, %v658_v52  ;;  %v290_v40 = vld [vmem:[#allocation6 + $0x530] sm:$0xff] }
 0x327   :  { %13405 = vmatprep.subr.bf16.mxu1 %v17462_v6  ;;  %v17590_v22 = vcombine.high %v2145_v42, %v2161_v43  ;;  %v17589_v55 = vcombine.low %v2145_v42, %v2161_v43  ;;  %v16120_v6 = vcombine.high %v674_v63, %v690_v0  ;;  %v306_v41 = vld [vmem:[#allocation6 + $0x5b0] sm:$0xff] }
 0x328   :  { %13365 = vmatpush1.bf16.msra.mxu0 %v16949_v14  ;;  %v15607_v14 = vcombine.low %v162_v61, %v178_v62  ;;  %v802_v42 = vld [vmem:[#allocation6 + $0x1530] sm:$0xff] }
 0x329   :  { %13366 = vmatprep.subr.bf16.mxu0 %v16982_v17  ;;  %v15640_v17 = vcombine.high %v194_v8, %v210_v10  ;;  %v818_v43 = vld [vmem:[#allocation6 + $0x15b0] sm:$0xff] }
 0x32a   :  { %13406 = vmatpush1.bf16.msra.mxu1 %v17461_v2  ;;  %v16119_v2 = vcombine.low %v674_v63, %v690_v0  ;;  %v322_v48 = vld [vmem:[#allocation6 + $0x630] sm:$0xff] }
 0x32b   :  { %13407 = vmatprep.subr.bf16.mxu1 %v17494_v18  ;;  %v16152_v18 = vcombine.high %v706_v11, %v722_v12  ;;  %v338_v50 = vld [vmem:[#allocation6 + $0x6b0] sm:$0xff] }
 0x32c   :  { %13367 = vmatpush1.bf16.msra.mxu0 %v16981_v7  ;;  %v15639_v7 = vcombine.low %v194_v8, %v210_v10  ;;  %v834_v51 = vld [vmem:[#allocation6 + $0x1630] sm:$0xff] }
 0x32d   :  { %13368 = vmatprep.subr.bf16.mxu0 %v17014_v53  ;;  %v15672_v53 = vcombine.high %v226_v21, %v242_v13  ;;  %v850_v52 = vld [vmem:[#allocation6 + $0x16b0] sm:$0xff] }
 0x32e   :  { %13408 = vmatpush1.bf16.msra.mxu1 %v17493_v25  ;;  %v16151_v25 = vcombine.low %v706_v11, %v722_v12  ;;  %v16280_v61 = vcombine.high %v834_v51, %v850_v52  ;;  %v354_v62 = vld [vmem:[#allocation6 + $0x730] sm:$0xff]  ;;  %v15767_v11 = vcombine.low %v322_v48, %v338_v50 }
 0x32f   :  { %13409 = vmatprep.subr.bf16.mxu1 %v17526_v26  ;;  %v16184_v26 = vcombine.high %v738_v23, %v754_v24  ;;  %v370_v63 = vld [vmem:[#allocation6 + $0x7b0] sm:$0xff] }
 0x330   :  { %13369 = vmatpush1.bf16.msra.mxu0 %v17013_v33  ;;  %v15671_v33 = vcombine.low %v226_v21, %v242_v13 }
 0x331   :  { %13370 = vmatprep.subr.bf16.mxu0 %v17046_v37  ;;  %v15704_v37 = vcombine.high %v258_v57, %v274_v54 }
 0x332   :  { %13410 = vmatpush1.bf16.msra.mxu1 %v17525_v34  ;;  %v16183_v34 = vcombine.low %v738_v23, %v754_v24  ;;  %v386_v23 = vld [vmem:[#allocation6 + $0x830] sm:$0xff] }
 0x333   :  { %13411 = vmatprep.subr.bf16.mxu1 %v17558_v38  ;;  %v16216_v38 = vcombine.high %v770_v35, %v786_v30  ;;  %v402_v24 = vld [vmem:[#allocation6 + $0x8b0] sm:$0xff] }
 0x334   :  { %13371 = vmatpush1.bf16.msra.mxu0 %v17045_v44  ;;  %v15703_v44 = vcombine.low %v258_v57, %v274_v54  ;;  %v15832_v57 = vcombine.high %v386_v23, %v402_v24 }
 0x335   :  { %13372 = vmatprep.subr.bf16.mxu0 %v17078_v19  ;;  %v15736_v19 = vcombine.high %v290_v40, %v306_v41 }
 0x336   :  { %13412 = vmatpush1.bf16.msra.mxu1 %v17557_v31  ;;  %v16215_v31 = vcombine.low %v770_v35, %v786_v30  ;;  %v418_v35 = vld [vmem:[#allocation6 + $0x930] sm:$0xff] }
 0x337   :  { %13413 = vmatprep.subr.bf16.mxu1 %v17590_v22  ;;  %v16248_v22 = vcombine.high %v802_v42, %v818_v43  ;;  %v434_v30 = vld [vmem:[#allocation6 + $0x9b0] sm:$0xff] }
 0x338   :  { %13373 = vmatpush1.bf16.msra.mxu0 %v17077_v5  ;;  %v15735_v5 = vcombine.low %v290_v40, %v306_v41  ;;  %v15864_v40 = vcombine.high %v418_v35, %v434_v30 }
 0x339   :  { %13424 = vmatprep.subr.bf16.mxu0 %v15576_v56  ;;  %v15768_v56 = vcombine.high %v322_v48, %v338_v50 }
 0x33a   :  { %13414 = vmatpush1.bf16.msra.mxu1 %v17589_v55  ;;  %v16247_v55 = vcombine.low %v802_v42, %v818_v43  ;;  %v450_v42 = vld [vmem:[#allocation6 + $0xa30] sm:$0xff] }
 0x33b   :  { %13465 = vmatprep.subr.bf16.mxu1 %v16088_v60  ;;  %13375 = vmatmul.mubr.bf16.vlgmr.msra.gmra.mrb[44].mxu0 %v17857_v36  ;;  %v466_v43 = vld [vmem:[#allocation6 + $0xab0] sm:$0xff] }
 0x33c   :  { %13425 = vmatpush1.bf16.msra.mxu0 %v15575_v3  ;;  %13456 = vmatprep.mubr.bf16.mxu0 %v17823_v58  ;;  %v15896_v48 = vcombine.high %v450_v42, %v466_v43 }
 0x33d   :  { %13416 = vmatmul.mubr.bf16.vlgmr.msra.gmra.mrb[44].mxu1 %v17861_v39  ;;  %13426 = vmatprep.subr.bf16.mxu0 %v15608_v4  ;;  %v882_v4 = vld [vmem:[#allocation6 + $0x17b0] sm:$0xff] }
 0x33e   :  { %13466 = vmatpush1.bf16.msra.mxu1 %v16087_v15  ;;  %13497 = vmatprep.mubr.bf16.mxu1 %v17827_v59  ;;  %v866_v15 = vld [vmem:[#allocation6 + $0x1730] sm:$0xff] }
 0x33f   :  { %13467 = vmatprep.subr.bf16.mxu1 %v16120_v6  ;;  %v16312_v13 = vcombine.high %v866_v15, %v882_v4 }
 0x340   :  { %13427 = vmatpush1.bf16.msra.mxu0 %v15607_v14 }
 0x341   :  { %13428 = vmatprep.subr.bf16.mxu0 %v15640_v17  ;;  %v16279_v17 = vcombine.low %v834_v51, %v850_v52  ;;  %v482_v51 = vld [vmem:[#allocation6 + $0xb30] sm:$0xff] }
 0x342   :  { %13468 = vmatpush1.bf16.msra.mxu1 %v16119_v2  ;;  %v498_v52 = vld [vmem:[#allocation6 + $0xbb0] sm:$0xff] }
 0x343   :  { %13469 = vmatprep.subr.bf16.mxu1 %v16152_v18  ;;  %v15800_v18 = vcombine.high %v354_v62, %v370_v63 }
 0x344   :  { %13429 = vmatpush1.bf16.msra.mxu0 %v15639_v7  ;;  %v898_v7 = vld [vmem:[#allocation6 + $0x1830] sm:$0xff] }
 0x345   :  { %13430 = vmatprep.subr.bf16.mxu0 %v15672_v53  ;;  %v15799_v53 = vcombine.low %v354_v62, %v370_v63  ;;  %v514_v63 = vld [vmem:[#allocation6 + $0xc30] sm:$0xff] }
 0x346   :  { %13470 = vmatpush1.bf16.msra.mxu1 %v16151_v25  ;;  %v914_v25 = vld [vmem:[#allocation6 + $0x18b0] sm:$0xff] }
 0x347   :  { %13471 = vmatprep.subr.bf16.mxu1 %v16184_v26  ;;  %v16311_v26 = vcombine.low %v866_v15, %v882_v4  ;;  %v16344_v54 = vcombine.high %v898_v7, %v914_v25  ;;  %v1042_v15 = vld [vmem:[#allocation6 + $0x1cb0] sm:$0xff]  ;;  %v15927_v4 = vcombine.low %v482_v51, %v498_v52 }
 0x348   :  { %13431 = vmatpush1.bf16.msra.mxu0 %v15671_v33  ;;  %v930_v33 = vld [vmem:[#allocation6 + $0x1930] sm:$0xff] }
 0x349   :  { %13432 = vmatprep.subr.bf16.mxu0 %v15704_v37  ;;  %v15831_v37 = vcombine.low %v386_v23, %v402_v24 }
 0x34a   :  { %13472 = vmatpush1.bf16.msra.mxu1 %v16183_v34  ;;  %v946_v34 = vld [vmem:[#allocation6 + $0x19b0] sm:$0xff] }
 0x34b   :  { %13473 = vmatprep.subr.bf16.mxu1 %v16216_v38  ;;  %v16343_v38 = vcombine.low %v898_v7, %v914_v25  ;;  %v16376_v41 = vcombine.high %v930_v33, %v946_v34  ;;  %v578_v7 = vld [vmem:[#allocation6 + $0xe30] sm:$0xff] }
 0x34c   :  { %13433 = vmatpush1.bf16.msra.mxu0 %v15703_v44  ;;  %v962_v44 = vld [vmem:[#allocation6 + $0x1a30] sm:$0xff] }
 0x34d   :  { %13434 = vmatprep.subr.bf16.mxu0 %v15736_v19  ;;  %v15863_v19 = vcombine.low %v418_v35, %v434_v30  ;;  %v594_v25 = vld [vmem:[#allocation6 + $0xeb0] sm:$0xff] }
 0x34e   :  { %13474 = vmatpush1.bf16.msra.mxu1 %v16215_v31  ;;  %v13130_v60 = vpop.f32.mrb[32].mxu0  ;;  %v978_v31 = vld [vmem:[#allocation6 + $0x1ab0] sm:$0xff]  ;;  %v16024_v35 = vcombine.high %v578_v7, %v594_v25 }
 0x34f   :  { %13475 = vmatprep.subr.bf16.mxu1 %v16248_v22  ;;  %v13132_v3 = vpop.f32.mrb[33].mxu0  ;;  %v16375_v22 = vcombine.low %v930_v33, %v946_v34  ;;  %v16408_v50 = vcombine.high %v962_v44, %v978_v31  ;;  %v610_v33 = vld [vmem:[#allocation6 + $0xf30] sm:$0xff] }
 0x350   :  { %v13171_v0 = vpop.f32.mrb[32].mxu1  ;;  %v13134_v10 = vpop.f32.mrb[34].mxu0  ;;  %13435 = vmatpush1.bf16.msra.mxu0 %v15735_v5  ;;  %v994_v5 = vld [vmem:[#allocation6 + $0x1b30] sm:$0xff] }
 0x351   :  { %v17977_v6 = vadd.f32 %v13171_v0, %v13130_v60  ;;  %v13173_v8 = vpop.f32.mrb[33].mxu1  ;;  %v13135_v2 = vpop.f32.mrb[35].mxu0  ;;  %13436 = vmatprep.subr.bf16.mxu0 %v15768_v56  ;;  %v15895_v56 = vcombine.low %v450_v42, %v466_v43  ;;  %v16407_v60 = vcombine.low %v962_v44, %v978_v31  ;;  %v530_v0 = vld [vmem:[#allocation6 + $0xcb0] sm:$0xff] }
 0x352   :  { %v17979_v12 = vadd.f32 %v13173_v8, %v13132_v3  ;;  %v13175_v14 = vpop.f32.mrb[34].mxu1  ;;  %13476 = vmatpush1.bf16.msra.mxu1 %v16247_v55  ;;  %v1010_v55 = vld [vmem:[#allocation6 + $0x1bb0] sm:$0xff]  ;;  %v15960_v10 = vcombine.high %v514_v63, %v530_v0 }
 0x353   :  { %v13176_v21 = vpop.f32.mrb[35].mxu1  ;;  %13477 = vmatprep.subr.bf16.mxu1 %v16280_v61  ;;  %v15928_v61 = vcombine.high %v482_v51, %v498_v52  ;;  %v16440_v62 = vcombine.high %v994_v5, %v1010_v55  ;;  %v1026_v3 = vld [vmem:[#allocation6 + $0x1c30] sm:$0xff]  ;;  %v16439_v8 = vcombine.low %v994_v5, %v1010_v55 }
 0x354   :  { %13437 = vmatpush1.bf16.msra.mxu0 %v15767_v11  ;;  %v16472_v11 = vcombine.high %v1026_v3, %v1042_v15  ;;  %v546_v14 = vld [vmem:[#allocation6 + $0xd30] sm:$0xff]  ;;  %v15959_v21 = vcombine.low %v514_v63, %v530_v0 }
 0x355   :  { %13438 = vmatprep.subr.bf16.mxu0 %v15800_v18  ;;  %v562_v2 = vld [vmem:[#allocation6 + $0xdb0] sm:$0xff] }
 0x356   :  { %13478 = vmatpush1.bf16.msra.mxu1 %v16279_v17  ;;  %v1058_v17 = vld [vmem:[#allocation6 + $0x1d30] sm:$0xff]  ;;  %v15992_v23 = vcombine.high %v546_v14, %v562_v2 }
 0x357   :  { %13479 = vmatprep.subr.bf16.mxu1 %v16312_v13  ;;  %v1074_v18 = vld [vmem:[#allocation6 + $0x1db0] sm:$0xff]  ;;  %v16471_v13 = vcombine.low %v1026_v3, %v1042_v15 }
 0x358   :  { %13439 = vmatpush1.bf16.msra.mxu0 %v15799_v53  ;;  %v16504_v24 = vcombine.high %v1058_v17, %v1074_v18  ;;  %v1090_v53 = vld [vmem:[#allocation6 + $0x1e30] sm:$0xff] }
 0x359   :  { %13440 = vmatprep.subr.bf16.mxu0 %v15832_v57  ;;  %v15991_v57 = vcombine.low %v546_v14, %v562_v2  ;;  %v626_v34 = vld [vmem:[#allocation6 + $0xfb0] sm:$0xff] }
 0x35a   :  { %13480 = vmatpush1.bf16.msra.mxu1 %v16311_v26  ;;  %v1106_v26 = vld [vmem:[#allocation6 + $0x1eb0] sm:$0xff]  ;;  %v16056_v42 = vcombine.high %v610_v33, %v626_v34 }
 0x35b   :  { %13481 = vmatprep.subr.bf16.mxu1 %v16344_v54  ;;  %v16503_v54 = vcombine.low %v1058_v17, %v1074_v18  ;;  %v16536_v30 = vcombine.high %v1090_v53, %v1106_v26  ;;  %v1154_v44 = vld [vmem:[#allocation6 + $0x2030] sm:$0xff] }
 0x35c   :  { %13441 = vmatpush1.bf16.msra.mxu0 %v15831_v37  ;;  %v1122_v37 = vld [vmem:[#allocation6 + $0x1f30] sm:$0xff] }
 0x35d   :  { %13442 = vmatprep.subr.bf16.mxu0 %v15864_v40  ;;  %v16023_v40 = vcombine.low %v578_v7, %v594_v25  ;;  %v1170_v31 = vld [vmem:[#allocation6 + $0x20b0] sm:$0xff] }
 0x35e   :  { %13482 = vmatpush1.bf16.msra.mxu1 %v16343_v38  ;;  %v1138_v38 = vld [vmem:[#allocation6 + $0x1fb0] sm:$0xff]  ;;  %v16600_v51 = vcombine.high %v1154_v44, %v1170_v31 }
 0x35f   :  { %13483 = vmatprep.subr.bf16.mxu1 %v16376_v41  ;;  %v16535_v41 = vcombine.low %v1090_v53, %v1106_v26  ;;  %v16568_v43 = vcombine.high %v1122_v37, %v1138_v38  ;;  %v1186_v5 = vld [vmem:[#allocation6 + $0x2130] sm:$0xff] }
 0x360   :  { %13443 = vmatpush1.bf16.msra.mxu0 %v15863_v19  ;;  %v1666_v19 = vld [vmem:[#allocation6 + $0x3030] sm:$0xff] }
 0x361   :  { %13444 = vmatprep.subr.bf16.mxu0 %v15896_v48  ;;  %v16055_v48 = vcombine.low %v610_v33, %v626_v34  ;;  %v1202_v55 = vld [vmem:[#allocation6 + $0x21b0] sm:$0xff] }
 0x362   :  { %13484 = vmatpush1.bf16.msra.mxu1 %v16375_v22  ;;  %v1682_v22 = vld [vmem:[#allocation6 + $0x30b0] sm:$0xff]  ;;  %v16632_v63 = vcombine.high %v1186_v5, %v1202_v55 }
 0x363   :  { %13485 = vmatprep.subr.bf16.mxu1 %v16408_v50  ;;  %v16567_v50 = vcombine.low %v1122_v37, %v1138_v38  ;;  %v17112_v52 = vcombine.high %v1666_v19, %v1682_v22  ;;  %v1218_v3 = vld [vmem:[#allocation6 + $0x2230] sm:$0xff] }
 0x364   :  { %13445 = vmatpush1.bf16.msra.mxu0 %v15895_v56  ;;  %v1698_v56 = vld [vmem:[#allocation6 + $0x3130] sm:$0xff] }
 0x365   :  { %13446 = vmatprep.subr.bf16.mxu0 %v15928_v61  ;;  %v16599_v61 = vcombine.low %v1154_v44, %v1170_v31  ;;  %v1234_v15 = vld [vmem:[#allocation6 + $0x22b0] sm:$0xff] }
 0x366   :  { %13486 = vmatpush1.bf16.msra.mxu1 %v16407_v60  ;;  %v1714_v60 = vld [vmem:[#allocation6 + $0x31b0] sm:$0xff]  ;;  %v16664_v14 = vcombine.high %v1218_v3, %v1234_v15 }
 0x367   :  { %13487 = vmatprep.subr.bf16.mxu1 %v16440_v62  ;;  %v17111_v62 = vcombine.low %v1666_v19, %v1682_v22  ;;  %v17144_v0 = vcombine.high %v1698_v56, %v1714_v60  ;;  %v1250_v17 = vld [vmem:[#allocation6 + $0x2330] sm:$0xff] }
 0x368   :  { %13447 = vmatpush1.bf16.msra.mxu0 %v15927_v4  ;;  %v1730_v4 = vld [vmem:[#allocation6 + $0x3230] sm:$0xff] }
 0x369   :  { %13448 = vmatprep.subr.bf16.mxu0 %v15960_v10  ;;  %v16631_v10 = vcombine.low %v1186_v5, %v1202_v55  ;;  %v1266_v18 = vld [vmem:[#allocation6 + $0x23b0] sm:$0xff] }
 0x36a   :  { %13488 = vmatpush1.bf16.msra.mxu1 %v16439_v8  ;;  %v1746_v8 = vld [vmem:[#allocation6 + $0x32b0] sm:$0xff]  ;;  %v16696_v7 = vcombine.high %v1250_v17, %v1266_v18 }
 0x36b   :  { %13489 = vmatprep.subr.bf16.mxu1 %v16472_v11  ;;  %v17143_v11 = vcombine.low %v1698_v56, %v1714_v60  ;;  %v17176_v2 = vcombine.high %v1730_v4, %v1746_v8  ;;  %v1282_v53 = vld [vmem:[#allocation6 + $0x2430] sm:$0xff] }
 0x36c   :  { %13449 = vmatpush1.bf16.msra.mxu0 %v15959_v21  ;;  %v1762_v21 = vld [vmem:[#allocation6 + $0x3330] sm:$0xff] }
 0x36d   :  { %13450 = vmatprep.subr.bf16.mxu0 %v15992_v23  ;;  %v16663_v23 = vcombine.low %v1218_v3, %v1234_v15  ;;  %v1298_v26 = vld [vmem:[#allocation6 + $0x24b0] sm:$0xff] }
 0x36e   :  { %13490 = vmatpush1.bf16.msra.mxu1 %v16471_v13  ;;  %v1778_v13 = vld [vmem:[#allocation6 + $0x33b0] sm:$0xff]  ;;  %v16728_v33 = vcombine.high %v1282_v53, %v1298_v26 }
 0x36f   :  { %13491 = vmatprep.subr.bf16.mxu1 %v16504_v24  ;;  %v17175_v24 = vcombine.low %v1730_v4, %v1746_v8  ;;  %v17208_v25 = vcombine.high %v1762_v21, %v1778_v13  ;;  %v1314_v37 = vld [vmem:[#allocation6 + $0x2530] sm:$0xff] }
 0x370   :  { %13451 = vmatpush1.bf16.msra.mxu0 %v15991_v57  ;;  %v1794_v57 = vld [vmem:[#allocation6 + $0x3430] sm:$0xff] }
 0x371   :  { %13452 = vmatprep.subr.bf16.mxu0 %v16024_v35  ;;  %v16695_v35 = vcombine.low %v1250_v17, %v1266_v18  ;;  %v1330_v38 = vld [vmem:[#allocation6 + $0x25b0] sm:$0xff] }
 0x372   :  { %13492 = vmatpush1.bf16.msra.mxu1 %v16503_v54  ;;  %v1810_v54 = vld [vmem:[#allocation6 + $0x34b0] sm:$0xff]  ;;  %v16760_v44 = vcombine.high %v1314_v37, %v1330_v38 }
 0x373   :  { %13493 = vmatprep.subr.bf16.mxu1 %v16536_v30  ;;  %v17207_v30 = vcombine.low %v1762_v21, %v1778_v13  ;;  %v17240_v34 = vcombine.high %v1794_v57, %v1810_v54  ;;  %v1346_v19 = vld [vmem:[#allocation6 + $0x2630] sm:$0xff] }
 0x374   :  { %13453 = vmatpush1.bf16.msra.mxu0 %v16023_v40  ;;  %v1826_v40 = vld [vmem:[#allocation6 + $0x3530] sm:$0xff] }
 0x375   :  { %13454 = vmatprep.subr.bf16.mxu0 %v16056_v42  ;;  %v16727_v42 = vcombine.low %v1282_v53, %v1298_v26  ;;  %v1362_v22 = vld [vmem:[#allocation6 + $0x26b0] sm:$0xff] }
 0x376   :  { %13494 = vmatpush1.bf16.msra.mxu1 %v16535_v41  ;;  %v1842_v41 = vld [vmem:[#allocation6 + $0x35b0] sm:$0xff]  ;;  %v16792_v55 = vcombine.high %v1346_v19, %v1362_v22  ;;  %v16791_v17 = vcombine.low %v1346_v19, %v1362_v22 }
 0x377   :  { %13495 = vmatprep.subr.bf16.mxu1 %v16568_v43  ;;  %v17239_v43 = vcombine.low %v1794_v57, %v1810_v54  ;;  %v17272_v31 = vcombine.high %v1826_v40, %v1842_v41  ;;  %v17271_v5 = vcombine.low %v1826_v40, %v1842_v41  ;;  %v1890_v4 = vld [vmem:[#allocation6 + $0x3730] sm:$0xff] }
 0x378   :  { %13455 = vmatpush1.bf16.msra.mxu0 %v16055_v48  ;;  %v1858_v48 = vld [vmem:[#allocation6 + $0x3630] sm:$0xff] }
 0x379   :  { %13506 = vmatprep.subr.bf16.mxu0 %v16600_v51  ;;  %v17985_v51 = vld [vmem:[#allocation8 + $0x8] sm:$0xff]  ;;  %v1906_v8 = vld [vmem:[#allocation6 + $0x37b0] sm:$0xff] }
 0x37a   :  { %13496 = vmatpush1.bf16.msra.mxu1 %v16567_v50  ;;  %v1874_v50 = vld [vmem:[#allocation6 + $0x36b0] sm:$0xff]  ;;  %v15206_v3 = vrot.slane %v17985_v51, %v17886_v28 }
 0x37b   :  { %13547 = vmatprep.subr.bf16.mxu1 %v17112_v52  ;;  %13457 = vmatmul.mubr.bf16.vlgmr.msra.gmra.mrb[48].mxu0 %v17833_v16  ;;  %v16759_v52 = vcombine.low %v1314_v37, %v1330_v38  ;;  %v17304_v60 = vcombine.high %v1858_v48, %v1874_v50  ;;  %v17303_v13 = vcombine.low %v1858_v48, %v1874_v50  ;;  %v1410_v53 = vld [vmem:[#allocation6 + $0x2830] sm:$0xff] }
 0x37c   :  { %13507 = vmatpush1.bf16.msra.mxu0 %v16599_v61  ;;  %13538 = vmatprep.mubr.bf16.mxu0 %v17845_v27  ;;  %v1378_v61 = vld [vmem:[#allocation6 + $0x2730] sm:$0xff] }
 0x37d   :  { %13498 = vmatmul.mubr.bf16.vlgmr.msra.gmra.mrb[48].mxu1 %v17839_v20  ;;  %13508 = vmatprep.subr.bf16.mxu0 %v16632_v63  ;;  %v1922_v57 = vld [vmem:[#allocation6 + $0x3830] sm:$0xff] }
 0x37e   :  { %13548 = vmatpush1.bf16.msra.mxu1 %v17111_v62  ;;  %13579 = vmatprep.mubr.bf16.mxu1 %v17850_v29  ;;  %v1394_v62 = vld [vmem:[#allocation6 + $0x27b0] sm:$0xff] }
 0x37f   :  { %13549 = vmatprep.subr.bf16.mxu1 %v17144_v0  ;;  %v1938_v54 = vld [vmem:[#allocation6 + $0x38b0] sm:$0xff] }
 0x380   :  { %13509 = vmatpush1.bf16.msra.mxu0 %v16631_v10  ;;  %v17368_v40 = vcombine.high %v1922_v57, %v1938_v54  ;;  %v1442_v41 = vld [vmem:[#allocation6 + $0x2930] sm:$0xff]  ;;  %v17367_v22 = vcombine.low %v1922_v57, %v1938_v54 }
 0x381   :  { %13510 = vmatprep.subr.bf16.mxu0 %v16664_v14  ;;  %v15210_v14 = vrot.slane %v17985_v51, %v17891_v32 }
 0x382   :  { %13550 = vmatpush1.bf16.msra.mxu1 %v17143_v11 }
 0x383   :  { %13551 = vmatprep.subr.bf16.mxu1 %v17176_v2 }
 0x384   :  { %13511 = vmatpush1.bf16.msra.mxu0 %v16663_v23  ;;  %v16824_v23 = vcombine.high %v1378_v61, %v1394_v62 }
 0x385   :  { %13512 = vmatprep.subr.bf16.mxu0 %v16696_v7 }
 0x386   :  { %13552 = vmatpush1.bf16.msra.mxu1 %v17175_v24 }
 0x387   :  { %13553 = vmatprep.subr.bf16.mxu1 %v17208_v25  ;;  %v17336_v25 = vcombine.high %v1890_v4, %v1906_v8 }
 0x388   :  { %13513 = vmatpush1.bf16.msra.mxu0 %v16695_v35 }
 0x389   :  { %13514 = vmatprep.subr.bf16.mxu0 %v16728_v33 }
 0x38a   :  { %13554 = vmatpush1.bf16.msra.mxu1 %v17207_v30  ;;  %v16823_v30 = vcombine.low %v1378_v61, %v1394_v62 }
 0x38b   :  { %13555 = vmatprep.subr.bf16.mxu1 %v17240_v34  ;;  %v17335_v34 = vcombine.low %v1890_v4, %v1906_v8  ;;  %v2034_v4 = vld [vmem:[#allocation6 + $0x3bb0] sm:$0xff] }
 0x38c   :  { %13515 = vmatpush1.bf16.msra.mxu0 %v16727_v42  ;;  %v1458_v42 = vld [vmem:[#allocation6 + $0x29b0] sm:$0xff] }
 0x38d   :  { %13516 = vmatprep.subr.bf16.mxu0 %v16760_v44  ;;  %v1970_v44 = vld [vmem:[#allocation6 + $0x39b0] sm:$0xff]  ;;  %v16888_v48 = vcombine.high %v1442_v41, %v1458_v42 }
 0x38e   :  { %13556 = vmatpush1.bf16.msra.mxu1 %v17239_v43  ;;  %v13212_v56 = vpop.f32.mrb[36].mxu0  ;;  %v1954_v43 = vld [vmem:[#allocation6 + $0x3930] sm:$0xff] }
 0x38f   :  { %13557 = vmatprep.subr.bf16.mxu1 %v17272_v31  ;;  %v13213_v63 = vadd.f32 %v13212_v56, %v17977_v6  ;;  %v13214_v15 = vpop.f32.mrb[37].mxu0  ;;  %v17400_v50 = vcombine.high %v1954_v43, %v1970_v44  ;;  %v2002_v56 = vld [vmem:[#allocation6 + $0x3ab0] sm:$0xff]  ;;  %v17399_v61 = vcombine.low %v1954_v43, %v1970_v44 }
 0x390   :  { %v13253_v0 = vpop.f32.mrb[36].mxu1  ;;  %v13215_v10 = vadd.f32 %v13214_v15, %v17979_v12  ;;  %v13216_v2 = vpop.f32.mrb[38].mxu0  ;;  %13517 = vmatpush1.bf16.msra.mxu0 %v16759_v52  ;;  %v1426_v12 = vld [vmem:[#allocation6 + $0x28b0] sm:$0xff] }
 0x391   :  { %v13255_v11 = vpop.f32.mrb[37].mxu1  ;;  %v13254_v18 = vadd.f32 %v13253_v0, %v13213_v63  ;;  %v13217_v6 = vpop.f32.mrb[39].mxu0  ;;  %13518 = vmatprep.subr.bf16.mxu0 %v16792_v55  ;;  %v16856_v37 = vcombine.high %v1410_v53, %v1426_v12  ;;  %v16855_v19 = vcombine.low %v1410_v53, %v1426_v12  ;;  %v1474_v52 = vld [vmem:[#allocation6 + $0x2a30] sm:$0xff] }
 0x392   :  { %v13257_v21 = vpop.f32.mrb[38].mxu1  ;;  %13558 = vmatpush1.bf16.msra.mxu1 %v17271_v5  ;;  %v13256_v24 = vadd.f32 %v13255_v11, %v13215_v10  ;;  %v1490_v5 = vld [vmem:[#allocation6 + $0x2ab0] sm:$0xff] }
 0x393   :  { %v13258_v7 = vpop.f32.mrb[39].mxu1  ;;  %13559 = vmatprep.subr.bf16.mxu1 %v17304_v60  ;;  %v15339_v26 = vadd.f32 %v15206_v3, %v13254_v18  ;;  %v1986_v55 = vld [vmem:[#allocation6 + $0x3a30] sm:$0xff]  ;;  %v16887_v60 = vcombine.low %v1442_v41, %v1458_v42  ;;  %v16920_v62 = vcombine.high %v1474_v52, %v1490_v5  ;;  %v16919_v8 = vcombine.low %v1474_v52, %v1490_v5  ;;  %v131_v5 = vld [vmem:[#allocation6 + $0x38] sm:$0xff] }
 0x394   :  { %v15340_v35 = vadd.f32 %v15210_v14, %v13256_v24  ;;  %13519 = vmatpush1.bf16.msra.mxu0 %v16791_v17  ;;  %v17432_v63 = vcombine.high %v1986_v55, %v2002_v56  ;;  %v1506_v0 = vld [vmem:[#allocation6 + $0x2b30] sm:$0xff]  ;;  %v17431_v10 = vcombine.low %v1986_v55, %v2002_v56  ;;  %v147_v55 = vld [vmem:[#allocation6 + $0xb8] sm:$0xff] }
 0x395   :  { %v15371_v33 = vmax.f32 %v15339_v26, 0.0  ;;  %13520 = vmatprep.subr.bf16.mxu0 %v16824_v23  ;;  %v1522_v3 = vld [vmem:[#allocation6 + $0x2bb0] sm:$0xff]  ;;  %v643_v56 = vld [vmem:[#allocation6 + $0x1038] sm:$0xff] }
 0x396   :  { %13560 = vmatpush1.bf16.msra.mxu1 %v17303_v13  ;;  %v15372_v38 = vmax.f32 %v15340_v35, 0.0  ;;  %v2018_v15 = vld [vmem:[#allocation6 + $0x3b30] sm:$0xff]  ;;  %v16952_v11 = vcombine.high %v1506_v0, %v1522_v3  ;;  %v16951_v6 = vcombine.low %v1506_v0, %v1522_v3  ;;  %v163_v3 = vld [vmem:[#allocation6 + $0x138] sm:$0xff] }
 0x397   :  { %13561 = vmatprep.subr.bf16.mxu1 %v17336_v25  ;;  %v17464_v14 = vcombine.high %v2018_v15, %v2034_v4  ;;  %v1538_v2 = vld [vmem:[#allocation6 + $0x2c30] sm:$0xff]  ;;  %v17463_v13 = vcombine.low %v2018_v15, %v2034_v4  ;;  %v179_v15 = vld [vmem:[#allocation6 + $0x1b8] sm:$0xff] }
 0x398   :  { %v17631_v31 = vpack.c.bf16 %v15372_v38, %v15371_v33  ;;  %13521 = vmatpush1.bf16.msra.mxu0 %v16823_v30  ;;  %v1554_v17 = vld [vmem:[#allocation6 + $0x2cb0] sm:$0xff]  ;;  %v675_v4 = vld [vmem:[#allocation6 + $0x1138] sm:$0xff] }
 0x399   :  { %13522 = vmatprep.subr.bf16.mxu0 %v16856_v37  ;;  %v2050_v18 = vld [vmem:[#allocation6 + $0x3c30] sm:$0xff]  ;;  %v16984_v23 = vcombine.high %v1538_v2, %v1554_v17  ;;  %v16983_v26 = vcombine.low %v1538_v2, %v1554_v17  ;;  %v195_v17 = vld [vmem:[#allocation6 + $0x238] sm:$0xff] }
 0x39a   :  { %13562 = vmatpush1.bf16.msra.mxu1 %v17335_v34  ;;  %15527 = vst [vmem:[#allocation9 + $0x20] sm:$0xff] %v17631_v31  ;;  %v2066_v21 = vld [vmem:[#allocation6 + $0x3cb0] sm:$0xff] }
 0x39b   :  { %13563 = vmatprep.subr.bf16.mxu1 %v17368_v40  ;;  %v17496_v24 = vcombine.high %v2050_v18, %v2066_v21  ;;  %v1570_v7 = vld [vmem:[#allocation6 + $0x2d30] sm:$0xff]  ;;  %v17495_v57 = vcombine.low %v2050_v18, %v2066_v21  ;;  %v211_v18 = vld [vmem:[#allocation6 + $0x2b8] sm:$0xff] }
 0x39c   :  { %13523 = vmatpush1.bf16.msra.mxu0 %v16855_v19  ;;  %v1586_v25 = vld [vmem:[#allocation6 + $0x2db0] sm:$0xff]  ;;  %v707_v21 = vld [vmem:[#allocation6 + $0x1238] sm:$0xff] }
 0x39d   :  { %13524 = vmatprep.subr.bf16.mxu0 %v16888_v48  ;;  %v2082_v53 = vld [vmem:[#allocation6 + $0x3d30] sm:$0xff]  ;;  %v17016_v54 = vcombine.high %v1570_v7, %v1586_v25  ;;  %v17015_v38 = vcombine.low %v1570_v7, %v1586_v25  ;;  %v227_v25 = vld [vmem:[#allocation6 + $0x338] sm:$0xff] }
 0x39e   :  { %13564 = vmatpush1.bf16.msra.mxu1 %v17367_v22  ;;  %v2098_v12 = vld [vmem:[#allocation6 + $0x3db0] sm:$0xff] }
 0x39f   :  { %13565 = vmatprep.subr.bf16.mxu1 %v17400_v50  ;;  %v17528_v35 = vcombine.high %v2082_v53, %v2098_v12  ;;  %v1602_v30 = vld [vmem:[#allocation6 + $0x2e30] sm:$0xff]  ;;  %v17527_v40 = vcombine.low %v2082_v53, %v2098_v12  ;;  %v243_v53 = vld [vmem:[#allocation6 + $0x3b8] sm:$0xff] }
 0x3a0   :  { %13525 = vmatpush1.bf16.msra.mxu0 %v16887_v60  ;;  %v1618_v33 = vld [vmem:[#allocation6 + $0x2eb0] sm:$0xff]  ;;  %v659_v60 = vld [vmem:[#allocation6 + $0x10b8] sm:$0xff] }
 0x3a1   :  { %13526 = vmatprep.subr.bf16.mxu0 %v16920_v62  ;;  %v2114_v34 = vld [vmem:[#allocation6 + $0x3e30] sm:$0xff]  ;;  %v17048_v41 = vcombine.high %v1602_v30, %v1618_v33  ;;  %v17047_v22 = vcombine.low %v1602_v30, %v1618_v33  ;;  %v16090_v0 = vcombine.high %v643_v56, %v659_v60  ;;  %v739_v12 = vld [vmem:[#allocation6 + $0x1338] sm:$0xff] }
 0x3a2   :  { %13566 = vmatpush1.bf16.msra.mxu1 %v17399_v61  ;;  %v2130_v37 = vld [vmem:[#allocation6 + $0x3eb0] sm:$0xff]  ;;  %v259_v33 = vld [vmem:[#allocation6 + $0x438] sm:$0xff] }
 0x3a3   :  { %13567 = vmatprep.subr.bf16.mxu1 %v17432_v63  ;;  %v17560_v42 = vcombine.high %v2114_v34, %v2130_v37  ;;  %v1634_v43 = vld [vmem:[#allocation6 + $0x2f30] sm:$0xff]  ;;  %v17559_v48 = vcombine.low %v2114_v34, %v2130_v37  ;;  %v15578_v63 = vcombine.high %v131_v5, %v147_v55  ;;  %v275_v34 = vld [vmem:[#allocation6 + $0x4b8] sm:$0xff] }
 0x3a4   :  { %13527 = vmatpush1.bf16.msra.mxu0 %v16919_v8  ;;  %v1650_v44 = vld [vmem:[#allocation6 + $0x2fb0] sm:$0xff]  ;;  %v691_v8 = vld [vmem:[#allocation6 + $0x11b8] sm:$0xff] }
 0x3a5   :  { %13528 = vmatprep.subr.bf16.mxu0 %v16952_v11  ;;  %v2146_v31 = vld [vmem:[#allocation6 + $0x3f30] sm:$0xff]  ;;  %v17080_v50 = vcombine.high %v1634_v43, %v1650_v44  ;;  %v17079_v61 = vcombine.low %v1634_v43, %v1650_v44  ;;  %v16089_v11 = vcombine.low %v643_v56, %v659_v60  ;;  %v16122_v2 = vcombine.high %v675_v4, %v691_v8  ;;  %v771_v37 = vld [vmem:[#allocation6 + $0x1438] sm:$0xff] }
 0x3a6   :  { %13568 = vmatpush1.bf16.msra.mxu1 %v17431_v10  ;;  %v2162_v19 = vld [vmem:[#allocation6 + $0x3fb0] sm:$0xff]  ;;  %v15577_v10 = vcombine.low %v131_v5, %v147_v55  ;;  %v291_v44 = vld [vmem:[#allocation6 + $0x538] sm:$0xff] }
 0x3a7   :  { %13569 = vmatprep.subr.bf16.mxu1 %v17464_v14  ;;  %v17592_v52 = vcombine.high %v2146_v31, %v2162_v19  ;;  %v17591_v62 = vcombine.low %v2146_v31, %v2162_v19  ;;  %v15610_v14 = vcombine.high %v163_v3, %v179_v15  ;;  %v307_v31 = vld [vmem:[#allocation6 + $0x5b8] sm:$0xff] }
 0x3a8   :  { %13529 = vmatpush1.bf16.msra.mxu0 %v16951_v6  ;;  %v723_v6 = vld [vmem:[#allocation6 + $0x12b8] sm:$0xff] }
 0x3a9   :  { %13530 = vmatprep.subr.bf16.mxu0 %v16984_v23  ;;  %v16121_v23 = vcombine.low %v675_v4, %v691_v8  ;;  %v16154_v7 = vcombine.high %v707_v21, %v723_v6  ;;  %v803_v19 = vld [vmem:[#allocation6 + $0x1538] sm:$0xff] }
 0x3aa   :  { %13570 = vmatpush1.bf16.msra.mxu1 %v17463_v13  ;;  %v15609_v13 = vcombine.low %v163_v3, %v179_v15  ;;  %v323_v55 = vld [vmem:[#allocation6 + $0x638] sm:$0xff] }
 0x3ab   :  { %13571 = vmatprep.subr.bf16.mxu1 %v17496_v24  ;;  %v15642_v24 = vcombine.high %v195_v17, %v211_v18  ;;  %v339_v56 = vld [vmem:[#allocation6 + $0x6b8] sm:$0xff] }
 0x3ac   :  { %13531 = vmatpush1.bf16.msra.mxu0 %v16983_v26  ;;  %v755_v26 = vld [vmem:[#allocation6 + $0x13b8] sm:$0xff] }
 0x3ad   :  { %13532 = vmatprep.subr.bf16.mxu0 %v17016_v54  ;;  %v16153_v54 = vcombine.low %v707_v21, %v723_v6  ;;  %v16186_v30 = vcombine.high %v739_v12, %v755_v26  ;;  %v835_v60 = vld [vmem:[#allocation6 + $0x1638] sm:$0xff]  ;;  %v15769_v6 = vcombine.low %v323_v55, %v339_v56 }
 0x3ae   :  { %13572 = vmatpush1.bf16.msra.mxu1 %v17495_v57  ;;  %v15641_v57 = vcombine.low %v195_v17, %v211_v18  ;;  %v355_v4 = vld [vmem:[#allocation6 + $0x738] sm:$0xff] }
 0x3af   :  { %13573 = vmatprep.subr.bf16.mxu1 %v17528_v35  ;;  %v15674_v35 = vcombine.high %v227_v25, %v243_v53  ;;  %v371_v8 = vld [vmem:[#allocation6 + $0x7b8] sm:$0xff] }
 0x3b0   :  { %13533 = vmatpush1.bf16.msra.mxu0 %v17015_v38  ;;  %v787_v38 = vld [vmem:[#allocation6 + $0x14b8] sm:$0xff] }
 0x3b1   :  { %13534 = vmatprep.subr.bf16.mxu0 %v17048_v41  ;;  %v16185_v41 = vcombine.low %v739_v12, %v755_v26  ;;  %v16218_v43 = vcombine.high %v771_v37, %v787_v38  ;;  %v387_v26 = vld [vmem:[#allocation6 + $0x838] sm:$0xff] }
 0x3b2   :  { %13574 = vmatpush1.bf16.msra.mxu1 %v17527_v40  ;;  %v15673_v40 = vcombine.low %v227_v25, %v243_v53  ;;  %v15802_v25 = vcombine.high %v355_v4, %v371_v8 }
 0x3b3   :  { %13575 = vmatprep.subr.bf16.mxu1 %v17560_v42  ;;  %v15706_v42 = vcombine.high %v259_v33, %v275_v34 }
 0x3b4   :  { %13535 = vmatpush1.bf16.msra.mxu0 %v17047_v22  ;;  %v819_v22 = vld [vmem:[#allocation6 + $0x15b8] sm:$0xff] }
 0x3b5   :  { %13536 = vmatprep.subr.bf16.mxu0 %v17080_v50  ;;  %v16217_v50 = vcombine.low %v771_v37, %v787_v38  ;;  %v16250_v5 = vcombine.high %v803_v19, %v819_v22  ;;  %v419_v38 = vld [vmem:[#allocation6 + $0x938] sm:$0xff] }
 0x3b6   :  { %13576 = vmatpush1.bf16.msra.mxu1 %v17559_v48  ;;  %v15705_v48 = vcombine.low %v259_v33, %v275_v34 }
 0x3b7   :  { %13577 = vmatprep.subr.bf16.mxu1 %v17592_v52  ;;  %v15738_v52 = vcombine.high %v291_v44, %v307_v31 }
 0x3b8   :  { %13537 = vmatpush1.bf16.msra.mxu0 %v17079_v61  ;;  %v851_v61 = vld [vmem:[#allocation6 + $0x16b8] sm:$0xff] }
 0x3b9   :  { %13588 = vmatprep.subr.bf16.mxu0 %v15578_v63  ;;  %v16249_v63 = vcombine.low %v803_v19, %v819_v22  ;;  %v16282_v15 = vcombine.high %v835_v60, %v851_v61  ;;  %v451_v22 = vld [vmem:[#allocation6 + $0xa38] sm:$0xff] }
 0x3ba   :  { %13578 = vmatpush1.bf16.msra.mxu1 %v17591_v62  ;;  %v15737_v62 = vcombine.low %v291_v44, %v307_v31 }
 0x3bb   :  { %13629 = vmatprep.subr.bf16.mxu1 %v16090_v0  ;;  %13539 = vmatmul.mubr.bf16.vlgmr.msra.gmra.mrb[52].mxu0 %v17857_v36  ;;  %v15770_v0 = vcombine.high %v323_v55, %v339_v56 }
 0x3bc   :  { %13589 = vmatpush1.bf16.msra.mxu0 %v15577_v10  ;;  %13620 = vmatprep.mubr.bf16.mxu0 %v17823_v58 }
 0x3bd   :  { %13580 = vmatmul.mubr.bf16.vlgmr.msra.gmra.mrb[52].mxu1 %v17861_v39  ;;  %13590 = vmatprep.subr.bf16.mxu0 %v15610_v14  ;;  %v867_v14 = vld [vmem:[#allocation6 + $0x1738] sm:$0xff] }
 0x3be   :  { %13630 = vmatpush1.bf16.msra.mxu1 %v16089_v11  ;;  %13661 = vmatprep.mubr.bf16.mxu1 %v17827_v59 }
 0x3bf   :  { %13631 = vmatprep.subr.bf16.mxu1 %v16122_v2  ;;  %v883_v2 = vld [vmem:[#allocation6 + $0x17b8] sm:$0xff] }
 0x3c0   :  { %13591 = vmatpush1.bf16.msra.mxu0 %v15609_v13  ;;  %v16314_v12 = vcombine.high %v867_v14, %v883_v2  ;;  %v16313_v33 = vcombine.low %v867_v14, %v883_v2  ;;  %v1027_v14 = vld [vmem:[#allocation6 + $0x1c38] sm:$0xff] }
 0x3c1   :  { %13592 = vmatprep.subr.bf16.mxu0 %v15642_v24  ;;  %v1043_v2 = vld [vmem:[#allocation6 + $0x1cb8] sm:$0xff] }
 0x3c2   :  { %13632 = vmatpush1.bf16.msra.mxu1 %v16121_v23 }
 0x3c3   :  { %13633 = vmatprep.subr.bf16.mxu1 %v16154_v7  ;;  %v16281_v7 = vcombine.low %v835_v60, %v851_v61  ;;  %v483_v61 = vld [vmem:[#allocation6 + $0xb38] sm:$0xff] }
 0x3c4   :  { %13593 = vmatpush1.bf16.msra.mxu0 %v15641_v57  ;;  %v403_v57 = vld [vmem:[#allocation6 + $0x8b8] sm:$0xff] }
 0x3c5   :  { %13594 = vmatprep.subr.bf16.mxu0 %v15674_v35  ;;  %v915_v35 = vld [vmem:[#allocation6 + $0x18b8] sm:$0xff]  ;;  %v15834_v34 = vcombine.high %v387_v26, %v403_v57 }
 0x3c6   :  { %13634 = vmatpush1.bf16.msra.mxu1 %v16153_v54  ;;  %v899_v54 = vld [vmem:[#allocation6 + $0x1838] sm:$0xff] }
 0x3c7   :  { %13635 = vmatprep.subr.bf16.mxu1 %v16186_v30  ;;  %v15801_v30 = vcombine.low %v355_v4, %v371_v8  ;;  %v16346_v37 = vcombine.high %v899_v54, %v915_v35  ;;  %v16345_v44 = vcombine.low %v899_v54, %v915_v35  ;;  %v579_v35 = vld [vmem:[#allocation6 + $0xe38] sm:$0xff] }
 0x3c8   :  { %13595 = vmatpush1.bf16.msra.mxu0 %v15673_v40  ;;  %v435_v40 = vld [vmem:[#allocation6 + $0x9b8] sm:$0xff] }
 0x3c9   :  { %13596 = vmatprep.subr.bf16.mxu0 %v15706_v42  ;;  %v947_v42 = vld [vmem:[#allocation6 + $0x19b8] sm:$0xff]  ;;  %v15866_v31 = vcombine.high %v419_v38, %v435_v40 }
 0x3ca   :  { %13636 = vmatpush1.bf16.msra.mxu1 %v16185_v41  ;;  %v931_v41 = vld [vmem:[#allocation6 + $0x1938] sm:$0xff] }
 0x3cb   :  { %13637 = vmatprep.subr.bf16.mxu1 %v16218_v43  ;;  %v15833_v43 = vcombine.low %v387_v26, %v403_v57  ;;  %v16378_v19 = vcombine.high %v931_v41, %v947_v42  ;;  %v16377_v55 = vcombine.low %v931_v41, %v947_v42  ;;  %v16473_v26 = vcombine.low %v1027_v14, %v1043_v2  ;;  %v611_v42 = vld [vmem:[#allocation6 + $0xf38] sm:$0xff] }
 0x3cc   :  { %13597 = vmatpush1.bf16.msra.mxu0 %v15705_v48  ;;  %v467_v48 = vld [vmem:[#allocation6 + $0xab8] sm:$0xff] }
 0x3cd   :  { %13598 = vmatprep.subr.bf16.mxu0 %v15738_v52  ;;  %v979_v52 = vld [vmem:[#allocation6 + $0x1ab8] sm:$0xff]  ;;  %v15898_v56 = vcombine.high %v451_v22, %v467_v48 }
 0x3ce   :  { %13638 = vmatpush1.bf16.msra.mxu1 %v16217_v50  ;;  %v13294_v3 = vpop.f32.mrb[40].mxu0  ;;  %v963_v50 = vld [vmem:[#allocation6 + $0x1a38] sm:$0xff] }
 0x3cf   :  { %13639 = vmatprep.subr.bf16.mxu1 %v16250_v5  ;;  %v13296_v11 = vpop.f32.mrb[41].mxu0  ;;  %v15865_v5 = vcombine.low %v419_v38, %v435_v40  ;;  %v16410_v60 = vcombine.high %v963_v50, %v979_v52 }
 0x3d0   :  { %v13335_v10 = vpop.f32.mrb[40].mxu1  ;;  %v13298_v21 = vpop.f32.mrb[42].mxu0  ;;  %13599 = vmatpush1.bf16.msra.mxu0 %v15737_v62  ;;  %v499_v62 = vld [vmem:[#allocation6 + $0xbb8] sm:$0xff] }
 0x3d1   :  { %v17997_v17 = vadd.f32 %v13335_v10, %v13294_v3  ;;  %v13337_v18 = vpop.f32.mrb[41].mxu1  ;;  %v13299_v24 = vpop.f32.mrb[43].mxu0  ;;  %13600 = vmatprep.subr.bf16.mxu0 %v15770_v0  ;;  %v1011_v0 = vld [vmem:[#allocation6 + $0x1bb8] sm:$0xff]  ;;  %v15897_v3 = vcombine.low %v451_v22, %v467_v48  ;;  %v15930_v4 = vcombine.high %v483_v61, %v499_v62 }
 0x3d2   :  { %v17999_v13 = vadd.f32 %v13337_v18, %v13296_v11  ;;  %v13339_v23 = vpop.f32.mrb[42].mxu1  ;;  %13640 = vmatpush1.bf16.msra.mxu1 %v16249_v63  ;;  %v995_v63 = vld [vmem:[#allocation6 + $0x1b38] sm:$0xff]  ;;  %v15929_v18 = vcombine.low %v483_v61, %v499_v62 }
 0x3d3   :  { %v13340_v53 = vpop.f32.mrb[43].mxu1  ;;  %13641 = vmatprep.subr.bf16.mxu1 %v16282_v15  ;;  %v16409_v15 = vcombine.low %v963_v50, %v979_v52  ;;  %v16442_v8 = vcombine.high %v995_v63, %v1011_v0  ;;  %v515_v10 = vld [vmem:[#allocation6 + $0xc38] sm:$0xff]  ;;  %v16441_v21 = vcombine.low %v995_v63, %v1011_v0  ;;  %v16474_v23 = vcombine.high %v1027_v14, %v1043_v2 }
 0x3d4   :  { %13601 = vmatpush1.bf16.msra.mxu0 %v15769_v6  ;;  %v531_v11 = vld [vmem:[#allocation6 + $0xcb8] sm:$0xff] }
 0x3d5   :  { %13602 = vmatprep.subr.bf16.mxu0 %v15802_v25  ;;  %v15962_v6 = vcombine.high %v515_v10, %v531_v11  ;;  %v547_v24 = vld [vmem:[#allocation6 + $0xd38] sm:$0xff] }
 0x3d6   :  { %13642 = vmatpush1.bf16.msra.mxu1 %v16281_v7  ;;  %v563_v7 = vld [vmem:[#allocation6 + $0xdb8] sm:$0xff] }
 0x3d7   :  { %13643 = vmatprep.subr.bf16.mxu1 %v16314_v12  ;;  %v1059_v25 = vld [vmem:[#allocation6 + $0x1d38] sm:$0xff]  ;;  %v15961_v12 = vcombine.low %v515_v10, %v531_v11  ;;  %v15994_v57 = vcombine.high %v547_v24, %v563_v7 }
 0x3d8   :  { %13603 = vmatpush1.bf16.msra.mxu0 %v15801_v30  ;;  %v1075_v53 = vld [vmem:[#allocation6 + $0x1db8] sm:$0xff] }
 0x3d9   :  { %13604 = vmatprep.subr.bf16.mxu0 %v15834_v34  ;;  %v16506_v54 = vcombine.high %v1059_v25, %v1075_v53  ;;  %v595_v30 = vld [vmem:[#allocation6 + $0xeb8] sm:$0xff]  ;;  %v16505_v38 = vcombine.low %v1059_v25, %v1075_v53 }
 0x3da   :  { %13644 = vmatpush1.bf16.msra.mxu1 %v16313_v33  ;;  %v1091_v33 = vld [vmem:[#allocation6 + $0x1e38] sm:$0xff]  ;;  %v16026_v40 = vcombine.high %v579_v35, %v595_v30 }
 0x3db   :  { %13645 = vmatprep.subr.bf16.mxu1 %v16346_v37  ;;  %v1107_v34 = vld [vmem:[#allocation6 + $0x1eb8] sm:$0xff]  ;;  %v15993_v37 = vcombine.low %v547_v24, %v563_v7 }
 0x3dc   :  { %13605 = vmatpush1.bf16.msra.mxu0 %v15833_v43  ;;  %v16538_v41 = vcombine.high %v1091_v33, %v1107_v34  ;;  %v627_v43 = vld [vmem:[#allocation6 + $0xfb8] sm:$0xff]  ;;  %v16537_v22 = vcombine.low %v1091_v33, %v1107_v34 }
 0x3dd   :  { %13606 = vmatprep.subr.bf16.mxu0 %v15866_v31  ;;  %v1139_v31 = vld [vmem:[#allocation6 + $0x1fb8] sm:$0xff]  ;;  %v16058_v48 = vcombine.high %v611_v42, %v627_v43 }
 0x3de   :  { %13646 = vmatpush1.bf16.msra.mxu1 %v16345_v44  ;;  %v1123_v44 = vld [vmem:[#allocation6 + $0x1f38] sm:$0xff] }
 0x3df   :  { %13647 = vmatprep.subr.bf16.mxu1 %v16378_v19  ;;  %v16025_v19 = vcombine.low %v579_v35, %v595_v30  ;;  %v16570_v50 = vcombine.high %v1123_v44, %v1139_v31  ;;  %v1155_v52 = vld [vmem:[#allocation6 + $0x2038] sm:$0xff]  ;;  %v16569_v61 = vcombine.low %v1123_v44, %v1139_v31 }
 0x3e0   :  { %13607 = vmatpush1.bf16.msra.mxu0 %v15865_v5  ;;  %v1171_v5 = vld [vmem:[#allocation6 + $0x20b8] sm:$0xff] }
 0x3e1   :  { %13608 = vmatprep.subr.bf16.mxu0 %v15898_v56  ;;  %v1683_v56 = vld [vmem:[#allocation6 + $0x30b8] sm:$0xff]  ;;  %v16602_v62 = vcombine.high %v1155_v52, %v1171_v5 }
 0x3e2   :  { %13648 = vmatpush1.bf16.msra.mxu1 %v16377_v55  ;;  %v1667_v55 = vld [vmem:[#allocation6 + $0x3038] sm:$0xff] }
 0x3e3   :  { %13649 = vmatprep.subr.bf16.mxu1 %v16410_v60  ;;  %v16057_v60 = vcombine.low %v611_v42, %v627_v43  ;;  %v17114_v63 = vcombine.high %v1667_v55, %v1683_v56  ;;  %v1187_v0 = vld [vmem:[#allocation6 + $0x2138] sm:$0xff]  ;;  %v17113_v10 = vcombine.low %v1667_v55, %v1683_v56 }
 0x3e4   :  { %13609 = vmatpush1.bf16.msra.mxu0 %v15897_v3  ;;  %v1203_v3 = vld [vmem:[#allocation6 + $0x21b8] sm:$0xff] }
 0x3e5   :  { %13610 = vmatprep.subr.bf16.mxu0 %v15930_v4  ;;  %v1715_v4 = vld [vmem:[#allocation6 + $0x31b8] sm:$0xff]  ;;  %v16634_v11 = vcombine.high %v1187_v0, %v1203_v3 }
 0x3e6   :  { %13650 = vmatpush1.bf16.msra.mxu1 %v16409_v15  ;;  %v1699_v15 = vld [vmem:[#allocation6 + $0x3138] sm:$0xff] }
 0x3e7   :  { %13651 = vmatprep.subr.bf16.mxu1 %v16442_v8  ;;  %v16601_v8 = vcombine.low %v1155_v52, %v1171_v5  ;;  %v17146_v14 = vcombine.high %v1699_v15, %v1715_v4  ;;  %v1219_v2 = vld [vmem:[#allocation6 + $0x2238] sm:$0xff]  ;;  %v17145_v24 = vcombine.low %v1699_v15, %v1715_v4 }
 0x3e8   :  { %13611 = vmatpush1.bf16.msra.mxu0 %v15929_v18  ;;  %v1235_v18 = vld [vmem:[#allocation6 + $0x22b8] sm:$0xff] }
 0x3e9   :  { %13612 = vmatprep.subr.bf16.mxu0 %v15962_v6  ;;  %v1747_v6 = vld [vmem:[#allocation6 + $0x32b8] sm:$0xff]  ;;  %v16666_v7 = vcombine.high %v1219_v2, %v1235_v18 }
 0x3ea   :  { %13652 = vmatpush1.bf16.msra.mxu1 %v16441_v21  ;;  %v1731_v21 = vld [vmem:[#allocation6 + $0x3238] sm:$0xff] }
 0x3eb   :  { %13653 = vmatprep.subr.bf16.mxu1 %v16474_v23  ;;  %v16633_v23 = vcombine.low %v1187_v0, %v1203_v3  ;;  %v17178_v25 = vcombine.high %v1731_v21, %v1747_v6  ;;  %v1251_v53 = vld [vmem:[#allocation6 + $0x2338] sm:$0xff]  ;;  %v17177_v35 = vcombine.low %v1731_v21, %v1747_v6 }
 0x3ec   :  { %13613 = vmatpush1.bf16.msra.mxu0 %v15961_v12  ;;  %v1267_v12 = vld [vmem:[#allocation6 + $0x23b8] sm:$0xff] }
 0x3ed   :  { %13614 = vmatprep.subr.bf16.mxu0 %v15994_v57  ;;  %v1779_v57 = vld [vmem:[#allocation6 + $0x33b8] sm:$0xff]  ;;  %v16698_v30 = vcombine.high %v1251_v53, %v1267_v12 }
 0x3ee   :  { %13654 = vmatpush1.bf16.msra.mxu1 %v16473_v26  ;;  %v1763_v26 = vld [vmem:[#allocation6 + $0x3338] sm:$0xff] }
 0x3ef   :  { %13655 = vmatprep.subr.bf16.mxu1 %v16506_v54  ;;  %v16665_v54 = vcombine.low %v1219_v2, %v1235_v18  ;;  %v17210_v33 = vcombine.high %v1763_v26, %v1779_v57  ;;  %v1283_v34 = vld [vmem:[#allocation6 + $0x2438] sm:$0xff]  ;;  %v17209_v42 = vcombine.low %v1763_v26, %v1779_v57  ;;  %v15214_v2 = vrot.slane %v17985_v51, %v17912_v9 }
 0x3f0   :  { %13615 = vmatpush1.bf16.msra.mxu0 %v15993_v37  ;;  %v1299_v37 = vld [vmem:[#allocation6 + $0x24b8] sm:$0xff] }
 0x3f1   :  { %13616 = vmatprep.subr.bf16.mxu0 %v16026_v40  ;;  %v1811_v40 = vld [vmem:[#allocation6 + $0x34b8] sm:$0xff]  ;;  %v16730_v43 = vcombine.high %v1283_v34, %v1299_v37 }
 0x3f2   :  { %13656 = vmatpush1.bf16.msra.mxu1 %v16505_v38  ;;  %v1795_v38 = vld [vmem:[#allocation6 + $0x3438] sm:$0xff] }
 0x3f3   :  { %13657 = vmatprep.subr.bf16.mxu1 %v16538_v41  ;;  %v16697_v41 = vcombine.low %v1251_v53, %v1267_v12  ;;  %v17242_v44 = vcombine.high %v1795_v38, %v1811_v40  ;;  %v1315_v31 = vld [vmem:[#allocation6 + $0x2538] sm:$0xff]  ;;  %v17241_v52 = vcombine.low %v1795_v38, %v1811_v40 }
 0x3f4   :  { %13617 = vmatpush1.bf16.msra.mxu0 %v16025_v19  ;;  %v1331_v19 = vld [vmem:[#allocation6 + $0x25b8] sm:$0xff] }
 0x3f5   :  { %13618 = vmatprep.subr.bf16.mxu0 %v16058_v48  ;;  %v1843_v48 = vld [vmem:[#allocation6 + $0x35b8] sm:$0xff]  ;;  %v16762_v5 = vcombine.high %v1315_v31, %v1331_v19 }
 0x3f6   :  { %13658 = vmatpush1.bf16.msra.mxu1 %v16537_v22  ;;  %v1827_v22 = vld [vmem:[#allocation6 + $0x3538] sm:$0xff] }
 0x3f7   :  { %13659 = vmatprep.subr.bf16.mxu1 %v16570_v50  ;;  %v16729_v50 = vcombine.low %v1283_v34, %v1299_v37  ;;  %v17274_v55 = vcombine.high %v1827_v22, %v1843_v48  ;;  %v1347_v56 = vld [vmem:[#allocation6 + $0x2638] sm:$0xff]  ;;  %v17273_v0 = vcombine.low %v1827_v22, %v1843_v48 }
 0x3f8   :  { %13619 = vmatpush1.bf16.msra.mxu0 %v16057_v60  ;;  %v1363_v60 = vld [vmem:[#allocation6 + $0x26b8] sm:$0xff] }
 0x3f9   :  { %13670 = vmatprep.subr.bf16.mxu0 %v16602_v62  ;;  %v1875_v62 = vld [vmem:[#allocation6 + $0x36b8] sm:$0xff]  ;;  %v16794_v3 = vcombine.high %v1347_v56, %v1363_v60  ;;  %v16793_v53 = vcombine.low %v1347_v56, %v1363_v60 }
 0x3fa   :  { %13660 = vmatpush1.bf16.msra.mxu1 %v16569_v61  ;;  %v1859_v61 = vld [vmem:[#allocation6 + $0x3638] sm:$0xff] }
 0x3fb   :  { %13711 = vmatprep.subr.bf16.mxu1 %v17114_v63  ;;  %13621 = vmatmul.mubr.bf16.vlgmr.msra.gmra.mrb[56].mxu0 %v17833_v16  ;;  %v16761_v63 = vcombine.low %v1315_v31, %v1331_v19  ;;  %v17306_v4 = vcombine.high %v1859_v61, %v1875_v62  ;;  %v1891_v21 = vld [vmem:[#allocation6 + $0x3738] sm:$0xff]  ;;  %v17305_v57 = vcombine.low %v1859_v61, %v1875_v62 }
 0x3fc   :  { %13671 = vmatpush1.bf16.msra.mxu0 %v16601_v8  ;;  %13702 = vmatprep.mubr.bf16.mxu0 %v17845_v27  ;;  %v1379_v8 = vld [vmem:[#allocation6 + $0x2738] sm:$0xff] }
 0x3fd   :  { %13662 = vmatmul.mubr.bf16.vlgmr.msra.gmra.mrb[56].mxu1 %v17839_v20  ;;  %13672 = vmatprep.subr.bf16.mxu0 %v16634_v11  ;;  %v1907_v6 = vld [vmem:[#allocation6 + $0x37b8] sm:$0xff] }
 0x3fe   :  { %13712 = vmatpush1.bf16.msra.mxu1 %v17113_v10  ;;  %13743 = vmatprep.mubr.bf16.mxu1 %v17850_v29  ;;  %v1395_v10 = vld [vmem:[#allocation6 + $0x27b8] sm:$0xff] }
 0x3ff   :  { %13713 = vmatprep.subr.bf16.mxu1 %v17146_v14  ;;  %v1411_v34 = vld [vmem:[#allocation6 + $0x2838] sm:$0xff] }
 0x400   :  { %13673 = vmatpush1.bf16.msra.mxu0 %v16633_v23  ;;  %v1923_v38 = vld [vmem:[#allocation6 + $0x3838] sm:$0xff] }
 0x401   :  { %13674 = vmatprep.subr.bf16.mxu0 %v16666_v7  ;;  %v15218_v7 = vrot.slane %v17985_v51, %v17915_v1  ;;  %v1939_v40 = vld [vmem:[#allocation6 + $0x38b8] sm:$0xff] }
 0x402   :  { %13714 = vmatpush1.bf16.msra.mxu1 %v17145_v24  ;;  %v17370_v19 = vcombine.high %v1923_v38, %v1939_v40  ;;  %v1443_v22 = vld [vmem:[#allocation6 + $0x2938] sm:$0xff]  ;;  %v17369_v56 = vcombine.low %v1923_v38, %v1939_v40 }
 0x403   :  { %13715 = vmatprep.subr.bf16.mxu1 %v17178_v25  ;;  %v1459_v48 = vld [vmem:[#allocation6 + $0x29b8] sm:$0xff] }
 0x404   :  { %13675 = vmatpush1.bf16.msra.mxu0 %v16665_v54  ;;  %v16826_v54 = vcombine.high %v1379_v8, %v1395_v10  ;;  %v16890_v60 = vcombine.high %v1443_v22, %v1459_v48  ;;  %v1475_v62 = vld [vmem:[#allocation6 + $0x2a38] sm:$0xff] }
 0x405   :  { %13676 = vmatprep.subr.bf16.mxu0 %v16698_v30 }
 0x406   :  { %13716 = vmatpush1.bf16.msra.mxu1 %v17177_v35 }
 0x407   :  { %13717 = vmatprep.subr.bf16.mxu1 %v17210_v33  ;;  %v17338_v33 = vcombine.high %v1891_v21, %v1907_v6 }
 0x408   :  { %13677 = vmatpush1.bf16.msra.mxu0 %v16697_v41  ;;  %v16825_v41 = vcombine.low %v1379_v8, %v1395_v10 }
 0x409   :  { %13678 = vmatprep.subr.bf16.mxu0 %v16730_v43  ;;  %v17337_v43 = vcombine.low %v1891_v21, %v1907_v6 }
 0x40a   :  { %13718 = vmatpush1.bf16.msra.mxu1 %v17209_v42 }
 0x40b   :  { %13719 = vmatprep.subr.bf16.mxu1 %v17242_v44 }
 0x40c   :  { %13679 = vmatpush1.bf16.msra.mxu0 %v16729_v50  ;;  %v1955_v50 = vld [vmem:[#allocation6 + $0x3938] sm:$0xff] }
 0x40d   :  { %13680 = vmatprep.subr.bf16.mxu0 %v16762_v5 }
 0x40e   :  { %13720 = vmatpush1.bf16.msra.mxu1 %v17241_v52  ;;  %v13376_v15 = vpop.f32.mrb[44].mxu0  ;;  %v1971_v52 = vld [vmem:[#allocation6 + $0x39b8] sm:$0xff] }
 0x40f   :  { %13721 = vmatprep.subr.bf16.mxu1 %v17274_v55  ;;  %v13377_v11 = vadd.f32 %v13376_v15, %v17997_v17  ;;  %v13378_v18 = vpop.f32.mrb[45].mxu0  ;;  %v17402_v61 = vcombine.high %v1955_v50, %v1971_v52  ;;  %v16889_v15 = vcombine.low %v1443_v22, %v1459_v48  ;;  %v1635_v48 = vld [vmem:[#allocation6 + $0x2f38] sm:$0xff] }
 0x410   :  { %v13417_v14 = vpop.f32.mrb[44].mxu1  ;;  %v13379_v23 = vadd.f32 %v13378_v18, %v17999_v13  ;;  %v13380_v25 = vpop.f32.mrb[46].mxu0  ;;  %13681 = vmatpush1.bf16.msra.mxu0 %v16761_v63  ;;  %v1427_v13 = vld [vmem:[#allocation6 + $0x28b8] sm:$0xff] }
 0x411   :  { %v13419_v24 = vpop.f32.mrb[45].mxu1  ;;  %v13418_v12 = vadd.f32 %v13417_v14, %v13377_v11  ;;  %v13381_v17 = vpop.f32.mrb[47].mxu0  ;;  %13682 = vmatprep.subr.bf16.mxu0 %v16794_v3  ;;  %v16858_v44 = vcombine.high %v1411_v34, %v1427_v13  ;;  %v16857_v55 = vcombine.low %v1411_v34, %v1427_v13  ;;  %v1491_v63 = vld [vmem:[#allocation6 + $0x2ab8] sm:$0xff] }
 0x412   :  { %v13421_v26 = vpop.f32.mrb[46].mxu1  ;;  %13722 = vmatpush1.bf16.msra.mxu1 %v17273_v0  ;;  %v13420_v35 = vadd.f32 %v13419_v24, %v13379_v23  ;;  %v1987_v0 = vld [vmem:[#allocation6 + $0x3a38] sm:$0xff]  ;;  %v16922_v8 = vcombine.high %v1475_v62, %v1491_v63  ;;  %v16921_v21 = vcombine.low %v1475_v62, %v1491_v63  ;;  %v132_v62 = vld [vmem:[#allocation6 + $0x40] sm:$0xff] }
 0x413   :  { %v13422_v30 = vpop.f32.mrb[47].mxu1  ;;  %13723 = vmatprep.subr.bf16.mxu1 %v17306_v4  ;;  %v15341_v37 = vadd.f32 %v15214_v2, %v13418_v12  ;;  %v2003_v3 = vld [vmem:[#allocation6 + $0x3ab8] sm:$0xff]  ;;  %v17401_v4 = vcombine.low %v1955_v50, %v1971_v52  ;;  %v148_v63 = vld [vmem:[#allocation6 + $0xc0] sm:$0xff] }
 0x414   :  { %v15342_v51 = vadd.f32 %v15218_v7, %v13420_v35  ;;  %13683 = vmatpush1.bf16.msra.mxu0 %v16793_v53  ;;  %v17434_v10 = vcombine.high %v1987_v0, %v2003_v3  ;;  %v1507_v11 = vld [vmem:[#allocation6 + $0x2b38] sm:$0xff]  ;;  %v17433_v6 = vcombine.low %v1987_v0, %v2003_v3  ;;  %v644_v0 = vld [vmem:[#allocation6 + $0x1040] sm:$0xff] }
 0x415   :  { %v15373_v42 = vmax.f32 %v15341_v37, 0.0  ;;  %13684 = vmatprep.subr.bf16.mxu0 %v16826_v54  ;;  %v1523_v14 = vld [vmem:[#allocation6 + $0x2bb8] sm:$0xff]  ;;  %v660_v3 = vld [vmem:[#allocation6 + $0x10c0] sm:$0xff] }
 0x416   :  { %13724 = vmatpush1.bf16.msra.mxu1 %v17305_v57  ;;  %v15374_v31 = vmax.f32 %v15342_v51, 0.0  ;;  %v2019_v2 = vld [vmem:[#allocation6 + $0x3b38] sm:$0xff]  ;;  %v16954_v23 = vcombine.high %v1507_v11, %v1523_v14  ;;  %v16953_v26 = vcombine.low %v1507_v11, %v1523_v14  ;;  %v164_v11 = vld [vmem:[#allocation6 + $0x140] sm:$0xff] }
 0x417   :  { %13725 = vmatprep.subr.bf16.mxu1 %v17338_v33  ;;  %v2035_v18 = vld [vmem:[#allocation6 + $0x3bb8] sm:$0xff]  ;;  %v180_v14 = vld [vmem:[#allocation6 + $0x1c0] sm:$0xff] }
 0x418   :  { %v17632_v5 = vpack.c.bf16 %v15374_v31, %v15373_v42  ;;  %13685 = vmatpush1.bf16.msra.mxu0 %v16825_v41  ;;  %v17466_v24 = vcombine.high %v2019_v2, %v2035_v18  ;;  %v1539_v7 = vld [vmem:[#allocation6 + $0x2c38] sm:$0xff]  ;;  %v17465_v17 = vcombine.low %v2019_v2, %v2035_v18  ;;  %v676_v2 = vld [vmem:[#allocation6 + $0x1140] sm:$0xff] }
 0x419   :  { %13686 = vmatprep.subr.bf16.mxu0 %v16858_v44  ;;  %v1555_v25 = vld [vmem:[#allocation6 + $0x2cb8] sm:$0xff]  ;;  %v692_v18 = vld [vmem:[#allocation6 + $0x11c0] sm:$0xff] }
 0x41a   :  { %13726 = vmatpush1.bf16.msra.mxu1 %v17337_v43  ;;  %15528 = vst [vmem:[#allocation9 + $0x28] sm:$0xff] %v17632_v5  ;;  %v2051_v53 = vld [vmem:[#allocation6 + $0x3c38] sm:$0xff]  ;;  %v16986_v57 = vcombine.high %v1539_v7, %v1555_v25  ;;  %v16985_v13 = vcombine.low %v1539_v7, %v1555_v25  ;;  %v196_v7 = vld [vmem:[#allocation6 + $0x240] sm:$0xff] }
 0x41b   :  { %13727 = vmatprep.subr.bf16.mxu1 %v17370_v19  ;;  %v2067_v12 = vld [vmem:[#allocation6 + $0x3cb8] sm:$0xff]  ;;  %v212_v25 = vld [vmem:[#allocation6 + $0x2c0] sm:$0xff] }
 0x41c   :  { %13687 = vmatpush1.bf16.msra.mxu0 %v16857_v55  ;;  %v17498_v54 = vcombine.high %v2051_v53, %v2067_v12  ;;  %v1571_v35 = vld [vmem:[#allocation6 + $0x2d38] sm:$0xff]  ;;  %v17497_v37 = vcombine.low %v2051_v53, %v2067_v12  ;;  %v708_v53 = vld [vmem:[#allocation6 + $0x1240] sm:$0xff] }
 0x41d   :  { %13688 = vmatprep.subr.bf16.mxu0 %v16890_v60  ;;  %v1587_v30 = vld [vmem:[#allocation6 + $0x2db8] sm:$0xff]  ;;  %v724_v12 = vld [vmem:[#allocation6 + $0x12c0] sm:$0xff] }
 0x41e   :  { %13728 = vmatpush1.bf16.msra.mxu1 %v17369_v56  ;;  %v2083_v33 = vld [vmem:[#allocation6 + $0x3d38] sm:$0xff]  ;;  %v17018_v38 = vcombine.high %v1571_v35, %v1587_v30  ;;  %v17017_v44 = vcombine.low %v1571_v35, %v1587_v30  ;;  %v228_v35 = vld [vmem:[#allocation6 + $0x340] sm:$0xff] }
 0x41f   :  { %13729 = vmatprep.subr.bf16.mxu1 %v17402_v61  ;;  %v2099_v34 = vld [vmem:[#allocation6 + $0x3db8] sm:$0xff]  ;;  %v244_v30 = vld [vmem:[#allocation6 + $0x3c0] sm:$0xff] }
 0x420   :  { %13689 = vmatpush1.bf16.msra.mxu0 %v16889_v15  ;;  %v17530_v40 = vcombine.high %v2083_v33, %v2099_v34  ;;  %v1603_v51 = vld [vmem:[#allocation6 + $0x2e38] sm:$0xff]  ;;  %v17529_v31 = vcombine.low %v2083_v33, %v2099_v34  ;;  %v740_v33 = vld [vmem:[#allocation6 + $0x1340] sm:$0xff] }
 0x421   :  { %13690 = vmatprep.subr.bf16.mxu0 %v16922_v8  ;;  %v1619_v41 = vld [vmem:[#allocation6 + $0x2eb8] sm:$0xff]  ;;  %v15580_v8 = vcombine.high %v132_v62, %v148_v63  ;;  %v756_v34 = vld [vmem:[#allocation6 + $0x13c0] sm:$0xff] }
 0x422   :  { %13730 = vmatpush1.bf16.msra.mxu1 %v17401_v4  ;;  %v2115_v42 = vld [vmem:[#allocation6 + $0x3e38] sm:$0xff]  ;;  %v17050_v19 = vcombine.high %v1603_v51, %v1619_v41  ;;  %v17049_v55 = vcombine.low %v1603_v51, %v1619_v41  ;;  %v260_v51 = vld [vmem:[#allocation6 + $0x440] sm:$0xff] }
 0x423   :  { %13731 = vmatprep.subr.bf16.mxu1 %v17434_v10  ;;  %v2131_v43 = vld [vmem:[#allocation6 + $0x3eb8] sm:$0xff]  ;;  %v16092_v10 = vcombine.high %v644_v0, %v660_v3  ;;  %v276_v41 = vld [vmem:[#allocation6 + $0x4c0] sm:$0xff] }
 0x424   :  { %13691 = vmatpush1.bf16.msra.mxu0 %v16921_v21  ;;  %v17562_v22 = vcombine.high %v2115_v42, %v2131_v43  ;;  %v1651_v50 = vld [vmem:[#allocation6 + $0x2fb8] sm:$0xff]  ;;  %v17561_v56 = vcombine.low %v2115_v42, %v2131_v43  ;;  %v15579_v21 = vcombine.low %v132_v62, %v148_v63  ;;  %v772_v42 = vld [vmem:[#allocation6 + $0x1440] sm:$0xff] }
 0x425   :  { %13692 = vmatprep.subr.bf16.mxu0 %v16954_v23  ;;  %v2147_v52 = vld [vmem:[#allocation6 + $0x3f38] sm:$0xff]  ;;  %v17082_v60 = vcombine.high %v1635_v48, %v1651_v50  ;;  %v17081_v15 = vcombine.low %v1635_v48, %v1651_v50  ;;  %v15612_v23 = vcombine.high %v164_v11, %v180_v14  ;;  %v788_v43 = vld [vmem:[#allocation6 + $0x14c0] sm:$0xff] }
 0x426   :  { %13732 = vmatpush1.bf16.msra.mxu1 %v17433_v6  ;;  %v2163_v5 = vld [vmem:[#allocation6 + $0x3fb8] sm:$0xff]  ;;  %v16091_v6 = vcombine.low %v644_v0, %v660_v3  ;;  %v292_v48 = vld [vmem:[#allocation6 + $0x540] sm:$0xff] }
 0x427   :  { %13733 = vmatprep.subr.bf16.mxu1 %v17466_v24  ;;  %v17594_v61 = vcombine.high %v2147_v52, %v2163_v5  ;;  %v17593_v4 = vcombine.low %v2147_v52, %v2163_v5  ;;  %v16124_v24 = vcombine.high %v676_v2, %v692_v18  ;;  %v308_v50 = vld [vmem:[#allocation6 + $0x5c0] sm:$0xff] }
 0x428   :  { %13693 = vmatpush1.bf16.msra.mxu0 %v16953_v26  ;;  %v15611_v26 = vcombine.low %v164_v11, %v180_v14  ;;  %v804_v52 = vld [vmem:[#allocation6 + $0x1540] sm:$0xff] }
 0x429   :  { %13694 = vmatprep.subr.bf16.mxu0 %v16986_v57  ;;  %v15644_v57 = vcombine.high %v196_v7, %v212_v25  ;;  %v820_v5 = vld [vmem:[#allocation6 + $0x15c0] sm:$0xff] }
 0x42a   :  { %13734 = vmatpush1.bf16.msra.mxu1 %v17465_v17  ;;  %v16123_v17 = vcombine.low %v676_v2, %v692_v18  ;;  %v324_v62 = vld [vmem:[#allocation6 + $0x640] sm:$0xff] }
 0x42b   :  { %13735 = vmatprep.subr.bf16.mxu1 %v17498_v54  ;;  %v16156_v54 = vcombine.high %v708_v53, %v724_v12  ;;  %v340_v63 = vld [vmem:[#allocation6 + $0x6c0] sm:$0xff] }
 0x42c   :  { %13695 = vmatpush1.bf16.msra.mxu0 %v16985_v13  ;;  %v15643_v13 = vcombine.low %v196_v7, %v212_v25  ;;  %v836_v0 = vld [vmem:[#allocation6 + $0x1640] sm:$0xff] }
 0x42d   :  { %13696 = vmatprep.subr.bf16.mxu0 %v17018_v38  ;;  %v15676_v38 = vcombine.high %v228_v35, %v244_v30  ;;  %v852_v3 = vld [vmem:[#allocation6 + $0x16c0] sm:$0xff] }
 0x42e   :  { %13736 = vmatpush1.bf16.msra.mxu1 %v17497_v37  ;;  %v16155_v37 = vcombine.low %v708_v53, %v724_v12  ;;  %v16284_v11 = vcombine.high %v836_v0, %v852_v3  ;;  %v356_v14 = vld [vmem:[#allocation6 + $0x740] sm:$0xff]  ;;  %v15771_v53 = vcombine.low %v324_v62, %v340_v63 }
 0x42f   :  { %13737 = vmatprep.subr.bf16.mxu1 %v17530_v40  ;;  %v16188_v40 = vcombine.high %v740_v33, %v756_v34  ;;  %v372_v2 = vld [vmem:[#allocation6 + $0x7c0] sm:$0xff] }
 0x430   :  { %13697 = vmatpush1.bf16.msra.mxu0 %v17017_v44  ;;  %v15675_v44 = vcombine.low %v228_v35, %v244_v30 }
 0x431   :  { %13698 = vmatprep.subr.bf16.mxu0 %v17050_v19  ;;  %v15708_v19 = vcombine.high %v260_v51, %v276_v41 }
 0x432   :  { %13738 = vmatpush1.bf16.msra.mxu1 %v17529_v31  ;;  %v16187_v31 = vcombine.low %v740_v33, %v756_v34  ;;  %v388_v33 = vld [vmem:[#allocation6 + $0x840] sm:$0xff] }
 0x433   :  { %13739 = vmatprep.subr.bf16.mxu1 %v17562_v22  ;;  %v16220_v22 = vcombine.high %v772_v42, %v788_v43  ;;  %v404_v34 = vld [vmem:[#allocation6 + $0x8c0] sm:$0xff] }
 0x434   :  { %13699 = vmatpush1.bf16.msra.mxu0 %v17049_v55  ;;  %v15707_v55 = vcombine.low %v260_v51, %v276_v41  ;;  %v15836_v51 = vcombine.high %v388_v33, %v404_v34 }
 0x435   :  { %13700 = vmatprep.subr.bf16.mxu0 %v17082_v60  ;;  %v15740_v60 = vcombine.high %v292_v48, %v308_v50 }
 0x436   :  { %13740 = vmatpush1.bf16.msra.mxu1 %v17561_v56  ;;  %v16219_v56 = vcombine.low %v772_v42, %v788_v43  ;;  %v420_v42 = vld [vmem:[#allocation6 + $0x940] sm:$0xff] }
 0x437   :  { %13741 = vmatprep.subr.bf16.mxu1 %v17594_v61  ;;  %v16252_v61 = vcombine.high %v804_v52, %v820_v5  ;;  %v436_v43 = vld [vmem:[#allocation6 + $0x9c0] sm:$0xff] }
 0x438   :  { %13701 = vmatpush1.bf16.msra.mxu0 %v17081_v15  ;;  %v15739_v15 = vcombine.low %v292_v48, %v308_v50  ;;  %v15868_v48 = vcombine.high %v420_v42, %v436_v43 }
 0x439   :  { %13752 = vmatprep.subr.bf16.mxu0 %v15580_v8  ;;  %v15772_v8 = vcombine.high %v324_v62, %v340_v63 }
 0x43a   :  { %13742 = vmatpush1.bf16.msra.mxu1 %v17593_v4  ;;  %v16251_v4 = vcombine.low %v804_v52, %v820_v5  ;;  %v452_v52 = vld [vmem:[#allocation6 + $0xa40] sm:$0xff] }
 0x43b   :  { %13793 = vmatprep.subr.bf16.mxu1 %v16092_v10  ;;  %13703 = vmatmul.mubr.bf16.vlgmr.msra.gmra.mrb[60].mxu0 %v17857_v36  ;;  %v468_v5 = vld [vmem:[#allocation6 + $0xac0] sm:$0xff] }
 0x43c   :  { %13753 = vmatpush1.bf16.msra.mxu0 %v15579_v21  ;;  %13784 = vmatprep.mubr.bf16.mxu0 %v17823_v58  ;;  %v15900_v62 = vcombine.high %v452_v52, %v468_v5 }
 0x43d   :  { %13744 = vmatmul.mubr.bf16.vlgmr.msra.gmra.mrb[60].mxu1 %v17861_v39  ;;  %13754 = vmatprep.subr.bf16.mxu0 %v15612_v23  ;;  %v884_v23 = vld [vmem:[#allocation6 + $0x17c0] sm:$0xff] }
 0x43e   :  { %13794 = vmatpush1.bf16.msra.mxu1 %v16091_v6  ;;  %13825 = vmatprep.mubr.bf16.mxu1 %v17827_v59  ;;  %v868_v6 = vld [vmem:[#allocation6 + $0x1740] sm:$0xff] }
 0x43f   :  { %13795 = vmatprep.subr.bf16.mxu1 %v16124_v24  ;;  %v16316_v30 = vcombine.high %v868_v6, %v884_v23 }
 0x440   :  { %13755 = vmatpush1.bf16.msra.mxu0 %v15611_v26 }
 0x441   :  { %13756 = vmatprep.subr.bf16.mxu0 %v15644_v57  ;;  %v16283_v57 = vcombine.low %v836_v0, %v852_v3  ;;  %v484_v0 = vld [vmem:[#allocation6 + $0xb40] sm:$0xff] }
 0x442   :  { %13796 = vmatpush1.bf16.msra.mxu1 %v16123_v17  ;;  %v500_v3 = vld [vmem:[#allocation6 + $0xbc0] sm:$0xff] }
 0x443   :  { %13797 = vmatprep.subr.bf16.mxu1 %v16156_v54  ;;  %v15804_v54 = vcombine.high %v356_v14, %v372_v2 }
 0x444   :  { %13757 = vmatpush1.bf16.msra.mxu0 %v15643_v13  ;;  %v900_v13 = vld [vmem:[#allocation6 + $0x1840] sm:$0xff] }
 0x445   :  { %13758 = vmatprep.subr.bf16.mxu0 %v15676_v38  ;;  %v15803_v38 = vcombine.low %v356_v14, %v372_v2  ;;  %v516_v2 = vld [vmem:[#allocation6 + $0xc40] sm:$0xff] }
 0x446   :  { %13798 = vmatpush1.bf16.msra.mxu1 %v16155_v37  ;;  %v916_v37 = vld [vmem:[#allocation6 + $0x18c0] sm:$0xff] }
 0x447   :  { %13799 = vmatprep.subr.bf16.mxu1 %v16188_v40  ;;  %v16315_v40 = vcombine.low %v868_v6, %v884_v23  ;;  %v16348_v41 = vcombine.high %v900_v13, %v916_v37  ;;  %v1044_v6 = vld [vmem:[#allocation6 + $0x1cc0] sm:$0xff]  ;;  %v15931_v23 = vcombine.low %v484_v0, %v500_v3 }
 0x448   :  { %13759 = vmatpush1.bf16.msra.mxu0 %v15675_v44  ;;  %v932_v44 = vld [vmem:[#allocation6 + $0x1940] sm:$0xff] }
 0x449   :  { %13760 = vmatprep.subr.bf16.mxu0 %v15708_v19  ;;  %v15835_v19 = vcombine.low %v388_v33, %v404_v34 }
 0x44a   :  { %13800 = vmatpush1.bf16.msra.mxu1 %v16187_v31  ;;  %v948_v31 = vld [vmem:[#allocation6 + $0x19c0] sm:$0xff] }
 0x44b   :  { %13801 = vmatprep.subr.bf16.mxu1 %v16220_v22  ;;  %v16347_v22 = vcombine.low %v900_v13, %v916_v37  ;;  %v16380_v50 = vcombine.high %v932_v44, %v948_v31  ;;  %v580_v13 = vld [vmem:[#allocation6 + $0xe40] sm:$0xff] }
 0x44c   :  { %13761 = vmatpush1.bf16.msra.mxu0 %v15707_v55  ;;  %v964_v55 = vld [vmem:[#allocation6 + $0x1a40] sm:$0xff] }
 0x44d   :  { %13762 = vmatprep.subr.bf16.mxu0 %v15740_v60  ;;  %v15867_v60 = vcombine.low %v420_v42, %v436_v43  ;;  %v596_v37 = vld [vmem:[#allocation6 + $0xec0] sm:$0xff] }
 0x44e   :  { %13802 = vmatpush1.bf16.msra.mxu1 %v16219_v56  ;;  %v13458_v10 = vpop.f32.mrb[48].mxu0  ;;  %v980_v56 = vld [vmem:[#allocation6 + $0x1ac0] sm:$0xff]  ;;  %v16028_v42 = vcombine.high %v580_v13, %v596_v37 }
 0x44f   :  { %13803 = vmatprep.subr.bf16.mxu1 %v16252_v61  ;;  %v13460_v21 = vpop.f32.mrb[49].mxu0  ;;  %v16379_v61 = vcombine.low %v932_v44, %v948_v31  ;;  %v16412_v63 = vcombine.high %v964_v55, %v980_v56  ;;  %v612_v44 = vld [vmem:[#allocation6 + $0xf40] sm:$0xff] }
 0x450   :  { %v13499_v18 = vpop.f32.mrb[48].mxu1  ;;  %v13462_v25 = vpop.f32.mrb[50].mxu0  ;;  %13763 = vmatpush1.bf16.msra.mxu0 %v15739_v15  ;;  %v996_v15 = vld [vmem:[#allocation6 + $0x1b40] sm:$0xff] }
 0x451   :  { %v18015_v24 = vadd.f32 %v13499_v18, %v13458_v10  ;;  %v13501_v7 = vpop.f32.mrb[49].mxu1  ;;  %v13463_v17 = vpop.f32.mrb[51].mxu0  ;;  %13764 = vmatprep.subr.bf16.mxu0 %v15772_v8  ;;  %v15899_v8 = vcombine.low %v452_v52, %v468_v5  ;;  %v16411_v10 = vcombine.low %v964_v55, %v980_v56  ;;  %v532_v18 = vld [vmem:[#allocation6 + $0xcc0] sm:$0xff] }
 0x452   :  { %v18017_v12 = vadd.f32 %v13501_v7, %v13460_v21  ;;  %v13503_v26 = vpop.f32.mrb[50].mxu1  ;;  %13804 = vmatpush1.bf16.msra.mxu1 %v16251_v4  ;;  %v1012_v4 = vld [vmem:[#allocation6 + $0x1bc0] sm:$0xff]  ;;  %v15964_v25 = vcombine.high %v516_v2, %v532_v18 }
 0x453   :  { %v13504_v35 = vpop.f32.mrb[51].mxu1  ;;  %13805 = vmatprep.subr.bf16.mxu1 %v16284_v11  ;;  %v15932_v11 = vcombine.high %v484_v0, %v500_v3  ;;  %v16444_v14 = vcombine.high %v996_v15, %v1012_v4  ;;  %v1028_v21 = vld [vmem:[#allocation6 + $0x1c40] sm:$0xff]  ;;  %v16443_v7 = vcombine.low %v996_v15, %v1012_v4 }
 0x454   :  { %13765 = vmatpush1.bf16.msra.mxu0 %v15771_v53  ;;  %v16476_v53 = vcombine.high %v1028_v21, %v1044_v6  ;;  %v548_v26 = vld [vmem:[#allocation6 + $0xd40] sm:$0xff]  ;;  %v15963_v35 = vcombine.low %v516_v2, %v532_v18 }
 0x455   :  { %13766 = vmatprep.subr.bf16.mxu0 %v15804_v54  ;;  %v564_v17 = vld [vmem:[#allocation6 + $0xdc0] sm:$0xff] }
 0x456   :  { %13806 = vmatpush1.bf16.msra.mxu1 %v16283_v57  ;;  %v1060_v57 = vld [vmem:[#allocation6 + $0x1d40] sm:$0xff]  ;;  %v15996_v33 = vcombine.high %v548_v26, %v564_v17 }
 0x457   :  { %13807 = vmatprep.subr.bf16.mxu1 %v16316_v30  ;;  %v1076_v54 = vld [vmem:[#allocation6 + $0x1dc0] sm:$0xff]  ;;  %v16475_v30 = vcombine.low %v1028_v21, %v1044_v6 }
 0x458   :  { %13767 = vmatpush1.bf16.msra.mxu0 %v15803_v38  ;;  %v16508_v34 = vcombine.high %v1060_v57, %v1076_v54  ;;  %v1092_v38 = vld [vmem:[#allocation6 + $0x1e40] sm:$0xff] }
 0x459   :  { %13768 = vmatprep.subr.bf16.mxu0 %v15836_v51  ;;  %v15995_v51 = vcombine.low %v548_v26, %v564_v17  ;;  %v628_v31 = vld [vmem:[#allocation6 + $0xfc0] sm:$0xff] }
 0x45a   :  { %13808 = vmatpush1.bf16.msra.mxu1 %v16315_v40  ;;  %v1108_v40 = vld [vmem:[#allocation6 + $0x1ec0] sm:$0xff]  ;;  %v16060_v52 = vcombine.high %v612_v44, %v628_v31 }
 0x45b   :  { %13809 = vmatprep.subr.bf16.mxu1 %v16348_v41  ;;  %v16507_v41 = vcombine.low %v1060_v57, %v1076_v54  ;;  %v16540_v43 = vcombine.high %v1092_v38, %v1108_v40  ;;  %v1156_v55 = vld [vmem:[#allocation6 + $0x2040] sm:$0xff] }
 0x45c   :  { %13769 = vmatpush1.bf16.msra.mxu0 %v15835_v19  ;;  %v1124_v19 = vld [vmem:[#allocation6 + $0x1f40] sm:$0xff] }
 0x45d   :  { %13770 = vmatprep.subr.bf16.mxu0 %v15868_v48  ;;  %v16027_v48 = vcombine.low %v580_v13, %v596_v37  ;;  %v1172_v56 = vld [vmem:[#allocation6 + $0x20c0] sm:$0xff] }
 0x45e   :  { %13810 = vmatpush1.bf16.msra.mxu1 %v16347_v22  ;;  %v1140_v22 = vld [vmem:[#allocation6 + $0x1fc0] sm:$0xff]  ;;  %v16604_v0 = vcombine.high %v1156_v55, %v1172_v56 }
 0x45f   :  { %13811 = vmatprep.subr.bf16.mxu1 %v16380_v50  ;;  %v16539_v50 = vcombine.low %v1092_v38, %v1108_v40  ;;  %v16572_v5 = vcombine.high %v1124_v19, %v1140_v22  ;;  %v1188_v15 = vld [vmem:[#allocation6 + $0x2140] sm:$0xff] }
 0x460   :  { %13771 = vmatpush1.bf16.msra.mxu0 %v15867_v60  ;;  %v1668_v60 = vld [vmem:[#allocation6 + $0x3040] sm:$0xff] }
 0x461   :  { %13772 = vmatprep.subr.bf16.mxu0 %v15900_v62  ;;  %v16059_v62 = vcombine.low %v612_v44, %v628_v31  ;;  %v1204_v4 = vld [vmem:[#allocation6 + $0x21c0] sm:$0xff] }
 0x462   :  { %13812 = vmatpush1.bf16.msra.mxu1 %v16379_v61  ;;  %v1684_v61 = vld [vmem:[#allocation6 + $0x30c0] sm:$0xff]  ;;  %v16636_v2 = vcombine.high %v1188_v15, %v1204_v4 }
 0x463   :  { %13813 = vmatprep.subr.bf16.mxu1 %v16412_v63  ;;  %v16571_v63 = vcombine.low %v1124_v19, %v1140_v22  ;;  %v17116_v3 = vcombine.high %v1668_v60, %v1684_v61  ;;  %v1220_v21 = vld [vmem:[#allocation6 + $0x2240] sm:$0xff] }
 0x464   :  { %13773 = vmatpush1.bf16.msra.mxu0 %v15899_v8  ;;  %v1700_v8 = vld [vmem:[#allocation6 + $0x3140] sm:$0xff] }
 0x465   :  { %13774 = vmatprep.subr.bf16.mxu0 %v15932_v11  ;;  %v16603_v11 = vcombine.low %v1156_v55, %v1172_v56  ;;  %v1236_v6 = vld [vmem:[#allocation6 + $0x22c0] sm:$0xff] }
 0x466   :  { %13814 = vmatpush1.bf16.msra.mxu1 %v16411_v10  ;;  %v1716_v10 = vld [vmem:[#allocation6 + $0x31c0] sm:$0xff]  ;;  %v16668_v26 = vcombine.high %v1220_v21, %v1236_v6 }
 0x467   :  { %13815 = vmatprep.subr.bf16.mxu1 %v16444_v14  ;;  %v17115_v14 = vcombine.low %v1668_v60, %v1684_v61  ;;  %v17148_v18 = vcombine.high %v1700_v8, %v1716_v10  ;;  %v1252_v57 = vld [vmem:[#allocation6 + $0x2340] sm:$0xff] }
 0x468   :  { %13775 = vmatpush1.bf16.msra.mxu0 %v15931_v23  ;;  %v1732_v23 = vld [vmem:[#allocation6 + $0x3240] sm:$0xff] }
 0x469   :  { %13776 = vmatprep.subr.bf16.mxu0 %v15964_v25  ;;  %v16635_v25 = vcombine.low %v1188_v15, %v1204_v4  ;;  %v1268_v54 = vld [vmem:[#allocation6 + $0x23c0] sm:$0xff] }
 0x46a   :  { %13816 = vmatpush1.bf16.msra.mxu1 %v16443_v7  ;;  %v1748_v7 = vld [vmem:[#allocation6 + $0x32c0] sm:$0xff]  ;;  %v16700_v13 = vcombine.high %v1252_v57, %v1268_v54 }
 0x46b   :  { %13817 = vmatprep.subr.bf16.mxu1 %v16476_v53  ;;  %v17147_v53 = vcombine.low %v1700_v8, %v1716_v10  ;;  %v17180_v17 = vcombine.high %v1732_v23, %v1748_v7  ;;  %v1284_v38 = vld [vmem:[#allocation6 + $0x2440] sm:$0xff] }
 0x46c   :  { %13777 = vmatpush1.bf16.msra.mxu0 %v15963_v35  ;;  %v1764_v35 = vld [vmem:[#allocation6 + $0x3340] sm:$0xff] }
 0x46d   :  { %13778 = vmatprep.subr.bf16.mxu0 %v15996_v33  ;;  %v16667_v33 = vcombine.low %v1220_v21, %v1236_v6  ;;  %v1300_v40 = vld [vmem:[#allocation6 + $0x24c0] sm:$0xff] }
 0x46e   :  { %13818 = vmatpush1.bf16.msra.mxu1 %v16475_v30  ;;  %v1780_v30 = vld [vmem:[#allocation6 + $0x33c0] sm:$0xff]  ;;  %v16732_v44 = vcombine.high %v1284_v38, %v1300_v40 }
 0x46f   :  { %13819 = vmatprep.subr.bf16.mxu1 %v16508_v34  ;;  %v17179_v34 = vcombine.low %v1732_v23, %v1748_v7  ;;  %v17212_v37 = vcombine.high %v1764_v35, %v1780_v30  ;;  %v1316_v19 = vld [vmem:[#allocation6 + $0x2540] sm:$0xff] }
 0x470   :  { %13779 = vmatpush1.bf16.msra.mxu0 %v15995_v51  ;;  %v1796_v51 = vld [vmem:[#allocation6 + $0x3440] sm:$0xff] }
 0x471   :  { %13780 = vmatprep.subr.bf16.mxu0 %v16028_v42  ;;  %v16699_v42 = vcombine.low %v1252_v57, %v1268_v54  ;;  %v1332_v22 = vld [vmem:[#allocation6 + $0x25c0] sm:$0xff] }
 0x472   :  { %13820 = vmatpush1.bf16.msra.mxu1 %v16507_v41  ;;  %v1812_v41 = vld [vmem:[#allocation6 + $0x34c0] sm:$0xff]  ;;  %v16764_v55 = vcombine.high %v1316_v19, %v1332_v22 }
 0x473   :  { %13821 = vmatprep.subr.bf16.mxu1 %v16540_v43  ;;  %v17211_v43 = vcombine.low %v1764_v35, %v1780_v30  ;;  %v17244_v31 = vcombine.high %v1796_v51, %v1812_v41  ;;  %v1348_v60 = vld [vmem:[#allocation6 + $0x2640] sm:$0xff] }
 0x474   :  { %13781 = vmatpush1.bf16.msra.mxu0 %v16027_v48  ;;  %v1828_v48 = vld [vmem:[#allocation6 + $0x3540] sm:$0xff] }
 0x475   :  { %13782 = vmatprep.subr.bf16.mxu0 %v16060_v52  ;;  %v16731_v52 = vcombine.low %v1284_v38, %v1300_v40  ;;  %v1364_v61 = vld [vmem:[#allocation6 + $0x26c0] sm:$0xff] }
 0x476   :  { %13822 = vmatpush1.bf16.msra.mxu1 %v16539_v50  ;;  %v1844_v50 = vld [vmem:[#allocation6 + $0x35c0] sm:$0xff]  ;;  %v16796_v15 = vcombine.high %v1348_v60, %v1364_v61  ;;  %v16795_v57 = vcombine.low %v1348_v60, %v1364_v61 }
 0x477   :  { %13823 = vmatprep.subr.bf16.mxu1 %v16572_v5  ;;  %v17243_v5 = vcombine.low %v1796_v51, %v1812_v41  ;;  %v17276_v56 = vcombine.high %v1828_v48, %v1844_v50  ;;  %v1380_v10 = vld [vmem:[#allocation6 + $0x2740] sm:$0xff] }
 0x478   :  { %13783 = vmatpush1.bf16.msra.mxu0 %v16059_v62  ;;  %v1860_v62 = vld [vmem:[#allocation6 + $0x3640] sm:$0xff] }
 0x479   :  { %13834 = vmatprep.subr.bf16.mxu0 %v16604_v0  ;;  %v16763_v0 = vcombine.low %v1316_v19, %v1332_v22  ;;  %v1892_v23 = vld [vmem:[#allocation6 + $0x3740] sm:$0xff] }
 0x47a   :  { %13824 = vmatpush1.bf16.msra.mxu1 %v16571_v63  ;;  %v1876_v63 = vld [vmem:[#allocation6 + $0x36c0] sm:$0xff] }
 0x47b   :  { %13875 = vmatprep.subr.bf16.mxu1 %v17116_v3  ;;  %13785 = vmatmul.mubr.bf16.vlgmr.msra.gmra.mrb[64].mxu0 %v17833_v16  ;;  %v17275_v3 = vcombine.low %v1828_v48, %v1844_v50  ;;  %v17308_v8 = vcombine.high %v1860_v62, %v1876_v63  ;;  %v1908_v7 = vld [vmem:[#allocation6 + $0x37c0] sm:$0xff]  ;;  %v17307_v30 = vcombine.low %v1860_v62, %v1876_v63 }
 0x47c   :  { %13835 = vmatpush1.bf16.msra.mxu0 %v16603_v11  ;;  %13866 = vmatprep.mubr.bf16.mxu0 %v17845_v27  ;;  %v1396_v11 = vld [vmem:[#allocation6 + $0x27c0] sm:$0xff] }
 0x47d   :  { %13826 = vmatmul.mubr.bf16.vlgmr.msra.gmra.mrb[64].mxu1 %v17839_v20  ;;  %13836 = vmatprep.subr.bf16.mxu0 %v16636_v2  ;;  %v1412_v38 = vld [vmem:[#allocation6 + $0x2840] sm:$0xff] }
 0x47e   :  { %13876 = vmatpush1.bf16.msra.mxu1 %v17115_v14  ;;  %13907 = vmatprep.mubr.bf16.mxu1 %v17850_v29  ;;  %v1924_v51 = vld [vmem:[#allocation6 + $0x3840] sm:$0xff] }
 0x47f   :  { %13877 = vmatprep.subr.bf16.mxu1 %v17148_v18  ;;  %v18024_v18 = vld [vmem:[#allocation8 + $0x8] sm:$0xff]  ;;  %v1940_v41 = vld [vmem:[#allocation6 + $0x38c0] sm:$0xff] }
 0x480   :  { %13837 = vmatpush1.bf16.msra.mxu0 %v16635_v25  ;;  %v15222_v21 = vrot.slane %v18024_v18, %v17936_v45  ;;  %v17372_v48 = vcombine.high %v1924_v51, %v1940_v41  ;;  %v1444_v50 = vld [vmem:[#allocation6 + $0x2940] sm:$0xff]  ;;  %v17371_v61 = vcombine.low %v1924_v51, %v1940_v41 }
 0x481   :  { %13838 = vmatprep.subr.bf16.mxu0 %v16668_v26  ;;  %v15226_v26 = vrot.slane %v18024_v18, %v17939_v47 }
 0x482   :  { %13878 = vmatpush1.bf16.msra.mxu1 %v17147_v53 }
 0x483   :  { %13879 = vmatprep.subr.bf16.mxu1 %v17180_v17 }
 0x484   :  { %13839 = vmatpush1.bf16.msra.mxu0 %v16667_v33  ;;  %v16828_v33 = vcombine.high %v1380_v10, %v1396_v11 }
 0x485   :  { %13840 = vmatprep.subr.bf16.mxu0 %v16700_v13 }
 0x486   :  { %13880 = vmatpush1.bf16.msra.mxu1 %v17179_v34 }
 0x487   :  { %13881 = vmatprep.subr.bf16.mxu1 %v17212_v37  ;;  %v17340_v37 = vcombine.high %v1892_v23, %v1908_v7 }
 0x488   :  { %13841 = vmatpush1.bf16.msra.mxu0 %v16699_v42 }
 0x489   :  { %13842 = vmatprep.subr.bf16.mxu0 %v16732_v44 }
 0x48a   :  { %13882 = vmatpush1.bf16.msra.mxu1 %v17211_v43  ;;  %v16827_v43 = vcombine.low %v1380_v10, %v1396_v11 }
 0x48b   :  { %13883 = vmatprep.subr.bf16.mxu1 %v17244_v31  ;;  %v17339_v31 = vcombine.low %v1892_v23, %v1908_v7  ;;  %v2036_v23 = vld [vmem:[#allocation6 + $0x3bc0] sm:$0xff] }
 0x48c   :  { %13843 = vmatpush1.bf16.msra.mxu0 %v16731_v52  ;;  %v1460_v52 = vld [vmem:[#allocation6 + $0x29c0] sm:$0xff] }
 0x48d   :  { %13844 = vmatprep.subr.bf16.mxu0 %v16764_v55  ;;  %v1972_v55 = vld [vmem:[#allocation6 + $0x39c0] sm:$0xff]  ;;  %v16892_v62 = vcombine.high %v1444_v50, %v1460_v52 }
 0x48e   :  { %13884 = vmatpush1.bf16.msra.mxu1 %v17243_v5  ;;  %v13540_v4 = vpop.f32.mrb[52].mxu0  ;;  %v1956_v5 = vld [vmem:[#allocation6 + $0x3940] sm:$0xff] }
 0x48f   :  { %13885 = vmatprep.subr.bf16.mxu1 %v17276_v56  ;;  %v13541_v14 = vadd.f32 %v13540_v4, %v18015_v24  ;;  %v13542_v6 = vpop.f32.mrb[53].mxu0  ;;  %v17404_v63 = vcombine.high %v1956_v5, %v1972_v55  ;;  %v2004_v4 = vld [vmem:[#allocation6 + $0x3ac0] sm:$0xff]  ;;  %v17403_v10 = vcombine.low %v1956_v5, %v1972_v55 }
 0x490   :  { %v13581_v2 = vpop.f32.mrb[52].mxu1  ;;  %v13543_v25 = vadd.f32 %v13542_v6, %v18017_v12  ;;  %v13544_v17 = vpop.f32.mrb[54].mxu0  ;;  %13845 = vmatpush1.bf16.msra.mxu0 %v16763_v0  ;;  %v1428_v12 = vld [vmem:[#allocation6 + $0x28c0] sm:$0xff] }
 0x491   :  { %v13583_v53 = vpop.f32.mrb[53].mxu1  ;;  %v13582_v54 = vadd.f32 %v13581_v2, %v13541_v14  ;;  %v13545_v35 = vpop.f32.mrb[55].mxu0  ;;  %13846 = vmatprep.subr.bf16.mxu0 %v16796_v15  ;;  %v16860_v19 = vcombine.high %v1412_v38, %v1428_v12  ;;  %v16859_v60 = vcombine.low %v1412_v38, %v1428_v12  ;;  %v1476_v0 = vld [vmem:[#allocation6 + $0x2a40] sm:$0xff] }
 0x492   :  { %v13585_v24 = vpop.f32.mrb[54].mxu1  ;;  %13886 = vmatpush1.bf16.msra.mxu1 %v17275_v3  ;;  %v13584_v34 = vadd.f32 %v13583_v53, %v13543_v25  ;;  %v1492_v3 = vld [vmem:[#allocation6 + $0x2ac0] sm:$0xff] }
 0x493   :  { %v13586_v13 = vpop.f32.mrb[55].mxu1  ;;  %13887 = vmatprep.subr.bf16.mxu1 %v17308_v8  ;;  %v15343_v40 = vadd.f32 %v15222_v21, %v13582_v54  ;;  %v1988_v15 = vld [vmem:[#allocation6 + $0x3a40] sm:$0xff]  ;;  %v16891_v8 = vcombine.low %v1444_v50, %v1460_v52  ;;  %v16924_v11 = vcombine.high %v1476_v0, %v1492_v3  ;;  %v16923_v7 = vcombine.low %v1476_v0, %v1492_v3  ;;  %v133_v3 = vld [vmem:[#allocation6 + $0x48] sm:$0xff] }
 0x494   :  { %v15344_v42 = vadd.f32 %v15226_v26, %v13584_v34  ;;  %13847 = vmatpush1.bf16.msra.mxu0 %v16795_v57  ;;  %v17436_v14 = vcombine.high %v1988_v15, %v2004_v4  ;;  %v1508_v2 = vld [vmem:[#allocation6 + $0x2b40] sm:$0xff]  ;;  %v17435_v25 = vcombine.low %v1988_v15, %v2004_v4  ;;  %v149_v15 = vld [vmem:[#allocation6 + $0xc8] sm:$0xff] }
 0x495   :  { %v15375_v44 = vmax.f32 %v15343_v40, 0.0  ;;  %13848 = vmatprep.subr.bf16.mxu0 %v16828_v33  ;;  %v1524_v21 = vld [vmem:[#allocation6 + $0x2bc0] sm:$0xff]  ;;  %v645_v4 = vld [vmem:[#allocation6 + $0x1048] sm:$0xff] }
 0x496   :  { %13888 = vmatpush1.bf16.msra.mxu1 %v17307_v30  ;;  %v15376_v22 = vmax.f32 %v15344_v42, 0.0  ;;  %v2020_v6 = vld [vmem:[#allocation6 + $0x3b40] sm:$0xff]  ;;  %v16956_v53 = vcombine.high %v1508_v2, %v1524_v21  ;;  %v16955_v35 = vcombine.low %v1508_v2, %v1524_v21  ;;  %v165_v21 = vld [vmem:[#allocation6 + $0x148] sm:$0xff] }
 0x497   :  { %13889 = vmatprep.subr.bf16.mxu1 %v17340_v37  ;;  %v17468_v26 = vcombine.high %v2020_v6, %v2036_v23  ;;  %v1540_v17 = vld [vmem:[#allocation6 + $0x2c40] sm:$0xff]  ;;  %v17467_v30 = vcombine.low %v2020_v6, %v2036_v23  ;;  %v181_v6 = vld [vmem:[#allocation6 + $0x1c8] sm:$0xff] }
 0x498   :  { %v17633_v56 = vpack.c.bf16 %v15376_v22, %v15375_v44  ;;  %13849 = vmatpush1.bf16.msra.mxu0 %v16827_v43  ;;  %v1556_v57 = vld [vmem:[#allocation6 + $0x2cc0] sm:$0xff]  ;;  %v677_v23 = vld [vmem:[#allocation6 + $0x1148] sm:$0xff] }
 0x499   :  { %13850 = vmatprep.subr.bf16.mxu0 %v16860_v19  ;;  %v2052_v54 = vld [vmem:[#allocation6 + $0x3c40] sm:$0xff]  ;;  %v16988_v33 = vcombine.high %v1540_v17, %v1556_v57  ;;  %v16987_v40 = vcombine.low %v1540_v17, %v1556_v57  ;;  %v197_v57 = vld [vmem:[#allocation6 + $0x248] sm:$0xff] }
 0x49a   :  { %13890 = vmatpush1.bf16.msra.mxu1 %v17339_v31  ;;  %15529 = vst [vmem:[#allocation9 + $0x30] sm:$0xff] %v17633_v56  ;;  %v2068_v24 = vld [vmem:[#allocation6 + $0x3cc0] sm:$0xff] }
 0x49b   :  { %13891 = vmatprep.subr.bf16.mxu1 %v17372_v48  ;;  %v17500_v34 = vcombine.high %v2052_v54, %v2068_v24  ;;  %v1572_v13 = vld [vmem:[#allocation6 + $0x2d40] sm:$0xff]  ;;  %v17499_v51 = vcombine.low %v2052_v54, %v2068_v24  ;;  %v213_v54 = vld [vmem:[#allocation6 + $0x2c8] sm:$0xff] }
 0x49c   :  { %13851 = vmatpush1.bf16.msra.mxu0 %v16859_v60  ;;  %v1588_v37 = vld [vmem:[#allocation6 + $0x2dc0] sm:$0xff]  ;;  %v709_v24 = vld [vmem:[#allocation6 + $0x1248] sm:$0xff] }
 0x49d   :  { %13852 = vmatprep.subr.bf16.mxu0 %v16892_v62  ;;  %v2084_v38 = vld [vmem:[#allocation6 + $0x3d40] sm:$0xff]  ;;  %v17020_v41 = vcombine.high %v1572_v13, %v1588_v37  ;;  %v17019_v22 = vcombine.low %v1572_v13, %v1588_v37  ;;  %v229_v37 = vld [vmem:[#allocation6 + $0x348] sm:$0xff] }
 0x49e   :  { %13892 = vmatpush1.bf16.msra.mxu1 %v17371_v61  ;;  %v2100_v12 = vld [vmem:[#allocation6 + $0x3dc0] sm:$0xff] }
 0x49f   :  { %13893 = vmatprep.subr.bf16.mxu1 %v17404_v63  ;;  %v17532_v42 = vcombine.high %v2084_v38, %v2100_v12  ;;  %v1604_v43 = vld [vmem:[#allocation6 + $0x2e40] sm:$0xff]  ;;  %v17531_v48 = vcombine.low %v2084_v38, %v2100_v12  ;;  %v245_v38 = vld [vmem:[#allocation6 + $0x3c8] sm:$0xff] }
 0x4a0   :  { %13853 = vmatpush1.bf16.msra.mxu0 %v16891_v8  ;;  %v1620_v44 = vld [vmem:[#allocation6 + $0x2ec0] sm:$0xff]  ;;  %v661_v8 = vld [vmem:[#allocation6 + $0x10c8] sm:$0xff] }
 0x4a1   :  { %13854 = vmatprep.subr.bf16.mxu0 %v16924_v11  ;;  %v2116_v31 = vld [vmem:[#allocation6 + $0x3e40] sm:$0xff]  ;;  %v17052_v50 = vcombine.high %v1604_v43, %v1620_v44  ;;  %v17051_v61 = vcombine.low %v1604_v43, %v1620_v44  ;;  %v16094_v2 = vcombine.high %v645_v4, %v661_v8  ;;  %v741_v12 = vld [vmem:[#allocation6 + $0x1348] sm:$0xff] }
 0x4a2   :  { %13894 = vmatpush1.bf16.msra.mxu1 %v17403_v10  ;;  %v2132_v19 = vld [vmem:[#allocation6 + $0x3ec0] sm:$0xff]  ;;  %v261_v44 = vld [vmem:[#allocation6 + $0x448] sm:$0xff] }
 0x4a3   :  { %13895 = vmatprep.subr.bf16.mxu1 %v17436_v14  ;;  %v17564_v52 = vcombine.high %v2116_v31, %v2132_v19  ;;  %v1636_v5 = vld [vmem:[#allocation6 + $0x2f40] sm:$0xff]  ;;  %v17563_v62 = vcombine.low %v2116_v31, %v2132_v19  ;;  %v15582_v14 = vcombine.high %v133_v3, %v149_v15  ;;  %v277_v31 = vld [vmem:[#allocation6 + $0x4c8] sm:$0xff] }
 0x4a4   :  { %13855 = vmatpush1.bf16.msra.mxu0 %v16923_v7  ;;  %v1652_v55 = vld [vmem:[#allocation6 + $0x2fc0] sm:$0xff]  ;;  %v693_v7 = vld [vmem:[#allocation6 + $0x11c8] sm:$0xff] }
 0x4a5   :  { %13856 = vmatprep.subr.bf16.mxu0 %v16956_v53  ;;  %v2148_v56 = vld [vmem:[#allocation6 + $0x3f40] sm:$0xff]  ;;  %v17084_v63 = vcombine.high %v1636_v5, %v1652_v55  ;;  %v17083_v10 = vcombine.low %v1636_v5, %v1652_v55  ;;  %v16093_v53 = vcombine.low %v645_v4, %v661_v8  ;;  %v16126_v17 = vcombine.high %v677_v23, %v693_v7  ;;  %v773_v19 = vld [vmem:[#allocation6 + $0x1448] sm:$0xff] }
 0x4a6   :  { %13896 = vmatpush1.bf16.msra.mxu1 %v17435_v25  ;;  %v2164_v60 = vld [vmem:[#allocation6 + $0x3fc0] sm:$0xff]  ;;  %v15581_v25 = vcombine.low %v133_v3, %v149_v15  ;;  %v293_v55 = vld [vmem:[#allocation6 + $0x548] sm:$0xff] }
 0x4a7   :  { %13897 = vmatprep.subr.bf16.mxu1 %v17468_v26  ;;  %v17596_v0 = vcombine.high %v2148_v56, %v2164_v60  ;;  %v17595_v11 = vcombine.low %v2148_v56, %v2164_v60  ;;  %v15614_v26 = vcombine.high %v165_v21, %v181_v6  ;;  %v309_v56 = vld [vmem:[#allocation6 + $0x5c8] sm:$0xff] }
 0x4a8   :  { %13857 = vmatpush1.bf16.msra.mxu0 %v16955_v35  ;;  %v725_v35 = vld [vmem:[#allocation6 + $0x12c8] sm:$0xff] }
 0x4a9   :  { %13858 = vmatprep.subr.bf16.mxu0 %v16988_v33  ;;  %v16125_v33 = vcombine.low %v677_v23, %v693_v7  ;;  %v16158_v13 = vcombine.high %v709_v24, %v725_v35  ;;  %v805_v60 = vld [vmem:[#allocation6 + $0x1548] sm:$0xff] }
 0x4aa   :  { %13898 = vmatpush1.bf16.msra.mxu1 %v17467_v30  ;;  %v15613_v30 = vcombine.low %v165_v21, %v181_v6  ;;  %v325_v15 = vld [vmem:[#allocation6 + $0x648] sm:$0xff] }
 0x4ab   :  { %13899 = vmatprep.subr.bf16.mxu1 %v17500_v34  ;;  %v15646_v34 = vcombine.high %v197_v57, %v213_v54  ;;  %v341_v4 = vld [vmem:[#allocation6 + $0x6c8] sm:$0xff] }
 0x4ac   :  { %13859 = vmatpush1.bf16.msra.mxu0 %v16987_v40  ;;  %v757_v40 = vld [vmem:[#allocation6 + $0x13c8] sm:$0xff] }
 0x4ad   :  { %13860 = vmatprep.subr.bf16.mxu0 %v17020_v41  ;;  %v16157_v41 = vcombine.low %v709_v24, %v725_v35  ;;  %v16190_v43 = vcombine.high %v741_v12, %v757_v40  ;;  %v837_v8 = vld [vmem:[#allocation6 + $0x1648] sm:$0xff]  ;;  %v15773_v35 = vcombine.low %v325_v15, %v341_v4 }
 0x4ae   :  { %13900 = vmatpush1.bf16.msra.mxu1 %v17499_v51  ;;  %v15645_v51 = vcombine.low %v197_v57, %v213_v54  ;;  %v357_v23 = vld [vmem:[#allocation6 + $0x748] sm:$0xff] }
 0x4af   :  { %13901 = vmatprep.subr.bf16.mxu1 %v17532_v42  ;;  %v15678_v42 = vcombine.high %v229_v37, %v245_v38  ;;  %v373_v7 = vld [vmem:[#allocation6 + $0x7c8] sm:$0xff] }
 0x4b0   :  { %13861 = vmatpush1.bf16.msra.mxu0 %v17019_v22  ;;  %v789_v22 = vld [vmem:[#allocation6 + $0x14c8] sm:$0xff] }
 0x4b1   :  { %13862 = vmatprep.subr.bf16.mxu0 %v17052_v50  ;;  %v16189_v50 = vcombine.low %v741_v12, %v757_v40  ;;  %v16222_v5 = vcombine.high %v773_v19, %v789_v22  ;;  %v389_v40 = vld [vmem:[#allocation6 + $0x848] sm:$0xff] }
 0x4b2   :  { %13902 = vmatpush1.bf16.msra.mxu1 %v17531_v48  ;;  %v15677_v48 = vcombine.low %v229_v37, %v245_v38  ;;  %v15806_v37 = vcombine.high %v357_v23, %v373_v7 }
 0x4b3   :  { %13903 = vmatprep.subr.bf16.mxu1 %v17564_v52  ;;  %v15710_v52 = vcombine.high %v261_v44, %v277_v31 }
 0x4b4   :  { %13863 = vmatpush1.bf16.msra.mxu0 %v17051_v61  ;;  %v821_v61 = vld [vmem:[#allocation6 + $0x15c8] sm:$0xff] }
 0x4b5   :  { %13864 = vmatprep.subr.bf16.mxu0 %v17084_v63  ;;  %v16221_v63 = vcombine.low %v773_v19, %v789_v22  ;;  %v16254_v3 = vcombine.high %v805_v60, %v821_v61  ;;  %v421_v22 = vld [vmem:[#allocation6 + $0x948] sm:$0xff] }
 0x4b6   :  { %13904 = vmatpush1.bf16.msra.mxu1 %v17563_v62  ;;  %v15709_v62 = vcombine.low %v261_v44, %v277_v31 }
 0x4b7   :  { %13905 = vmatprep.subr.bf16.mxu1 %v17596_v0  ;;  %v15742_v0 = vcombine.high %v293_v55, %v309_v56 }
 0x4b8   :  { %13865 = vmatpush1.bf16.msra.mxu0 %v17083_v10  ;;  %v853_v10 = vld [vmem:[#allocation6 + $0x16c8] sm:$0xff] }
 0x4b9   :  { %13916 = vmatprep.subr.bf16.mxu0 %v15582_v14  ;;  %v16253_v14 = vcombine.low %v805_v60, %v821_v61  ;;  %v16286_v6 = vcombine.high %v837_v8, %v853_v10  ;;  %v453_v61 = vld [vmem:[#allocation6 + $0xa48] sm:$0xff] }
 0x4ba   :  { %13906 = vmatpush1.bf16.msra.mxu1 %v17595_v11  ;;  %v15741_v11 = vcombine.low %v293_v55, %v309_v56 }
 0x4bb   :  { %13957 = vmatprep.subr.bf16.mxu1 %v16094_v2  ;;  %13867 = vmatmul.mubr.bf16.vlgmr.msra.gmra.mrb[68].mxu0 %v17857_v36  ;;  %v15774_v2 = vcombine.high %v325_v15, %v341_v4 }
 0x4bc   :  { %13917 = vmatpush1.bf16.msra.mxu0 %v15581_v25  ;;  %13948 = vmatprep.mubr.bf16.mxu0 %v17823_v58 }
 0x4bd   :  { %13908 = vmatmul.mubr.bf16.vlgmr.msra.gmra.mrb[68].mxu1 %v17861_v39  ;;  %13918 = vmatprep.subr.bf16.mxu0 %v15614_v26  ;;  %v869_v26 = vld [vmem:[#allocation6 + $0x1748] sm:$0xff] }
 0x4be   :  { %13958 = vmatpush1.bf16.msra.mxu1 %v16093_v53  ;;  %13989 = vmatprep.mubr.bf16.mxu1 %v17827_v59 }
 0x4bf   :  { %13959 = vmatprep.subr.bf16.mxu1 %v16126_v17  ;;  %v885_v17 = vld [vmem:[#allocation6 + $0x17c8] sm:$0xff] }
 0x4c0   :  { %13919 = vmatpush1.bf16.msra.mxu0 %v15613_v30  ;;  %v16318_v12 = vcombine.high %v869_v26, %v885_v17  ;;  %v16317_v44 = vcombine.low %v869_v26, %v885_v17  ;;  %v1029_v26 = vld [vmem:[#allocation6 + $0x1c48] sm:$0xff] }
 0x4c1   :  { %13920 = vmatprep.subr.bf16.mxu0 %v15646_v34  ;;  %v1045_v17 = vld [vmem:[#allocation6 + $0x1cc8] sm:$0xff] }
 0x4c2   :  { %13960 = vmatpush1.bf16.msra.mxu1 %v16125_v33 }
 0x4c3   :  { %13961 = vmatprep.subr.bf16.mxu1 %v16158_v13  ;;  %v16285_v13 = vcombine.low %v837_v8, %v853_v10  ;;  %v485_v10 = vld [vmem:[#allocation6 + $0xb48] sm:$0xff] }
 0x4c4   :  { %13921 = vmatpush1.bf16.msra.mxu0 %v15645_v51  ;;  %v405_v51 = vld [vmem:[#allocation6 + $0x8c8] sm:$0xff] }
 0x4c5   :  { %13922 = vmatprep.subr.bf16.mxu0 %v15678_v42  ;;  %v917_v42 = vld [vmem:[#allocation6 + $0x18c8] sm:$0xff]  ;;  %v15838_v31 = vcombine.high %v389_v40, %v405_v51 }
 0x4c6   :  { %13962 = vmatpush1.bf16.msra.mxu1 %v16157_v41  ;;  %v901_v41 = vld [vmem:[#allocation6 + $0x1848] sm:$0xff] }
 0x4c7   :  { %13963 = vmatprep.subr.bf16.mxu1 %v16190_v43  ;;  %v15805_v43 = vcombine.low %v357_v23, %v373_v7  ;;  %v16350_v19 = vcombine.high %v901_v41, %v917_v42  ;;  %v16349_v55 = vcombine.low %v901_v41, %v917_v42  ;;  %v581_v42 = vld [vmem:[#allocation6 + $0xe48] sm:$0xff] }
 0x4c8   :  { %13923 = vmatpush1.bf16.msra.mxu0 %v15677_v48  ;;  %v437_v48 = vld [vmem:[#allocation6 + $0x9c8] sm:$0xff] }
 0x4c9   :  { %13924 = vmatprep.subr.bf16.mxu0 %v15710_v52  ;;  %v949_v52 = vld [vmem:[#allocation6 + $0x19c8] sm:$0xff]  ;;  %v15870_v56 = vcombine.high %v421_v22, %v437_v48 }
 0x4ca   :  { %13964 = vmatpush1.bf16.msra.mxu1 %v16189_v50  ;;  %v933_v50 = vld [vmem:[#allocation6 + $0x1948] sm:$0xff] }
 0x4cb   :  { %13965 = vmatprep.subr.bf16.mxu1 %v16222_v5  ;;  %v15837_v5 = vcombine.low %v389_v40, %v405_v51  ;;  %v16382_v60 = vcombine.high %v933_v50, %v949_v52  ;;  %v16381_v15 = vcombine.low %v933_v50, %v949_v52  ;;  %v16477_v40 = vcombine.low %v1029_v26, %v1045_v17  ;;  %v613_v52 = vld [vmem:[#allocation6 + $0xf48] sm:$0xff] }
 0x4cc   :  { %13925 = vmatpush1.bf16.msra.mxu0 %v15709_v62  ;;  %v469_v62 = vld [vmem:[#allocation6 + $0xac8] sm:$0xff] }
 0x4cd   :  { %13926 = vmatprep.subr.bf16.mxu0 %v15742_v0  ;;  %v981_v0 = vld [vmem:[#allocation6 + $0x1ac8] sm:$0xff]  ;;  %v15902_v4 = vcombine.high %v453_v61, %v469_v62 }
 0x4ce   :  { %13966 = vmatpush1.bf16.msra.mxu1 %v16221_v63  ;;  %v13622_v21 = vpop.f32.mrb[56].mxu0  ;;  %v965_v63 = vld [vmem:[#allocation6 + $0x1a48] sm:$0xff] }
 0x4cf   :  { %13967 = vmatprep.subr.bf16.mxu1 %v16254_v3  ;;  %v13624_v53 = vpop.f32.mrb[57].mxu0  ;;  %v15869_v3 = vcombine.low %v421_v22, %v437_v48  ;;  %v16414_v8 = vcombine.high %v965_v63, %v981_v0 }
 0x4d0   :  { %v13663_v25 = vpop.f32.mrb[56].mxu1  ;;  %v13626_v24 = vpop.f32.mrb[58].mxu0  ;;  %13927 = vmatpush1.bf16.msra.mxu0 %v15741_v11  ;;  %v501_v11 = vld [vmem:[#allocation6 + $0xbc8] sm:$0xff] }
 0x4d1   :  { %v18035_v57 = vadd.f32 %v13663_v25, %v13622_v21  ;;  %v13665_v54 = vpop.f32.mrb[57].mxu1  ;;  %v13627_v34 = vpop.f32.mrb[59].mxu0  ;;  %13928 = vmatprep.subr.bf16.mxu0 %v15774_v2  ;;  %v1013_v2 = vld [vmem:[#allocation6 + $0x1bc8] sm:$0xff]  ;;  %v15901_v21 = vcombine.low %v453_v61, %v469_v62  ;;  %v15934_v23 = vcombine.high %v485_v10, %v501_v11 }
 0x4d2   :  { %v18037_v30 = vadd.f32 %v13665_v54, %v13624_v53  ;;  %v13667_v33 = vpop.f32.mrb[58].mxu1  ;;  %13968 = vmatpush1.bf16.msra.mxu1 %v16253_v14  ;;  %v997_v14 = vld [vmem:[#allocation6 + $0x1b48] sm:$0xff]  ;;  %v15933_v54 = vcombine.low %v485_v10, %v501_v11 }
 0x4d3   :  { %v13668_v38 = vpop.f32.mrb[59].mxu1  ;;  %13969 = vmatprep.subr.bf16.mxu1 %v16286_v6  ;;  %v16413_v6 = vcombine.low %v965_v63, %v981_v0  ;;  %v16446_v7 = vcombine.high %v997_v14, %v1013_v2  ;;  %v517_v25 = vld [vmem:[#allocation6 + $0xc48] sm:$0xff]  ;;  %v16445_v24 = vcombine.low %v997_v14, %v1013_v2  ;;  %v16478_v33 = vcombine.high %v1029_v26, %v1045_v17 }
 0x4d4   :  { %13929 = vmatpush1.bf16.msra.mxu0 %v15773_v35  ;;  %v533_v53 = vld [vmem:[#allocation6 + $0xcc8] sm:$0xff] }
 0x4d5   :  { %13930 = vmatprep.subr.bf16.mxu0 %v15806_v37  ;;  %v15966_v35 = vcombine.high %v517_v25, %v533_v53  ;;  %v549_v34 = vld [vmem:[#allocation6 + $0xd48] sm:$0xff] }
 0x4d6   :  { %13970 = vmatpush1.bf16.msra.mxu1 %v16285_v13  ;;  %v565_v13 = vld [vmem:[#allocation6 + $0xdc8] sm:$0xff] }
 0x4d7   :  { %13971 = vmatprep.subr.bf16.mxu1 %v16318_v12  ;;  %v1061_v37 = vld [vmem:[#allocation6 + $0x1d48] sm:$0xff]  ;;  %v15965_v12 = vcombine.low %v517_v25, %v533_v53  ;;  %v15998_v51 = vcombine.high %v549_v34, %v565_v13 }
 0x4d8   :  { %13931 = vmatpush1.bf16.msra.mxu0 %v15805_v43  ;;  %v1077_v38 = vld [vmem:[#allocation6 + $0x1dc8] sm:$0xff] }
 0x4d9   :  { %13932 = vmatprep.subr.bf16.mxu0 %v15838_v31  ;;  %v16510_v41 = vcombine.high %v1061_v37, %v1077_v38  ;;  %v597_v43 = vld [vmem:[#allocation6 + $0xec8] sm:$0xff]  ;;  %v16509_v22 = vcombine.low %v1061_v37, %v1077_v38 }
 0x4da   :  { %13972 = vmatpush1.bf16.msra.mxu1 %v16317_v44  ;;  %v1093_v44 = vld [vmem:[#allocation6 + $0x1e48] sm:$0xff]  ;;  %v16030_v48 = vcombine.high %v581_v42, %v597_v43 }
 0x4db   :  { %13973 = vmatprep.subr.bf16.mxu1 %v16350_v19  ;;  %v1109_v31 = vld [vmem:[#allocation6 + $0x1ec8] sm:$0xff]  ;;  %v15997_v19 = vcombine.low %v549_v34, %v565_v13 }
 0x4dc   :  { %13933 = vmatpush1.bf16.msra.mxu0 %v15837_v5  ;;  %v16542_v50 = vcombine.high %v1093_v44, %v1109_v31  ;;  %v629_v5 = vld [vmem:[#allocation6 + $0xfc8] sm:$0xff]  ;;  %v16541_v61 = vcombine.low %v1093_v44, %v1109_v31 }
 0x4dd   :  { %13934 = vmatprep.subr.bf16.mxu0 %v15870_v56  ;;  %v1141_v56 = vld [vmem:[#allocation6 + $0x1fc8] sm:$0xff]  ;;  %v16062_v62 = vcombine.high %v613_v52, %v629_v5 }
 0x4de   :  { %13974 = vmatpush1.bf16.msra.mxu1 %v16349_v55  ;;  %v1125_v55 = vld [vmem:[#allocation6 + $0x1f48] sm:$0xff] }
 0x4df   :  { %13975 = vmatprep.subr.bf16.mxu1 %v16382_v60  ;;  %v16029_v60 = vcombine.low %v581_v42, %v597_v43  ;;  %v16574_v63 = vcombine.high %v1125_v55, %v1141_v56  ;;  %v1157_v0 = vld [vmem:[#allocation6 + $0x2048] sm:$0xff]  ;;  %v16573_v10 = vcombine.low %v1125_v55, %v1141_v56 }
 0x4e0   :  { %13935 = vmatpush1.bf16.msra.mxu0 %v15869_v3  ;;  %v1173_v3 = vld [vmem:[#allocation6 + $0x20c8] sm:$0xff] }
 0x4e1   :  { %13936 = vmatprep.subr.bf16.mxu0 %v15902_v4  ;;  %v1685_v4 = vld [vmem:[#allocation6 + $0x30c8] sm:$0xff]  ;;  %v16606_v11 = vcombine.high %v1157_v0, %v1173_v3 }
 0x4e2   :  { %13976 = vmatpush1.bf16.msra.mxu1 %v16381_v15  ;;  %v1669_v15 = vld [vmem:[#allocation6 + $0x3048] sm:$0xff] }
 0x4e3   :  { %13977 = vmatprep.subr.bf16.mxu1 %v16414_v8  ;;  %v16061_v8 = vcombine.low %v613_v52, %v629_v5  ;;  %v17118_v14 = vcombine.high %v1669_v15, %v1685_v4  ;;  %v1189_v2 = vld [vmem:[#allocation6 + $0x2148] sm:$0xff]  ;;  %v17117_v25 = vcombine.low %v1669_v15, %v1685_v4 }
 0x4e4   :  { %13937 = vmatpush1.bf16.msra.mxu0 %v15901_v21  ;;  %v1205_v21 = vld [vmem:[#allocation6 + $0x21c8] sm:$0xff] }
 0x4e5   :  { %13938 = vmatprep.subr.bf16.mxu0 %v15934_v23  ;;  %v1717_v23 = vld [vmem:[#allocation6 + $0x31c8] sm:$0xff]  ;;  %v16638_v53 = vcombine.high %v1189_v2, %v1205_v21 }
 0x4e6   :  { %13978 = vmatpush1.bf16.msra.mxu1 %v16413_v6  ;;  %v1701_v6 = vld [vmem:[#allocation6 + $0x3148] sm:$0xff] }
 0x4e7   :  { %13979 = vmatprep.subr.bf16.mxu1 %v16446_v7  ;;  %v16605_v7 = vcombine.low %v1157_v0, %v1173_v3  ;;  %v17150_v26 = vcombine.high %v1701_v6, %v1717_v23  ;;  %v1221_v17 = vld [vmem:[#allocation6 + $0x2248] sm:$0xff]  ;;  %v17149_v34 = vcombine.low %v1701_v6, %v1717_v23 }
 0x4e8   :  { %13939 = vmatpush1.bf16.msra.mxu0 %v15933_v54  ;;  %v1237_v54 = vld [vmem:[#allocation6 + $0x22c8] sm:$0xff] }
 0x4e9   :  { %13940 = vmatprep.subr.bf16.mxu0 %v15966_v35  ;;  %v1749_v35 = vld [vmem:[#allocation6 + $0x32c8] sm:$0xff]  ;;  %v16670_v13 = vcombine.high %v1221_v17, %v1237_v54 }
 0x4ea   :  { %13980 = vmatpush1.bf16.msra.mxu1 %v16445_v24  ;;  %v1733_v24 = vld [vmem:[#allocation6 + $0x3248] sm:$0xff] }
 0x4eb   :  { %13981 = vmatprep.subr.bf16.mxu1 %v16478_v33  ;;  %v16637_v33 = vcombine.low %v1189_v2, %v1205_v21  ;;  %v17182_v37 = vcombine.high %v1733_v24, %v1749_v35  ;;  %v1253_v38 = vld [vmem:[#allocation6 + $0x2348] sm:$0xff]  ;;  %v17181_v42 = vcombine.low %v1733_v24, %v1749_v35 }
 0x4ec   :  { %13941 = vmatpush1.bf16.msra.mxu0 %v15965_v12  ;;  %v1269_v12 = vld [vmem:[#allocation6 + $0x23c8] sm:$0xff] }
 0x4ed   :  { %13942 = vmatprep.subr.bf16.mxu0 %v15998_v51  ;;  %v1781_v51 = vld [vmem:[#allocation6 + $0x33c8] sm:$0xff]  ;;  %v16702_v43 = vcombine.high %v1253_v38, %v1269_v12 }
 0x4ee   :  { %13982 = vmatpush1.bf16.msra.mxu1 %v16477_v40  ;;  %v1765_v40 = vld [vmem:[#allocation6 + $0x3348] sm:$0xff] }
 0x4ef   :  { %13983 = vmatprep.subr.bf16.mxu1 %v16510_v41  ;;  %v16669_v41 = vcombine.low %v1221_v17, %v1237_v54  ;;  %v17214_v44 = vcombine.high %v1765_v40, %v1781_v51  ;;  %v1285_v31 = vld [vmem:[#allocation6 + $0x2448] sm:$0xff]  ;;  %v17213_v52 = vcombine.low %v1765_v40, %v1781_v51  ;;  %v15230_v17 = vrot.slane %v18024_v18, %v17962_v46 }
 0x4f0   :  { %13943 = vmatpush1.bf16.msra.mxu0 %v15997_v19  ;;  %v1301_v19 = vld [vmem:[#allocation6 + $0x24c8] sm:$0xff] }
 0x4f1   :  { %13944 = vmatprep.subr.bf16.mxu0 %v16030_v48  ;;  %v1813_v48 = vld [vmem:[#allocation6 + $0x34c8] sm:$0xff]  ;;  %v16734_v5 = vcombine.high %v1285_v31, %v1301_v19 }
 0x4f2   :  { %13984 = vmatpush1.bf16.msra.mxu1 %v16509_v22  ;;  %v1797_v22 = vld [vmem:[#allocation6 + $0x3448] sm:$0xff] }
 0x4f3   :  { %13985 = vmatprep.subr.bf16.mxu1 %v16542_v50  ;;  %v16701_v50 = vcombine.low %v1253_v38, %v1269_v12  ;;  %v17246_v55 = vcombine.high %v1797_v22, %v1813_v48  ;;  %v1317_v56 = vld [vmem:[#allocation6 + $0x2548] sm:$0xff]  ;;  %v17245_v0 = vcombine.low %v1797_v22, %v1813_v48 }
 0x4f4   :  { %13945 = vmatpush1.bf16.msra.mxu0 %v16029_v60  ;;  %v1333_v60 = vld [vmem:[#allocation6 + $0x25c8] sm:$0xff] }
 0x4f5   :  { %13946 = vmatprep.subr.bf16.mxu0 %v16062_v62  ;;  %v1845_v62 = vld [vmem:[#allocation6 + $0x35c8] sm:$0xff]  ;;  %v16766_v3 = vcombine.high %v1317_v56, %v1333_v60 }
 0x4f6   :  { %13986 = vmatpush1.bf16.msra.mxu1 %v16541_v61  ;;  %v1829_v61 = vld [vmem:[#allocation6 + $0x3548] sm:$0xff] }
 0x4f7   :  { %13987 = vmatprep.subr.bf16.mxu1 %v16574_v63  ;;  %v16733_v63 = vcombine.low %v1285_v31, %v1301_v19  ;;  %v17278_v15 = vcombine.high %v1829_v61, %v1845_v62  ;;  %v1349_v4 = vld [vmem:[#allocation6 + $0x2648] sm:$0xff]  ;;  %v17277_v2 = vcombine.low %v1829_v61, %v1845_v62 }
 0x4f8   :  { %13947 = vmatpush1.bf16.msra.mxu0 %v16061_v8  ;;  %v1365_v8 = vld [vmem:[#allocation6 + $0x26c8] sm:$0xff] }
 0x4f9   :  { %13998 = vmatprep.subr.bf16.mxu0 %v16606_v11  ;;  %v1877_v11 = vld [vmem:[#allocation6 + $0x36c8] sm:$0xff]  ;;  %v16798_v21 = vcombine.high %v1349_v4, %v1365_v8  ;;  %v16797_v38 = vcombine.low %v1349_v4, %v1365_v8 }
 0x4fa   :  { %13988 = vmatpush1.bf16.msra.mxu1 %v16573_v10  ;;  %v1861_v10 = vld [vmem:[#allocation6 + $0x3648] sm:$0xff] }
 0x4fb   :  { %14039 = vmatprep.subr.bf16.mxu1 %v17118_v14  ;;  %13949 = vmatmul.mubr.bf16.vlgmr.msra.gmra.mrb[72].mxu0 %v17833_v16  ;;  %v16765_v14 = vcombine.low %v1317_v56, %v1333_v60  ;;  %v17310_v23 = vcombine.high %v1861_v10, %v1877_v11  ;;  %v1893_v24 = vld [vmem:[#allocation6 + $0x3748] sm:$0xff]  ;;  %v17309_v51 = vcombine.low %v1861_v10, %v1877_v11 }
 0x4fc   :  { %13999 = vmatpush1.bf16.msra.mxu0 %v16605_v7  ;;  %14030 = vmatprep.mubr.bf16.mxu0 %v17845_v27  ;;  %v1381_v7 = vld [vmem:[#allocation6 + $0x2748] sm:$0xff] }
 0x4fd   :  { %13990 = vmatmul.mubr.bf16.vlgmr.msra.gmra.mrb[72].mxu1 %v17839_v20  ;;  %14000 = vmatprep.subr.bf16.mxu0 %v16638_v53  ;;  %v1909_v35 = vld [vmem:[#allocation6 + $0x37c8] sm:$0xff] }
 0x4fe   :  { %14040 = vmatpush1.bf16.msra.mxu1 %v17117_v25  ;;  %14071 = vmatprep.mubr.bf16.mxu1 %v17850_v29  ;;  %v1397_v25 = vld [vmem:[#allocation6 + $0x27c8] sm:$0xff] }
 0x4ff   :  { %14041 = vmatprep.subr.bf16.mxu1 %v17150_v26  ;;  %v1413_v31 = vld [vmem:[#allocation6 + $0x2848] sm:$0xff] }
 0x500   :  { %14001 = vmatpush1.bf16.msra.mxu0 %v16637_v33  ;;  %v1925_v22 = vld [vmem:[#allocation6 + $0x3848] sm:$0xff] }
 0x501   :  { %14002 = vmatprep.subr.bf16.mxu0 %v16670_v13  ;;  %v15234_v13 = vrot.slane %v18024_v18, %v17965_v49  ;;  %v1941_v48 = vld [vmem:[#allocation6 + $0x38c8] sm:$0xff] }
 0x502   :  { %14042 = vmatpush1.bf16.msra.mxu1 %v17149_v34  ;;  %v17374_v60 = vcombine.high %v1925_v22, %v1941_v48  ;;  %v1445_v61 = vld [vmem:[#allocation6 + $0x2948] sm:$0xff]  ;;  %v17373_v4 = vcombine.low %v1925_v22, %v1941_v48 }
 0x503   :  { %14043 = vmatprep.subr.bf16.mxu1 %v17182_v37  ;;  %v1461_v62 = vld [vmem:[#allocation6 + $0x29c8] sm:$0xff] }
 0x504   :  { %14003 = vmatpush1.bf16.msra.mxu0 %v16669_v41  ;;  %v16830_v41 = vcombine.high %v1381_v7, %v1397_v25  ;;  %v16894_v8 = vcombine.high %v1445_v61, %v1461_v62  ;;  %v1477_v11 = vld [vmem:[#allocation6 + $0x2a48] sm:$0xff] }
 0x505   :  { %14004 = vmatprep.subr.bf16.mxu0 %v16702_v43 }
 0x506   :  { %14044 = vmatpush1.bf16.msra.mxu1 %v17181_v42 }
 0x507   :  { %14045 = vmatprep.subr.bf16.mxu1 %v17214_v44  ;;  %v17342_v44 = vcombine.high %v1893_v24, %v1909_v35 }
 0x508   :  { %14005 = vmatpush1.bf16.msra.mxu0 %v16701_v50  ;;  %v16829_v50 = vcombine.low %v1381_v7, %v1397_v25 }
 0x509   :  { %14006 = vmatprep.subr.bf16.mxu0 %v16734_v5  ;;  %v17341_v5 = vcombine.low %v1893_v24, %v1909_v35 }
 0x50a   :  { %14046 = vmatpush1.bf16.msra.mxu1 %v17213_v52 }
 0x50b   :  { %14047 = vmatprep.subr.bf16.mxu1 %v17246_v55 }
 0x50c   :  { %14007 = vmatpush1.bf16.msra.mxu0 %v16733_v63  ;;  %v1957_v63 = vld [vmem:[#allocation6 + $0x3948] sm:$0xff] }
 0x50d   :  { %14008 = vmatprep.subr.bf16.mxu0 %v16766_v3 }
 0x50e   :  { %14048 = vmatpush1.bf16.msra.mxu1 %v17245_v0  ;;  %v13704_v6 = vpop.f32.mrb[60].mxu0  ;;  %v1973_v0 = vld [vmem:[#allocation6 + $0x39c8] sm:$0xff] }
 0x50f   :  { %14049 = vmatprep.subr.bf16.mxu1 %v17278_v15  ;;  %v13705_v53 = vadd.f32 %v13704_v6, %v18035_v57  ;;  %v13706_v54 = vpop.f32.mrb[61].mxu0  ;;  %v17406_v10 = vcombine.high %v1957_v63, %v1973_v0  ;;  %v16893_v6 = vcombine.low %v1445_v61, %v1461_v62  ;;  %v1637_v62 = vld [vmem:[#allocation6 + $0x2f48] sm:$0xff] }
 0x510   :  { %v13745_v26 = vpop.f32.mrb[60].mxu1  ;;  %v13707_v33 = vadd.f32 %v13706_v54, %v18037_v30  ;;  %v13708_v37 = vpop.f32.mrb[62].mxu0  ;;  %14009 = vmatpush1.bf16.msra.mxu0 %v16765_v14  ;;  %v1429_v30 = vld [vmem:[#allocation6 + $0x28c8] sm:$0xff] }
 0x511   :  { %v13747_v34 = vpop.f32.mrb[61].mxu1  ;;  %v13746_v12 = vadd.f32 %v13745_v26, %v13705_v53  ;;  %v13709_v57 = vpop.f32.mrb[63].mxu0  ;;  %14010 = vmatprep.subr.bf16.mxu0 %v16798_v21  ;;  %v16862_v55 = vcombine.high %v1413_v31, %v1429_v30  ;;  %v16861_v15 = vcombine.low %v1413_v31, %v1429_v30  ;;  %v1493_v14 = vld [vmem:[#allocation6 + $0x2ac8] sm:$0xff] }
 0x512   :  { %v13749_v40 = vpop.f32.mrb[62].mxu1  ;;  %14050 = vmatpush1.bf16.msra.mxu1 %v17277_v2  ;;  %v13748_v42 = vadd.f32 %v13747_v34, %v13707_v33  ;;  %v1989_v2 = vld [vmem:[#allocation6 + $0x3a48] sm:$0xff]  ;;  %v16926_v7 = vcombine.high %v1477_v11, %v1493_v14  ;;  %v16925_v24 = vcombine.low %v1477_v11, %v1493_v14  ;;  %v134_v11 = vld [vmem:[#allocation6 + $0x50] sm:$0xff] }
 0x513   :  { %v13750_v43 = vpop.f32.mrb[63].mxu1  ;;  %14051 = vmatprep.subr.bf16.mxu1 %v17310_v23  ;;  %v15345_v19 = vadd.f32 %v15230_v17, %v13746_v12  ;;  %v2005_v21 = vld [vmem:[#allocation6 + $0x3ac8] sm:$0xff]  ;;  %v17405_v23 = vcombine.low %v1957_v63, %v1973_v0  ;;  %v150_v14 = vld [vmem:[#allocation6 + $0xd0] sm:$0xff] }
 0x514   :  { %v15346_v18 = vadd.f32 %v15234_v13, %v13748_v42  ;;  %14011 = vmatpush1.bf16.msra.mxu0 %v16797_v38  ;;  %v17438_v25 = vcombine.high %v1989_v2, %v2005_v21  ;;  %v1509_v53 = vld [vmem:[#allocation6 + $0x2b48] sm:$0xff]  ;;  %v17437_v35 = vcombine.low %v1989_v2, %v2005_v21  ;;  %v646_v2 = vld [vmem:[#allocation6 + $0x1050] sm:$0xff] }
 0x515   :  { %v15377_v52 = vmax.f32 %v15345_v19, 0.0  ;;  %14012 = vmatprep.subr.bf16.mxu0 %v16830_v41  ;;  %v1525_v26 = vld [vmem:[#allocation6 + $0x2bc8] sm:$0xff]  ;;  %v662_v21 = vld [vmem:[#allocation6 + $0x10d0] sm:$0xff] }
 0x516   :  { %14052 = vmatpush1.bf16.msra.mxu1 %v17309_v51  ;;  %v15378_v56 = vmax.f32 %v15346_v18, 0.0  ;;  %v2021_v17 = vld [vmem:[#allocation6 + $0x3b48] sm:$0xff]  ;;  %v16958_v33 = vcombine.high %v1509_v53, %v1525_v26  ;;  %v16957_v40 = vcombine.low %v1509_v53, %v1525_v26  ;;  %v166_v53 = vld [vmem:[#allocation6 + $0x150] sm:$0xff] }
 0x517   :  { %14053 = vmatprep.subr.bf16.mxu1 %v17342_v44  ;;  %v2037_v54 = vld [vmem:[#allocation6 + $0x3bc8] sm:$0xff]  ;;  %v182_v26 = vld [vmem:[#allocation6 + $0x1d0] sm:$0xff] }
 0x518   :  { %v17634_v3 = vpack.c.bf16 %v15378_v56, %v15377_v52  ;;  %14013 = vmatpush1.bf16.msra.mxu0 %v16829_v50  ;;  %v17470_v34 = vcombine.high %v2021_v17, %v2037_v54  ;;  %v1541_v13 = vld [vmem:[#allocation6 + $0x2c48] sm:$0xff]  ;;  %v17469_v57 = vcombine.low %v2021_v17, %v2037_v54  ;;  %v678_v17 = vld [vmem:[#allocation6 + $0x1150] sm:$0xff] }
 0x519   :  { %14014 = vmatprep.subr.bf16.mxu0 %v16862_v55  ;;  %v1557_v37 = vld [vmem:[#allocation6 + $0x2cc8] sm:$0xff]  ;;  %v694_v54 = vld [vmem:[#allocation6 + $0x11d0] sm:$0xff] }
 0x51a   :  { %14054 = vmatpush1.bf16.msra.mxu1 %v17341_v5  ;;  %15530 = vst [vmem:[#allocation9 + $0x38] sm:$0xff] %v17634_v3  ;;  %v2053_v38 = vld [vmem:[#allocation6 + $0x3c48] sm:$0xff]  ;;  %v16990_v51 = vcombine.high %v1541_v13, %v1557_v37  ;;  %v16989_v30 = vcombine.low %v1541_v13, %v1557_v37  ;;  %v198_v13 = vld [vmem:[#allocation6 + $0x250] sm:$0xff] }
 0x51b   :  { %14055 = vmatprep.subr.bf16.mxu1 %v17374_v60  ;;  %v2069_v12 = vld [vmem:[#allocation6 + $0x3cc8] sm:$0xff]  ;;  %v214_v37 = vld [vmem:[#allocation6 + $0x2d0] sm:$0xff] }
 0x51c   :  { %14015 = vmatpush1.bf16.msra.mxu0 %v16861_v15  ;;  %v17502_v41 = vcombine.high %v2053_v38, %v2069_v12  ;;  %v1573_v42 = vld [vmem:[#allocation6 + $0x2d48] sm:$0xff]  ;;  %v17501_v19 = vcombine.low %v2053_v38, %v2069_v12  ;;  %v710_v38 = vld [vmem:[#allocation6 + $0x1250] sm:$0xff] }
 0x51d   :  { %14016 = vmatprep.subr.bf16.mxu0 %v16894_v8  ;;  %v1589_v43 = vld [vmem:[#allocation6 + $0x2dc8] sm:$0xff]  ;;  %v726_v12 = vld [vmem:[#allocation6 + $0x12d0] sm:$0xff] }
 0x51e   :  { %14056 = vmatpush1.bf16.msra.mxu1 %v17373_v4  ;;  %v2085_v44 = vld [vmem:[#allocation6 + $0x3d48] sm:$0xff]  ;;  %v17022_v22 = vcombine.high %v1573_v42, %v1589_v43  ;;  %v17021_v55 = vcombine.low %v1573_v42, %v1589_v43  ;;  %v230_v42 = vld [vmem:[#allocation6 + $0x350] sm:$0xff] }
 0x51f   :  { %14057 = vmatprep.subr.bf16.mxu1 %v17406_v10  ;;  %v2101_v31 = vld [vmem:[#allocation6 + $0x3dc8] sm:$0xff]  ;;  %v246_v43 = vld [vmem:[#allocation6 + $0x3d0] sm:$0xff] }
 0x520   :  { %14017 = vmatpush1.bf16.msra.mxu0 %v16893_v6  ;;  %v17534_v48 = vcombine.high %v2085_v44, %v2101_v31  ;;  %v1605_v18 = vld [vmem:[#allocation6 + $0x2e48] sm:$0xff]  ;;  %v17533_v56 = vcombine.low %v2085_v44, %v2101_v31  ;;  %v742_v44 = vld [vmem:[#allocation6 + $0x1350] sm:$0xff] }
 0x521   :  { %14018 = vmatprep.subr.bf16.mxu0 %v16926_v7  ;;  %v1621_v50 = vld [vmem:[#allocation6 + $0x2ec8] sm:$0xff]  ;;  %v15584_v7 = vcombine.high %v134_v11, %v150_v14  ;;  %v758_v31 = vld [vmem:[#allocation6 + $0x13d0] sm:$0xff] }
 0x522   :  { %14058 = vmatpush1.bf16.msra.mxu1 %v17405_v23  ;;  %v2117_v52 = vld [vmem:[#allocation6 + $0x3e48] sm:$0xff]  ;;  %v17054_v60 = vcombine.high %v1605_v18, %v1621_v50  ;;  %v17053_v15 = vcombine.low %v1605_v18, %v1621_v50  ;;  %v262_v18 = vld [vmem:[#allocation6 + $0x450] sm:$0xff] }
 0x523   :  { %14059 = vmatprep.subr.bf16.mxu1 %v17438_v25  ;;  %v2133_v5 = vld [vmem:[#allocation6 + $0x3ec8] sm:$0xff]  ;;  %v16096_v25 = vcombine.high %v646_v2, %v662_v21  ;;  %v278_v50 = vld [vmem:[#allocation6 + $0x4d0] sm:$0xff] }
 0x524   :  { %14019 = vmatpush1.bf16.msra.mxu0 %v16925_v24  ;;  %v17566_v61 = vcombine.high %v2117_v52, %v2133_v5  ;;  %v1653_v63 = vld [vmem:[#allocation6 + $0x2fc8] sm:$0xff]  ;;  %v17565_v4 = vcombine.low %v2117_v52, %v2133_v5  ;;  %v15583_v24 = vcombine.low %v134_v11, %v150_v14  ;;  %v774_v52 = vld [vmem:[#allocation6 + $0x1450] sm:$0xff] }
 0x525   :  { %14020 = vmatprep.subr.bf16.mxu0 %v16958_v33  ;;  %v2149_v0 = vld [vmem:[#allocation6 + $0x3f48] sm:$0xff]  ;;  %v17086_v8 = vcombine.high %v1637_v62, %v1653_v63  ;;  %v17085_v6 = vcombine.low %v1637_v62, %v1653_v63  ;;  %v15616_v33 = vcombine.high %v166_v53, %v182_v26  ;;  %v790_v5 = vld [vmem:[#allocation6 + $0x14d0] sm:$0xff] }
 0x526   :  { %14060 = vmatpush1.bf16.msra.mxu1 %v17437_v35  ;;  %v2165_v3 = vld [vmem:[#allocation6 + $0x3fc8] sm:$0xff]  ;;  %v16095_v35 = vcombine.low %v646_v2, %v662_v21  ;;  %v294_v62 = vld [vmem:[#allocation6 + $0x550] sm:$0xff] }
 0x527   :  { %14061 = vmatprep.subr.bf16.mxu1 %v17470_v34  ;;  %v17598_v10 = vcombine.high %v2149_v0, %v2165_v3  ;;  %v17597_v23 = vcombine.low %v2149_v0, %v2165_v3  ;;  %v16128_v34 = vcombine.high %v678_v17, %v694_v54  ;;  %v310_v63 = vld [vmem:[#allocation6 + $0x5d0] sm:$0xff] }
 0x528   :  { %14021 = vmatpush1.bf16.msra.mxu0 %v16957_v40  ;;  %v15615_v40 = vcombine.low %v166_v53, %v182_v26  ;;  %v806_v0 = vld [vmem:[#allocation6 + $0x1550] sm:$0xff] }
 0x529   :  { %14022 = vmatprep.subr.bf16.mxu0 %v16990_v51  ;;  %v15648_v51 = vcombine.high %v198_v13, %v214_v37  ;;  %v822_v3 = vld [vmem:[#allocation6 + $0x15d0] sm:$0xff] }
 0x52a   :  { %14062 = vmatpush1.bf16.msra.mxu1 %v17469_v57  ;;  %v16127_v57 = vcombine.low %v678_v17, %v694_v54  ;;  %v326_v11 = vld [vmem:[#allocation6 + $0x650] sm:$0xff] }
 0x52b   :  { %14063 = vmatprep.subr.bf16.mxu1 %v17502_v41  ;;  %v16160_v41 = vcombine.high %v710_v38, %v726_v12  ;;  %v342_v14 = vld [vmem:[#allocation6 + $0x6d0] sm:$0xff] }
 0x52c   :  { %14023 = vmatpush1.bf16.msra.mxu0 %v16989_v30  ;;  %v15647_v30 = vcombine.low %v198_v13, %v214_v37  ;;  %v838_v2 = vld [vmem:[#allocation6 + $0x1650] sm:$0xff] }
 0x52d   :  { %14024 = vmatprep.subr.bf16.mxu0 %v17022_v22  ;;  %v15680_v22 = vcombine.high %v230_v42, %v246_v43  ;;  %v854_v21 = vld [vmem:[#allocation6 + $0x16d0] sm:$0xff] }
 0x52e   :  { %14064 = vmatpush1.bf16.msra.mxu1 %v17501_v19  ;;  %v16159_v19 = vcombine.low %v710_v38, %v726_v12  ;;  %v16288_v53 = vcombine.high %v838_v2, %v854_v21  ;;  %v358_v26 = vld [vmem:[#allocation6 + $0x750] sm:$0xff]  ;;  %v15775_v38 = vcombine.low %v326_v11, %v342_v14 }
 0x52f   :  { %14065 = vmatprep.subr.bf16.mxu1 %v17534_v48  ;;  %v16192_v48 = vcombine.high %v742_v44, %v758_v31  ;;  %v374_v17 = vld [vmem:[#allocation6 + $0x7d0] sm:$0xff] }
 0x530   :  { %14025 = vmatpush1.bf16.msra.mxu0 %v17021_v55  ;;  %v15679_v55 = vcombine.low %v230_v42, %v246_v43 }
 0x531   :  { %14026 = vmatprep.subr.bf16.mxu0 %v17054_v60  ;;  %v15712_v60 = vcombine.high %v262_v18, %v278_v50 }
 0x532   :  { %14066 = vmatpush1.bf16.msra.mxu1 %v17533_v56  ;;  %v16191_v56 = vcombine.low %v742_v44, %v758_v31  ;;  %v390_v44 = vld [vmem:[#allocation6 + $0x850] sm:$0xff] }
 0x533   :  { %14067 = vmatprep.subr.bf16.mxu1 %v17566_v61  ;;  %v16224_v61 = vcombine.high %v774_v52, %v790_v5  ;;  %v406_v31 = vld [vmem:[#allocation6 + $0x8d0] sm:$0xff] }
 0x534   :  { %14027 = vmatpush1.bf16.msra.mxu0 %v17053_v15  ;;  %v15711_v15 = vcombine.low %v262_v18, %v278_v50  ;;  %v15840_v18 = vcombine.high %v390_v44, %v406_v31 }
 0x535   :  { %14028 = vmatprep.subr.bf16.mxu0 %v17086_v8  ;;  %v15744_v8 = vcombine.high %v294_v62, %v310_v63 }
 0x536   :  { %14068 = vmatpush1.bf16.msra.mxu1 %v17565_v4  ;;  %v16223_v4 = vcombine.low %v774_v52, %v790_v5  ;;  %v422_v52 = vld [vmem:[#allocation6 + $0x950] sm:$0xff] }
 0x537   :  { %14069 = vmatprep.subr.bf16.mxu1 %v17598_v10  ;;  %v16256_v10 = vcombine.high %v806_v0, %v822_v3  ;;  %v438_v5 = vld [vmem:[#allocation6 + $0x9d0] sm:$0xff] }
 0x538   :  { %14029 = vmatpush1.bf16.msra.mxu0 %v17085_v6  ;;  %v15743_v6 = vcombine.low %v294_v62, %v310_v63  ;;  %v15872_v62 = vcombine.high %v422_v52, %v438_v5 }
 0x539   :  { %14080 = vmatprep.subr.bf16.mxu0 %v15584_v7  ;;  %v15776_v7 = vcombine.high %v326_v11, %v342_v14 }
 0x53a   :  { %14070 = vmatpush1.bf16.msra.mxu1 %v17597_v23  ;;  %v16255_v23 = vcombine.low %v806_v0, %v822_v3  ;;  %v454_v0 = vld [vmem:[#allocation6 + $0xa50] sm:$0xff] }
 0x53b   :  { %14121 = vmatprep.subr.bf16.mxu1 %v16096_v25  ;;  %14031 = vmatmul.mubr.bf16.vlgmr.msra.gmra.mrb[76].mxu0 %v17857_v36  ;;  %v470_v3 = vld [vmem:[#allocation6 + $0xad0] sm:$0xff] }
 0x53c   :  { %14081 = vmatpush1.bf16.msra.mxu0 %v15583_v24  ;;  %14112 = vmatprep.mubr.bf16.mxu0 %v17823_v58  ;;  %v15904_v11 = vcombine.high %v454_v0, %v470_v3 }
 0x53d   :  { %14072 = vmatmul.mubr.bf16.vlgmr.msra.gmra.mrb[76].mxu1 %v17861_v39  ;;  %14082 = vmatprep.subr.bf16.mxu0 %v15616_v33  ;;  %v886_v33 = vld [vmem:[#allocation6 + $0x17d0] sm:$0xff] }
 0x53e   :  { %14122 = vmatpush1.bf16.msra.mxu1 %v16095_v35  ;;  %14153 = vmatprep.mubr.bf16.mxu1 %v17827_v59  ;;  %v870_v35 = vld [vmem:[#allocation6 + $0x1750] sm:$0xff] }
 0x53f   :  { %14123 = vmatprep.subr.bf16.mxu1 %v16128_v34  ;;  %v16320_v43 = vcombine.high %v870_v35, %v886_v33 }
 0x540   :  { %14083 = vmatpush1.bf16.msra.mxu0 %v15615_v40 }
 0x541   :  { %14084 = vmatprep.subr.bf16.mxu0 %v15648_v51  ;;  %v16287_v51 = vcombine.low %v838_v2, %v854_v21  ;;  %v486_v2 = vld [vmem:[#allocation6 + $0xb50] sm:$0xff] }
 0x542   :  { %14124 = vmatpush1.bf16.msra.mxu1 %v16127_v57  ;;  %v502_v21 = vld [vmem:[#allocation6 + $0xbd0] sm:$0xff] }
 0x543   :  { %14125 = vmatprep.subr.bf16.mxu1 %v16160_v41  ;;  %v15808_v41 = vcombine.high %v358_v26, %v374_v17 }
 0x544   :  { %14085 = vmatpush1.bf16.msra.mxu0 %v15647_v30  ;;  %v902_v30 = vld [vmem:[#allocation6 + $0x1850] sm:$0xff] }
 0x545   :  { %14086 = vmatprep.subr.bf16.mxu0 %v15680_v22  ;;  %v15807_v22 = vcombine.low %v358_v26, %v374_v17  ;;  %v518_v17 = vld [vmem:[#allocation6 + $0xc50] sm:$0xff] }
 0x546   :  { %14126 = vmatpush1.bf16.msra.mxu1 %v16159_v19  ;;  %v918_v19 = vld [vmem:[#allocation6 + $0x18d0] sm:$0xff] }
 0x547   :  { %14127 = vmatprep.subr.bf16.mxu1 %v16192_v48  ;;  %v16319_v48 = vcombine.low %v870_v35, %v886_v33  ;;  %v16352_v50 = vcombine.high %v902_v30, %v918_v19  ;;  %v1046_v35 = vld [vmem:[#allocation6 + $0x1cd0] sm:$0xff]  ;;  %v15935_v33 = vcombine.low %v486_v2, %v502_v21 }
 0x548   :  { %14087 = vmatpush1.bf16.msra.mxu0 %v15679_v55  ;;  %v934_v55 = vld [vmem:[#allocation6 + $0x1950] sm:$0xff] }
 0x549   :  { %14088 = vmatprep.subr.bf16.mxu0 %v15712_v60  ;;  %v15839_v60 = vcombine.low %v390_v44, %v406_v31 }
 0x54a   :  { %14128 = vmatpush1.bf16.msra.mxu1 %v16191_v56  ;;  %v950_v56 = vld [vmem:[#allocation6 + $0x19d0] sm:$0xff] }
 0x54b   :  { %14129 = vmatprep.subr.bf16.mxu1 %v16224_v61  ;;  %v16351_v61 = vcombine.low %v902_v30, %v918_v19  ;;  %v16384_v63 = vcombine.high %v934_v55, %v950_v56  ;;  %v582_v30 = vld [vmem:[#allocation6 + $0xe50] sm:$0xff] }
 0x54c   :  { %14089 = vmatpush1.bf16.msra.mxu0 %v15711_v15  ;;  %v966_v15 = vld [vmem:[#allocation6 + $0x1a50] sm:$0xff] }
 0x54d   :  { %14090 = vmatprep.subr.bf16.mxu0 %v15744_v8  ;;  %v15871_v8 = vcombine.low %v422_v52, %v438_v5  ;;  %v598_v19 = vld [vmem:[#allocation6 + $0xed0] sm:$0xff] }
 0x54e   :  { %14130 = vmatpush1.bf16.msra.mxu1 %v16223_v4  ;;  %v13786_v25 = vpop.f32.mrb[64].mxu0  ;;  %v982_v4 = vld [vmem:[#allocation6 + $0x1ad0] sm:$0xff]  ;;  %v16032_v52 = vcombine.high %v582_v30, %v598_v19 }
 0x54f   :  { %14131 = vmatprep.subr.bf16.mxu1 %v16256_v10  ;;  %v13788_v24 = vpop.f32.mrb[65].mxu0  ;;  %v16383_v10 = vcombine.low %v934_v55, %v950_v56  ;;  %v16416_v14 = vcombine.high %v966_v15, %v982_v4  ;;  %v614_v55 = vld [vmem:[#allocation6 + $0xf50] sm:$0xff] }
 0x550   :  { %v13827_v54 = vpop.f32.mrb[64].mxu1  ;;  %v13790_v37 = vpop.f32.mrb[66].mxu0  ;;  %14091 = vmatpush1.bf16.msra.mxu0 %v15743_v6  ;;  %v998_v6 = vld [vmem:[#allocation6 + $0x1b50] sm:$0xff] }
 0x551   :  { %v18053_v34 = vadd.f32 %v13827_v54, %v13786_v25  ;;  %v13829_v13 = vpop.f32.mrb[65].mxu1  ;;  %v13791_v57 = vpop.f32.mrb[67].mxu0  ;;  %14092 = vmatprep.subr.bf16.mxu0 %v15776_v7  ;;  %v15903_v7 = vcombine.low %v454_v0, %v470_v3  ;;  %v16415_v25 = vcombine.low %v966_v15, %v982_v4  ;;  %v534_v54 = vld [vmem:[#allocation6 + $0xcd0] sm:$0xff] }
 0x552   :  { %v18055_v12 = vadd.f32 %v13829_v13, %v13788_v24  ;;  %v13831_v40 = vpop.f32.mrb[66].mxu1  ;;  %14132 = vmatpush1.bf16.msra.mxu1 %v16255_v23  ;;  %v1014_v23 = vld [vmem:[#allocation6 + $0x1bd0] sm:$0xff]  ;;  %v15968_v37 = vcombine.high %v518_v17, %v534_v54 }
 0x553   :  { %v13832_v42 = vpop.f32.mrb[67].mxu1  ;;  %14133 = vmatprep.subr.bf16.mxu1 %v16288_v53  ;;  %v15936_v53 = vcombine.high %v486_v2, %v502_v21  ;;  %v16448_v26 = vcombine.high %v998_v6, %v1014_v23  ;;  %v1030_v24 = vld [vmem:[#allocation6 + $0x1c50] sm:$0xff]  ;;  %v16447_v13 = vcombine.low %v998_v6, %v1014_v23 }
 0x554   :  { %14093 = vmatpush1.bf16.msra.mxu0 %v15775_v38  ;;  %v16480_v38 = vcombine.high %v1030_v24, %v1046_v35  ;;  %v550_v40 = vld [vmem:[#allocation6 + $0xd50] sm:$0xff]  ;;  %v15967_v42 = vcombine.low %v518_v17, %v534_v54 }
 0x555   :  { %14094 = vmatprep.subr.bf16.mxu0 %v15808_v41  ;;  %v566_v57 = vld [vmem:[#allocation6 + $0xdd0] sm:$0xff] }
 0x556   :  { %14134 = vmatpush1.bf16.msra.mxu1 %v16287_v51  ;;  %v1062_v51 = vld [vmem:[#allocation6 + $0x1d50] sm:$0xff]  ;;  %v16000_v44 = vcombine.high %v550_v40, %v566_v57 }
 0x557   :  { %14135 = vmatprep.subr.bf16.mxu1 %v16320_v43  ;;  %v1078_v41 = vld [vmem:[#allocation6 + $0x1dd0] sm:$0xff]  ;;  %v16479_v43 = vcombine.low %v1030_v24, %v1046_v35 }
 0x558   :  { %14095 = vmatpush1.bf16.msra.mxu0 %v15807_v22  ;;  %v16512_v31 = vcombine.high %v1062_v51, %v1078_v41  ;;  %v1094_v22 = vld [vmem:[#allocation6 + $0x1e50] sm:$0xff] }
 0x559   :  { %14096 = vmatprep.subr.bf16.mxu0 %v15840_v18  ;;  %v15999_v18 = vcombine.low %v550_v40, %v566_v57  ;;  %v630_v56 = vld [vmem:[#allocation6 + $0xfd0] sm:$0xff] }
 0x55a   :  { %14136 = vmatpush1.bf16.msra.mxu1 %v16319_v48  ;;  %v1110_v48 = vld [vmem:[#allocation6 + $0x1ed0] sm:$0xff]  ;;  %v16064_v0 = vcombine.high %v614_v55, %v630_v56 }
 0x55b   :  { %14137 = vmatprep.subr.bf16.mxu1 %v16352_v50  ;;  %v16511_v50 = vcombine.low %v1062_v51, %v1078_v41  ;;  %v16544_v5 = vcombine.high %v1094_v22, %v1110_v48  ;;  %v1158_v15 = vld [vmem:[#allocation6 + $0x2050] sm:$0xff] }
 0x55c   :  { %14097 = vmatpush1.bf16.msra.mxu0 %v15839_v60  ;;  %v1126_v60 = vld [vmem:[#allocation6 + $0x1f50] sm:$0xff] }
 0x55d   :  { %14098 = vmatprep.subr.bf16.mxu0 %v15872_v62  ;;  %v16031_v62 = vcombine.low %v582_v30, %v598_v19  ;;  %v1174_v4 = vld [vmem:[#allocation6 + $0x20d0] sm:$0xff] }
 0x55e   :  { %14138 = vmatpush1.bf16.msra.mxu1 %v16351_v61  ;;  %v1142_v61 = vld [vmem:[#allocation6 + $0x1fd0] sm:$0xff]  ;;  %v16608_v2 = vcombine.high %v1158_v15, %v1174_v4 }
 0x55f   :  { %14139 = vmatprep.subr.bf16.mxu1 %v16384_v63  ;;  %v16543_v63 = vcombine.low %v1094_v22, %v1110_v48  ;;  %v16576_v3 = vcombine.high %v1126_v60, %v1142_v61  ;;  %v1190_v6 = vld [vmem:[#allocation6 + $0x2150] sm:$0xff] }
 0x560   :  { %14099 = vmatpush1.bf16.msra.mxu0 %v15871_v8  ;;  %v1670_v8 = vld [vmem:[#allocation6 + $0x3050] sm:$0xff] }
 0x561   :  { %14100 = vmatprep.subr.bf16.mxu0 %v15904_v11  ;;  %v16063_v11 = vcombine.low %v614_v55, %v630_v56  ;;  %v1206_v23 = vld [vmem:[#allocation6 + $0x21d0] sm:$0xff] }
 0x562   :  { %14140 = vmatpush1.bf16.msra.mxu1 %v16383_v10  ;;  %v1686_v10 = vld [vmem:[#allocation6 + $0x30d0] sm:$0xff]  ;;  %v16640_v17 = vcombine.high %v1190_v6, %v1206_v23 }
 0x563   :  { %14141 = vmatprep.subr.bf16.mxu1 %v16416_v14  ;;  %v16575_v14 = vcombine.low %v1126_v60, %v1142_v61  ;;  %v17120_v21 = vcombine.high %v1670_v8, %v1686_v10  ;;  %v1222_v24 = vld [vmem:[#allocation6 + $0x2250] sm:$0xff] }
 0x564   :  { %14101 = vmatpush1.bf16.msra.mxu0 %v15903_v7  ;;  %v1702_v7 = vld [vmem:[#allocation6 + $0x3150] sm:$0xff] }
 0x565   :  { %14102 = vmatprep.subr.bf16.mxu0 %v15936_v53  ;;  %v16607_v53 = vcombine.low %v1158_v15, %v1174_v4  ;;  %v1238_v35 = vld [vmem:[#allocation6 + $0x22d0] sm:$0xff] }
 0x566   :  { %14142 = vmatpush1.bf16.msra.mxu1 %v16415_v25  ;;  %v1718_v25 = vld [vmem:[#allocation6 + $0x31d0] sm:$0xff]  ;;  %v16672_v40 = vcombine.high %v1222_v24, %v1238_v35 }
 0x567   :  { %14143 = vmatprep.subr.bf16.mxu1 %v16448_v26  ;;  %v17119_v26 = vcombine.low %v1670_v8, %v1686_v10  ;;  %v17152_v54 = vcombine.high %v1702_v7, %v1718_v25  ;;  %v1254_v51 = vld [vmem:[#allocation6 + $0x2350] sm:$0xff] }
 0x568   :  { %14103 = vmatpush1.bf16.msra.mxu0 %v15935_v33  ;;  %v1734_v33 = vld [vmem:[#allocation6 + $0x3250] sm:$0xff] }
 0x569   :  { %14104 = vmatprep.subr.bf16.mxu0 %v15968_v37  ;;  %v16639_v37 = vcombine.low %v1190_v6, %v1206_v23  ;;  %v1270_v41 = vld [vmem:[#allocation6 + $0x23d0] sm:$0xff] }
 0x56a   :  { %14144 = vmatpush1.bf16.msra.mxu1 %v16447_v13  ;;  %v1750_v13 = vld [vmem:[#allocation6 + $0x32d0] sm:$0xff]  ;;  %v16704_v30 = vcombine.high %v1254_v51, %v1270_v41 }
 0x56b   :  { %14145 = vmatprep.subr.bf16.mxu1 %v16480_v38  ;;  %v17151_v38 = vcombine.low %v1702_v7, %v1718_v25  ;;  %v17184_v57 = vcombine.high %v1734_v33, %v1750_v13  ;;  %v1286_v22 = vld [vmem:[#allocation6 + $0x2450] sm:$0xff] }
 0x56c   :  { %14105 = vmatpush1.bf16.msra.mxu0 %v15967_v42  ;;  %v1766_v42 = vld [vmem:[#allocation6 + $0x3350] sm:$0xff] }
 0x56d   :  { %14106 = vmatprep.subr.bf16.mxu0 %v16000_v44  ;;  %v16671_v44 = vcombine.low %v1222_v24, %v1238_v35  ;;  %v1302_v48 = vld [vmem:[#allocation6 + $0x24d0] sm:$0xff] }
 0x56e   :  { %14146 = vmatpush1.bf16.msra.mxu1 %v16479_v43  ;;  %v1782_v43 = vld [vmem:[#allocation6 + $0x33d0] sm:$0xff]  ;;  %v16736_v55 = vcombine.high %v1286_v22, %v1302_v48 }
 0x56f   :  { %14147 = vmatprep.subr.bf16.mxu1 %v16512_v31  ;;  %v17183_v31 = vcombine.low %v1734_v33, %v1750_v13  ;;  %v17216_v19 = vcombine.high %v1766_v42, %v1782_v43  ;;  %v1318_v60 = vld [vmem:[#allocation6 + $0x2550] sm:$0xff] }
 0x570   :  { %14107 = vmatpush1.bf16.msra.mxu0 %v15999_v18  ;;  %v1798_v18 = vld [vmem:[#allocation6 + $0x3450] sm:$0xff] }
 0x571   :  { %14108 = vmatprep.subr.bf16.mxu0 %v16032_v52  ;;  %v16703_v52 = vcombine.low %v1254_v51, %v1270_v41  ;;  %v1334_v61 = vld [vmem:[#allocation6 + $0x25d0] sm:$0xff] }
 0x572   :  { %14148 = vmatpush1.bf16.msra.mxu1 %v16511_v50  ;;  %v1814_v50 = vld [vmem:[#allocation6 + $0x34d0] sm:$0xff]  ;;  %v16768_v15 = vcombine.high %v1318_v60, %v1334_v61 }
 0x573   :  { %14149 = vmatprep.subr.bf16.mxu1 %v16544_v5  ;;  %v17215_v5 = vcombine.low %v1766_v42, %v1782_v43  ;;  %v17248_v56 = vcombine.high %v1798_v18, %v1814_v50  ;;  %v1350_v8 = vld [vmem:[#allocation6 + $0x2650] sm:$0xff] }
 0x574   :  { %14109 = vmatpush1.bf16.msra.mxu0 %v16031_v62  ;;  %v1830_v62 = vld [vmem:[#allocation6 + $0x3550] sm:$0xff] }
 0x575   :  { %14110 = vmatprep.subr.bf16.mxu0 %v16064_v0  ;;  %v16735_v0 = vcombine.low %v1286_v22, %v1302_v48  ;;  %v1366_v10 = vld [vmem:[#allocation6 + $0x26d0] sm:$0xff] }
 0x576   :  { %14150 = vmatpush1.bf16.msra.mxu1 %v16543_v63  ;;  %v1846_v63 = vld [vmem:[#allocation6 + $0x35d0] sm:$0xff]  ;;  %v16800_v23 = vcombine.high %v1350_v8, %v1366_v10  ;;  %v16799_v51 = vcombine.low %v1350_v8, %v1366_v10 }
 0x577   :  { %14151 = vmatprep.subr.bf16.mxu1 %v16576_v3  ;;  %v17247_v3 = vcombine.low %v1798_v18, %v1814_v50  ;;  %v17280_v4 = vcombine.high %v1830_v62, %v1846_v63  ;;  %v17279_v6 = vcombine.low %v1830_v62, %v1846_v63  ;;  %v1894_v33 = vld [vmem:[#allocation6 + $0x3750] sm:$0xff] }
 0x578   :  { %14111 = vmatpush1.bf16.msra.mxu0 %v16063_v11  ;;  %v1862_v11 = vld [vmem:[#allocation6 + $0x3650] sm:$0xff] }
 0x579   :  { %14162 = vmatprep.subr.bf16.mxu0 %v16608_v2  ;;  %v18061_v2 = vld [vmem:[#allocation8 + $0x10] sm:$0xff] }
 0x57a   :  { %14152 = vmatpush1.bf16.msra.mxu1 %v16575_v14  ;;  %v1878_v14 = vld [vmem:[#allocation6 + $0x36d0] sm:$0xff]  ;;  %v15238_v24 = vrot.slane %v18061_v2, %v17886_v28 }
 0x57b   :  { %14203 = vmatprep.subr.bf16.mxu1 %v17120_v21  ;;  %14113 = vmatmul.mubr.bf16.vlgmr.msra.gmra.mrb[80].mxu0 %v17833_v16  ;;  %v16767_v21 = vcombine.low %v1318_v60, %v1334_v61  ;;  %v17312_v25 = vcombine.high %v1862_v11, %v1878_v14  ;;  %v1910_v13 = vld [vmem:[#allocation6 + $0x37d0] sm:$0xff]  ;;  %v17311_v43 = vcombine.low %v1862_v11, %v1878_v14 }
 0x57c   :  { %14163 = vmatpush1.bf16.msra.mxu0 %v16607_v53  ;;  %14194 = vmatprep.mubr.bf16.mxu0 %v17845_v27  ;;  %v1382_v53 = vld [vmem:[#allocation6 + $0x2750] sm:$0xff] }
 0x57d   :  { %14154 = vmatmul.mubr.bf16.vlgmr.msra.gmra.mrb[80].mxu1 %v17839_v20  ;;  %14164 = vmatprep.subr.bf16.mxu0 %v16640_v17  ;;  %v1414_v22 = vld [vmem:[#allocation6 + $0x2850] sm:$0xff] }
 0x57e   :  { %14204 = vmatpush1.bf16.msra.mxu1 %v17119_v26  ;;  %14235 = vmatprep.mubr.bf16.mxu1 %v17850_v29  ;;  %v1398_v26 = vld [vmem:[#allocation6 + $0x27d0] sm:$0xff] }
 0x57f   :  { %14205 = vmatprep.subr.bf16.mxu1 %v17152_v54  ;;  %v1926_v18 = vld [vmem:[#allocation6 + $0x3850] sm:$0xff] }
 0x580   :  { %14165 = vmatpush1.bf16.msra.mxu0 %v16639_v37  ;;  %v1942_v50 = vld [vmem:[#allocation6 + $0x38d0] sm:$0xff] }
 0x581   :  { %14166 = vmatprep.subr.bf16.mxu0 %v16672_v40  ;;  %v15242_v40 = vrot.slane %v18061_v2, %v17891_v32  ;;  %v17376_v62 = vcombine.high %v1926_v18, %v1942_v50  ;;  %v1446_v63 = vld [vmem:[#allocation6 + $0x2950] sm:$0xff]  ;;  %v17375_v10 = vcombine.low %v1926_v18, %v1942_v50 }
 0x582   :  { %14206 = vmatpush1.bf16.msra.mxu1 %v17151_v38 }
 0x583   :  { %14207 = vmatprep.subr.bf16.mxu1 %v17184_v57 }
 0x584   :  { %14167 = vmatpush1.bf16.msra.mxu0 %v16671_v44  ;;  %v16832_v44 = vcombine.high %v1382_v53, %v1398_v26 }
 0x585   :  { %14168 = vmatprep.subr.bf16.mxu0 %v16704_v30 }
 0x586   :  { %14208 = vmatpush1.bf16.msra.mxu1 %v17183_v31 }
 0x587   :  { %14209 = vmatprep.subr.bf16.mxu1 %v17216_v19  ;;  %v17344_v19 = vcombine.high %v1894_v33, %v1910_v13 }
 0x588   :  { %14169 = vmatpush1.bf16.msra.mxu0 %v16703_v52 }
 0x589   :  { %14170 = vmatprep.subr.bf16.mxu0 %v16736_v55 }
 0x58a   :  { %14210 = vmatpush1.bf16.msra.mxu1 %v17215_v5  ;;  %v16831_v5 = vcombine.low %v1382_v53, %v1398_v26 }
 0x58b   :  { %14211 = vmatprep.subr.bf16.mxu1 %v17248_v56  ;;  %v17343_v56 = vcombine.low %v1894_v33, %v1910_v13  ;;  %v2038_v33 = vld [vmem:[#allocation6 + $0x3bd0] sm:$0xff] }
 0x58c   :  { %14171 = vmatpush1.bf16.msra.mxu0 %v16735_v0  ;;  %v1462_v0 = vld [vmem:[#allocation6 + $0x29d0] sm:$0xff] }
 0x58d   :  { %14172 = vmatprep.subr.bf16.mxu0 %v16768_v15  ;;  %v1974_v15 = vld [vmem:[#allocation6 + $0x39d0] sm:$0xff]  ;;  %v16896_v11 = vcombine.high %v1446_v63, %v1462_v0 }
 0x58e   :  { %14212 = vmatpush1.bf16.msra.mxu1 %v17247_v3  ;;  %v13868_v7 = vpop.f32.mrb[68].mxu0  ;;  %v1958_v3 = vld [vmem:[#allocation6 + $0x3950] sm:$0xff] }
 0x58f   :  { %14213 = vmatprep.subr.bf16.mxu1 %v17280_v4  ;;  %v13869_v17 = vadd.f32 %v13868_v7, %v18053_v34  ;;  %v13870_v35 = vpop.f32.mrb[69].mxu0  ;;  %v17408_v14 = vcombine.high %v1958_v3, %v1974_v15  ;;  %v2006_v7 = vld [vmem:[#allocation6 + $0x3ad0] sm:$0xff]  ;;  %v17407_v53 = vcombine.low %v1958_v3, %v1974_v15 }
 0x590   :  { %v13909_v54 = vpop.f32.mrb[68].mxu1  ;;  %v13871_v37 = vadd.f32 %v13870_v35, %v18055_v12  ;;  %v13872_v57 = vpop.f32.mrb[70].mxu0  ;;  %14173 = vmatpush1.bf16.msra.mxu0 %v16767_v21  ;;  %v1430_v12 = vld [vmem:[#allocation6 + $0x28d0] sm:$0xff] }
 0x591   :  { %v13911_v38 = vpop.f32.mrb[69].mxu1  ;;  %v13910_v41 = vadd.f32 %v13909_v54, %v13869_v17  ;;  %v13873_v34 = vpop.f32.mrb[71].mxu0  ;;  %14174 = vmatprep.subr.bf16.mxu0 %v16800_v23  ;;  %v16864_v60 = vcombine.high %v1414_v22, %v1430_v12  ;;  %v16863_v8 = vcombine.low %v1414_v22, %v1430_v12  ;;  %v1478_v21 = vld [vmem:[#allocation6 + $0x2a50] sm:$0xff] }
 0x592   :  { %v13913_v42 = vpop.f32.mrb[70].mxu1  ;;  %14214 = vmatpush1.bf16.msra.mxu1 %v17279_v6  ;;  %v13912_v31 = vadd.f32 %v13911_v38, %v13871_v37  ;;  %v1494_v6 = vld [vmem:[#allocation6 + $0x2ad0] sm:$0xff] }
 0x593   :  { %v13914_v30 = vpop.f32.mrb[71].mxu1  ;;  %14215 = vmatprep.subr.bf16.mxu1 %v17312_v25  ;;  %v15347_v48 = vadd.f32 %v15238_v24, %v13910_v41  ;;  %v1990_v23 = vld [vmem:[#allocation6 + $0x3a50] sm:$0xff]  ;;  %v16895_v25 = vcombine.low %v1446_v63, %v1462_v0  ;;  %v16928_v26 = vcombine.high %v1478_v21, %v1494_v6  ;;  %v16927_v13 = vcombine.low %v1478_v21, %v1494_v6  ;;  %v135_v6 = vld [vmem:[#allocation6 + $0x58] sm:$0xff] }
 0x594   :  { %v15348_v52 = vadd.f32 %v15242_v40, %v13912_v31  ;;  %14175 = vmatpush1.bf16.msra.mxu0 %v16799_v51  ;;  %v17440_v17 = vcombine.high %v1990_v23, %v2006_v7  ;;  %v1510_v54 = vld [vmem:[#allocation6 + $0x2b50] sm:$0xff]  ;;  %v17439_v37 = vcombine.low %v1990_v23, %v2006_v7  ;;  %v151_v23 = vld [vmem:[#allocation6 + $0xd8] sm:$0xff] }
 0x595   :  { %v15379_v55 = vmax.f32 %v15347_v48, 0.0  ;;  %14176 = vmatprep.subr.bf16.mxu0 %v16832_v44  ;;  %v1526_v24 = vld [vmem:[#allocation6 + $0x2bd0] sm:$0xff]  ;;  %v647_v7 = vld [vmem:[#allocation6 + $0x1058] sm:$0xff] }
 0x596   :  { %14216 = vmatpush1.bf16.msra.mxu1 %v17311_v43  ;;  %v15380_v61 = vmax.f32 %v15348_v52, 0.0  ;;  %v2022_v35 = vld [vmem:[#allocation6 + $0x3b50] sm:$0xff]  ;;  %v16960_v38 = vcombine.high %v1510_v54, %v1526_v24  ;;  %v16959_v34 = vcombine.low %v1510_v54, %v1526_v24  ;;  %v167_v24 = vld [vmem:[#allocation6 + $0x158] sm:$0xff] }
 0x597   :  { %14217 = vmatprep.subr.bf16.mxu1 %v17344_v19  ;;  %v17472_v40 = vcombine.high %v2022_v35, %v2038_v33  ;;  %v1542_v57 = vld [vmem:[#allocation6 + $0x2c50] sm:$0xff]  ;;  %v17471_v43 = vcombine.low %v2022_v35, %v2038_v33  ;;  %v183_v35 = vld [vmem:[#allocation6 + $0x1d8] sm:$0xff] }
 0x598   :  { %v17635_v4 = vpack.c.bf16 %v15380_v61, %v15379_v55  ;;  %14177 = vmatpush1.bf16.msra.mxu0 %v16831_v5  ;;  %v1558_v51 = vld [vmem:[#allocation6 + $0x2cd0] sm:$0xff]  ;;  %v679_v33 = vld [vmem:[#allocation6 + $0x1158] sm:$0xff] }
 0x599   :  { %14178 = vmatprep.subr.bf16.mxu0 %v16864_v60  ;;  %v2054_v41 = vld [vmem:[#allocation6 + $0x3c50] sm:$0xff]  ;;  %v16992_v44 = vcombine.high %v1542_v57, %v1558_v51  ;;  %v16991_v48 = vcombine.low %v1542_v57, %v1558_v51  ;;  %v199_v51 = vld [vmem:[#allocation6 + $0x258] sm:$0xff] }
 0x59a   :  { %14218 = vmatpush1.bf16.msra.mxu1 %v17343_v56  ;;  %15531 = vst [vmem:[#allocation9 + $0x40] sm:$0xff] %v17635_v4  ;;  %v2070_v42 = vld [vmem:[#allocation6 + $0x3cd0] sm:$0xff] }
 0x59b   :  { %14219 = vmatprep.subr.bf16.mxu1 %v17376_v62  ;;  %v17504_v31 = vcombine.high %v2054_v41, %v2070_v42  ;;  %v1574_v30 = vld [vmem:[#allocation6 + $0x2d50] sm:$0xff]  ;;  %v17503_v18 = vcombine.low %v2054_v41, %v2070_v42  ;;  %v215_v41 = vld [vmem:[#allocation6 + $0x2d8] sm:$0xff] }
 0x59c   :  { %14179 = vmatpush1.bf16.msra.mxu0 %v16863_v8  ;;  %v1590_v19 = vld [vmem:[#allocation6 + $0x2dd0] sm:$0xff]  ;;  %v711_v42 = vld [vmem:[#allocation6 + $0x1258] sm:$0xff] }
 0x59d   :  { %14180 = vmatprep.subr.bf16.mxu0 %v16896_v11  ;;  %v2086_v22 = vld [vmem:[#allocation6 + $0x3d50] sm:$0xff]  ;;  %v17024_v50 = vcombine.high %v1574_v30, %v1590_v19  ;;  %v17023_v61 = vcombine.low %v1574_v30, %v1590_v19  ;;  %v231_v19 = vld [vmem:[#allocation6 + $0x358] sm:$0xff] }
 0x59e   :  { %14220 = vmatpush1.bf16.msra.mxu1 %v17375_v10  ;;  %v2102_v12 = vld [vmem:[#allocation6 + $0x3dd0] sm:$0xff] }
 0x59f   :  { %14221 = vmatprep.subr.bf16.mxu1 %v17408_v14  ;;  %v17536_v52 = vcombine.high %v2086_v22, %v2102_v12  ;;  %v1606_v5 = vld [vmem:[#allocation6 + $0x2e50] sm:$0xff]  ;;  %v17535_v62 = vcombine.low %v2086_v22, %v2102_v12  ;;  %v247_v22 = vld [vmem:[#allocation6 + $0x3d8] sm:$0xff] }
 0x5a0   :  { %14181 = vmatpush1.bf16.msra.mxu0 %v16895_v25  ;;  %v1622_v55 = vld [vmem:[#allocation6 + $0x2ed0] sm:$0xff]  ;;  %v663_v25 = vld [vmem:[#allocation6 + $0x10d8] sm:$0xff] }
 0x5a1   :  { %14182 = vmatprep.subr.bf16.mxu0 %v16928_v26  ;;  %v2118_v56 = vld [vmem:[#allocation6 + $0x3e50] sm:$0xff]  ;;  %v17056_v63 = vcombine.high %v1606_v5, %v1622_v55  ;;  %v17055_v10 = vcombine.low %v1606_v5, %v1622_v55  ;;  %v16098_v54 = vcombine.high %v647_v7, %v663_v25  ;;  %v743_v12 = vld [vmem:[#allocation6 + $0x1358] sm:$0xff] }
 0x5a2   :  { %14222 = vmatpush1.bf16.msra.mxu1 %v17407_v53  ;;  %v2134_v60 = vld [vmem:[#allocation6 + $0x3ed0] sm:$0xff]  ;;  %v263_v55 = vld [vmem:[#allocation6 + $0x458] sm:$0xff] }
 0x5a3   :  { %14223 = vmatprep.subr.bf16.mxu1 %v17440_v17  ;;  %v17568_v0 = vcombine.high %v2118_v56, %v2134_v60  ;;  %v1638_v3 = vld [vmem:[#allocation6 + $0x2f50] sm:$0xff]  ;;  %v17567_v11 = vcombine.low %v2118_v56, %v2134_v60  ;;  %v15586_v17 = vcombine.high %v135_v6, %v151_v23  ;;  %v279_v56 = vld [vmem:[#allocation6 + $0x4d8] sm:$0xff] }
 0x5a4   :  { %14183 = vmatpush1.bf16.msra.mxu0 %v16927_v13  ;;  %v1654_v15 = vld [vmem:[#allocation6 + $0x2fd0] sm:$0xff]  ;;  %v695_v13 = vld [vmem:[#allocation6 + $0x11d8] sm:$0xff] }
 0x5a5   :  { %14184 = vmatprep.subr.bf16.mxu0 %v16960_v38  ;;  %v2150_v4 = vld [vmem:[#allocation6 + $0x3f50] sm:$0xff]  ;;  %v17088_v14 = vcombine.high %v1638_v3, %v1654_v15  ;;  %v17087_v53 = vcombine.low %v1638_v3, %v1654_v15  ;;  %v16097_v38 = vcombine.low %v647_v7, %v663_v25  ;;  %v16130_v57 = vcombine.high %v679_v33, %v695_v13  ;;  %v775_v60 = vld [vmem:[#allocation6 + $0x1458] sm:$0xff] }
 0x5a6   :  { %14224 = vmatpush1.bf16.msra.mxu1 %v17439_v37  ;;  %v2166_v8 = vld [vmem:[#allocation6 + $0x3fd0] sm:$0xff]  ;;  %v15585_v37 = vcombine.low %v135_v6, %v151_v23  ;;  %v295_v15 = vld [vmem:[#allocation6 + $0x558] sm:$0xff] }
 0x5a7   :  { %14225 = vmatprep.subr.bf16.mxu1 %v17472_v40  ;;  %v17600_v21 = vcombine.high %v2150_v4, %v2166_v8  ;;  %v17599_v26 = vcombine.low %v2150_v4, %v2166_v8  ;;  %v15618_v40 = vcombine.high %v167_v24, %v183_v35  ;;  %v311_v4 = vld [vmem:[#allocation6 + $0x5d8] sm:$0xff] }
 0x5a8   :  { %14185 = vmatpush1.bf16.msra.mxu0 %v16959_v34  ;;  %v727_v34 = vld [vmem:[#allocation6 + $0x12d8] sm:$0xff] }
 0x5a9   :  { %14186 = vmatprep.subr.bf16.mxu0 %v16992_v44  ;;  %v16129_v44 = vcombine.low %v679_v33, %v695_v13  ;;  %v16162_v30 = vcombine.high %v711_v42, %v727_v34  ;;  %v807_v8 = vld [vmem:[#allocation6 + $0x1558] sm:$0xff] }
 0x5aa   :  { %14226 = vmatpush1.bf16.msra.mxu1 %v17471_v43  ;;  %v15617_v43 = vcombine.low %v167_v24, %v183_v35  ;;  %v327_v23 = vld [vmem:[#allocation6 + $0x658] sm:$0xff] }
 0x5ab   :  { %14227 = vmatprep.subr.bf16.mxu1 %v17504_v31  ;;  %v15650_v31 = vcombine.high %v199_v51, %v215_v41  ;;  %v343_v7 = vld [vmem:[#allocation6 + $0x6d8] sm:$0xff] }
 0x5ac   :  { %14187 = vmatpush1.bf16.msra.mxu0 %v16991_v48  ;;  %v759_v48 = vld [vmem:[#allocation6 + $0x13d8] sm:$0xff] }
 0x5ad   :  { %14188 = vmatprep.subr.bf16.mxu0 %v17024_v50  ;;  %v16161_v50 = vcombine.low %v711_v42, %v727_v34  ;;  %v16194_v5 = vcombine.high %v743_v12, %v759_v48  ;;  %v839_v25 = vld [vmem:[#allocation6 + $0x1658] sm:$0xff]  ;;  %v15777_v34 = vcombine.low %v327_v23, %v343_v7 }
 0x5ae   :  { %14228 = vmatpush1.bf16.msra.mxu1 %v17503_v18  ;;  %v15649_v18 = vcombine.low %v199_v51, %v215_v41  ;;  %v359_v33 = vld [vmem:[#allocation6 + $0x758] sm:$0xff] }
 0x5af   :  { %14229 = vmatprep.subr.bf16.mxu1 %v17536_v52  ;;  %v15682_v52 = vcombine.high %v231_v19, %v247_v22  ;;  %v375_v13 = vld [vmem:[#allocation6 + $0x7d8] sm:$0xff] }
 0x5b0   :  { %14189 = vmatpush1.bf16.msra.mxu0 %v17023_v61  ;;  %v791_v61 = vld [vmem:[#allocation6 + $0x14d8] sm:$0xff] }
 0x5b1   :  { %14190 = vmatprep.subr.bf16.mxu0 %v17056_v63  ;;  %v16193_v63 = vcombine.low %v743_v12, %v759_v48  ;;  %v16226_v3 = vcombine.high %v775_v60, %v791_v61  ;;  %v391_v48 = vld [vmem:[#allocation6 + $0x858] sm:$0xff] }
 0x5b2   :  { %14230 = vmatpush1.bf16.msra.mxu1 %v17535_v62  ;;  %v15681_v62 = vcombine.low %v231_v19, %v247_v22  ;;  %v15810_v19 = vcombine.high %v359_v33, %v375_v13 }
 0x5b3   :  { %14231 = vmatprep.subr.bf16.mxu1 %v17568_v0  ;;  %v15714_v0 = vcombine.high %v263_v55, %v279_v56 }
 0x5b4   :  { %14191 = vmatpush1.bf16.msra.mxu0 %v17055_v10  ;;  %v823_v10 = vld [vmem:[#allocation6 + $0x15d8] sm:$0xff] }
 0x5b5   :  { %14192 = vmatprep.subr.bf16.mxu0 %v17088_v14  ;;  %v16225_v14 = vcombine.low %v775_v60, %v791_v61  ;;  %v16258_v6 = vcombine.high %v807_v8, %v823_v10  ;;  %v423_v61 = vld [vmem:[#allocation6 + $0x958] sm:$0xff] }
 0x5b6   :  { %14232 = vmatpush1.bf16.msra.mxu1 %v17567_v11  ;;  %v15713_v11 = vcombine.low %v263_v55, %v279_v56 }
 0x5b7   :  { %14233 = vmatprep.subr.bf16.mxu1 %v17600_v21  ;;  %v15746_v21 = vcombine.high %v295_v15, %v311_v4 }
 0x5b8   :  { %14193 = vmatpush1.bf16.msra.mxu0 %v17087_v53  ;;  %v855_v53 = vld [vmem:[#allocation6 + $0x16d8] sm:$0xff] }
 0x5b9   :  { %14244 = vmatprep.subr.bf16.mxu0 %v15586_v17  ;;  %v16257_v17 = vcombine.low %v807_v8, %v823_v10  ;;  %v16290_v35 = vcombine.high %v839_v25, %v855_v53  ;;  %v455_v10 = vld [vmem:[#allocation6 + $0xa58] sm:$0xff] }
 0x5ba   :  { %14234 = vmatpush1.bf16.msra.mxu1 %v17599_v26  ;;  %v15745_v26 = vcombine.low %v295_v15, %v311_v4 }
 0x5bb   :  { %14285 = vmatprep.subr.bf16.mxu1 %v16098_v54  ;;  %14195 = vmatmul.mubr.bf16.vlgmr.msra.gmra.mrb[84].mxu0 %v17857_v36  ;;  %v15778_v54 = vcombine.high %v327_v23, %v343_v7 }
 0x5bc   :  { %14245 = vmatpush1.bf16.msra.mxu0 %v15585_v37  ;;  %14276 = vmatprep.mubr.bf16.mxu0 %v17823_v58 }
 0x5bd   :  { %14236 = vmatmul.mubr.bf16.vlgmr.msra.gmra.mrb[84].mxu1 %v17861_v39  ;;  %14246 = vmatprep.subr.bf16.mxu0 %v15618_v40  ;;  %v871_v40 = vld [vmem:[#allocation6 + $0x1758] sm:$0xff] }
 0x5be   :  { %14286 = vmatpush1.bf16.msra.mxu1 %v16097_v38  ;;  %14317 = vmatprep.mubr.bf16.mxu1 %v17827_v59 }
 0x5bf   :  { %14287 = vmatprep.subr.bf16.mxu1 %v16130_v57  ;;  %v887_v57 = vld [vmem:[#allocation6 + $0x17d8] sm:$0xff] }
 0x5c0   :  { %14247 = vmatpush1.bf16.msra.mxu0 %v15617_v43  ;;  %v16322_v12 = vcombine.high %v871_v40, %v887_v57  ;;  %v16321_v55 = vcombine.low %v871_v40, %v887_v57  ;;  %v1031_v40 = vld [vmem:[#allocation6 + $0x1c58] sm:$0xff] }
 0x5c1   :  { %14248 = vmatprep.subr.bf16.mxu0 %v15650_v31  ;;  %v1047_v57 = vld [vmem:[#allocation6 + $0x1cd8] sm:$0xff] }
 0x5c2   :  { %14288 = vmatpush1.bf16.msra.mxu1 %v16129_v44 }
 0x5c3   :  { %14289 = vmatprep.subr.bf16.mxu1 %v16162_v30  ;;  %v16289_v30 = vcombine.low %v839_v25, %v855_v53  ;;  %v487_v53 = vld [vmem:[#allocation6 + $0xb58] sm:$0xff] }
 0x5c4   :  { %14249 = vmatpush1.bf16.msra.mxu0 %v15649_v18  ;;  %v407_v18 = vld [vmem:[#allocation6 + $0x8d8] sm:$0xff] }
 0x5c5   :  { %14250 = vmatprep.subr.bf16.mxu0 %v15682_v52  ;;  %v919_v52 = vld [vmem:[#allocation6 + $0x18d8] sm:$0xff]  ;;  %v15842_v56 = vcombine.high %v391_v48, %v407_v18 }
 0x5c6   :  { %14290 = vmatpush1.bf16.msra.mxu1 %v16161_v50  ;;  %v903_v50 = vld [vmem:[#allocation6 + $0x1858] sm:$0xff] }
 0x5c7   :  { %14291 = vmatprep.subr.bf16.mxu1 %v16194_v5  ;;  %v15809_v5 = vcombine.low %v359_v33, %v375_v13  ;;  %v16354_v60 = vcombine.high %v903_v50, %v919_v52  ;;  %v16353_v15 = vcombine.low %v903_v50, %v919_v52  ;;  %v583_v52 = vld [vmem:[#allocation6 + $0xe58] sm:$0xff] }
 0x5c8   :  { %14251 = vmatpush1.bf16.msra.mxu0 %v15681_v62  ;;  %v439_v62 = vld [vmem:[#allocation6 + $0x9d8] sm:$0xff] }
 0x5c9   :  { %14252 = vmatprep.subr.bf16.mxu0 %v15714_v0  ;;  %v951_v0 = vld [vmem:[#allocation6 + $0x19d8] sm:$0xff]  ;;  %v15874_v4 = vcombine.high %v423_v61, %v439_v62 }
 0x5ca   :  { %14292 = vmatpush1.bf16.msra.mxu1 %v16193_v63  ;;  %v935_v63 = vld [vmem:[#allocation6 + $0x1958] sm:$0xff] }
 0x5cb   :  { %14293 = vmatprep.subr.bf16.mxu1 %v16226_v3  ;;  %v15841_v3 = vcombine.low %v391_v48, %v407_v18  ;;  %v16386_v8 = vcombine.high %v935_v63, %v951_v0  ;;  %v16385_v23 = vcombine.low %v935_v63, %v951_v0  ;;  %v16481_v48 = vcombine.low %v1031_v40, %v1047_v57  ;;  %v615_v0 = vld [vmem:[#allocation6 + $0xf58] sm:$0xff] }
 0x5cc   :  { %14253 = vmatpush1.bf16.msra.mxu0 %v15713_v11  ;;  %v471_v11 = vld [vmem:[#allocation6 + $0xad8] sm:$0xff] }
 0x5cd   :  { %14254 = vmatprep.subr.bf16.mxu0 %v15746_v21  ;;  %v983_v21 = vld [vmem:[#allocation6 + $0x1ad8] sm:$0xff]  ;;  %v15906_v7 = vcombine.high %v455_v10, %v471_v11 }
 0x5ce   :  { %14294 = vmatpush1.bf16.msra.mxu1 %v16225_v14  ;;  %v13950_v24 = vpop.f32.mrb[72].mxu0  ;;  %v967_v14 = vld [vmem:[#allocation6 + $0x1a58] sm:$0xff] }
 0x5cf   :  { %14295 = vmatprep.subr.bf16.mxu1 %v16258_v6  ;;  %v13952_v38 = vpop.f32.mrb[73].mxu0  ;;  %v15873_v6 = vcombine.low %v423_v61, %v439_v62  ;;  %v16418_v25 = vcombine.high %v967_v14, %v983_v21 }
 0x5d0   :  { %v13991_v37 = vpop.f32.mrb[72].mxu1  ;;  %v13954_v42 = vpop.f32.mrb[74].mxu0  ;;  %14255 = vmatpush1.bf16.msra.mxu0 %v15745_v26  ;;  %v503_v26 = vld [vmem:[#allocation6 + $0xbd8] sm:$0xff] }
 0x5d1   :  { %v18073_v51 = vadd.f32 %v13991_v37, %v13950_v24  ;;  %v13993_v41 = vpop.f32.mrb[73].mxu1  ;;  %v13955_v31 = vpop.f32.mrb[75].mxu0  ;;  %14256 = vmatprep.subr.bf16.mxu0 %v15778_v54  ;;  %v1015_v54 = vld [vmem:[#allocation6 + $0x1bd8] sm:$0xff]  ;;  %v15905_v24 = vcombine.low %v455_v10, %v471_v11  ;;  %v15938_v33 = vcombine.high %v487_v53, %v503_v26 }
 0x5d2   :  { %v18075_v43 = vadd.f32 %v13993_v41, %v13952_v38  ;;  %v13995_v44 = vpop.f32.mrb[74].mxu1  ;;  %14296 = vmatpush1.bf16.msra.mxu1 %v16257_v17  ;;  %v999_v17 = vld [vmem:[#allocation6 + $0x1b58] sm:$0xff]  ;;  %v15937_v41 = vcombine.low %v487_v53, %v503_v26 }
 0x5d3   :  { %v13996_v22 = vpop.f32.mrb[75].mxu1  ;;  %14297 = vmatprep.subr.bf16.mxu1 %v16290_v35  ;;  %v16417_v35 = vcombine.low %v967_v14, %v983_v21  ;;  %v16450_v13 = vcombine.high %v999_v17, %v1015_v54  ;;  %v519_v37 = vld [vmem:[#allocation6 + $0xc58] sm:$0xff]  ;;  %v16449_v42 = vcombine.low %v999_v17, %v1015_v54  ;;  %v16482_v44 = vcombine.high %v1031_v40, %v1047_v57 }
 0x5d4   :  { %14257 = vmatpush1.bf16.msra.mxu0 %v15777_v34  ;;  %v535_v38 = vld [vmem:[#allocation6 + $0xcd8] sm:$0xff] }
 0x5d5   :  { %14258 = vmatprep.subr.bf16.mxu0 %v15810_v19  ;;  %v15970_v34 = vcombine.high %v519_v37, %v535_v38  ;;  %v551_v31 = vld [vmem:[#allocation6 + $0xd58] sm:$0xff] }
 0x5d6   :  { %14298 = vmatpush1.bf16.msra.mxu1 %v16289_v30  ;;  %v567_v30 = vld [vmem:[#allocation6 + $0xdd8] sm:$0xff] }
 0x5d7   :  { %14299 = vmatprep.subr.bf16.mxu1 %v16322_v12  ;;  %v1063_v19 = vld [vmem:[#allocation6 + $0x1d58] sm:$0xff]  ;;  %v15969_v12 = vcombine.low %v519_v37, %v535_v38  ;;  %v16002_v18 = vcombine.high %v551_v31, %v567_v30 }
 0x5d8   :  { %14259 = vmatpush1.bf16.msra.mxu0 %v15809_v5  ;;  %v1079_v22 = vld [vmem:[#allocation6 + $0x1dd8] sm:$0xff] }
 0x5d9   :  { %14260 = vmatprep.subr.bf16.mxu0 %v15842_v56  ;;  %v16514_v50 = vcombine.high %v1063_v19, %v1079_v22  ;;  %v599_v5 = vld [vmem:[#allocation6 + $0xed8] sm:$0xff]  ;;  %v16513_v61 = vcombine.low %v1063_v19, %v1079_v22 }
 0x5da   :  { %14300 = vmatpush1.bf16.msra.mxu1 %v16321_v55  ;;  %v1095_v55 = vld [vmem:[#allocation6 + $0x1e58] sm:$0xff]  ;;  %v16034_v62 = vcombine.high %v583_v52, %v599_v5 }
 0x5db   :  { %14301 = vmatprep.subr.bf16.mxu1 %v16354_v60  ;;  %v1111_v56 = vld [vmem:[#allocation6 + $0x1ed8] sm:$0xff]  ;;  %v16001_v60 = vcombine.low %v551_v31, %v567_v30 }
 0x5dc   :  { %14261 = vmatpush1.bf16.msra.mxu0 %v15841_v3  ;;  %v16546_v63 = vcombine.high %v1095_v55, %v1111_v56  ;;  %v631_v3 = vld [vmem:[#allocation6 + $0xfd8] sm:$0xff]  ;;  %v16545_v10 = vcombine.low %v1095_v55, %v1111_v56 }
 0x5dd   :  { %14262 = vmatprep.subr.bf16.mxu0 %v15874_v4  ;;  %v1143_v4 = vld [vmem:[#allocation6 + $0x1fd8] sm:$0xff]  ;;  %v16066_v11 = vcombine.high %v615_v0, %v631_v3 }
 0x5de   :  { %14302 = vmatpush1.bf16.msra.mxu1 %v16353_v15  ;;  %v1127_v15 = vld [vmem:[#allocation6 + $0x1f58] sm:$0xff] }
 0x5df   :  { %14303 = vmatprep.subr.bf16.mxu1 %v16386_v8  ;;  %v16033_v8 = vcombine.low %v583_v52, %v599_v5  ;;  %v16578_v14 = vcombine.high %v1127_v15, %v1143_v4  ;;  %v1159_v21 = vld [vmem:[#allocation6 + $0x2058] sm:$0xff]  ;;  %v16577_v53 = vcombine.low %v1127_v15, %v1143_v4 }
 0x5e0   :  { %14263 = vmatpush1.bf16.msra.mxu0 %v15873_v6  ;;  %v1175_v6 = vld [vmem:[#allocation6 + $0x20d8] sm:$0xff] }
 0x5e1   :  { %14264 = vmatprep.subr.bf16.mxu0 %v15906_v7  ;;  %v1687_v7 = vld [vmem:[#allocation6 + $0x30d8] sm:$0xff]  ;;  %v16610_v26 = vcombine.high %v1159_v21, %v1175_v6 }
 0x5e2   :  { %14304 = vmatpush1.bf16.msra.mxu1 %v16385_v23  ;;  %v1671_v23 = vld [vmem:[#allocation6 + $0x3058] sm:$0xff] }
 0x5e3   :  { %14305 = vmatprep.subr.bf16.mxu1 %v16418_v25  ;;  %v16065_v25 = vcombine.low %v615_v0, %v631_v3  ;;  %v17122_v17 = vcombine.high %v1671_v23, %v1687_v7  ;;  %v1191_v54 = vld [vmem:[#allocation6 + $0x2158] sm:$0xff]  ;;  %v17121_v37 = vcombine.low %v1671_v23, %v1687_v7 }
 0x5e4   :  { %14265 = vmatpush1.bf16.msra.mxu0 %v15905_v24  ;;  %v1207_v24 = vld [vmem:[#allocation6 + $0x21d8] sm:$0xff] }
 0x5e5   :  { %14266 = vmatprep.subr.bf16.mxu0 %v15938_v33  ;;  %v1719_v33 = vld [vmem:[#allocation6 + $0x31d8] sm:$0xff]  ;;  %v16642_v38 = vcombine.high %v1191_v54, %v1207_v24 }
 0x5e6   :  { %14306 = vmatpush1.bf16.msra.mxu1 %v16417_v35  ;;  %v1703_v35 = vld [vmem:[#allocation6 + $0x3158] sm:$0xff] }
 0x5e7   :  { %14307 = vmatprep.subr.bf16.mxu1 %v16450_v13  ;;  %v16609_v13 = vcombine.low %v1159_v21, %v1175_v6  ;;  %v17154_v40 = vcombine.high %v1703_v35, %v1719_v33  ;;  %v1223_v57 = vld [vmem:[#allocation6 + $0x2258] sm:$0xff]  ;;  %v17153_v31 = vcombine.low %v1703_v35, %v1719_v33 }
 0x5e8   :  { %14267 = vmatpush1.bf16.msra.mxu0 %v15937_v41  ;;  %v1239_v41 = vld [vmem:[#allocation6 + $0x22d8] sm:$0xff] }
 0x5e9   :  { %14268 = vmatprep.subr.bf16.mxu0 %v15970_v34  ;;  %v1751_v34 = vld [vmem:[#allocation6 + $0x32d8] sm:$0xff]  ;;  %v16674_v30 = vcombine.high %v1223_v57, %v1239_v41 }
 0x5ea   :  { %14308 = vmatpush1.bf16.msra.mxu1 %v16449_v42  ;;  %v1735_v42 = vld [vmem:[#allocation6 + $0x3258] sm:$0xff] }
 0x5eb   :  { %14309 = vmatprep.subr.bf16.mxu1 %v16482_v44  ;;  %v16641_v44 = vcombine.low %v1191_v54, %v1207_v24  ;;  %v17186_v19 = vcombine.high %v1735_v42, %v1751_v34  ;;  %v1255_v22 = vld [vmem:[#allocation6 + $0x2358] sm:$0xff]  ;;  %v17185_v52 = vcombine.low %v1735_v42, %v1751_v34 }
 0x5ec   :  { %14269 = vmatpush1.bf16.msra.mxu0 %v15969_v12  ;;  %v1271_v12 = vld [vmem:[#allocation6 + $0x23d8] sm:$0xff] }
 0x5ed   :  { %14270 = vmatprep.subr.bf16.mxu0 %v16002_v18  ;;  %v1783_v18 = vld [vmem:[#allocation6 + $0x33d8] sm:$0xff]  ;;  %v16706_v5 = vcombine.high %v1255_v22, %v1271_v12 }
 0x5ee   :  { %14310 = vmatpush1.bf16.msra.mxu1 %v16481_v48  ;;  %v1767_v48 = vld [vmem:[#allocation6 + $0x3358] sm:$0xff] }
 0x5ef   :  { %14311 = vmatprep.subr.bf16.mxu1 %v16514_v50  ;;  %v16673_v50 = vcombine.low %v1223_v57, %v1239_v41  ;;  %v17218_v55 = vcombine.high %v1767_v48, %v1783_v18  ;;  %v1287_v56 = vld [vmem:[#allocation6 + $0x2458] sm:$0xff]  ;;  %v17217_v0 = vcombine.low %v1767_v48, %v1783_v18  ;;  %v15246_v57 = vrot.slane %v18061_v2, %v17912_v9 }
 0x5f0   :  { %14271 = vmatpush1.bf16.msra.mxu0 %v16001_v60  ;;  %v1303_v60 = vld [vmem:[#allocation6 + $0x24d8] sm:$0xff] }
 0x5f1   :  { %14272 = vmatprep.subr.bf16.mxu0 %v16034_v62  ;;  %v1815_v62 = vld [vmem:[#allocation6 + $0x34d8] sm:$0xff]  ;;  %v16738_v3 = vcombine.high %v1287_v56, %v1303_v60 }
 0x5f2   :  { %14312 = vmatpush1.bf16.msra.mxu1 %v16513_v61  ;;  %v1799_v61 = vld [vmem:[#allocation6 + $0x3458] sm:$0xff] }
 0x5f3   :  { %14313 = vmatprep.subr.bf16.mxu1 %v16546_v63  ;;  %v16705_v63 = vcombine.low %v1255_v22, %v1271_v12  ;;  %v17250_v15 = vcombine.high %v1799_v61, %v1815_v62  ;;  %v1319_v4 = vld [vmem:[#allocation6 + $0x2558] sm:$0xff]  ;;  %v17249_v21 = vcombine.low %v1799_v61, %v1815_v62 }
 0x5f4   :  { %14273 = vmatpush1.bf16.msra.mxu0 %v16033_v8  ;;  %v1335_v8 = vld [vmem:[#allocation6 + $0x25d8] sm:$0xff] }
 0x5f5   :  { %14274 = vmatprep.subr.bf16.mxu0 %v16066_v11  ;;  %v1847_v11 = vld [vmem:[#allocation6 + $0x35d8] sm:$0xff]  ;;  %v16770_v6 = vcombine.high %v1319_v4, %v1335_v8 }
 0x5f6   :  { %14314 = vmatpush1.bf16.msra.mxu1 %v16545_v10  ;;  %v1831_v10 = vld [vmem:[#allocation6 + $0x3558] sm:$0xff] }
 0x5f7   :  { %14315 = vmatprep.subr.bf16.mxu1 %v16578_v14  ;;  %v16737_v14 = vcombine.low %v1287_v56, %v1303_v60  ;;  %v17282_v23 = vcombine.high %v1831_v10, %v1847_v11  ;;  %v1351_v7 = vld [vmem:[#allocation6 + $0x2658] sm:$0xff]  ;;  %v17281_v54 = vcombine.low %v1831_v10, %v1847_v11 }
 0x5f8   :  { %14275 = vmatpush1.bf16.msra.mxu0 %v16065_v25  ;;  %v1367_v25 = vld [vmem:[#allocation6 + $0x26d8] sm:$0xff] }
 0x5f9   :  { %14326 = vmatprep.subr.bf16.mxu0 %v16610_v26  ;;  %v1879_v26 = vld [vmem:[#allocation6 + $0x36d8] sm:$0xff]  ;;  %v16802_v24 = vcombine.high %v1351_v7, %v1367_v25  ;;  %v16801_v22 = vcombine.low %v1351_v7, %v1367_v25 }
 0x5fa   :  { %14316 = vmatpush1.bf16.msra.mxu1 %v16577_v53  ;;  %v1863_v53 = vld [vmem:[#allocation6 + $0x3658] sm:$0xff] }
 0x5fb   :  { %14367 = vmatprep.subr.bf16.mxu1 %v17122_v17  ;;  %14277 = vmatmul.mubr.bf16.vlgmr.msra.gmra.mrb[88].mxu0 %v17833_v16  ;;  %v16769_v17 = vcombine.low %v1319_v4, %v1335_v8  ;;  %v17314_v33 = vcombine.high %v1863_v53, %v1879_v26  ;;  %v1895_v42 = vld [vmem:[#allocation6 + $0x3758] sm:$0xff]  ;;  %v17313_v18 = vcombine.low %v1863_v53, %v1879_v26 }
 0x5fc   :  { %14327 = vmatpush1.bf16.msra.mxu0 %v16609_v13  ;;  %14358 = vmatprep.mubr.bf16.mxu0 %v17845_v27  ;;  %v1383_v13 = vld [vmem:[#allocation6 + $0x2758] sm:$0xff] }
 0x5fd   :  { %14318 = vmatmul.mubr.bf16.vlgmr.msra.gmra.mrb[88].mxu1 %v17839_v20  ;;  %14328 = vmatprep.subr.bf16.mxu0 %v16642_v38  ;;  %v1911_v34 = vld [vmem:[#allocation6 + $0x37d8] sm:$0xff] }
 0x5fe   :  { %14368 = vmatpush1.bf16.msra.mxu1 %v17121_v37  ;;  %14399 = vmatprep.mubr.bf16.mxu1 %v17850_v29  ;;  %v1399_v37 = vld [vmem:[#allocation6 + $0x27d8] sm:$0xff] }
 0x5ff   :  { %14369 = vmatprep.subr.bf16.mxu1 %v17154_v40  ;;  %v1415_v56 = vld [vmem:[#allocation6 + $0x2858] sm:$0xff] }
 0x600   :  { %14329 = vmatpush1.bf16.msra.mxu0 %v16641_v44  ;;  %v1927_v61 = vld [vmem:[#allocation6 + $0x3858] sm:$0xff] }
 0x601   :  { %14330 = vmatprep.subr.bf16.mxu0 %v16674_v30  ;;  %v15250_v30 = vrot.slane %v18061_v2, %v17915_v1  ;;  %v1943_v62 = vld [vmem:[#allocation6 + $0x38d8] sm:$0xff] }
 0x602   :  { %14370 = vmatpush1.bf16.msra.mxu1 %v17153_v31  ;;  %v17378_v8 = vcombine.high %v1927_v61, %v1943_v62  ;;  %v1447_v10 = vld [vmem:[#allocation6 + $0x2958] sm:$0xff]  ;;  %v17377_v7 = vcombine.low %v1927_v61, %v1943_v62 }
 0x603   :  { %14371 = vmatprep.subr.bf16.mxu1 %v17186_v19  ;;  %v1463_v11 = vld [vmem:[#allocation6 + $0x29d8] sm:$0xff] }
 0x604   :  { %14331 = vmatpush1.bf16.msra.mxu0 %v16673_v50  ;;  %v16834_v50 = vcombine.high %v1383_v13, %v1399_v37  ;;  %v16898_v25 = vcombine.high %v1447_v10, %v1463_v11  ;;  %v1479_v26 = vld [vmem:[#allocation6 + $0x2a58] sm:$0xff] }
 0x605   :  { %14332 = vmatprep.subr.bf16.mxu0 %v16706_v5 }
 0x606   :  { %14372 = vmatpush1.bf16.msra.mxu1 %v17185_v52 }
 0x607   :  { %14373 = vmatprep.subr.bf16.mxu1 %v17218_v55  ;;  %v17346_v55 = vcombine.high %v1895_v42, %v1911_v34 }
 0x608   :  { %14333 = vmatpush1.bf16.msra.mxu0 %v16705_v63  ;;  %v16833_v63 = vcombine.low %v1383_v13, %v1399_v37 }
 0x609   :  { %14334 = vmatprep.subr.bf16.mxu0 %v16738_v3  ;;  %v17345_v3 = vcombine.low %v1895_v42, %v1911_v34 }
 0x60a   :  { %14374 = vmatpush1.bf16.msra.mxu1 %v17217_v0 }
 0x60b   :  { %14375 = vmatprep.subr.bf16.mxu1 %v17250_v15 }
 0x60c   :  { %14335 = vmatpush1.bf16.msra.mxu0 %v16737_v14  ;;  %v1959_v14 = vld [vmem:[#allocation6 + $0x3958] sm:$0xff] }
 0x60d   :  { %14336 = vmatprep.subr.bf16.mxu0 %v16770_v6 }
 0x60e   :  { %14376 = vmatpush1.bf16.msra.mxu1 %v17249_v21  ;;  %v14032_v35 = vpop.f32.mrb[76].mxu0  ;;  %v1975_v21 = vld [vmem:[#allocation6 + $0x39d8] sm:$0xff] }
 0x60f   :  { %14377 = vmatprep.subr.bf16.mxu1 %v17282_v23  ;;  %v14033_v38 = vadd.f32 %v14032_v35, %v18073_v51  ;;  %v14034_v41 = vpop.f32.mrb[77].mxu0  ;;  %v17410_v53 = vcombine.high %v1959_v14, %v1975_v21  ;;  %v16897_v35 = vcombine.low %v1447_v10, %v1463_v11  ;;  %v1639_v11 = vld [vmem:[#allocation6 + $0x2f58] sm:$0xff] }
 0x610   :  { %v14073_v40 = vpop.f32.mrb[76].mxu1  ;;  %v14035_v44 = vadd.f32 %v14034_v41, %v18075_v43  ;;  %v14036_v19 = vpop.f32.mrb[78].mxu0  ;;  %14337 = vmatpush1.bf16.msra.mxu0 %v16769_v17  ;;  %v1431_v43 = vld [vmem:[#allocation6 + $0x28d8] sm:$0xff] }
 0x611   :  { %v14075_v31 = vpop.f32.mrb[77].mxu1  ;;  %v14074_v12 = vadd.f32 %v14073_v40, %v14033_v38  ;;  %v14037_v51 = vpop.f32.mrb[79].mxu0  ;;  %14338 = vmatprep.subr.bf16.mxu0 %v16802_v24  ;;  %v16866_v15 = vcombine.high %v1415_v56, %v1431_v43  ;;  %v16865_v23 = vcombine.low %v1415_v56, %v1431_v43  ;;  %v1495_v17 = vld [vmem:[#allocation6 + $0x2ad8] sm:$0xff] }
 0x612   :  { %v14077_v48 = vpop.f32.mrb[78].mxu1  ;;  %14378 = vmatpush1.bf16.msra.mxu1 %v17281_v54  ;;  %v14076_v52 = vadd.f32 %v14075_v31, %v14035_v44  ;;  %v1991_v54 = vld [vmem:[#allocation6 + $0x3a58] sm:$0xff]  ;;  %v16930_v13 = vcombine.high %v1479_v26, %v1495_v17  ;;  %v16929_v42 = vcombine.low %v1479_v26, %v1495_v17  ;;  %v136_v26 = vld [vmem:[#allocation6 + $0x60] sm:$0xff] }
 0x613   :  { %v14078_v5 = vpop.f32.mrb[79].mxu1  ;;  %14379 = vmatprep.subr.bf16.mxu1 %v17314_v33  ;;  %v15349_v60 = vadd.f32 %v15246_v57, %v14074_v12  ;;  %v2007_v24 = vld [vmem:[#allocation6 + $0x3ad8] sm:$0xff]  ;;  %v17409_v33 = vcombine.low %v1959_v14, %v1975_v21  ;;  %v152_v17 = vld [vmem:[#allocation6 + $0xe0] sm:$0xff] }
 0x614   :  { %v15350_v2 = vadd.f32 %v15250_v30, %v14076_v52  ;;  %14339 = vmatpush1.bf16.msra.mxu0 %v16801_v22  ;;  %v17442_v37 = vcombine.high %v1991_v54, %v2007_v24  ;;  %v1511_v38 = vld [vmem:[#allocation6 + $0x2b58] sm:$0xff]  ;;  %v17441_v34 = vcombine.low %v1991_v54, %v2007_v24  ;;  %v648_v54 = vld [vmem:[#allocation6 + $0x1060] sm:$0xff] }
 0x615   :  { %v15381_v0 = vmax.f32 %v15349_v60, 0.0  ;;  %14340 = vmatprep.subr.bf16.mxu0 %v16834_v50  ;;  %v1527_v40 = vld [vmem:[#allocation6 + $0x2bd8] sm:$0xff]  ;;  %v664_v24 = vld [vmem:[#allocation6 + $0x10e0] sm:$0xff] }
 0x616   :  { %14380 = vmatpush1.bf16.msra.mxu1 %v17313_v18  ;;  %v15382_v4 = vmax.f32 %v15350_v2, 0.0  ;;  %v2023_v57 = vld [vmem:[#allocation6 + $0x3b58] sm:$0xff]  ;;  %v16962_v44 = vcombine.high %v1511_v38, %v1527_v40  ;;  %v16961_v48 = vcombine.low %v1511_v38, %v1527_v40  ;;  %v168_v38 = vld [vmem:[#allocation6 + $0x160] sm:$0xff] }
 0x617   :  { %14381 = vmatprep.subr.bf16.mxu1 %v17346_v55  ;;  %v2039_v41 = vld [vmem:[#allocation6 + $0x3bd8] sm:$0xff]  ;;  %v184_v40 = vld [vmem:[#allocation6 + $0x1e0] sm:$0xff] }
 0x618   :  { %v17636_v6 = vpack.c.bf16 %v15382_v4, %v15381_v0  ;;  %14341 = vmatpush1.bf16.msra.mxu0 %v16833_v63  ;;  %v17474_v31 = vcombine.high %v2023_v57, %v2039_v41  ;;  %v1543_v30 = vld [vmem:[#allocation6 + $0x2c58] sm:$0xff]  ;;  %v17473_v51 = vcombine.low %v2023_v57, %v2039_v41  ;;  %v680_v57 = vld [vmem:[#allocation6 + $0x1160] sm:$0xff] }
 0x619   :  { %14342 = vmatprep.subr.bf16.mxu0 %v16866_v15  ;;  %v1559_v19 = vld [vmem:[#allocation6 + $0x2cd8] sm:$0xff]  ;;  %v696_v41 = vld [vmem:[#allocation6 + $0x11e0] sm:$0xff] }
 0x61a   :  { %14382 = vmatpush1.bf16.msra.mxu1 %v17345_v3  ;;  %15532 = vst [vmem:[#allocation9 + $0x48] sm:$0xff] %v17636_v6  ;;  %v2055_v22 = vld [vmem:[#allocation6 + $0x3c58] sm:$0xff]  ;;  %v16994_v18 = vcombine.high %v1543_v30, %v1559_v19  ;;  %v16993_v43 = vcombine.low %v1543_v30, %v1559_v19  ;;  %v200_v30 = vld [vmem:[#allocation6 + $0x260] sm:$0xff] }
 0x61b   :  { %14383 = vmatprep.subr.bf16.mxu1 %v17378_v8  ;;  %v2071_v12 = vld [vmem:[#allocation6 + $0x3cd8] sm:$0xff]  ;;  %v216_v19 = vld [vmem:[#allocation6 + $0x2e0] sm:$0xff] }
 0x61c   :  { %14343 = vmatpush1.bf16.msra.mxu0 %v16865_v23  ;;  %v17506_v50 = vcombine.high %v2055_v22, %v2071_v12  ;;  %v1575_v52 = vld [vmem:[#allocation6 + $0x2d58] sm:$0xff]  ;;  %v17505_v60 = vcombine.low %v2055_v22, %v2071_v12  ;;  %v712_v22 = vld [vmem:[#allocation6 + $0x1260] sm:$0xff] }
 0x61d   :  { %14344 = vmatprep.subr.bf16.mxu0 %v16898_v25  ;;  %v1591_v5 = vld [vmem:[#allocation6 + $0x2dd8] sm:$0xff]  ;;  %v728_v12 = vld [vmem:[#allocation6 + $0x12e0] sm:$0xff] }
 0x61e   :  { %14384 = vmatpush1.bf16.msra.mxu1 %v17377_v7  ;;  %v2087_v55 = vld [vmem:[#allocation6 + $0x3d58] sm:$0xff]  ;;  %v17026_v61 = vcombine.high %v1575_v52, %v1591_v5  ;;  %v17025_v15 = vcombine.low %v1575_v52, %v1591_v5  ;;  %v232_v52 = vld [vmem:[#allocation6 + $0x360] sm:$0xff] }
 0x61f   :  { %14385 = vmatprep.subr.bf16.mxu1 %v17410_v53  ;;  %v2103_v56 = vld [vmem:[#allocation6 + $0x3dd8] sm:$0xff]  ;;  %v248_v5 = vld [vmem:[#allocation6 + $0x3e0] sm:$0xff] }
 0x620   :  { %14345 = vmatpush1.bf16.msra.mxu0 %v16897_v35  ;;  %v17538_v62 = vcombine.high %v2087_v55, %v2103_v56  ;;  %v1607_v2 = vld [vmem:[#allocation6 + $0x2e58] sm:$0xff]  ;;  %v17537_v4 = vcombine.low %v2087_v55, %v2103_v56  ;;  %v744_v55 = vld [vmem:[#allocation6 + $0x1360] sm:$0xff] }
 0x621   :  { %14346 = vmatprep.subr.bf16.mxu0 %v16930_v13  ;;  %v1623_v63 = vld [vmem:[#allocation6 + $0x2ed8] sm:$0xff]  ;;  %v15588_v13 = vcombine.high %v136_v26, %v152_v17  ;;  %v760_v56 = vld [vmem:[#allocation6 + $0x13e0] sm:$0xff] }
 0x622   :  { %14386 = vmatpush1.bf16.msra.mxu1 %v17409_v33  ;;  %v2119_v0 = vld [vmem:[#allocation6 + $0x3e58] sm:$0xff]  ;;  %v17058_v8 = vcombine.high %v1607_v2, %v1623_v63  ;;  %v17057_v23 = vcombine.low %v1607_v2, %v1623_v63  ;;  %v264_v2 = vld [vmem:[#allocation6 + $0x460] sm:$0xff] }
 0x623   :  { %14387 = vmatprep.subr.bf16.mxu1 %v17442_v37  ;;  %v2135_v3 = vld [vmem:[#allocation6 + $0x3ed8] sm:$0xff]  ;;  %v16100_v37 = vcombine.high %v648_v54, %v664_v24  ;;  %v280_v63 = vld [vmem:[#allocation6 + $0x4e0] sm:$0xff] }
 0x624   :  { %14347 = vmatpush1.bf16.msra.mxu0 %v16929_v42  ;;  %v17570_v10 = vcombine.high %v2119_v0, %v2135_v3  ;;  %v1655_v14 = vld [vmem:[#allocation6 + $0x2fd8] sm:$0xff]  ;;  %v17569_v7 = vcombine.low %v2119_v0, %v2135_v3  ;;  %v15587_v42 = vcombine.low %v136_v26, %v152_v17  ;;  %v776_v0 = vld [vmem:[#allocation6 + $0x1460] sm:$0xff] }
 0x625   :  { %14348 = vmatprep.subr.bf16.mxu0 %v16962_v44  ;;  %v2151_v21 = vld [vmem:[#allocation6 + $0x3f58] sm:$0xff]  ;;  %v17090_v25 = vcombine.high %v1639_v11, %v1655_v14  ;;  %v17089_v35 = vcombine.low %v1639_v11, %v1655_v14  ;;  %v15620_v44 = vcombine.high %v168_v38, %v184_v40  ;;  %v792_v3 = vld [vmem:[#allocation6 + $0x14e0] sm:$0xff] }
 0x626   :  { %14388 = vmatpush1.bf16.msra.mxu1 %v17441_v34  ;;  %v2167_v6 = vld [vmem:[#allocation6 + $0x3fd8] sm:$0xff]  ;;  %v16099_v34 = vcombine.low %v648_v54, %v664_v24  ;;  %v296_v11 = vld [vmem:[#allocation6 + $0x560] sm:$0xff] }
 0x627   :  { %14389 = vmatprep.subr.bf16.mxu1 %v17474_v31  ;;  %v17602_v53 = vcombine.high %v2151_v21, %v2167_v6  ;;  %v17601_v33 = vcombine.low %v2151_v21, %v2167_v6  ;;  %v16132_v31 = vcombine.high %v680_v57, %v696_v41  ;;  %v312_v14 = vld [vmem:[#allocation6 + $0x5e0] sm:$0xff] }
 0x628   :  { %14349 = vmatpush1.bf16.msra.mxu0 %v16961_v48  ;;  %v15619_v48 = vcombine.low %v168_v38, %v184_v40  ;;  %v808_v21 = vld [vmem:[#allocation6 + $0x1560] sm:$0xff] }
 0x629   :  { %14350 = vmatprep.subr.bf16.mxu0 %v16994_v18  ;;  %v15652_v18 = vcombine.high %v200_v30, %v216_v19  ;;  %v824_v6 = vld [vmem:[#allocation6 + $0x15e0] sm:$0xff] }
 0x62a   :  { %14390 = vmatpush1.bf16.msra.mxu1 %v17473_v51  ;;  %v16131_v51 = vcombine.low %v680_v57, %v696_v41  ;;  %v328_v26 = vld [vmem:[#allocation6 + $0x660] sm:$0xff] }
 0x62b   :  { %14391 = vmatprep.subr.bf16.mxu1 %v17506_v50  ;;  %v16164_v50 = vcombine.high %v712_v22, %v728_v12  ;;  %v344_v17 = vld [vmem:[#allocation6 + $0x6e0] sm:$0xff] }
 0x62c   :  { %14351 = vmatpush1.bf16.msra.mxu0 %v16993_v43  ;;  %v15651_v43 = vcombine.low %v200_v30, %v216_v19  ;;  %v840_v54 = vld [vmem:[#allocation6 + $0x1660] sm:$0xff] }
 0x62d   :  { %14352 = vmatprep.subr.bf16.mxu0 %v17026_v61  ;;  %v15684_v61 = vcombine.high %v232_v52, %v248_v5  ;;  %v856_v24 = vld [vmem:[#allocation6 + $0x16e0] sm:$0xff] }
 0x62e   :  { %14392 = vmatpush1.bf16.msra.mxu1 %v17505_v60  ;;  %v16163_v60 = vcombine.low %v712_v22, %v728_v12  ;;  %v16292_v38 = vcombine.high %v840_v54, %v856_v24  ;;  %v360_v40 = vld [vmem:[#allocation6 + $0x760] sm:$0xff]  ;;  %v15779_v22 = vcombine.low %v328_v26, %v344_v17 }
 0x62f   :  { %14393 = vmatprep.subr.bf16.mxu1 %v17538_v62  ;;  %v16196_v62 = vcombine.high %v744_v55, %v760_v56  ;;  %v376_v57 = vld [vmem:[#allocation6 + $0x7e0] sm:$0xff] }
 0x630   :  { %14353 = vmatpush1.bf16.msra.mxu0 %v17025_v15  ;;  %v15683_v15 = vcombine.low %v232_v52, %v248_v5 }
 0x631   :  { %14354 = vmatprep.subr.bf16.mxu0 %v17058_v8  ;;  %v15716_v8 = vcombine.high %v264_v2, %v280_v63 }
 0x632   :  { %14394 = vmatpush1.bf16.msra.mxu1 %v17537_v4  ;;  %v16195_v4 = vcombine.low %v744_v55, %v760_v56  ;;  %v392_v55 = vld [vmem:[#allocation6 + $0x860] sm:$0xff] }
 0x633   :  { %14395 = vmatprep.subr.bf16.mxu1 %v17570_v10  ;;  %v16228_v10 = vcombine.high %v776_v0, %v792_v3  ;;  %v408_v56 = vld [vmem:[#allocation6 + $0x8e0] sm:$0xff] }
 0x634   :  { %14355 = vmatpush1.bf16.msra.mxu0 %v17057_v23  ;;  %v15715_v23 = vcombine.low %v264_v2, %v280_v63  ;;  %v15844_v2 = vcombine.high %v392_v55, %v408_v56 }
 0x635   :  { %14356 = vmatprep.subr.bf16.mxu0 %v17090_v25  ;;  %v15748_v25 = vcombine.high %v296_v11, %v312_v14 }
 0x636   :  { %14396 = vmatpush1.bf16.msra.mxu1 %v17569_v7  ;;  %v16227_v7 = vcombine.low %v776_v0, %v792_v3  ;;  %v424_v0 = vld [vmem:[#allocation6 + $0x960] sm:$0xff] }
 0x637   :  { %14397 = vmatprep.subr.bf16.mxu1 %v17602_v53  ;;  %v16260_v53 = vcombine.high %v808_v21, %v824_v6  ;;  %v440_v3 = vld [vmem:[#allocation6 + $0x9e0] sm:$0xff] }
 0x638   :  { %14357 = vmatpush1.bf16.msra.mxu0 %v17089_v35  ;;  %v15747_v35 = vcombine.low %v296_v11, %v312_v14  ;;  %v15876_v11 = vcombine.high %v424_v0, %v440_v3 }
 0x639   :  { %14408 = vmatprep.subr.bf16.mxu0 %v15588_v13  ;;  %v15780_v13 = vcombine.high %v328_v26, %v344_v17 }
 0x63a   :  { %14398 = vmatpush1.bf16.msra.mxu1 %v17601_v33  ;;  %v16259_v33 = vcombine.low %v808_v21, %v824_v6  ;;  %v456_v21 = vld [vmem:[#allocation6 + $0xa60] sm:$0xff] }
 0x63b   :  { %14449 = vmatprep.subr.bf16.mxu1 %v16100_v37  ;;  %14359 = vmatmul.mubr.bf16.vlgmr.msra.gmra.mrb[92].mxu0 %v17857_v36  ;;  %v472_v6 = vld [vmem:[#allocation6 + $0xae0] sm:$0xff] }
 0x63c   :  { %14409 = vmatpush1.bf16.msra.mxu0 %v15587_v42  ;;  %14440 = vmatprep.mubr.bf16.mxu0 %v17823_v58  ;;  %v15908_v26 = vcombine.high %v456_v21, %v472_v6 }
 0x63d   :  { %14400 = vmatmul.mubr.bf16.vlgmr.msra.gmra.mrb[92].mxu1 %v17861_v39  ;;  %14410 = vmatprep.subr.bf16.mxu0 %v15620_v44  ;;  %v888_v44 = vld [vmem:[#allocation6 + $0x17e0] sm:$0xff] }
 0x63e   :  { %14450 = vmatpush1.bf16.msra.mxu1 %v16099_v34  ;;  %14481 = vmatprep.mubr.bf16.mxu1 %v17827_v59  ;;  %v872_v34 = vld [vmem:[#allocation6 + $0x1760] sm:$0xff] }
 0x63f   :  { %14451 = vmatprep.subr.bf16.mxu1 %v16132_v31  ;;  %v16324_v5 = vcombine.high %v872_v34, %v888_v44 }
 0x640   :  { %14411 = vmatpush1.bf16.msra.mxu0 %v15619_v48 }
 0x641   :  { %14412 = vmatprep.subr.bf16.mxu0 %v15652_v18  ;;  %v16291_v18 = vcombine.low %v840_v54, %v856_v24  ;;  %v488_v54 = vld [vmem:[#allocation6 + $0xb60] sm:$0xff] }
 0x642   :  { %14452 = vmatpush1.bf16.msra.mxu1 %v16131_v51  ;;  %v504_v24 = vld [vmem:[#allocation6 + $0xbe0] sm:$0xff] }
 0x643   :  { %14453 = vmatprep.subr.bf16.mxu1 %v16164_v50  ;;  %v15812_v50 = vcombine.high %v360_v40, %v376_v57 }
 0x644   :  { %14413 = vmatpush1.bf16.msra.mxu0 %v15651_v43  ;;  %v904_v43 = vld [vmem:[#allocation6 + $0x1860] sm:$0xff] }
 0x645   :  { %14414 = vmatprep.subr.bf16.mxu0 %v15684_v61  ;;  %v15811_v61 = vcombine.low %v360_v40, %v376_v57  ;;  %v520_v57 = vld [vmem:[#allocation6 + $0xc60] sm:$0xff] }
 0x646   :  { %14454 = vmatpush1.bf16.msra.mxu1 %v16163_v60  ;;  %v920_v60 = vld [vmem:[#allocation6 + $0x18e0] sm:$0xff] }
 0x647   :  { %14455 = vmatprep.subr.bf16.mxu1 %v16196_v62  ;;  %v16323_v62 = vcombine.low %v872_v34, %v888_v44  ;;  %v16356_v63 = vcombine.high %v904_v43, %v920_v60  ;;  %v1048_v34 = vld [vmem:[#allocation6 + $0x1ce0] sm:$0xff]  ;;  %v15939_v44 = vcombine.low %v488_v54, %v504_v24 }
 0x648   :  { %14415 = vmatpush1.bf16.msra.mxu0 %v15683_v15  ;;  %v936_v15 = vld [vmem:[#allocation6 + $0x1960] sm:$0xff] }
 0x649   :  { %14416 = vmatprep.subr.bf16.mxu0 %v15716_v8  ;;  %v15843_v8 = vcombine.low %v392_v55, %v408_v56 }
 0x64a   :  { %14456 = vmatpush1.bf16.msra.mxu1 %v16195_v4  ;;  %v952_v4 = vld [vmem:[#allocation6 + $0x19e0] sm:$0xff] }
 0x64b   :  { %14457 = vmatprep.subr.bf16.mxu1 %v16228_v10  ;;  %v16355_v10 = vcombine.low %v904_v43, %v920_v60  ;;  %v16388_v14 = vcombine.high %v936_v15, %v952_v4  ;;  %v584_v43 = vld [vmem:[#allocation6 + $0xe60] sm:$0xff] }
 0x64c   :  { %14417 = vmatpush1.bf16.msra.mxu0 %v15715_v23  ;;  %v968_v23 = vld [vmem:[#allocation6 + $0x1a60] sm:$0xff] }
 0x64d   :  { %14418 = vmatprep.subr.bf16.mxu0 %v15748_v25  ;;  %v15875_v25 = vcombine.low %v424_v0, %v440_v3  ;;  %v600_v60 = vld [vmem:[#allocation6 + $0xee0] sm:$0xff] }
 0x64e   :  { %14458 = vmatpush1.bf16.msra.mxu1 %v16227_v7  ;;  %v14114_v37 = vpop.f32.mrb[80].mxu0  ;;  %v984_v7 = vld [vmem:[#allocation6 + $0x1ae0] sm:$0xff]  ;;  %v16036_v0 = vcombine.high %v584_v43, %v600_v60 }
 0x64f   :  { %14459 = vmatprep.subr.bf16.mxu1 %v16260_v53  ;;  %v14116_v42 = vpop.f32.mrb[81].mxu0  ;;  %v16387_v53 = vcombine.low %v936_v15, %v952_v4  ;;  %v16420_v17 = vcombine.high %v968_v23, %v984_v7  ;;  %v616_v15 = vld [vmem:[#allocation6 + $0xf60] sm:$0xff] }
 0x650   :  { %v14155_v41 = vpop.f32.mrb[80].mxu1  ;;  %v14118_v19 = vpop.f32.mrb[82].mxu0  ;;  %14419 = vmatpush1.bf16.msra.mxu0 %v15747_v35  ;;  %v1000_v35 = vld [vmem:[#allocation6 + $0x1b60] sm:$0xff] }
 0x651   :  { %v18091_v31 = vadd.f32 %v14155_v41, %v14114_v37  ;;  %v14157_v30 = vpop.f32.mrb[81].mxu1  ;;  %v14119_v51 = vpop.f32.mrb[83].mxu0  ;;  %14420 = vmatprep.subr.bf16.mxu0 %v15780_v13  ;;  %v15907_v13 = vcombine.low %v456_v21, %v472_v6  ;;  %v16419_v37 = vcombine.low %v968_v23, %v984_v7  ;;  %v536_v41 = vld [vmem:[#allocation6 + $0xce0] sm:$0xff] }
 0x652   :  { %v18093_v12 = vadd.f32 %v14157_v30, %v14116_v42  ;;  %v14159_v48 = vpop.f32.mrb[82].mxu1  ;;  %14460 = vmatpush1.bf16.msra.mxu1 %v16259_v33  ;;  %v1016_v33 = vld [vmem:[#allocation6 + $0x1be0] sm:$0xff]  ;;  %v15972_v19 = vcombine.high %v520_v57, %v536_v41 }
 0x653   :  { %v14160_v52 = vpop.f32.mrb[83].mxu1  ;;  %14461 = vmatprep.subr.bf16.mxu1 %v16292_v38  ;;  %v15940_v38 = vcombine.high %v488_v54, %v504_v24  ;;  %v16452_v40 = vcombine.high %v1000_v35, %v1016_v33  ;;  %v1032_v42 = vld [vmem:[#allocation6 + $0x1c60] sm:$0xff]  ;;  %v16451_v30 = vcombine.low %v1000_v35, %v1016_v33 }
 0x654   :  { %14421 = vmatpush1.bf16.msra.mxu0 %v15779_v22  ;;  %v16484_v22 = vcombine.high %v1032_v42, %v1048_v34  ;;  %v552_v48 = vld [vmem:[#allocation6 + $0xd60] sm:$0xff]  ;;  %v15971_v52 = vcombine.low %v520_v57, %v536_v41 }
 0x655   :  { %14422 = vmatprep.subr.bf16.mxu0 %v15812_v50  ;;  %v568_v51 = vld [vmem:[#allocation6 + $0xde0] sm:$0xff] }
 0x656   :  { %14462 = vmatpush1.bf16.msra.mxu1 %v16291_v18  ;;  %v1064_v18 = vld [vmem:[#allocation6 + $0x1d60] sm:$0xff]  ;;  %v16004_v55 = vcombine.high %v552_v48, %v568_v51 }
 0x657   :  { %14463 = vmatprep.subr.bf16.mxu1 %v16324_v5  ;;  %v1080_v50 = vld [vmem:[#allocation6 + $0x1de0] sm:$0xff]  ;;  %v16483_v5 = vcombine.low %v1032_v42, %v1048_v34 }
 0x658   :  { %14423 = vmatpush1.bf16.msra.mxu0 %v15811_v61  ;;  %v16516_v56 = vcombine.high %v1064_v18, %v1080_v50  ;;  %v1096_v61 = vld [vmem:[#allocation6 + $0x1e60] sm:$0xff] }
 0x659   :  { %14424 = vmatprep.subr.bf16.mxu0 %v15844_v2  ;;  %v16003_v2 = vcombine.low %v552_v48, %v568_v51  ;;  %v632_v4 = vld [vmem:[#allocation6 + $0xfe0] sm:$0xff] }
 0x65a   :  { %14464 = vmatpush1.bf16.msra.mxu1 %v16323_v62  ;;  %v1112_v62 = vld [vmem:[#allocation6 + $0x1ee0] sm:$0xff]  ;;  %v16068_v21 = vcombine.high %v616_v15, %v632_v4 }
 0x65b   :  { %14465 = vmatprep.subr.bf16.mxu1 %v16356_v63  ;;  %v16515_v63 = vcombine.low %v1064_v18, %v1080_v50  ;;  %v16548_v3 = vcombine.high %v1096_v61, %v1112_v62  ;;  %v1160_v23 = vld [vmem:[#allocation6 + $0x2060] sm:$0xff] }
 0x65c   :  { %14425 = vmatpush1.bf16.msra.mxu0 %v15843_v8  ;;  %v1128_v8 = vld [vmem:[#allocation6 + $0x1f60] sm:$0xff] }
 0x65d   :  { %14426 = vmatprep.subr.bf16.mxu0 %v15876_v11  ;;  %v16035_v11 = vcombine.low %v584_v43, %v600_v60  ;;  %v1176_v7 = vld [vmem:[#allocation6 + $0x20e0] sm:$0xff] }
 0x65e   :  { %14466 = vmatpush1.bf16.msra.mxu1 %v16355_v10  ;;  %v1144_v10 = vld [vmem:[#allocation6 + $0x1fe0] sm:$0xff]  ;;  %v16612_v54 = vcombine.high %v1160_v23, %v1176_v7 }
 0x65f   :  { %14467 = vmatprep.subr.bf16.mxu1 %v16388_v14  ;;  %v16547_v14 = vcombine.low %v1096_v61, %v1112_v62  ;;  %v16580_v6 = vcombine.high %v1128_v8, %v1144_v10  ;;  %v1192_v35 = vld [vmem:[#allocation6 + $0x2160] sm:$0xff] }
 0x660   :  { %14427 = vmatpush1.bf16.msra.mxu0 %v15875_v25  ;;  %v1672_v25 = vld [vmem:[#allocation6 + $0x3060] sm:$0xff] }
 0x661   :  { %14428 = vmatprep.subr.bf16.mxu0 %v15908_v26  ;;  %v16067_v26 = vcombine.low %v616_v15, %v632_v4  ;;  %v1208_v33 = vld [vmem:[#allocation6 + $0x21e0] sm:$0xff] }
 0x662   :  { %14468 = vmatpush1.bf16.msra.mxu1 %v16387_v53  ;;  %v1688_v53 = vld [vmem:[#allocation6 + $0x30e0] sm:$0xff]  ;;  %v16644_v57 = vcombine.high %v1192_v35, %v1208_v33 }
 0x663   :  { %14469 = vmatprep.subr.bf16.mxu1 %v16420_v17  ;;  %v16579_v17 = vcombine.low %v1128_v8, %v1144_v10  ;;  %v17124_v24 = vcombine.high %v1672_v25, %v1688_v53  ;;  %v1224_v42 = vld [vmem:[#allocation6 + $0x2260] sm:$0xff] }
 0x664   :  { %14429 = vmatpush1.bf16.msra.mxu0 %v15907_v13  ;;  %v1704_v13 = vld [vmem:[#allocation6 + $0x3160] sm:$0xff] }
 0x665   :  { %14430 = vmatprep.subr.bf16.mxu0 %v15940_v38  ;;  %v16611_v38 = vcombine.low %v1160_v23, %v1176_v7  ;;  %v1240_v34 = vld [vmem:[#allocation6 + $0x22e0] sm:$0xff] }
 0x666   :  { %14470 = vmatpush1.bf16.msra.mxu1 %v16419_v37  ;;  %v1720_v37 = vld [vmem:[#allocation6 + $0x31e0] sm:$0xff]  ;;  %v16676_v48 = vcombine.high %v1224_v42, %v1240_v34 }
 0x667   :  { %14471 = vmatprep.subr.bf16.mxu1 %v16452_v40  ;;  %v17123_v40 = vcombine.low %v1672_v25, %v1688_v53  ;;  %v17156_v41 = vcombine.high %v1704_v13, %v1720_v37  ;;  %v1256_v18 = vld [vmem:[#allocation6 + $0x2360] sm:$0xff] }
 0x668   :  { %14431 = vmatpush1.bf16.msra.mxu0 %v15939_v44  ;;  %v1736_v44 = vld [vmem:[#allocation6 + $0x3260] sm:$0xff] }
 0x669   :  { %14432 = vmatprep.subr.bf16.mxu0 %v15972_v19  ;;  %v16643_v19 = vcombine.low %v1192_v35, %v1208_v33  ;;  %v1272_v50 = vld [vmem:[#allocation6 + $0x23e0] sm:$0xff] }
 0x66a   :  { %14472 = vmatpush1.bf16.msra.mxu1 %v16451_v30  ;;  %v1752_v30 = vld [vmem:[#allocation6 + $0x32e0] sm:$0xff]  ;;  %v16708_v43 = vcombine.high %v1256_v18, %v1272_v50 }
 0x66b   :  { %14473 = vmatprep.subr.bf16.mxu1 %v16484_v22  ;;  %v17155_v22 = vcombine.low %v1704_v13, %v1720_v37  ;;  %v17188_v51 = vcombine.high %v1736_v44, %v1752_v30  ;;  %v1288_v61 = vld [vmem:[#allocation6 + $0x2460] sm:$0xff] }
 0x66c   :  { %14433 = vmatpush1.bf16.msra.mxu0 %v15971_v52  ;;  %v1768_v52 = vld [vmem:[#allocation6 + $0x3360] sm:$0xff] }
 0x66d   :  { %14434 = vmatprep.subr.bf16.mxu0 %v16004_v55  ;;  %v16675_v55 = vcombine.low %v1224_v42, %v1240_v34  ;;  %v1304_v62 = vld [vmem:[#allocation6 + $0x24e0] sm:$0xff] }
 0x66e   :  { %14474 = vmatpush1.bf16.msra.mxu1 %v16483_v5  ;;  %v1784_v5 = vld [vmem:[#allocation6 + $0x33e0] sm:$0xff]  ;;  %v16740_v15 = vcombine.high %v1288_v61, %v1304_v62 }
 0x66f   :  { %14475 = vmatprep.subr.bf16.mxu1 %v16516_v56  ;;  %v17187_v56 = vcombine.low %v1736_v44, %v1752_v30  ;;  %v17220_v60 = vcombine.high %v1768_v52, %v1784_v5  ;;  %v1320_v8 = vld [vmem:[#allocation6 + $0x2560] sm:$0xff] }
 0x670   :  { %14435 = vmatpush1.bf16.msra.mxu0 %v16003_v2  ;;  %v1800_v2 = vld [vmem:[#allocation6 + $0x3460] sm:$0xff] }
 0x671   :  { %14436 = vmatprep.subr.bf16.mxu0 %v16036_v0  ;;  %v16707_v0 = vcombine.low %v1256_v18, %v1272_v50  ;;  %v1336_v10 = vld [vmem:[#allocation6 + $0x25e0] sm:$0xff] }
 0x672   :  { %14476 = vmatpush1.bf16.msra.mxu1 %v16515_v63  ;;  %v1816_v63 = vld [vmem:[#allocation6 + $0x34e0] sm:$0xff]  ;;  %v16772_v23 = vcombine.high %v1320_v8, %v1336_v10 }
 0x673   :  { %14477 = vmatprep.subr.bf16.mxu1 %v16548_v3  ;;  %v17219_v3 = vcombine.low %v1768_v52, %v1784_v5  ;;  %v17252_v4 = vcombine.high %v1800_v2, %v1816_v63  ;;  %v1352_v25 = vld [vmem:[#allocation6 + $0x2660] sm:$0xff] }
 0x674   :  { %14437 = vmatpush1.bf16.msra.mxu0 %v16035_v11  ;;  %v1832_v11 = vld [vmem:[#allocation6 + $0x3560] sm:$0xff] }
 0x675   :  { %14438 = vmatprep.subr.bf16.mxu0 %v16068_v21  ;;  %v16739_v21 = vcombine.low %v1288_v61, %v1304_v62  ;;  %v1368_v53 = vld [vmem:[#allocation6 + $0x26e0] sm:$0xff] }
 0x676   :  { %14478 = vmatpush1.bf16.msra.mxu1 %v16547_v14  ;;  %v1848_v14 = vld [vmem:[#allocation6 + $0x35e0] sm:$0xff]  ;;  %v16804_v35 = vcombine.high %v1352_v25, %v1368_v53  ;;  %v16803_v18 = vcombine.low %v1352_v25, %v1368_v53 }
 0x677   :  { %14479 = vmatprep.subr.bf16.mxu1 %v16580_v6  ;;  %v17251_v6 = vcombine.low %v1800_v2, %v1816_v63  ;;  %v17284_v7 = vcombine.high %v1832_v11, %v1848_v14  ;;  %v1384_v37 = vld [vmem:[#allocation6 + $0x2760] sm:$0xff] }
 0x678   :  { %14439 = vmatpush1.bf16.msra.mxu0 %v16067_v26  ;;  %v1864_v26 = vld [vmem:[#allocation6 + $0x3660] sm:$0xff] }
 0x679   :  { %14490 = vmatprep.subr.bf16.mxu0 %v16612_v54  ;;  %v16771_v54 = vcombine.low %v1320_v8, %v1336_v10  ;;  %v1896_v44 = vld [vmem:[#allocation6 + $0x3760] sm:$0xff] }
 0x67a   :  { %14480 = vmatpush1.bf16.msra.mxu1 %v16579_v17  ;;  %v1880_v17 = vld [vmem:[#allocation6 + $0x36e0] sm:$0xff] }
 0x67b   :  { %14531 = vmatprep.subr.bf16.mxu1 %v17124_v24  ;;  %14441 = vmatmul.mubr.bf16.vlgmr.msra.gmra.mrb[96].mxu0 %v17833_v16  ;;  %v17283_v24 = vcombine.low %v1832_v11, %v1848_v14  ;;  %v17316_v13 = vcombine.high %v1864_v26, %v1880_v17  ;;  %v1912_v30 = vld [vmem:[#allocation6 + $0x37e0] sm:$0xff]  ;;  %v17315_v5 = vcombine.low %v1864_v26, %v1880_v17 }
 0x67c   :  { %14491 = vmatpush1.bf16.msra.mxu0 %v16611_v38  ;;  %14522 = vmatprep.mubr.bf16.mxu0 %v17845_v27  ;;  %v1400_v38 = vld [vmem:[#allocation6 + $0x27e0] sm:$0xff] }
 0x67d   :  { %14482 = vmatmul.mubr.bf16.vlgmr.msra.gmra.mrb[96].mxu1 %v17839_v20  ;;  %14492 = vmatprep.subr.bf16.mxu0 %v16644_v57  ;;  %v1416_v61 = vld [vmem:[#allocation6 + $0x2860] sm:$0xff] }
 0x67e   :  { %14532 = vmatpush1.bf16.msra.mxu1 %v17123_v40  ;;  %14563 = vmatprep.mubr.bf16.mxu1 %v17850_v29  ;;  %v1928_v2 = vld [vmem:[#allocation6 + $0x3860] sm:$0xff] }
 0x67f   :  { %14533 = vmatprep.subr.bf16.mxu1 %v17156_v41  ;;  %v18100_v41 = vld [vmem:[#allocation8 + $0x10] sm:$0xff]  ;;  %v1944_v63 = vld [vmem:[#allocation6 + $0x38e0] sm:$0xff] }
 0x680   :  { %14493 = vmatpush1.bf16.msra.mxu0 %v16643_v19  ;;  %v15254_v42 = vrot.slane %v18100_v41, %v17936_v45  ;;  %v17380_v11 = vcombine.high %v1928_v2, %v1944_v63  ;;  %v1448_v14 = vld [vmem:[#allocation6 + $0x2960] sm:$0xff]  ;;  %v17379_v53 = vcombine.low %v1928_v2, %v1944_v63 }
 0x681   :  { %14494 = vmatprep.subr.bf16.mxu0 %v16676_v48  ;;  %v15258_v48 = vrot.slane %v18100_v41, %v17939_v47 }
 0x682   :  { %14534 = vmatpush1.bf16.msra.mxu1 %v17155_v22 }
 0x683   :  { %14535 = vmatprep.subr.bf16.mxu1 %v17188_v51 }
 0x684   :  { %14495 = vmatpush1.bf16.msra.mxu0 %v16675_v55  ;;  %v16836_v55 = vcombine.high %v1384_v37, %v1400_v38 }
 0x685   :  { %14496 = vmatprep.subr.bf16.mxu0 %v16708_v43 }
 0x686   :  { %14536 = vmatpush1.bf16.msra.mxu1 %v17187_v56 }
 0x687   :  { %14537 = vmatprep.subr.bf16.mxu1 %v17220_v60  ;;  %v17348_v60 = vcombine.high %v1896_v44, %v1912_v30 }
 0x688   :  { %14497 = vmatpush1.bf16.msra.mxu0 %v16707_v0 }
 0x689   :  { %14498 = vmatprep.subr.bf16.mxu0 %v16740_v15 }
 0x68a   :  { %14538 = vmatpush1.bf16.msra.mxu1 %v17219_v3  ;;  %v16835_v3 = vcombine.low %v1384_v37, %v1400_v38 }
 0x68b   :  { %14539 = vmatprep.subr.bf16.mxu1 %v17252_v4  ;;  %v17347_v4 = vcombine.low %v1896_v44, %v1912_v30  ;;  %v2040_v44 = vld [vmem:[#allocation6 + $0x3be0] sm:$0xff] }
 0x68c   :  { %14499 = vmatpush1.bf16.msra.mxu0 %v16739_v21  ;;  %v1464_v21 = vld [vmem:[#allocation6 + $0x29e0] sm:$0xff] }
 0x68d   :  { %14500 = vmatprep.subr.bf16.mxu0 %v16772_v23  ;;  %v1976_v23 = vld [vmem:[#allocation6 + $0x39e0] sm:$0xff]  ;;  %v16900_v26 = vcombine.high %v1448_v14, %v1464_v21 }
 0x68e   :  { %14540 = vmatpush1.bf16.msra.mxu1 %v17251_v6  ;;  %v14196_v33 = vpop.f32.mrb[84].mxu0  ;;  %v1960_v6 = vld [vmem:[#allocation6 + $0x3960] sm:$0xff] }
 0x68f   :  { %14541 = vmatprep.subr.bf16.mxu1 %v17284_v7  ;;  %v14197_v40 = vadd.f32 %v14196_v33, %v18091_v31  ;;  %v14198_v34 = vpop.f32.mrb[85].mxu0  ;;  %v17412_v17 = vcombine.high %v1960_v6, %v1976_v23  ;;  %v2008_v33 = vld [vmem:[#allocation6 + $0x3ae0] sm:$0xff]  ;;  %v17411_v37 = vcombine.low %v1960_v6, %v1976_v23 }
 0x690   :  { %v14237_v57 = vpop.f32.mrb[84].mxu1  ;;  %v14199_v19 = vadd.f32 %v14198_v34, %v18093_v12  ;;  %v14200_v51 = vpop.f32.mrb[86].mxu0  ;;  %14501 = vmatpush1.bf16.msra.mxu0 %v16771_v54  ;;  %v1432_v12 = vld [vmem:[#allocation6 + $0x28e0] sm:$0xff] }
 0x691   :  { %v14239_v22 = vpop.f32.mrb[85].mxu1  ;;  %v14238_v50 = vadd.f32 %v14237_v57, %v14197_v40  ;;  %v14201_v52 = vpop.f32.mrb[87].mxu0  ;;  %14502 = vmatprep.subr.bf16.mxu0 %v16804_v35  ;;  %v16868_v8 = vcombine.high %v1416_v61, %v1432_v12  ;;  %v16867_v25 = vcombine.low %v1416_v61, %v1432_v12  ;;  %v1480_v54 = vld [vmem:[#allocation6 + $0x2a60] sm:$0xff] }
 0x692   :  { %v14241_v31 = vpop.f32.mrb[86].mxu1  ;;  %14542 = vmatpush1.bf16.msra.mxu1 %v17283_v24  ;;  %v14240_v56 = vadd.f32 %v14239_v22, %v14199_v19  ;;  %v1496_v24 = vld [vmem:[#allocation6 + $0x2ae0] sm:$0xff] }
 0x693   :  { %v14242_v43 = vpop.f32.mrb[87].mxu1  ;;  %14543 = vmatprep.subr.bf16.mxu1 %v17316_v13  ;;  %v15351_v62 = vadd.f32 %v15254_v42, %v14238_v50  ;;  %v1992_v35 = vld [vmem:[#allocation6 + $0x3a60] sm:$0xff]  ;;  %v16899_v13 = vcombine.low %v1448_v14, %v1464_v21  ;;  %v16932_v38 = vcombine.high %v1480_v54, %v1496_v24  ;;  %v16931_v30 = vcombine.low %v1480_v54, %v1496_v24  ;;  %v137_v24 = vld [vmem:[#allocation6 + $0x68] sm:$0xff] }
 0x694   :  { %v15352_v0 = vadd.f32 %v15258_v48, %v14240_v56  ;;  %14503 = vmatpush1.bf16.msra.mxu0 %v16803_v18  ;;  %v17444_v40 = vcombine.high %v1992_v35, %v2008_v33  ;;  %v1512_v57 = vld [vmem:[#allocation6 + $0x2b60] sm:$0xff]  ;;  %v17443_v19 = vcombine.low %v1992_v35, %v2008_v33  ;;  %v153_v35 = vld [vmem:[#allocation6 + $0xe8] sm:$0xff] }
 0x695   :  { %v15383_v15 = vmax.f32 %v15351_v62, 0.0  ;;  %14504 = vmatprep.subr.bf16.mxu0 %v16836_v55  ;;  %v1528_v42 = vld [vmem:[#allocation6 + $0x2be0] sm:$0xff]  ;;  %v649_v33 = vld [vmem:[#allocation6 + $0x1068] sm:$0xff] }
 0x696   :  { %14544 = vmatpush1.bf16.msra.mxu1 %v17315_v5  ;;  %v15384_v10 = vmax.f32 %v15352_v0, 0.0  ;;  %v2024_v34 = vld [vmem:[#allocation6 + $0x3b60] sm:$0xff]  ;;  %v16964_v22 = vcombine.high %v1512_v57, %v1528_v42  ;;  %v16963_v52 = vcombine.low %v1512_v57, %v1528_v42  ;;  %v169_v42 = vld [vmem:[#allocation6 + $0x168] sm:$0xff] }
 0x697   :  { %14545 = vmatprep.subr.bf16.mxu1 %v17348_v60  ;;  %v17476_v48 = vcombine.high %v2024_v34, %v2040_v44  ;;  %v1544_v51 = vld [vmem:[#allocation6 + $0x2c60] sm:$0xff]  ;;  %v17475_v5 = vcombine.low %v2024_v34, %v2040_v44  ;;  %v185_v34 = vld [vmem:[#allocation6 + $0x1e8] sm:$0xff] }
 0x698   :  { %v17637_v7 = vpack.c.bf16 %v15384_v10, %v15383_v15  ;;  %14505 = vmatpush1.bf16.msra.mxu0 %v16835_v3  ;;  %v1560_v18 = vld [vmem:[#allocation6 + $0x2ce0] sm:$0xff]  ;;  %v681_v44 = vld [vmem:[#allocation6 + $0x1168] sm:$0xff] }
 0x699   :  { %14506 = vmatprep.subr.bf16.mxu0 %v16868_v8  ;;  %v2056_v50 = vld [vmem:[#allocation6 + $0x3c60] sm:$0xff]  ;;  %v16996_v55 = vcombine.high %v1544_v51, %v1560_v18  ;;  %v16995_v62 = vcombine.low %v1544_v51, %v1560_v18  ;;  %v201_v18 = vld [vmem:[#allocation6 + $0x268] sm:$0xff] }
 0x69a   :  { %14546 = vmatpush1.bf16.msra.mxu1 %v17347_v4  ;;  %15533 = vst [vmem:[#allocation9 + $0x50] sm:$0xff] %v17637_v7  ;;  %v2072_v31 = vld [vmem:[#allocation6 + $0x3ce0] sm:$0xff] }
 0x69b   :  { %14547 = vmatprep.subr.bf16.mxu1 %v17380_v11  ;;  %v17508_v56 = vcombine.high %v2056_v50, %v2072_v31  ;;  %v1576_v43 = vld [vmem:[#allocation6 + $0x2d60] sm:$0xff]  ;;  %v17507_v2 = vcombine.low %v2056_v50, %v2072_v31  ;;  %v217_v50 = vld [vmem:[#allocation6 + $0x2e8] sm:$0xff] }
 0x69c   :  { %14507 = vmatpush1.bf16.msra.mxu0 %v16867_v25  ;;  %v1592_v60 = vld [vmem:[#allocation6 + $0x2de0] sm:$0xff]  ;;  %v713_v31 = vld [vmem:[#allocation6 + $0x1268] sm:$0xff] }
 0x69d   :  { %14508 = vmatprep.subr.bf16.mxu0 %v16900_v26  ;;  %v2088_v61 = vld [vmem:[#allocation6 + $0x3d60] sm:$0xff]  ;;  %v17028_v63 = vcombine.high %v1576_v43, %v1592_v60  ;;  %v17027_v10 = vcombine.low %v1576_v43, %v1592_v60  ;;  %v233_v60 = vld [vmem:[#allocation6 + $0x368] sm:$0xff] }
 0x69e   :  { %14548 = vmatpush1.bf16.msra.mxu1 %v17379_v53  ;;  %v2104_v12 = vld [vmem:[#allocation6 + $0x3de0] sm:$0xff] }
 0x69f   :  { %14549 = vmatprep.subr.bf16.mxu1 %v17412_v17  ;;  %v17540_v0 = vcombine.high %v2088_v61, %v2104_v12  ;;  %v1608_v3 = vld [vmem:[#allocation6 + $0x2e60] sm:$0xff]  ;;  %v17539_v11 = vcombine.low %v2088_v61, %v2104_v12  ;;  %v249_v61 = vld [vmem:[#allocation6 + $0x3e8] sm:$0xff] }
 0x6a0   :  { %14509 = vmatpush1.bf16.msra.mxu0 %v16899_v13  ;;  %v1624_v15 = vld [vmem:[#allocation6 + $0x2ee0] sm:$0xff]  ;;  %v665_v13 = vld [vmem:[#allocation6 + $0x10e8] sm:$0xff] }
 0x6a1   :  { %14510 = vmatprep.subr.bf16.mxu0 %v16932_v38  ;;  %v2120_v4 = vld [vmem:[#allocation6 + $0x3e60] sm:$0xff]  ;;  %v17060_v14 = vcombine.high %v1608_v3, %v1624_v15  ;;  %v17059_v53 = vcombine.low %v1608_v3, %v1624_v15  ;;  %v16102_v57 = vcombine.high %v649_v33, %v665_v13  ;;  %v745_v12 = vld [vmem:[#allocation6 + $0x1368] sm:$0xff] }
 0x6a2   :  { %14550 = vmatpush1.bf16.msra.mxu1 %v17411_v37  ;;  %v2136_v8 = vld [vmem:[#allocation6 + $0x3ee0] sm:$0xff]  ;;  %v265_v15 = vld [vmem:[#allocation6 + $0x468] sm:$0xff] }
 0x6a3   :  { %14551 = vmatprep.subr.bf16.mxu1 %v17444_v40  ;;  %v17572_v21 = vcombine.high %v2120_v4, %v2136_v8  ;;  %v1640_v6 = vld [vmem:[#allocation6 + $0x2f60] sm:$0xff]  ;;  %v17571_v26 = vcombine.low %v2120_v4, %v2136_v8  ;;  %v15590_v40 = vcombine.high %v137_v24, %v153_v35  ;;  %v281_v4 = vld [vmem:[#allocation6 + $0x4e8] sm:$0xff] }
 0x6a4   :  { %14511 = vmatpush1.bf16.msra.mxu0 %v16931_v30  ;;  %v1656_v23 = vld [vmem:[#allocation6 + $0x2fe0] sm:$0xff]  ;;  %v697_v30 = vld [vmem:[#allocation6 + $0x11e8] sm:$0xff] }
 0x6a5   :  { %14512 = vmatprep.subr.bf16.mxu0 %v16964_v22  ;;  %v2152_v7 = vld [vmem:[#allocation6 + $0x3f60] sm:$0xff]  ;;  %v17092_v17 = vcombine.high %v1640_v6, %v1656_v23  ;;  %v17091_v37 = vcombine.low %v1640_v6, %v1656_v23  ;;  %v16101_v22 = vcombine.low %v649_v33, %v665_v13  ;;  %v16134_v51 = vcombine.high %v681_v44, %v697_v30  ;;  %v777_v8 = vld [vmem:[#allocation6 + $0x1468] sm:$0xff] }
 0x6a6   :  { %14552 = vmatpush1.bf16.msra.mxu1 %v17443_v19  ;;  %v2168_v25 = vld [vmem:[#allocation6 + $0x3fe0] sm:$0xff]  ;;  %v15589_v19 = vcombine.low %v137_v24, %v153_v35  ;;  %v297_v23 = vld [vmem:[#allocation6 + $0x568] sm:$0xff] }
 0x6a7   :  { %14553 = vmatprep.subr.bf16.mxu1 %v17476_v48  ;;  %v17604_v54 = vcombine.high %v2152_v7, %v2168_v25  ;;  %v17603_v38 = vcombine.low %v2152_v7, %v2168_v25  ;;  %v15622_v48 = vcombine.high %v169_v42, %v185_v34  ;;  %v313_v7 = vld [vmem:[#allocation6 + $0x5e8] sm:$0xff] }
 0x6a8   :  { %14513 = vmatpush1.bf16.msra.mxu0 %v16963_v52  ;;  %v729_v52 = vld [vmem:[#allocation6 + $0x12e8] sm:$0xff] }
 0x6a9   :  { %14514 = vmatprep.subr.bf16.mxu0 %v16996_v55  ;;  %v16133_v55 = vcombine.low %v681_v44, %v697_v30  ;;  %v16166_v43 = vcombine.high %v713_v31, %v729_v52  ;;  %v809_v25 = vld [vmem:[#allocation6 + $0x1568] sm:$0xff] }
 0x6aa   :  { %14554 = vmatpush1.bf16.msra.mxu1 %v17475_v5  ;;  %v15621_v5 = vcombine.low %v169_v42, %v185_v34  ;;  %v329_v35 = vld [vmem:[#allocation6 + $0x668] sm:$0xff] }
 0x6ab   :  { %14555 = vmatprep.subr.bf16.mxu1 %v17508_v56  ;;  %v15654_v56 = vcombine.high %v201_v18, %v217_v50  ;;  %v345_v33 = vld [vmem:[#allocation6 + $0x6e8] sm:$0xff] }
 0x6ac   :  { %14515 = vmatpush1.bf16.msra.mxu0 %v16995_v62  ;;  %v761_v62 = vld [vmem:[#allocation6 + $0x13e8] sm:$0xff] }
 0x6ad   :  { %14516 = vmatprep.subr.bf16.mxu0 %v17028_v63  ;;  %v16165_v63 = vcombine.low %v713_v31, %v729_v52  ;;  %v16198_v3 = vcombine.high %v745_v12, %v761_v62  ;;  %v841_v13 = vld [vmem:[#allocation6 + $0x1668] sm:$0xff]  ;;  %v15781_v52 = vcombine.low %v329_v35, %v345_v33 }
 0x6ae   :  { %14556 = vmatpush1.bf16.msra.mxu1 %v17507_v2  ;;  %v15653_v2 = vcombine.low %v201_v18, %v217_v50  ;;  %v361_v44 = vld [vmem:[#allocation6 + $0x768] sm:$0xff] }
 0x6af   :  { %14557 = vmatprep.subr.bf16.mxu1 %v17540_v0  ;;  %v15686_v0 = vcombine.high %v233_v60, %v249_v61  ;;  %v377_v30 = vld [vmem:[#allocation6 + $0x7e8] sm:$0xff] }
 0x6b0   :  { %14517 = vmatpush1.bf16.msra.mxu0 %v17027_v10  ;;  %v793_v10 = vld [vmem:[#allocation6 + $0x14e8] sm:$0xff] }
 0x6b1   :  { %14518 = vmatprep.subr.bf16.mxu0 %v17060_v14  ;;  %v16197_v14 = vcombine.low %v745_v12, %v761_v62  ;;  %v16230_v6 = vcombine.high %v777_v8, %v793_v10  ;;  %v393_v62 = vld [vmem:[#allocation6 + $0x868] sm:$0xff] }
 0x6b2   :  { %14558 = vmatpush1.bf16.msra.mxu1 %v17539_v11  ;;  %v15685_v11 = vcombine.low %v233_v60, %v249_v61  ;;  %v15814_v60 = vcombine.high %v361_v44, %v377_v30 }
 0x6b3   :  { %14559 = vmatprep.subr.bf16.mxu1 %v17572_v21  ;;  %v15718_v21 = vcombine.high %v265_v15, %v281_v4 }
 0x6b4   :  { %14519 = vmatpush1.bf16.msra.mxu0 %v17059_v53  ;;  %v825_v53 = vld [vmem:[#allocation6 + $0x15e8] sm:$0xff] }
 0x6b5   :  { %14520 = vmatprep.subr.bf16.mxu0 %v17092_v17  ;;  %v16229_v17 = vcombine.low %v777_v8, %v793_v10  ;;  %v16262_v24 = vcombine.high %v809_v25, %v825_v53  ;;  %v425_v10 = vld [vmem:[#allocation6 + $0x968] sm:$0xff] }
 0x6b6   :  { %14560 = vmatpush1.bf16.msra.mxu1 %v17571_v26  ;;  %v15717_v26 = vcombine.low %v265_v15, %v281_v4 }
 0x6b7   :  { %14561 = vmatprep.subr.bf16.mxu1 %v17604_v54  ;;  %v15750_v54 = vcombine.high %v297_v23, %v313_v7 }
 0x6b8   :  { %14521 = vmatpush1.bf16.msra.mxu0 %v17091_v37  ;;  %v857_v37 = vld [vmem:[#allocation6 + $0x16e8] sm:$0xff] }
 0x6b9   :  { %14572 = vmatprep.subr.bf16.mxu0 %v15590_v40  ;;  %v16261_v40 = vcombine.low %v809_v25, %v825_v53  ;;  %v16294_v34 = vcombine.high %v841_v13, %v857_v37  ;;  %v457_v53 = vld [vmem:[#allocation6 + $0xa68] sm:$0xff] }
 0x6ba   :  { %14562 = vmatpush1.bf16.msra.mxu1 %v17603_v38  ;;  %v15749_v38 = vcombine.low %v297_v23, %v313_v7 }
 0x6bb   :  { %14613 = vmatprep.subr.bf16.mxu1 %v16102_v57  ;;  %14523 = vmatmul.mubr.bf16.vlgmr.msra.gmra.mrb[100].mxu0 %v17857_v36  ;;  %v15782_v57 = vcombine.high %v329_v35, %v345_v33 }
 0x6bc   :  { %14573 = vmatpush1.bf16.msra.mxu0 %v15589_v19  ;;  %14604 = vmatprep.mubr.bf16.mxu0 %v17823_v58 }
 0x6bd   :  { %14564 = vmatmul.mubr.bf16.vlgmr.msra.gmra.mrb[100].mxu1 %v17861_v39  ;;  %14574 = vmatprep.subr.bf16.mxu0 %v15622_v48  ;;  %v873_v48 = vld [vmem:[#allocation6 + $0x1768] sm:$0xff] }
 0x6be   :  { %14614 = vmatpush1.bf16.msra.mxu1 %v16101_v22  ;;  %14645 = vmatprep.mubr.bf16.mxu1 %v17827_v59 }
 0x6bf   :  { %14615 = vmatprep.subr.bf16.mxu1 %v16134_v51  ;;  %v889_v51 = vld [vmem:[#allocation6 + $0x17e8] sm:$0xff] }
 0x6c0   :  { %14575 = vmatpush1.bf16.msra.mxu0 %v15621_v5  ;;  %v16326_v12 = vcombine.high %v873_v48, %v889_v51  ;;  %v16325_v15 = vcombine.low %v873_v48, %v889_v51  ;;  %v1033_v48 = vld [vmem:[#allocation6 + $0x1c68] sm:$0xff] }
 0x6c1   :  { %14576 = vmatprep.subr.bf16.mxu0 %v15654_v56  ;;  %v1049_v51 = vld [vmem:[#allocation6 + $0x1ce8] sm:$0xff] }
 0x6c2   :  { %14616 = vmatpush1.bf16.msra.mxu1 %v16133_v55 }
 0x6c3   :  { %14617 = vmatprep.subr.bf16.mxu1 %v16166_v43  ;;  %v16293_v43 = vcombine.low %v841_v13, %v857_v37  ;;  %v489_v37 = vld [vmem:[#allocation6 + $0xb68] sm:$0xff] }
 0x6c4   :  { %14577 = vmatpush1.bf16.msra.mxu0 %v15653_v2  ;;  %v409_v2 = vld [vmem:[#allocation6 + $0x8e8] sm:$0xff] }
 0x6c5   :  { %14578 = vmatprep.subr.bf16.mxu0 %v15686_v0  ;;  %v921_v0 = vld [vmem:[#allocation6 + $0x18e8] sm:$0xff]  ;;  %v15846_v4 = vcombine.high %v393_v62, %v409_v2 }
 0x6c6   :  { %14618 = vmatpush1.bf16.msra.mxu1 %v16165_v63  ;;  %v905_v63 = vld [vmem:[#allocation6 + $0x1868] sm:$0xff] }
 0x6c7   :  { %14619 = vmatprep.subr.bf16.mxu1 %v16198_v3  ;;  %v15813_v3 = vcombine.low %v361_v44, %v377_v30  ;;  %v16358_v8 = vcombine.high %v905_v63, %v921_v0  ;;  %v16357_v23 = vcombine.low %v905_v63, %v921_v0  ;;  %v585_v0 = vld [vmem:[#allocation6 + $0xe68] sm:$0xff] }
 0x6c8   :  { %14579 = vmatpush1.bf16.msra.mxu0 %v15685_v11  ;;  %v441_v11 = vld [vmem:[#allocation6 + $0x9e8] sm:$0xff] }
 0x6c9   :  { %14580 = vmatprep.subr.bf16.mxu0 %v15718_v21  ;;  %v953_v21 = vld [vmem:[#allocation6 + $0x19e8] sm:$0xff]  ;;  %v15878_v7 = vcombine.high %v425_v10, %v441_v11 }
 0x6ca   :  { %14620 = vmatpush1.bf16.msra.mxu1 %v16197_v14  ;;  %v937_v14 = vld [vmem:[#allocation6 + $0x1968] sm:$0xff] }
 0x6cb   :  { %14621 = vmatprep.subr.bf16.mxu1 %v16230_v6  ;;  %v15845_v6 = vcombine.low %v393_v62, %v409_v2  ;;  %v16390_v25 = vcombine.high %v937_v14, %v953_v21  ;;  %v16389_v35 = vcombine.low %v937_v14, %v953_v21  ;;  %v16485_v62 = vcombine.low %v1033_v48, %v1049_v51  ;;  %v617_v21 = vld [vmem:[#allocation6 + $0xf68] sm:$0xff] }
 0x6cc   :  { %14581 = vmatpush1.bf16.msra.mxu0 %v15717_v26  ;;  %v473_v26 = vld [vmem:[#allocation6 + $0xae8] sm:$0xff] }
 0x6cd   :  { %14582 = vmatprep.subr.bf16.mxu0 %v15750_v54  ;;  %v985_v54 = vld [vmem:[#allocation6 + $0x1ae8] sm:$0xff]  ;;  %v15910_v33 = vcombine.high %v457_v53, %v473_v26 }
 0x6ce   :  { %14622 = vmatpush1.bf16.msra.mxu1 %v16229_v17  ;;  %v14278_v42 = vpop.f32.mrb[88].mxu0  ;;  %v969_v17 = vld [vmem:[#allocation6 + $0x1a68] sm:$0xff] }
 0x6cf   :  { %14623 = vmatprep.subr.bf16.mxu1 %v16262_v24  ;;  %v14280_v22 = vpop.f32.mrb[89].mxu0  ;;  %v15877_v24 = vcombine.low %v425_v10, %v441_v11  ;;  %v16422_v13 = vcombine.high %v969_v17, %v985_v54 }
 0x6d0   :  { %v14319_v19 = vpop.f32.mrb[88].mxu1  ;;  %v14282_v31 = vpop.f32.mrb[90].mxu0  ;;  %14583 = vmatpush1.bf16.msra.mxu0 %v15749_v38  ;;  %v505_v38 = vld [vmem:[#allocation6 + $0xbe8] sm:$0xff] }
 0x6d1   :  { %v18111_v18 = vadd.f32 %v14319_v19, %v14278_v42  ;;  %v14321_v50 = vpop.f32.mrb[89].mxu1  ;;  %v14283_v56 = vpop.f32.mrb[91].mxu0  ;;  %14584 = vmatprep.subr.bf16.mxu0 %v15782_v57  ;;  %v1017_v57 = vld [vmem:[#allocation6 + $0x1be8] sm:$0xff]  ;;  %v15909_v42 = vcombine.low %v457_v53, %v473_v26  ;;  %v15942_v44 = vcombine.high %v489_v37, %v505_v38 }
 0x6d2   :  { %v18113_v5 = vadd.f32 %v14321_v50, %v14280_v22  ;;  %v14323_v55 = vpop.f32.mrb[90].mxu1  ;;  %14624 = vmatpush1.bf16.msra.mxu1 %v16261_v40  ;;  %v1001_v40 = vld [vmem:[#allocation6 + $0x1b68] sm:$0xff]  ;;  %v15941_v50 = vcombine.low %v489_v37, %v505_v38 }
 0x6d3   :  { %v14324_v61 = vpop.f32.mrb[91].mxu1  ;;  %14625 = vmatprep.subr.bf16.mxu1 %v16294_v34  ;;  %v16421_v34 = vcombine.low %v969_v17, %v985_v54  ;;  %v16454_v30 = vcombine.high %v1001_v40, %v1017_v57  ;;  %v521_v19 = vld [vmem:[#allocation6 + $0xc68] sm:$0xff]  ;;  %v16453_v31 = vcombine.low %v1001_v40, %v1017_v57  ;;  %v16486_v55 = vcombine.high %v1033_v48, %v1049_v51 }
 0x6d4   :  { %14585 = vmatpush1.bf16.msra.mxu0 %v15781_v52  ;;  %v537_v22 = vld [vmem:[#allocation6 + $0xce8] sm:$0xff] }
 0x6d5   :  { %14586 = vmatprep.subr.bf16.mxu0 %v15814_v60  ;;  %v15974_v52 = vcombine.high %v521_v19, %v537_v22  ;;  %v553_v56 = vld [vmem:[#allocation6 + $0xd68] sm:$0xff] }
 0x6d6   :  { %14626 = vmatpush1.bf16.msra.mxu1 %v16293_v43  ;;  %v569_v43 = vld [vmem:[#allocation6 + $0xde8] sm:$0xff] }
 0x6d7   :  { %14627 = vmatprep.subr.bf16.mxu1 %v16326_v12  ;;  %v1065_v60 = vld [vmem:[#allocation6 + $0x1d68] sm:$0xff]  ;;  %v15973_v12 = vcombine.low %v521_v19, %v537_v22  ;;  %v16006_v2 = vcombine.high %v553_v56, %v569_v43 }
 0x6d8   :  { %14587 = vmatpush1.bf16.msra.mxu0 %v15813_v3  ;;  %v1081_v61 = vld [vmem:[#allocation6 + $0x1de8] sm:$0xff] }
 0x6d9   :  { %14588 = vmatprep.subr.bf16.mxu0 %v15846_v4  ;;  %v16518_v63 = vcombine.high %v1065_v60, %v1081_v61  ;;  %v601_v3 = vld [vmem:[#allocation6 + $0xee8] sm:$0xff]  ;;  %v16517_v10 = vcombine.low %v1065_v60, %v1081_v61 }
 0x6da   :  { %14628 = vmatpush1.bf16.msra.mxu1 %v16325_v15  ;;  %v1097_v15 = vld [vmem:[#allocation6 + $0x1e68] sm:$0xff]  ;;  %v16038_v11 = vcombine.high %v585_v0, %v601_v3 }
 0x6db   :  { %14629 = vmatprep.subr.bf16.mxu1 %v16358_v8  ;;  %v1113_v4 = vld [vmem:[#allocation6 + $0x1ee8] sm:$0xff]  ;;  %v16005_v8 = vcombine.low %v553_v56, %v569_v43 }
 0x6dc   :  { %14589 = vmatpush1.bf16.msra.mxu0 %v15845_v6  ;;  %v16550_v14 = vcombine.high %v1097_v15, %v1113_v4  ;;  %v633_v6 = vld [vmem:[#allocation6 + $0xfe8] sm:$0xff]  ;;  %v16549_v53 = vcombine.low %v1097_v15, %v1113_v4 }
 0x6dd   :  { %14590 = vmatprep.subr.bf16.mxu0 %v15878_v7  ;;  %v1145_v7 = vld [vmem:[#allocation6 + $0x1fe8] sm:$0xff]  ;;  %v16070_v26 = vcombine.high %v617_v21, %v633_v6 }
 0x6de   :  { %14630 = vmatpush1.bf16.msra.mxu1 %v16357_v23  ;;  %v1129_v23 = vld [vmem:[#allocation6 + $0x1f68] sm:$0xff] }
 0x6df   :  { %14631 = vmatprep.subr.bf16.mxu1 %v16390_v25  ;;  %v16037_v25 = vcombine.low %v585_v0, %v601_v3  ;;  %v16582_v17 = vcombine.high %v1129_v23, %v1145_v7  ;;  %v1161_v54 = vld [vmem:[#allocation6 + $0x2068] sm:$0xff]  ;;  %v16581_v37 = vcombine.low %v1129_v23, %v1145_v7 }
 0x6e0   :  { %14591 = vmatpush1.bf16.msra.mxu0 %v15877_v24  ;;  %v1177_v24 = vld [vmem:[#allocation6 + $0x20e8] sm:$0xff] }
 0x6e1   :  { %14592 = vmatprep.subr.bf16.mxu0 %v15910_v33  ;;  %v1689_v33 = vld [vmem:[#allocation6 + $0x30e8] sm:$0xff]  ;;  %v16614_v38 = vcombine.high %v1161_v54, %v1177_v24 }
 0x6e2   :  { %14632 = vmatpush1.bf16.msra.mxu1 %v16389_v35  ;;  %v1673_v35 = vld [vmem:[#allocation6 + $0x3068] sm:$0xff] }
 0x6e3   :  { %14633 = vmatprep.subr.bf16.mxu1 %v16422_v13  ;;  %v16069_v13 = vcombine.low %v617_v21, %v633_v6  ;;  %v17126_v40 = vcombine.high %v1673_v35, %v1689_v33  ;;  %v1193_v57 = vld [vmem:[#allocation6 + $0x2168] sm:$0xff]  ;;  %v17125_v19 = vcombine.low %v1673_v35, %v1689_v33 }
 0x6e4   :  { %14593 = vmatpush1.bf16.msra.mxu0 %v15909_v42  ;;  %v1209_v42 = vld [vmem:[#allocation6 + $0x21e8] sm:$0xff] }
 0x6e5   :  { %14594 = vmatprep.subr.bf16.mxu0 %v15942_v44  ;;  %v1721_v44 = vld [vmem:[#allocation6 + $0x31e8] sm:$0xff]  ;;  %v16646_v22 = vcombine.high %v1193_v57, %v1209_v42 }
 0x6e6   :  { %14634 = vmatpush1.bf16.msra.mxu1 %v16421_v34  ;;  %v1705_v34 = vld [vmem:[#allocation6 + $0x3168] sm:$0xff] }
 0x6e7   :  { %14635 = vmatprep.subr.bf16.mxu1 %v16454_v30  ;;  %v16613_v30 = vcombine.low %v1161_v54, %v1177_v24  ;;  %v17158_v48 = vcombine.high %v1705_v34, %v1721_v44  ;;  %v1225_v51 = vld [vmem:[#allocation6 + $0x2268] sm:$0xff]  ;;  %v17157_v56 = vcombine.low %v1705_v34, %v1721_v44 }
 0x6e8   :  { %14595 = vmatpush1.bf16.msra.mxu0 %v15941_v50  ;;  %v1241_v50 = vld [vmem:[#allocation6 + $0x22e8] sm:$0xff] }
 0x6e9   :  { %14596 = vmatprep.subr.bf16.mxu0 %v15974_v52  ;;  %v1753_v52 = vld [vmem:[#allocation6 + $0x32e8] sm:$0xff]  ;;  %v16678_v43 = vcombine.high %v1225_v51, %v1241_v50 }
 0x6ea   :  { %14636 = vmatpush1.bf16.msra.mxu1 %v16453_v31  ;;  %v1737_v31 = vld [vmem:[#allocation6 + $0x3268] sm:$0xff] }
 0x6eb   :  { %14637 = vmatprep.subr.bf16.mxu1 %v16486_v55  ;;  %v16645_v55 = vcombine.low %v1193_v57, %v1209_v42  ;;  %v17190_v60 = vcombine.high %v1737_v31, %v1753_v52  ;;  %v1257_v61 = vld [vmem:[#allocation6 + $0x2368] sm:$0xff]  ;;  %v17189_v0 = vcombine.low %v1737_v31, %v1753_v52 }
 0x6ec   :  { %14597 = vmatpush1.bf16.msra.mxu0 %v15973_v12  ;;  %v1273_v12 = vld [vmem:[#allocation6 + $0x23e8] sm:$0xff] }
 0x6ed   :  { %14598 = vmatprep.subr.bf16.mxu0 %v16006_v2  ;;  %v1785_v2 = vld [vmem:[#allocation6 + $0x33e8] sm:$0xff]  ;;  %v16710_v3 = vcombine.high %v1257_v61, %v1273_v12 }
 0x6ee   :  { %14638 = vmatpush1.bf16.msra.mxu1 %v16485_v62  ;;  %v1769_v62 = vld [vmem:[#allocation6 + $0x3368] sm:$0xff] }
 0x6ef   :  { %14639 = vmatprep.subr.bf16.mxu1 %v16518_v63  ;;  %v16677_v63 = vcombine.low %v1225_v51, %v1241_v50  ;;  %v17222_v15 = vcombine.high %v1769_v62, %v1785_v2  ;;  %v1289_v4 = vld [vmem:[#allocation6 + $0x2468] sm:$0xff]  ;;  %v17221_v21 = vcombine.low %v1769_v62, %v1785_v2  ;;  %v15262_v51 = vrot.slane %v18100_v41, %v17962_v46 }
 0x6f0   :  { %14599 = vmatpush1.bf16.msra.mxu0 %v16005_v8  ;;  %v1305_v8 = vld [vmem:[#allocation6 + $0x24e8] sm:$0xff] }
 0x6f1   :  { %14600 = vmatprep.subr.bf16.mxu0 %v16038_v11  ;;  %v1817_v11 = vld [vmem:[#allocation6 + $0x34e8] sm:$0xff]  ;;  %v16742_v6 = vcombine.high %v1289_v4, %v1305_v8 }
 0x6f2   :  { %14640 = vmatpush1.bf16.msra.mxu1 %v16517_v10  ;;  %v1801_v10 = vld [vmem:[#allocation6 + $0x3468] sm:$0xff] }
 0x6f3   :  { %14641 = vmatprep.subr.bf16.mxu1 %v16550_v14  ;;  %v16709_v14 = vcombine.low %v1257_v61, %v1273_v12  ;;  %v17254_v23 = vcombine.high %v1801_v10, %v1817_v11  ;;  %v1321_v7 = vld [vmem:[#allocation6 + $0x2568] sm:$0xff]  ;;  %v17253_v54 = vcombine.low %v1801_v10, %v1817_v11 }
 0x6f4   :  { %14601 = vmatpush1.bf16.msra.mxu0 %v16037_v25  ;;  %v1337_v25 = vld [vmem:[#allocation6 + $0x25e8] sm:$0xff] }
 0x6f5   :  { %14602 = vmatprep.subr.bf16.mxu0 %v16070_v26  ;;  %v1849_v26 = vld [vmem:[#allocation6 + $0x35e8] sm:$0xff]  ;;  %v16774_v24 = vcombine.high %v1321_v7, %v1337_v25 }
 0x6f6   :  { %14642 = vmatpush1.bf16.msra.mxu1 %v16549_v53  ;;  %v1833_v53 = vld [vmem:[#allocation6 + $0x3568] sm:$0xff] }
 0x6f7   :  { %14643 = vmatprep.subr.bf16.mxu1 %v16582_v17  ;;  %v16741_v17 = vcombine.low %v1289_v4, %v1305_v8  ;;  %v17286_v35 = vcombine.high %v1833_v53, %v1849_v26  ;;  %v1353_v33 = vld [vmem:[#allocation6 + $0x2668] sm:$0xff]  ;;  %v17285_v57 = vcombine.low %v1833_v53, %v1849_v26 }
 0x6f8   :  { %14603 = vmatpush1.bf16.msra.mxu0 %v16069_v13  ;;  %v1369_v13 = vld [vmem:[#allocation6 + $0x26e8] sm:$0xff] }
 0x6f9   :  { %14654 = vmatprep.subr.bf16.mxu0 %v16614_v38  ;;  %v1881_v38 = vld [vmem:[#allocation6 + $0x36e8] sm:$0xff]  ;;  %v16806_v42 = vcombine.high %v1353_v33, %v1369_v13  ;;  %v16805_v61 = vcombine.low %v1353_v33, %v1369_v13 }
 0x6fa   :  { %14644 = vmatpush1.bf16.msra.mxu1 %v16581_v37  ;;  %v1865_v37 = vld [vmem:[#allocation6 + $0x3668] sm:$0xff] }
 0x6fb   :  { %14695 = vmatprep.subr.bf16.mxu1 %v17126_v40  ;;  %14605 = vmatmul.mubr.bf16.vlgmr.msra.gmra.mrb[104].mxu0 %v17833_v16  ;;  %v16773_v40 = vcombine.low %v1321_v7, %v1337_v25  ;;  %v17318_v44 = vcombine.high %v1865_v37, %v1881_v38  ;;  %v1897_v31 = vld [vmem:[#allocation6 + $0x3768] sm:$0xff]  ;;  %v17317_v2 = vcombine.low %v1865_v37, %v1881_v38 }
 0x6fc   :  { %14655 = vmatpush1.bf16.msra.mxu0 %v16613_v30  ;;  %14686 = vmatprep.mubr.bf16.mxu0 %v17845_v27  ;;  %v1385_v30 = vld [vmem:[#allocation6 + $0x2768] sm:$0xff] }
 0x6fd   :  { %14646 = vmatmul.mubr.bf16.vlgmr.msra.gmra.mrb[104].mxu1 %v17839_v20  ;;  %14656 = vmatprep.subr.bf16.mxu0 %v16646_v22  ;;  %v1913_v52 = vld [vmem:[#allocation6 + $0x37e8] sm:$0xff] }
 0x6fe   :  { %14696 = vmatpush1.bf16.msra.mxu1 %v17125_v19  ;;  %14727 = vmatprep.mubr.bf16.mxu1 %v17850_v29  ;;  %v1401_v19 = vld [vmem:[#allocation6 + $0x27e8] sm:$0xff] }
 0x6ff   :  { %14697 = vmatprep.subr.bf16.mxu1 %v17158_v48  ;;  %v1417_v4 = vld [vmem:[#allocation6 + $0x2868] sm:$0xff] }
 0x700   :  { %14657 = vmatpush1.bf16.msra.mxu0 %v16645_v55  ;;  %v1929_v10 = vld [vmem:[#allocation6 + $0x3868] sm:$0xff] }
 0x701   :  { %14658 = vmatprep.subr.bf16.mxu0 %v16678_v43  ;;  %v15266_v43 = vrot.slane %v18100_v41, %v17965_v49  ;;  %v1945_v11 = vld [vmem:[#allocation6 + $0x38e8] sm:$0xff] }
 0x702   :  { %14698 = vmatpush1.bf16.msra.mxu1 %v17157_v56  ;;  %v17382_v25 = vcombine.high %v1929_v10, %v1945_v11  ;;  %v1449_v53 = vld [vmem:[#allocation6 + $0x2968] sm:$0xff]  ;;  %v17381_v33 = vcombine.low %v1929_v10, %v1945_v11 }
 0x703   :  { %14699 = vmatprep.subr.bf16.mxu1 %v17190_v60  ;;  %v1465_v26 = vld [vmem:[#allocation6 + $0x29e8] sm:$0xff] }
 0x704   :  { %14659 = vmatpush1.bf16.msra.mxu0 %v16677_v63  ;;  %v16838_v63 = vcombine.high %v1385_v30, %v1401_v19  ;;  %v16902_v13 = vcombine.high %v1449_v53, %v1465_v26  ;;  %v1481_v38 = vld [vmem:[#allocation6 + $0x2a68] sm:$0xff] }
 0x705   :  { %14660 = vmatprep.subr.bf16.mxu0 %v16710_v3 }
 0x706   :  { %14700 = vmatpush1.bf16.msra.mxu1 %v17189_v0 }
 0x707   :  { %14701 = vmatprep.subr.bf16.mxu1 %v17222_v15  ;;  %v17350_v15 = vcombine.high %v1897_v31, %v1913_v52 }
 0x708   :  { %14661 = vmatpush1.bf16.msra.mxu0 %v16709_v14  ;;  %v16837_v14 = vcombine.low %v1385_v30, %v1401_v19 }
 0x709   :  { %14662 = vmatprep.subr.bf16.mxu0 %v16742_v6  ;;  %v17349_v6 = vcombine.low %v1897_v31, %v1913_v52 }
 0x70a   :  { %14702 = vmatpush1.bf16.msra.mxu1 %v17221_v21 }
 0x70b   :  { %14703 = vmatprep.subr.bf16.mxu1 %v17254_v23 }
 0x70c   :  { %14663 = vmatpush1.bf16.msra.mxu0 %v16741_v17  ;;  %v1961_v17 = vld [vmem:[#allocation6 + $0x3968] sm:$0xff] }
 0x70d   :  { %14664 = vmatprep.subr.bf16.mxu0 %v16774_v24 }
 0x70e   :  { %14704 = vmatpush1.bf16.msra.mxu1 %v17253_v54  ;;  %v14360_v34 = vpop.f32.mrb[92].mxu0  ;;  %v1977_v54 = vld [vmem:[#allocation6 + $0x39e8] sm:$0xff] }
 0x70f   :  { %14705 = vmatprep.subr.bf16.mxu1 %v17286_v35  ;;  %v14361_v22 = vadd.f32 %v14360_v34, %v18111_v18  ;;  %v14362_v50 = vpop.f32.mrb[93].mxu0  ;;  %v17414_v37 = vcombine.high %v1961_v17, %v1977_v54  ;;  %v16901_v34 = vcombine.low %v1449_v53, %v1465_v26  ;;  %v1641_v26 = vld [vmem:[#allocation6 + $0x2f68] sm:$0xff] }
 0x710   :  { %v14401_v48 = vpop.f32.mrb[92].mxu1  ;;  %v14363_v55 = vadd.f32 %v14362_v50, %v18113_v5  ;;  %v14364_v60 = vpop.f32.mrb[94].mxu0  ;;  %14665 = vmatpush1.bf16.msra.mxu0 %v16773_v40  ;;  %v1433_v5 = vld [vmem:[#allocation6 + $0x28e8] sm:$0xff] }
 0x711   :  { %v14403_v56 = vpop.f32.mrb[93].mxu1  ;;  %v14402_v12 = vadd.f32 %v14401_v48, %v14361_v22  ;;  %v14365_v18 = vpop.f32.mrb[95].mxu0  ;;  %14666 = vmatprep.subr.bf16.mxu0 %v16806_v42  ;;  %v16870_v23 = vcombine.high %v1417_v4, %v1433_v5  ;;  %v16869_v35 = vcombine.low %v1417_v4, %v1433_v5  ;;  %v1497_v40 = vld [vmem:[#allocation6 + $0x2ae8] sm:$0xff] }
 0x712   :  { %v14405_v62 = vpop.f32.mrb[94].mxu1  ;;  %14706 = vmatpush1.bf16.msra.mxu1 %v17285_v57  ;;  %v14404_v0 = vadd.f32 %v14403_v56, %v14363_v55  ;;  %v1993_v57 = vld [vmem:[#allocation6 + $0x3a68] sm:$0xff]  ;;  %v16934_v30 = vcombine.high %v1481_v38, %v1497_v40  ;;  %v16933_v31 = vcombine.low %v1481_v38, %v1497_v40  ;;  %v138_v38 = vld [vmem:[#allocation6 + $0x70] sm:$0xff] }
 0x713   :  { %v14406_v3 = vpop.f32.mrb[95].mxu1  ;;  %14707 = vmatprep.subr.bf16.mxu1 %v17318_v44  ;;  %v15353_v8 = vadd.f32 %v15262_v51, %v14402_v12  ;;  %v2009_v42 = vld [vmem:[#allocation6 + $0x3ae8] sm:$0xff]  ;;  %v17413_v44 = vcombine.low %v1961_v17, %v1977_v54  ;;  %v154_v40 = vld [vmem:[#allocation6 + $0xf0] sm:$0xff] }
 0x714   :  { %v15354_v41 = vadd.f32 %v15266_v43, %v14404_v0  ;;  %14667 = vmatpush1.bf16.msra.mxu0 %v16805_v61  ;;  %v17446_v19 = vcombine.high %v1993_v57, %v2009_v42  ;;  %v1513_v22 = vld [vmem:[#allocation6 + $0x2b68] sm:$0xff]  ;;  %v17445_v52 = vcombine.low %v1993_v57, %v2009_v42  ;;  %v650_v57 = vld [vmem:[#allocation6 + $0x1070] sm:$0xff] }
 0x715   :  { %v15385_v21 = vmax.f32 %v15353_v8, 0.0  ;;  %14668 = vmatprep.subr.bf16.mxu0 %v16838_v63  ;;  %v1529_v48 = vld [vmem:[#allocation6 + $0x2be8] sm:$0xff]  ;;  %v666_v42 = vld [vmem:[#allocation6 + $0x10f0] sm:$0xff] }
 0x716   :  { %14708 = vmatpush1.bf16.msra.mxu1 %v17317_v2  ;;  %v15386_v7 = vmax.f32 %v15354_v41, 0.0  ;;  %v2025_v51 = vld [vmem:[#allocation6 + $0x3b68] sm:$0xff]  ;;  %v16966_v55 = vcombine.high %v1513_v22, %v1529_v48  ;;  %v16965_v62 = vcombine.low %v1513_v22, %v1529_v48  ;;  %v170_v22 = vld [vmem:[#allocation6 + $0x170] sm:$0xff] }
 0x717   :  { %14709 = vmatprep.subr.bf16.mxu1 %v17350_v15  ;;  %v2041_v50 = vld [vmem:[#allocation6 + $0x3be8] sm:$0xff]  ;;  %v186_v48 = vld [vmem:[#allocation6 + $0x1f0] sm:$0xff] }
 0x718   :  { %v17638_v24 = vpack.c.bf16 %v15386_v7, %v15385_v21  ;;  %14669 = vmatpush1.bf16.msra.mxu0 %v16837_v14  ;;  %v17478_v56 = vcombine.high %v2025_v51, %v2041_v50  ;;  %v1545_v43 = vld [vmem:[#allocation6 + $0x2c68] sm:$0xff]  ;;  %v17477_v18 = vcombine.low %v2025_v51, %v2041_v50  ;;  %v682_v51 = vld [vmem:[#allocation6 + $0x1170] sm:$0xff] }
 0x719   :  { %14670 = vmatprep.subr.bf16.mxu0 %v16870_v23  ;;  %v1561_v60 = vld [vmem:[#allocation6 + $0x2ce8] sm:$0xff]  ;;  %v698_v50 = vld [vmem:[#allocation6 + $0x11f0] sm:$0xff] }
 0x71a   :  { %14710 = vmatpush1.bf16.msra.mxu1 %v17349_v6  ;;  %15534 = vst [vmem:[#allocation9 + $0x58] sm:$0xff] %v17638_v24  ;;  %v2057_v61 = vld [vmem:[#allocation6 + $0x3c68] sm:$0xff]  ;;  %v16998_v2 = vcombine.high %v1545_v43, %v1561_v60  ;;  %v16997_v5 = vcombine.low %v1545_v43, %v1561_v60  ;;  %v202_v43 = vld [vmem:[#allocation6 + $0x270] sm:$0xff] }
 0x71b   :  { %14711 = vmatprep.subr.bf16.mxu1 %v17382_v25  ;;  %v2073_v12 = vld [vmem:[#allocation6 + $0x3ce8] sm:$0xff]  ;;  %v218_v60 = vld [vmem:[#allocation6 + $0x2f0] sm:$0xff] }
 0x71c   :  { %14671 = vmatpush1.bf16.msra.mxu0 %v16869_v35  ;;  %v17510_v63 = vcombine.high %v2057_v61, %v2073_v12  ;;  %v1577_v0 = vld [vmem:[#allocation6 + $0x2d68] sm:$0xff]  ;;  %v17509_v8 = vcombine.low %v2057_v61, %v2073_v12  ;;  %v714_v61 = vld [vmem:[#allocation6 + $0x1270] sm:$0xff] }
 0x71d   :  { %14672 = vmatprep.subr.bf16.mxu0 %v16902_v13  ;;  %v1593_v3 = vld [vmem:[#allocation6 + $0x2de8] sm:$0xff]  ;;  %v730_v12 = vld [vmem:[#allocation6 + $0x12f0] sm:$0xff] }
 0x71e   :  { %14712 = vmatpush1.bf16.msra.mxu1 %v17381_v33  ;;  %v2089_v15 = vld [vmem:[#allocation6 + $0x3d68] sm:$0xff]  ;;  %v17030_v10 = vcombine.high %v1577_v0, %v1593_v3  ;;  %v17029_v23 = vcombine.low %v1577_v0, %v1593_v3  ;;  %v234_v0 = vld [vmem:[#allocation6 + $0x370] sm:$0xff] }
 0x71f   :  { %14713 = vmatprep.subr.bf16.mxu1 %v17414_v37  ;;  %v2105_v4 = vld [vmem:[#allocation6 + $0x3de8] sm:$0xff]  ;;  %v250_v3 = vld [vmem:[#allocation6 + $0x3f0] sm:$0xff] }
 0x720   :  { %14673 = vmatpush1.bf16.msra.mxu0 %v16901_v34  ;;  %v17542_v11 = vcombine.high %v2089_v15, %v2105_v4  ;;  %v1609_v41 = vld [vmem:[#allocation6 + $0x2e68] sm:$0xff]  ;;  %v17541_v7 = vcombine.low %v2089_v15, %v2105_v4  ;;  %v746_v15 = vld [vmem:[#allocation6 + $0x1370] sm:$0xff] }
 0x721   :  { %14674 = vmatprep.subr.bf16.mxu0 %v16934_v30  ;;  %v1625_v14 = vld [vmem:[#allocation6 + $0x2ee8] sm:$0xff]  ;;  %v15592_v30 = vcombine.high %v138_v38, %v154_v40  ;;  %v762_v4 = vld [vmem:[#allocation6 + $0x13f0] sm:$0xff] }
 0x722   :  { %14714 = vmatpush1.bf16.msra.mxu1 %v17413_v44  ;;  %v2121_v21 = vld [vmem:[#allocation6 + $0x3e68] sm:$0xff]  ;;  %v17062_v25 = vcombine.high %v1609_v41, %v1625_v14  ;;  %v17061_v35 = vcombine.low %v1609_v41, %v1625_v14  ;;  %v266_v41 = vld [vmem:[#allocation6 + $0x470] sm:$0xff] }
 0x723   :  { %14715 = vmatprep.subr.bf16.mxu1 %v17446_v19  ;;  %v2137_v6 = vld [vmem:[#allocation6 + $0x3ee8] sm:$0xff]  ;;  %v16104_v19 = vcombine.high %v650_v57, %v666_v42  ;;  %v282_v14 = vld [vmem:[#allocation6 + $0x4f0] sm:$0xff] }
 0x724   :  { %14675 = vmatpush1.bf16.msra.mxu0 %v16933_v31  ;;  %v17574_v53 = vcombine.high %v2121_v21, %v2137_v6  ;;  %v1657_v17 = vld [vmem:[#allocation6 + $0x2fe8] sm:$0xff]  ;;  %v17573_v33 = vcombine.low %v2121_v21, %v2137_v6  ;;  %v15591_v31 = vcombine.low %v138_v38, %v154_v40  ;;  %v778_v21 = vld [vmem:[#allocation6 + $0x1470] sm:$0xff] }
 0x725   :  { %14676 = vmatprep.subr.bf16.mxu0 %v16966_v55  ;;  %v2153_v54 = vld [vmem:[#allocation6 + $0x3f68] sm:$0xff]  ;;  %v17094_v13 = vcombine.high %v1641_v26, %v1657_v17  ;;  %v17093_v34 = vcombine.low %v1641_v26, %v1657_v17  ;;  %v15624_v55 = vcombine.high %v170_v22, %v186_v48  ;;  %v794_v6 = vld [vmem:[#allocation6 + $0x14f0] sm:$0xff] }
 0x726   :  { %14716 = vmatpush1.bf16.msra.mxu1 %v17445_v52  ;;  %v2169_v24 = vld [vmem:[#allocation6 + $0x3fe8] sm:$0xff]  ;;  %v16103_v52 = vcombine.low %v650_v57, %v666_v42  ;;  %v298_v26 = vld [vmem:[#allocation6 + $0x570] sm:$0xff] }
 0x727   :  { %14717 = vmatprep.subr.bf16.mxu1 %v17478_v56  ;;  %v17606_v37 = vcombine.high %v2153_v54, %v2169_v24  ;;  %v17605_v44 = vcombine.low %v2153_v54, %v2169_v24  ;;  %v16136_v56 = vcombine.high %v682_v51, %v698_v50  ;;  %v314_v17 = vld [vmem:[#allocation6 + $0x5f0] sm:$0xff] }
 0x728   :  { %14677 = vmatpush1.bf16.msra.mxu0 %v16965_v62  ;;  %v15623_v62 = vcombine.low %v170_v22, %v186_v48  ;;  %v810_v54 = vld [vmem:[#allocation6 + $0x1570] sm:$0xff] }
 0x729   :  { %14678 = vmatprep.subr.bf16.mxu0 %v16998_v2  ;;  %v15656_v2 = vcombine.high %v202_v43, %v218_v60  ;;  %v826_v24 = vld [vmem:[#allocation6 + $0x15f0] sm:$0xff] }
 0x72a   :  { %14718 = vmatpush1.bf16.msra.mxu1 %v17477_v18  ;;  %v16135_v18 = vcombine.low %v682_v51, %v698_v50  ;;  %v330_v38 = vld [vmem:[#allocation6 + $0x670] sm:$0xff] }
 0x72b   :  { %14719 = vmatprep.subr.bf16.mxu1 %v17510_v63  ;;  %v16168_v63 = vcombine.high %v714_v61, %v730_v12  ;;  %v346_v40 = vld [vmem:[#allocation6 + $0x6f0] sm:$0xff] }
 0x72c   :  { %14679 = vmatpush1.bf16.msra.mxu0 %v16997_v5  ;;  %v15655_v5 = vcombine.low %v202_v43, %v218_v60  ;;  %v842_v57 = vld [vmem:[#allocation6 + $0x1670] sm:$0xff] }
 0x72d   :  { %14680 = vmatprep.subr.bf16.mxu0 %v17030_v10  ;;  %v15688_v10 = vcombine.high %v234_v0, %v250_v3  ;;  %v858_v42 = vld [vmem:[#allocation6 + $0x16f0] sm:$0xff] }
 0x72e   :  { %14720 = vmatpush1.bf16.msra.mxu1 %v17509_v8  ;;  %v16167_v8 = vcombine.low %v714_v61, %v730_v12  ;;  %v16296_v22 = vcombine.high %v842_v57, %v858_v42  ;;  %v362_v48 = vld [vmem:[#allocation6 + $0x770] sm:$0xff]  ;;  %v15783_v61 = vcombine.low %v330_v38, %v346_v40 }
 0x72f   :  { %14721 = vmatprep.subr.bf16.mxu1 %v17542_v11  ;;  %v16200_v11 = vcombine.high %v746_v15, %v762_v4  ;;  %v378_v51 = vld [vmem:[#allocation6 + $0x7f0] sm:$0xff] }
 0x730   :  { %14681 = vmatpush1.bf16.msra.mxu0 %v17029_v23  ;;  %v15687_v23 = vcombine.low %v234_v0, %v250_v3 }
 0x731   :  { %14682 = vmatprep.subr.bf16.mxu0 %v17062_v25  ;;  %v15720_v25 = vcombine.high %v266_v41, %v282_v14 }
 0x732   :  { %14722 = vmatpush1.bf16.msra.mxu1 %v17541_v7  ;;  %v16199_v7 = vcombine.low %v746_v15, %v762_v4  ;;  %v394_v15 = vld [vmem:[#allocation6 + $0x870] sm:$0xff] }
 0x733   :  { %14723 = vmatprep.subr.bf16.mxu1 %v17574_v53  ;;  %v16232_v53 = vcombine.high %v778_v21, %v794_v6  ;;  %v410_v4 = vld [vmem:[#allocation6 + $0x8f0] sm:$0xff] }
 0x734   :  { %14683 = vmatpush1.bf16.msra.mxu0 %v17061_v35  ;;  %v15719_v35 = vcombine.low %v266_v41, %v282_v14  ;;  %v15848_v41 = vcombine.high %v394_v15, %v410_v4 }
 0x735   :  { %14684 = vmatprep.subr.bf16.mxu0 %v17094_v13  ;;  %v15752_v13 = vcombine.high %v298_v26, %v314_v17 }
 0x736   :  { %14724 = vmatpush1.bf16.msra.mxu1 %v17573_v33  ;;  %v16231_v33 = vcombine.low %v778_v21, %v794_v6  ;;  %v426_v21 = vld [vmem:[#allocation6 + $0x970] sm:$0xff] }
 0x737   :  { %14725 = vmatprep.subr.bf16.mxu1 %v17606_v37  ;;  %v16264_v37 = vcombine.high %v810_v54, %v826_v24  ;;  %v442_v6 = vld [vmem:[#allocation6 + $0x9f0] sm:$0xff] }
 0x738   :  { %14685 = vmatpush1.bf16.msra.mxu0 %v17093_v34  ;;  %v15751_v34 = vcombine.low %v298_v26, %v314_v17  ;;  %v15880_v26 = vcombine.high %v426_v21, %v442_v6 }
 0x739   :  { %14736 = vmatprep.subr.bf16.mxu0 %v15592_v30  ;;  %v15784_v30 = vcombine.high %v330_v38, %v346_v40 }
 0x73a   :  { %14726 = vmatpush1.bf16.msra.mxu1 %v17605_v44  ;;  %v16263_v44 = vcombine.low %v810_v54, %v826_v24  ;;  %v458_v54 = vld [vmem:[#allocation6 + $0xa70] sm:$0xff] }
 0x73b   :  { %14777 = vmatprep.subr.bf16.mxu1 %v16104_v19  ;;  %14687 = vmatmul.mubr.bf16.vlgmr.msra.gmra.mrb[108].mxu0 %v17857_v36  ;;  %v474_v24 = vld [vmem:[#allocation6 + $0xaf0] sm:$0xff] }
 0x73c   :  { %14737 = vmatpush1.bf16.msra.mxu0 %v15591_v31  ;;  %14768 = vmatprep.mubr.bf16.mxu0 %v17823_v58  ;;  %v15912_v38 = vcombine.high %v458_v54, %v474_v24 }
 0x73d   :  { %14728 = vmatmul.mubr.bf16.vlgmr.msra.gmra.mrb[108].mxu1 %v17861_v39  ;;  %14738 = vmatprep.subr.bf16.mxu0 %v15624_v55  ;;  %v890_v55 = vld [vmem:[#allocation6 + $0x17f0] sm:$0xff] }
 0x73e   :  { %14778 = vmatpush1.bf16.msra.mxu1 %v16103_v52  ;;  %14809 = vmatprep.mubr.bf16.mxu1 %v17827_v59  ;;  %v874_v52 = vld [vmem:[#allocation6 + $0x1770] sm:$0xff] }
 0x73f   :  { %14779 = vmatprep.subr.bf16.mxu1 %v16136_v56  ;;  %v16328_v3 = vcombine.high %v874_v52, %v890_v55 }
 0x740   :  { %14739 = vmatpush1.bf16.msra.mxu0 %v15623_v62 }
 0x741   :  { %14740 = vmatprep.subr.bf16.mxu0 %v15656_v2  ;;  %v16295_v2 = vcombine.low %v842_v57, %v858_v42  ;;  %v490_v57 = vld [vmem:[#allocation6 + $0xb70] sm:$0xff] }
 0x742   :  { %14780 = vmatpush1.bf16.msra.mxu1 %v16135_v18  ;;  %v506_v42 = vld [vmem:[#allocation6 + $0xbf0] sm:$0xff] }
 0x743   :  { %14781 = vmatprep.subr.bf16.mxu1 %v16168_v63  ;;  %v15816_v63 = vcombine.high %v362_v48, %v378_v51 }
 0x744   :  { %14741 = vmatpush1.bf16.msra.mxu0 %v15655_v5  ;;  %v906_v5 = vld [vmem:[#allocation6 + $0x1870] sm:$0xff] }
 0x745   :  { %14742 = vmatprep.subr.bf16.mxu0 %v15688_v10  ;;  %v15815_v10 = vcombine.low %v362_v48, %v378_v51  ;;  %v522_v51 = vld [vmem:[#allocation6 + $0xc70] sm:$0xff] }
 0x746   :  { %14782 = vmatpush1.bf16.msra.mxu1 %v16167_v8  ;;  %v922_v8 = vld [vmem:[#allocation6 + $0x18f0] sm:$0xff] }
 0x747   :  { %14783 = vmatprep.subr.bf16.mxu1 %v16200_v11  ;;  %v16327_v11 = vcombine.low %v874_v52, %v890_v55  ;;  %v16360_v14 = vcombine.high %v906_v5, %v922_v8  ;;  %v1050_v52 = vld [vmem:[#allocation6 + $0x1cf0] sm:$0xff]  ;;  %v15943_v55 = vcombine.low %v490_v57, %v506_v42 }
 0x748   :  { %14743 = vmatpush1.bf16.msra.mxu0 %v15687_v23  ;;  %v938_v23 = vld [vmem:[#allocation6 + $0x1970] sm:$0xff] }
 0x749   :  { %14744 = vmatprep.subr.bf16.mxu0 %v15720_v25  ;;  %v15847_v25 = vcombine.low %v394_v15, %v410_v4 }
 0x74a   :  { %14784 = vmatpush1.bf16.msra.mxu1 %v16199_v7  ;;  %v954_v7 = vld [vmem:[#allocation6 + $0x19f0] sm:$0xff] }
 0x74b   :  { %14785 = vmatprep.subr.bf16.mxu1 %v16232_v53  ;;  %v16359_v53 = vcombine.low %v906_v5, %v922_v8  ;;  %v16392_v17 = vcombine.high %v938_v23, %v954_v7  ;;  %v586_v5 = vld [vmem:[#allocation6 + $0xe70] sm:$0xff] }
 0x74c   :  { %14745 = vmatpush1.bf16.msra.mxu0 %v15719_v35  ;;  %v970_v35 = vld [vmem:[#allocation6 + $0x1a70] sm:$0xff] }
 0x74d   :  { %14746 = vmatprep.subr.bf16.mxu0 %v15752_v13  ;;  %v15879_v13 = vcombine.low %v426_v21, %v442_v6  ;;  %v602_v8 = vld [vmem:[#allocation6 + $0xef0] sm:$0xff] }
 0x74e   :  { %14786 = vmatpush1.bf16.msra.mxu1 %v16231_v33  ;;  %v14442_v19 = vpop.f32.mrb[96].mxu0  ;;  %v986_v33 = vld [vmem:[#allocation6 + $0x1af0] sm:$0xff]  ;;  %v16040_v21 = vcombine.high %v586_v5, %v602_v8 }
 0x74f   :  { %14787 = vmatprep.subr.bf16.mxu1 %v16264_v37  ;;  %v14444_v31 = vpop.f32.mrb[97].mxu0  ;;  %v16391_v37 = vcombine.low %v938_v23, %v954_v7  ;;  %v16424_v40 = vcombine.high %v970_v35, %v986_v33  ;;  %v618_v23 = vld [vmem:[#allocation6 + $0xf70] sm:$0xff] }
 0x750   :  { %v14483_v50 = vpop.f32.mrb[96].mxu1  ;;  %v14446_v60 = vpop.f32.mrb[98].mxu0  ;;  %14747 = vmatpush1.bf16.msra.mxu0 %v15751_v34  ;;  %v1002_v34 = vld [vmem:[#allocation6 + $0x1b70] sm:$0xff] }
 0x751   :  { %v18129_v56 = vadd.f32 %v14483_v50, %v14442_v19  ;;  %v14485_v43 = vpop.f32.mrb[97].mxu1  ;;  %v14447_v18 = vpop.f32.mrb[99].mxu0  ;;  %14748 = vmatprep.subr.bf16.mxu0 %v15784_v30  ;;  %v15911_v30 = vcombine.low %v458_v54, %v474_v24  ;;  %v16423_v19 = vcombine.low %v970_v35, %v986_v33  ;;  %v538_v50 = vld [vmem:[#allocation6 + $0xcf0] sm:$0xff] }
 0x752   :  { %v18131_v12 = vadd.f32 %v14485_v43, %v14444_v31  ;;  %v14487_v62 = vpop.f32.mrb[98].mxu1  ;;  %14788 = vmatpush1.bf16.msra.mxu1 %v16263_v44  ;;  %v1018_v44 = vld [vmem:[#allocation6 + $0x1bf0] sm:$0xff]  ;;  %v15976_v60 = vcombine.high %v522_v51, %v538_v50 }
 0x753   :  { %v14488_v0 = vpop.f32.mrb[99].mxu1  ;;  %14789 = vmatprep.subr.bf16.mxu1 %v16296_v22  ;;  %v15944_v22 = vcombine.high %v490_v57, %v506_v42  ;;  %v16456_v48 = vcombine.high %v1002_v34, %v1018_v44  ;;  %v1034_v31 = vld [vmem:[#allocation6 + $0x1c70] sm:$0xff]  ;;  %v16455_v43 = vcombine.low %v1002_v34, %v1018_v44 }
 0x754   :  { %14749 = vmatpush1.bf16.msra.mxu0 %v15783_v61  ;;  %v16488_v61 = vcombine.high %v1034_v31, %v1050_v52  ;;  %v554_v62 = vld [vmem:[#allocation6 + $0xd70] sm:$0xff]  ;;  %v15975_v0 = vcombine.low %v522_v51, %v538_v50 }
 0x755   :  { %14750 = vmatprep.subr.bf16.mxu0 %v15816_v63  ;;  %v570_v18 = vld [vmem:[#allocation6 + $0xdf0] sm:$0xff] }
 0x756   :  { %14790 = vmatpush1.bf16.msra.mxu1 %v16295_v2  ;;  %v1066_v2 = vld [vmem:[#allocation6 + $0x1d70] sm:$0xff]  ;;  %v16008_v15 = vcombine.high %v554_v62, %v570_v18 }
 0x757   :  { %14791 = vmatprep.subr.bf16.mxu1 %v16328_v3  ;;  %v1082_v63 = vld [vmem:[#allocation6 + $0x1df0] sm:$0xff]  ;;  %v16487_v3 = vcombine.low %v1034_v31, %v1050_v52 }
 0x758   :  { %14751 = vmatpush1.bf16.msra.mxu0 %v15815_v10  ;;  %v16520_v4 = vcombine.high %v1066_v2, %v1082_v63  ;;  %v1098_v10 = vld [vmem:[#allocation6 + $0x1e70] sm:$0xff] }
 0x759   :  { %14752 = vmatprep.subr.bf16.mxu0 %v15848_v41  ;;  %v16007_v41 = vcombine.low %v554_v62, %v570_v18  ;;  %v634_v7 = vld [vmem:[#allocation6 + $0xff0] sm:$0xff] }
 0x75a   :  { %14792 = vmatpush1.bf16.msra.mxu1 %v16327_v11  ;;  %v1114_v11 = vld [vmem:[#allocation6 + $0x1ef0] sm:$0xff]  ;;  %v16072_v54 = vcombine.high %v618_v23, %v634_v7 }
 0x75b   :  { %14793 = vmatprep.subr.bf16.mxu1 %v16360_v14  ;;  %v16519_v14 = vcombine.low %v1066_v2, %v1082_v63  ;;  %v16552_v6 = vcombine.high %v1098_v10, %v1114_v11  ;;  %v1162_v35 = vld [vmem:[#allocation6 + $0x2070] sm:$0xff] }
 0x75c   :  { %14753 = vmatpush1.bf16.msra.mxu0 %v15847_v25  ;;  %v1130_v25 = vld [vmem:[#allocation6 + $0x1f70] sm:$0xff] }
 0x75d   :  { %14754 = vmatprep.subr.bf16.mxu0 %v15880_v26  ;;  %v16039_v26 = vcombine.low %v586_v5, %v602_v8  ;;  %v1178_v33 = vld [vmem:[#allocation6 + $0x20f0] sm:$0xff] }
 0x75e   :  { %14794 = vmatpush1.bf16.msra.mxu1 %v16359_v53  ;;  %v1146_v53 = vld [vmem:[#allocation6 + $0x1ff0] sm:$0xff]  ;;  %v16616_v57 = vcombine.high %v1162_v35, %v1178_v33 }
 0x75f   :  { %14795 = vmatprep.subr.bf16.mxu1 %v16392_v17  ;;  %v16551_v17 = vcombine.low %v1098_v10, %v1114_v11  ;;  %v16584_v24 = vcombine.high %v1130_v25, %v1146_v53  ;;  %v1194_v34 = vld [vmem:[#allocation6 + $0x2170] sm:$0xff] }
 0x760   :  { %14755 = vmatpush1.bf16.msra.mxu0 %v15879_v13  ;;  %v1674_v13 = vld [vmem:[#allocation6 + $0x3070] sm:$0xff] }
 0x761   :  { %14756 = vmatprep.subr.bf16.mxu0 %v15912_v38  ;;  %v16071_v38 = vcombine.low %v618_v23, %v634_v7  ;;  %v1210_v44 = vld [vmem:[#allocation6 + $0x21f0] sm:$0xff] }
 0x762   :  { %14796 = vmatpush1.bf16.msra.mxu1 %v16391_v37  ;;  %v1690_v37 = vld [vmem:[#allocation6 + $0x30f0] sm:$0xff]  ;;  %v16648_v51 = vcombine.high %v1194_v34, %v1210_v44 }
 0x763   :  { %14797 = vmatprep.subr.bf16.mxu1 %v16424_v40  ;;  %v16583_v40 = vcombine.low %v1130_v25, %v1146_v53  ;;  %v17128_v42 = vcombine.high %v1674_v13, %v1690_v37  ;;  %v1226_v31 = vld [vmem:[#allocation6 + $0x2270] sm:$0xff] }
 0x764   :  { %14757 = vmatpush1.bf16.msra.mxu0 %v15911_v30  ;;  %v1706_v30 = vld [vmem:[#allocation6 + $0x3170] sm:$0xff] }
 0x765   :  { %14758 = vmatprep.subr.bf16.mxu0 %v15944_v22  ;;  %v16615_v22 = vcombine.low %v1162_v35, %v1178_v33  ;;  %v1242_v52 = vld [vmem:[#allocation6 + $0x22f0] sm:$0xff] }
 0x766   :  { %14798 = vmatpush1.bf16.msra.mxu1 %v16423_v19  ;;  %v1722_v19 = vld [vmem:[#allocation6 + $0x31f0] sm:$0xff]  ;;  %v16680_v62 = vcombine.high %v1226_v31, %v1242_v52 }
 0x767   :  { %14799 = vmatprep.subr.bf16.mxu1 %v16456_v48  ;;  %v17127_v48 = vcombine.low %v1674_v13, %v1690_v37  ;;  %v17160_v50 = vcombine.high %v1706_v30, %v1722_v19  ;;  %v1258_v2 = vld [vmem:[#allocation6 + $0x2370] sm:$0xff] }
 0x768   :  { %14759 = vmatpush1.bf16.msra.mxu0 %v15943_v55  ;;  %v1738_v55 = vld [vmem:[#allocation6 + $0x3270] sm:$0xff] }
 0x769   :  { %14760 = vmatprep.subr.bf16.mxu0 %v15976_v60  ;;  %v16647_v60 = vcombine.low %v1194_v34, %v1210_v44  ;;  %v1274_v63 = vld [vmem:[#allocation6 + $0x23f0] sm:$0xff] }
 0x76a   :  { %14800 = vmatpush1.bf16.msra.mxu1 %v16455_v43  ;;  %v1754_v43 = vld [vmem:[#allocation6 + $0x32f0] sm:$0xff]  ;;  %v16712_v5 = vcombine.high %v1258_v2, %v1274_v63 }
 0x76b   :  { %14801 = vmatprep.subr.bf16.mxu1 %v16488_v61  ;;  %v17159_v61 = vcombine.low %v1706_v30, %v1722_v19  ;;  %v17192_v18 = vcombine.high %v1738_v55, %v1754_v43  ;;  %v1290_v10 = vld [vmem:[#allocation6 + $0x2470] sm:$0xff] }
 0x76c   :  { %14761 = vmatpush1.bf16.msra.mxu0 %v15975_v0  ;;  %v1770_v0 = vld [vmem:[#allocation6 + $0x3370] sm:$0xff] }
 0x76d   :  { %14762 = vmatprep.subr.bf16.mxu0 %v16008_v15  ;;  %v16679_v15 = vcombine.low %v1226_v31, %v1242_v52  ;;  %v1306_v11 = vld [vmem:[#allocation6 + $0x24f0] sm:$0xff] }
 0x76e   :  { %14802 = vmatpush1.bf16.msra.mxu1 %v16487_v3  ;;  %v1786_v3 = vld [vmem:[#allocation6 + $0x33f0] sm:$0xff]  ;;  %v16744_v23 = vcombine.high %v1290_v10, %v1306_v11 }
 0x76f   :  { %14803 = vmatprep.subr.bf16.mxu1 %v16520_v4  ;;  %v17191_v4 = vcombine.low %v1738_v55, %v1754_v43  ;;  %v17224_v8 = vcombine.high %v1770_v0, %v1786_v3  ;;  %v1322_v25 = vld [vmem:[#allocation6 + $0x2570] sm:$0xff] }
 0x770   :  { %14763 = vmatpush1.bf16.msra.mxu0 %v16007_v41  ;;  %v1802_v41 = vld [vmem:[#allocation6 + $0x3470] sm:$0xff] }
 0x771   :  { %14764 = vmatprep.subr.bf16.mxu0 %v16040_v21  ;;  %v16711_v21 = vcombine.low %v1258_v2, %v1274_v63  ;;  %v1338_v53 = vld [vmem:[#allocation6 + $0x25f0] sm:$0xff] }
 0x772   :  { %14804 = vmatpush1.bf16.msra.mxu1 %v16519_v14  ;;  %v1818_v14 = vld [vmem:[#allocation6 + $0x34f0] sm:$0xff]  ;;  %v16776_v35 = vcombine.high %v1322_v25, %v1338_v53 }
 0x773   :  { %14805 = vmatprep.subr.bf16.mxu1 %v16552_v6  ;;  %v17223_v6 = vcombine.low %v1770_v0, %v1786_v3  ;;  %v17256_v7 = vcombine.high %v1802_v41, %v1818_v14  ;;  %v1354_v13 = vld [vmem:[#allocation6 + $0x2670] sm:$0xff] }
 0x774   :  { %14765 = vmatpush1.bf16.msra.mxu0 %v16039_v26  ;;  %v1834_v26 = vld [vmem:[#allocation6 + $0x3570] sm:$0xff] }
 0x775   :  { %14766 = vmatprep.subr.bf16.mxu0 %v16072_v54  ;;  %v16743_v54 = vcombine.low %v1290_v10, %v1306_v11  ;;  %v1370_v37 = vld [vmem:[#allocation6 + $0x26f0] sm:$0xff] }
 0x776   :  { %14806 = vmatpush1.bf16.msra.mxu1 %v16551_v17  ;;  %v1850_v17 = vld [vmem:[#allocation6 + $0x35f0] sm:$0xff]  ;;  %v16808_v44 = vcombine.high %v1354_v13, %v1370_v37  ;;  %v16807_v2 = vcombine.low %v1354_v13, %v1370_v37 }
 0x777   :  { %14807 = vmatprep.subr.bf16.mxu1 %v16584_v24  ;;  %v17255_v24 = vcombine.low %v1802_v41, %v1818_v14  ;;  %v17288_v33 = vcombine.high %v1834_v26, %v1850_v17  ;;  %v17287_v34 = vcombine.low %v1834_v26, %v1850_v17  ;;  %v1898_v55 = vld [vmem:[#allocation6 + $0x3770] sm:$0xff] }
 0x778   :  { %14767 = vmatpush1.bf16.msra.mxu0 %v16071_v38  ;;  %v1866_v38 = vld [vmem:[#allocation6 + $0x3670] sm:$0xff] }
 0x779   :  { %14818 = vmatprep.subr.bf16.mxu0 %v16616_v57  ;;  %v18137_v57 = vld [vmem:[#allocation8 + $0x18] sm:$0xff]  ;;  %v1914_v43 = vld [vmem:[#allocation6 + $0x37f0] sm:$0xff] }
 0x77a   :  { %14808 = vmatpush1.bf16.msra.mxu1 %v16583_v40  ;;  %v1882_v40 = vld [vmem:[#allocation6 + $0x36f0] sm:$0xff]  ;;  %v15270_v31 = vrot.slane %v18137_v57, %v17886_v28 }
 0x77b   :  { %14859 = vmatprep.subr.bf16.mxu1 %v17128_v42  ;;  %14769 = vmatmul.mubr.bf16.vlgmr.msra.gmra.mrb[112].mxu0 %v17833_v16  ;;  %v16775_v42 = vcombine.low %v1322_v25, %v1338_v53  ;;  %v17320_v19 = vcombine.high %v1866_v38, %v1882_v40  ;;  %v17319_v3 = vcombine.low %v1866_v38, %v1882_v40  ;;  %v1930_v11 = vld [vmem:[#allocation6 + $0x3870] sm:$0xff] }
 0x77c   :  { %14819 = vmatpush1.bf16.msra.mxu0 %v16615_v22  ;;  %14850 = vmatprep.mubr.bf16.mxu0 %v17845_v27  ;;  %v1386_v22 = vld [vmem:[#allocation6 + $0x2770] sm:$0xff] }
 0x77d   :  { %14810 = vmatmul.mubr.bf16.vlgmr.msra.gmra.mrb[112].mxu1 %v17839_v20  ;;  %14820 = vmatprep.subr.bf16.mxu0 %v16648_v51  ;;  %v1946_v41 = vld [vmem:[#allocation6 + $0x38f0] sm:$0xff] }
 0x77e   :  { %14860 = vmatpush1.bf16.msra.mxu1 %v17127_v48  ;;  %14891 = vmatprep.mubr.bf16.mxu1 %v17850_v29  ;;  %v1402_v48 = vld [vmem:[#allocation6 + $0x27f0] sm:$0xff]  ;;  %v17384_v25 = vcombine.high %v1930_v11, %v1946_v41 }
 0x77f   :  { %14861 = vmatprep.subr.bf16.mxu1 %v17160_v50  ;;  %v16839_v14 = vcombine.low %v1386_v22, %v1402_v48  ;;  %v1450_v53 = vld [vmem:[#allocation6 + $0x2970] sm:$0xff] }
 0x780   :  { %14821 = vmatpush1.bf16.msra.mxu0 %v16647_v60  ;;  %v1466_v26 = vld [vmem:[#allocation6 + $0x29f0] sm:$0xff] }
 0x781   :  { %14822 = vmatprep.subr.bf16.mxu0 %v16680_v62  ;;  %v15274_v62 = vrot.slane %v18137_v57, %v17891_v32  ;;  %v1962_v17 = vld [vmem:[#allocation6 + $0x3970] sm:$0xff]  ;;  %v16904_v13 = vcombine.high %v1450_v53, %v1466_v26 }
 0x782   :  { %14862 = vmatpush1.bf16.msra.mxu1 %v17159_v61  ;;  %v1482_v38 = vld [vmem:[#allocation6 + $0x2a70] sm:$0xff] }
 0x783   :  { %14863 = vmatprep.subr.bf16.mxu1 %v17192_v18  ;;  %v1498_v40 = vld [vmem:[#allocation6 + $0x2af0] sm:$0xff] }
 0x784   :  { %14823 = vmatpush1.bf16.msra.mxu0 %v16679_v15  ;;  %v16840_v15 = vcombine.high %v1386_v22, %v1402_v48  ;;  %v1514_v48 = vld [vmem:[#allocation6 + $0x2b70] sm:$0xff] }
 0x785   :  { %14824 = vmatprep.subr.bf16.mxu0 %v16712_v5  ;;  %v17352_v5 = vcombine.high %v1898_v55, %v1914_v43 }
 0x786   :  { %14864 = vmatpush1.bf16.msra.mxu1 %v17191_v4 }
 0x787   :  { %14865 = vmatprep.subr.bf16.mxu1 %v17224_v8  ;;  %v1418_v8 = vld [vmem:[#allocation6 + $0x2870] sm:$0xff] }
 0x788   :  { %14825 = vmatpush1.bf16.msra.mxu0 %v16711_v21 }
 0x789   :  { %14826 = vmatprep.subr.bf16.mxu0 %v16744_v23 }
 0x78a   :  { %14866 = vmatpush1.bf16.msra.mxu1 %v17223_v6  ;;  %v17351_v6 = vcombine.low %v1898_v55, %v1914_v43 }
 0x78b   :  { %14867 = vmatprep.subr.bf16.mxu1 %v17256_v7 }
 0x78c   :  { %14827 = vmatpush1.bf16.msra.mxu0 %v16743_v54  ;;  %v1978_v54 = vld [vmem:[#allocation6 + $0x39f0] sm:$0xff] }
 0x78d   :  { %14828 = vmatprep.subr.bf16.mxu0 %v16776_v35  ;;  %v17416_v37 = vcombine.high %v1962_v17, %v1978_v54 }
 0x78e   :  { %14868 = vmatpush1.bf16.msra.mxu1 %v17255_v24  ;;  %v14524_v30 = vpop.f32.mrb[100].mxu0 }
 0x78f   :  { %14869 = vmatprep.subr.bf16.mxu1 %v17288_v33  ;;  %v14525_v51 = vadd.f32 %v14524_v30, %v18129_v56  ;;  %v14526_v52 = vpop.f32.mrb[101].mxu0  ;;  %v17383_v33 = vcombine.low %v1930_v11, %v1946_v41  ;;  %v17415_v30 = vcombine.low %v1962_v17, %v1978_v54  ;;  %v1610_v41 = vld [vmem:[#allocation6 + $0x2e70] sm:$0xff] }
 0x790   :  { %v14565_v50 = vpop.f32.mrb[100].mxu1  ;;  %v14527_v60 = vadd.f32 %v14526_v52, %v18131_v12  ;;  %v14528_v18 = vpop.f32.mrb[102].mxu0  ;;  %14829 = vmatpush1.bf16.msra.mxu0 %v16775_v42  ;;  %v1434_v12 = vld [vmem:[#allocation6 + $0x28f0] sm:$0xff]  ;;  %v16935_v52 = vcombine.low %v1482_v38, %v1498_v40 }
 0x791   :  { %v14567_v61 = vpop.f32.mrb[101].mxu1  ;;  %v14566_v63 = vadd.f32 %v14565_v50, %v14525_v51  ;;  %v14529_v56 = vpop.f32.mrb[103].mxu0  ;;  %14830 = vmatprep.subr.bf16.mxu0 %v16808_v44  ;;  %v16872_v23 = vcombine.high %v1418_v8, %v1434_v12  ;;  %v16871_v35 = vcombine.low %v1418_v8, %v1434_v12  ;;  %v1994_v42 = vld [vmem:[#allocation6 + $0x3a70] sm:$0xff]  ;;  %v16903_v44 = vcombine.low %v1450_v53, %v1466_v26 }
 0x792   :  { %v14569_v0 = vpop.f32.mrb[102].mxu1  ;;  %14870 = vmatpush1.bf16.msra.mxu1 %v17287_v34  ;;  %v14568_v28 = vadd.f32 %v14567_v61, %v14527_v60  ;;  %v2010_v34 = vld [vmem:[#allocation6 + $0x3af0] sm:$0xff] }
 0x793   :  { %v14570_v4 = vpop.f32.mrb[103].mxu1  ;;  %14871 = vmatprep.subr.bf16.mxu1 %v17320_v19  ;;  %v15355_v10 = vadd.f32 %v15270_v31, %v14566_v63  ;;  %v16936_v19 = vcombine.high %v1482_v38, %v1498_v40  ;;  %v17448_v22 = vcombine.high %v1994_v42, %v2010_v34  ;;  %v1530_v51 = vld [vmem:[#allocation6 + $0x2bf0] sm:$0xff]  ;;  %v17447_v55 = vcombine.low %v1994_v42, %v2010_v34  ;;  %v155_v38 = vld [vmem:[#allocation6 + $0xf8] sm:$0xff] }
 0x794   :  { %v15356_v32 = vadd.f32 %v15274_v62, %v14568_v28  ;;  %14831 = vmatpush1.bf16.msra.mxu0 %v16807_v2  ;;  %v2026_v50 = vld [vmem:[#allocation6 + $0x3b70] sm:$0xff]  ;;  %v16968_v43 = vcombine.high %v1514_v48, %v1530_v51  ;;  %v16967_v63 = vcombine.low %v1514_v48, %v1530_v51  ;;  %v651_v40 = vld [vmem:[#allocation6 + $0x1078] sm:$0xff] }
 0x795   :  { %v15387_v21 = vmax.f32 %v15355_v10, 0.0  ;;  %14832 = vmatprep.subr.bf16.mxu0 %v16840_v15  ;;  %v2042_v31 = vld [vmem:[#allocation6 + $0x3bf0] sm:$0xff]  ;;  %v667_v42 = vld [vmem:[#allocation6 + $0x10f8] sm:$0xff] }
 0x796   :  { %14872 = vmatpush1.bf16.msra.mxu1 %v17319_v3  ;;  %v15388_v7 = vmax.f32 %v15356_v32, 0.0  ;;  %v17480_v60 = vcombine.high %v2026_v50, %v2042_v31  ;;  %v1546_v61 = vld [vmem:[#allocation6 + $0x2c70] sm:$0xff]  ;;  %v17479_v0 = vcombine.low %v2026_v50, %v2042_v31  ;;  %v187_v48 = vld [vmem:[#allocation6 + $0x1f8] sm:$0xff] }
 0x797   :  { %14873 = vmatprep.subr.bf16.mxu1 %v17352_v5  ;;  %v1562_v62 = vld [vmem:[#allocation6 + $0x2cf0] sm:$0xff]  ;;  %v683_v51 = vld [vmem:[#allocation6 + $0x1178] sm:$0xff] }
 0x798   :  { %v17639_v24 = vpack.c.bf16 %v15388_v7, %v15387_v21  ;;  %14833 = vmatpush1.bf16.msra.mxu0 %v16839_v14  ;;  %v2058_v18 = vld [vmem:[#allocation6 + $0x3c70] sm:$0xff]  ;;  %v17000_v56 = vcombine.high %v1546_v61, %v1562_v62  ;;  %v16999_v8 = vcombine.low %v1546_v61, %v1562_v62  ;;  %v699_v50 = vld [vmem:[#allocation6 + $0x11f8] sm:$0xff] }
 0x799   :  { %14834 = vmatprep.subr.bf16.mxu0 %v16872_v23  ;;  %v2074_v2 = vld [vmem:[#allocation6 + $0x3cf0] sm:$0xff]  ;;  %v219_v61 = vld [vmem:[#allocation6 + $0x2f8] sm:$0xff] }
 0x79a   :  { %14874 = vmatpush1.bf16.msra.mxu1 %v17351_v6  ;;  %15535 = vst [vmem:[#allocation9 + $0x60] sm:$0xff] %v17639_v24  ;;  %v17512_v3 = vcombine.high %v2058_v18, %v2074_v2  ;;  %v1578_v15 = vld [vmem:[#allocation6 + $0x2d70] sm:$0xff]  ;;  %v17511_v12 = vcombine.low %v2058_v18, %v2074_v2  ;;  %v715_v62 = vld [vmem:[#allocation6 + $0x1278] sm:$0xff] }
 0x79b   :  { %14875 = vmatprep.subr.bf16.mxu1 %v17384_v25  ;;  %v1594_v28 = vld [vmem:[#allocation6 + $0x2df0] sm:$0xff]  ;;  %v731_v18 = vld [vmem:[#allocation6 + $0x12f8] sm:$0xff] }
 0x79c   :  { %14835 = vmatpush1.bf16.msra.mxu0 %v16871_v35  ;;  %v2090_v4 = vld [vmem:[#allocation6 + $0x3d70] sm:$0xff]  ;;  %v17032_v10 = vcombine.high %v1578_v15, %v1594_v28  ;;  %v17031_v6 = vcombine.low %v1578_v15, %v1594_v28  ;;  %v251_v15 = vld [vmem:[#allocation6 + $0x3f8] sm:$0xff] }
 0x79d   :  { %14836 = vmatprep.subr.bf16.mxu0 %v16904_v13  ;;  %v2106_v5 = vld [vmem:[#allocation6 + $0x3df0] sm:$0xff]  ;;  %v747_v28 = vld [vmem:[#allocation6 + $0x1378] sm:$0xff] }
 0x79e   :  { %14876 = vmatpush1.bf16.msra.mxu1 %v17383_v33  ;;  %v17544_v11 = vcombine.high %v2090_v4, %v2106_v5  ;;  %v1626_v32 = vld [vmem:[#allocation6 + $0x2ef0] sm:$0xff]  ;;  %v17543_v23 = vcombine.low %v2090_v4, %v2106_v5  ;;  %v763_v4 = vld [vmem:[#allocation6 + $0x13f8] sm:$0xff] }
 0x79f   :  { %14877 = vmatprep.subr.bf16.mxu1 %v17416_v37  ;;  %v2122_v14 = vld [vmem:[#allocation6 + $0x3e70] sm:$0xff]  ;;  %v17064_v7 = vcombine.high %v1610_v41, %v1626_v32  ;;  %v17063_v24 = vcombine.low %v1610_v41, %v1626_v32  ;;  %v139_v37 = vld [vmem:[#allocation6 + $0x78] sm:$0xff] }
 0x7a0   :  { %14837 = vmatpush1.bf16.msra.mxu0 %v16903_v44  ;;  %v2138_v21 = vld [vmem:[#allocation6 + $0x3ef0] sm:$0xff]  ;;  %v15593_v31 = vcombine.low %v139_v37, %v155_v38  ;;  %v283_v41 = vld [vmem:[#allocation6 + $0x4f8] sm:$0xff] }
 0x7a1   :  { %14838 = vmatprep.subr.bf16.mxu0 %v16936_v19  ;;  %v17576_v25 = vcombine.high %v2122_v14, %v2138_v21  ;;  %v1642_v53 = vld [vmem:[#allocation6 + $0x2f70] sm:$0xff]  ;;  %v17575_v35 = vcombine.low %v2122_v14, %v2138_v21  ;;  %v16106_v19 = vcombine.high %v651_v40, %v667_v42  ;;  %v779_v32 = vld [vmem:[#allocation6 + $0x1478] sm:$0xff] }
 0x7a2   :  { %14878 = vmatpush1.bf16.msra.mxu1 %v17415_v30  ;;  %v1658_v26 = vld [vmem:[#allocation6 + $0x2ff0] sm:$0xff]  ;;  %v15594_v30 = vcombine.high %v139_v37, %v155_v38  ;;  %v795_v14 = vld [vmem:[#allocation6 + $0x14f8] sm:$0xff] }
 0x7a3   :  { %14879 = vmatprep.subr.bf16.mxu1 %v17448_v22  ;;  %v2154_v17 = vld [vmem:[#allocation6 + $0x3f70] sm:$0xff]  ;;  %v17096_v33 = vcombine.high %v1642_v53, %v1658_v26  ;;  %v17095_v34 = vcombine.low %v1642_v53, %v1658_v26  ;;  %v171_v22 = vld [vmem:[#allocation6 + $0x178] sm:$0xff] }
 0x7a4   :  { %14839 = vmatpush1.bf16.msra.mxu0 %v16935_v52  ;;  %v2170_v54 = vld [vmem:[#allocation6 + $0x3ff0] sm:$0xff]  ;;  %v16105_v52 = vcombine.low %v651_v40, %v667_v42  ;;  %v15625_v2 = vcombine.low %v171_v22, %v187_v48  ;;  %v827_v53 = vld [vmem:[#allocation6 + $0x15f8] sm:$0xff] }
 0x7a5   :  { %14840 = vmatprep.subr.bf16.mxu0 %v16968_v43  ;;  %v17608_v13 = vcombine.high %v2154_v17, %v2170_v54  ;;  %v17607_v44 = vcombine.low %v2154_v17, %v2170_v54  ;;  %v16138_v43 = vcombine.high %v683_v51, %v699_v50  ;;  %v16233_v17 = vcombine.low %v779_v32, %v795_v14  ;;  %v859_v37 = vld [vmem:[#allocation6 + $0x16f8] sm:$0xff] }
 0x7a6   :  { %14880 = vmatpush1.bf16.msra.mxu1 %v17447_v55  ;;  %v15626_v55 = vcombine.high %v171_v22, %v187_v48 }
 0x7a7   :  { %14881 = vmatprep.subr.bf16.mxu1 %v17480_v60  ;;  %v203_v60 = vld [vmem:[#allocation6 + $0x278] sm:$0xff] }
 0x7a8   :  { %14841 = vmatpush1.bf16.msra.mxu0 %v16967_v63  ;;  %v16137_v63 = vcombine.low %v683_v51, %v699_v50  ;;  %v15657_v5 = vcombine.low %v203_v60, %v219_v61  ;;  %v875_v51 = vld [vmem:[#allocation6 + $0x1778] sm:$0xff] }
 0x7a9   :  { %14842 = vmatprep.subr.bf16.mxu0 %v17000_v56  ;;  %v16170_v56 = vcombine.high %v715_v62, %v731_v18  ;;  %v891_v50 = vld [vmem:[#allocation6 + $0x17f8] sm:$0xff] }
 0x7aa   :  { %14882 = vmatpush1.bf16.msra.mxu1 %v17479_v0  ;;  %v15658_v0 = vcombine.high %v203_v60, %v219_v61 }
 0x7ab   :  { %14883 = vmatprep.subr.bf16.mxu1 %v17512_v3  ;;  %v235_v3 = vld [vmem:[#allocation6 + $0x378] sm:$0xff] }
 0x7ac   :  { %14843 = vmatpush1.bf16.msra.mxu0 %v16999_v8  ;;  %v16169_v8 = vcombine.low %v715_v62, %v731_v18  ;;  %v15689_v21 = vcombine.low %v235_v3, %v251_v15 }
 0x7ad   :  { %14844 = vmatprep.subr.bf16.mxu0 %v17032_v10  ;;  %v16202_v10 = vcombine.high %v747_v28, %v763_v4 }
 0x7ae   :  { %14884 = vmatpush1.bf16.msra.mxu1 %v17511_v12  ;;  %v15690_v12 = vcombine.high %v235_v3, %v251_v15  ;;  %v411_v3 = vld [vmem:[#allocation6 + $0x8f8] sm:$0xff] }
 0x7af   :  { %14885 = vmatprep.subr.bf16.mxu1 %v17544_v11  ;;  %v267_v11 = vld [vmem:[#allocation6 + $0x478] sm:$0xff] }
 0x7b0   :  { %14845 = vmatpush1.bf16.msra.mxu0 %v17031_v6  ;;  %v15722_v6 = vcombine.high %v267_v11, %v283_v41  ;;  %v15721_v26 = vcombine.low %v267_v11, %v283_v41  ;;  %v907_v15 = vld [vmem:[#allocation6 + $0x1878] sm:$0xff] }
 0x7b1   :  { %14846 = vmatprep.subr.bf16.mxu0 %v17064_v7  ;;  %v315_v7 = vld [vmem:[#allocation6 + $0x5f8] sm:$0xff] }
 0x7b2   :  { %14886 = vmatpush1.bf16.msra.mxu1 %v17543_v23  ;;  %v299_v23 = vld [vmem:[#allocation6 + $0x578] sm:$0xff] }
 0x7b3   :  { %14887 = vmatprep.subr.bf16.mxu1 %v17576_v25  ;;  %v811_v25 = vld [vmem:[#allocation6 + $0x1578] sm:$0xff]  ;;  %v15754_v54 = vcombine.high %v299_v23, %v315_v7  ;;  %v15753_v38 = vcombine.low %v299_v23, %v315_v7 }
 0x7b4   :  { %14847 = vmatpush1.bf16.msra.mxu0 %v17063_v24  ;;  %v16266_v24 = vcombine.high %v811_v25, %v827_v53  ;;  %v16265_v40 = vcombine.low %v811_v25, %v827_v53  ;;  %v443_v11 = vld [vmem:[#allocation6 + $0x9f8] sm:$0xff] }
 0x7b5   :  { %14848 = vmatprep.subr.bf16.mxu0 %v17096_v33  ;;  %v347_v33 = vld [vmem:[#allocation6 + $0x6f8] sm:$0xff] }
 0x7b6   :  { %14888 = vmatpush1.bf16.msra.mxu1 %v17575_v35  ;;  %v331_v35 = vld [vmem:[#allocation6 + $0x678] sm:$0xff] }
 0x7b7   :  { %14889 = vmatprep.subr.bf16.mxu1 %v17608_v13  ;;  %v843_v13 = vld [vmem:[#allocation6 + $0x1678] sm:$0xff]  ;;  %v15786_v42 = vcombine.high %v331_v35, %v347_v33 }
 0x7b8   :  { %14849 = vmatpush1.bf16.msra.mxu0 %v17095_v34  ;;  %v16297_v18 = vcombine.low %v843_v13, %v859_v37  ;;  %v939_v41 = vld [vmem:[#allocation6 + $0x1978] sm:$0xff] }
 0x7b9   :  { %14900 = vmatprep.subr.bf16.mxu0 %v15594_v30  ;;  %v363_v30 = vld [vmem:[#allocation6 + $0x778] sm:$0xff] }
 0x7ba   :  { %14890 = vmatpush1.bf16.msra.mxu1 %v17607_v44  ;;  %v16298_v44 = vcombine.high %v843_v13, %v859_v37  ;;  %v475_v23 = vld [vmem:[#allocation6 + $0xaf8] sm:$0xff] }
 0x7bb   :  { %14941 = vmatprep.subr.bf16.mxu1 %v16106_v19  ;;  %14851 = vmatmul.mubr.bf16.vlgmr.msra.gmra.mrb[116].mxu0 %v17857_v36  ;;  %v379_v19 = vld [vmem:[#allocation6 + $0x7f8] sm:$0xff] }
 0x7bc   :  { %14901 = vmatpush1.bf16.msra.mxu0 %v15593_v31  ;;  %14932 = vmatprep.mubr.bf16.mxu0 %v17823_v58  ;;  %v16201_v58 = vcombine.low %v747_v28, %v763_v4  ;;  %v923_v28 = vld [vmem:[#allocation6 + $0x18f8] sm:$0xff]  ;;  %v15817_v4 = vcombine.low %v363_v30, %v379_v19 }
 0x7bd   :  { %14892 = vmatmul.mubr.bf16.vlgmr.msra.gmra.mrb[116].mxu1 %v17861_v39  ;;  %14902 = vmatprep.subr.bf16.mxu0 %v15626_v55  ;;  %v971_v7 = vld [vmem:[#allocation6 + $0x1a78] sm:$0xff] }
 0x7be   :  { %14942 = vmatpush1.bf16.msra.mxu1 %v16105_v52  ;;  %14973 = vmatprep.mubr.bf16.mxu1 %v17827_v59  ;;  %v16234_v59 = vcombine.high %v779_v32, %v795_v14  ;;  %v955_v32 = vld [vmem:[#allocation6 + $0x19f8] sm:$0xff] }
 0x7bf   :  { %14943 = vmatprep.subr.bf16.mxu1 %v16138_v43  ;;  %v15785_v43 = vcombine.low %v331_v35, %v347_v33  ;;  %v987_v25 = vld [vmem:[#allocation6 + $0x1af8] sm:$0xff] }
 0x7c0   :  { %14903 = vmatpush1.bf16.msra.mxu0 %v15625_v2  ;;  %v15818_v2 = vcombine.high %v363_v30, %v379_v19  ;;  %v507_v35 = vld [vmem:[#allocation6 + $0xbf8] sm:$0xff] }
 0x7c1   :  { %14904 = vmatprep.subr.bf16.mxu0 %v15658_v0  ;;  %v16330_v0 = vcombine.high %v875_v51, %v891_v50  ;;  %v1003_v33 = vld [vmem:[#allocation6 + $0x1b78] sm:$0xff] }
 0x7c2   :  { %14944 = vmatpush1.bf16.msra.mxu1 %v16137_v63  ;;  %v1019_v13 = vld [vmem:[#allocation6 + $0x1bf8] sm:$0xff] }
 0x7c3   :  { %14945 = vmatprep.subr.bf16.mxu1 %v16170_v56  ;;  %v395_v56 = vld [vmem:[#allocation6 + $0x878] sm:$0xff] }
 0x7c4   :  { %14905 = vmatpush1.bf16.msra.mxu0 %v15657_v5  ;;  %v16329_v5 = vcombine.low %v875_v51, %v891_v50  ;;  %v15849_v14 = vcombine.low %v395_v56, %v411_v3  ;;  %v1035_v30 = vld [vmem:[#allocation6 + $0x1c78] sm:$0xff] }
 0x7c5   :  { %14906 = vmatprep.subr.bf16.mxu0 %v15690_v12  ;;  %v16362_v12 = vcombine.high %v907_v15, %v923_v28  ;;  %v1051_v19 = vld [vmem:[#allocation6 + $0x1cf8] sm:$0xff] }
 0x7c6   :  { %14946 = vmatpush1.bf16.msra.mxu1 %v16169_v8  ;;  %v15850_v8 = vcombine.high %v395_v56, %v411_v3  ;;  %v16490_v50 = vcombine.high %v1035_v30, %v1051_v19  ;;  %v603_v56 = vld [vmem:[#allocation6 + $0xef8] sm:$0xff] }
 0x7c7   :  { %14947 = vmatprep.subr.bf16.mxu1 %v16202_v10  ;;  %v427_v10 = vld [vmem:[#allocation6 + $0x978] sm:$0xff] }
 0x7c8   :  { %14907 = vmatpush1.bf16.msra.mxu0 %v15689_v21  ;;  %v16361_v21 = vcombine.low %v907_v15, %v923_v28  ;;  %v15881_v53 = vcombine.low %v427_v10, %v443_v11  ;;  %v1099_v3 = vld [vmem:[#allocation6 + $0x1e78] sm:$0xff] }
 0x7c9   :  { %14908 = vmatprep.subr.bf16.mxu0 %v15722_v6  ;;  %v16394_v6 = vcombine.high %v939_v41, %v955_v32  ;;  %v1115_v15 = vld [vmem:[#allocation6 + $0x1ef8] sm:$0xff] }
 0x7ca   :  { %14948 = vmatpush1.bf16.msra.mxu1 %v16201_v58  ;;  %v15882_v58 = vcombine.high %v427_v10, %v443_v11  ;;  %v635_v10 = vld [vmem:[#allocation6 + $0xff8] sm:$0xff] }
 0x7cb   :  { %14949 = vmatprep.subr.bf16.mxu1 %v16234_v59  ;;  %v459_v59 = vld [vmem:[#allocation6 + $0xa78] sm:$0xff] }
 0x7cc   :  { %14909 = vmatpush1.bf16.msra.mxu0 %v15721_v26  ;;  %v16393_v26 = vcombine.low %v939_v41, %v955_v32  ;;  %v15913_v37 = vcombine.low %v459_v59, %v475_v23  ;;  %v1131_v11 = vld [vmem:[#allocation6 + $0x1f78] sm:$0xff] }
 0x7cd   :  { %14910 = vmatprep.subr.bf16.mxu0 %v15754_v54  ;;  %v16426_v54 = vcombine.high %v971_v7, %v987_v25  ;;  %v1147_v41 = vld [vmem:[#allocation6 + $0x1ff8] sm:$0xff] }
 0x7ce   :  { %14950 = vmatpush1.bf16.msra.mxu1 %v16233_v17  ;;  %v14606_v34 = vpop.f32.mrb[104].mxu0  ;;  %v15914_v17 = vcombine.high %v459_v59, %v475_v23  ;;  %v1179_v59 = vld [vmem:[#allocation6 + $0x20f8] sm:$0xff] }
 0x7cf   :  { %14951 = vmatprep.subr.bf16.mxu1 %v16266_v24  ;;  %v14608_v48 = vpop.f32.mrb[105].mxu0  ;;  %v491_v24 = vld [vmem:[#allocation6 + $0xb78] sm:$0xff] }
 0x7d0   :  { %v14647_v22 = vpop.f32.mrb[104].mxu1  ;;  %v14610_v55 = vpop.f32.mrb[106].mxu0  ;;  %14911 = vmatpush1.bf16.msra.mxu0 %v15753_v38  ;;  %v16425_v38 = vcombine.low %v971_v7, %v987_v25  ;;  %v1675_v23 = vld [vmem:[#allocation6 + $0x3078] sm:$0xff] }
 0x7d1   :  { %v18149_v31 = vadd.f32 %v14647_v22, %v14606_v34  ;;  %v14649_v52 = vpop.f32.mrb[105].mxu1  ;;  %v14611_v62 = vpop.f32.mrb[107].mxu0  ;;  %14912 = vmatprep.subr.bf16.mxu0 %v15786_v42  ;;  %v16458_v42 = vcombine.high %v1003_v33, %v1019_v13  ;;  %v523_v34 = vld [vmem:[#allocation6 + $0xc78] sm:$0xff]  ;;  %v15945_v22 = vcombine.low %v491_v24, %v507_v35 }
 0x7d2   :  { %v18151_v60 = vadd.f32 %v14649_v52, %v14608_v48  ;;  %v14651_v61 = vpop.f32.mrb[106].mxu1  ;;  %14952 = vmatpush1.bf16.msra.mxu1 %v16265_v40  ;;  %v15946_v40 = vcombine.high %v491_v24, %v507_v35  ;;  %v16457_v48 = vcombine.low %v1003_v33, %v1019_v13  ;;  %v555_v52 = vld [vmem:[#allocation6 + $0xd78] sm:$0xff] }
 0x7d3   :  { %v14652_v63 = vpop.f32.mrb[107].mxu1  ;;  %14953 = vmatprep.subr.bf16.mxu1 %v16298_v44  ;;  %v539_v44 = vld [vmem:[#allocation6 + $0xcf8] sm:$0xff] }
 0x7d4   :  { %14913 = vmatpush1.bf16.msra.mxu0 %v15785_v43  ;;  %v15978_v51 = vcombine.high %v523_v34, %v539_v44  ;;  %v571_v55 = vld [vmem:[#allocation6 + $0xdf8] sm:$0xff]  ;;  %v15977_v62 = vcombine.low %v523_v34, %v539_v44 }
 0x7d5   :  { %14914 = vmatprep.subr.bf16.mxu0 %v15818_v2  ;;  %v1067_v43 = vld [vmem:[#allocation6 + $0x1d78] sm:$0xff]  ;;  %v16010_v2 = vcombine.high %v555_v52, %v571_v55  ;;  %v16009_v28 = vcombine.low %v555_v52, %v571_v55 }
 0x7d6   :  { %14954 = vmatpush1.bf16.msra.mxu1 %v16297_v18  ;;  %v1083_v61 = vld [vmem:[#allocation6 + $0x1df8] sm:$0xff]  ;;  %v16489_v18 = vcombine.low %v1035_v30, %v1051_v19 }
 0x7d7   :  { %14955 = vmatprep.subr.bf16.mxu1 %v16330_v0  ;;  %v16522_v63 = vcombine.high %v1067_v43, %v1083_v61  ;;  %v587_v0 = vld [vmem:[#allocation6 + $0xe78] sm:$0xff] }
 0x7d8   :  { %14915 = vmatpush1.bf16.msra.mxu0 %v15817_v4  ;;  %v16521_v4 = vcombine.low %v1067_v43, %v1083_v61  ;;  %v16041_v32 = vcombine.low %v587_v0, %v603_v56  ;;  %v1691_v7 = vld [vmem:[#allocation6 + $0x30f8] sm:$0xff] }
 0x7d9   :  { %14916 = vmatprep.subr.bf16.mxu0 %v15850_v8  ;;  %v16554_v8 = vcombine.high %v1099_v3, %v1115_v15  ;;  %v1211_v24 = vld [vmem:[#allocation6 + $0x21f8] sm:$0xff] }
 0x7da   :  { %14956 = vmatpush1.bf16.msra.mxu1 %v16329_v5  ;;  %v16042_v5 = vcombine.high %v587_v0, %v603_v56  ;;  %v1707_v35 = vld [vmem:[#allocation6 + $0x3178] sm:$0xff] }
 0x7db   :  { %14957 = vmatprep.subr.bf16.mxu1 %v16362_v12  ;;  %v619_v12 = vld [vmem:[#allocation6 + $0xf78] sm:$0xff] }
 0x7dc   :  { %14917 = vmatpush1.bf16.msra.mxu0 %v15849_v14  ;;  %v16553_v14 = vcombine.low %v1099_v3, %v1115_v15  ;;  %v16073_v25 = vcombine.low %v619_v12, %v635_v10  ;;  %v1723_v33 = vld [vmem:[#allocation6 + $0x31f8] sm:$0xff] }
 0x7dd   :  { %14918 = vmatprep.subr.bf16.mxu0 %v15882_v58  ;;  %v16586_v58 = vcombine.high %v1131_v11, %v1147_v41  ;;  %v1243_v34 = vld [vmem:[#allocation6 + $0x22f8] sm:$0xff] }
 0x7de   :  { %14958 = vmatpush1.bf16.msra.mxu1 %v16361_v21  ;;  %v16074_v21 = vcombine.high %v619_v12, %v635_v10  ;;  %v1739_v44 = vld [vmem:[#allocation6 + $0x3278] sm:$0xff] }
 0x7df   :  { %14959 = vmatprep.subr.bf16.mxu1 %v16394_v6  ;;  %v1163_v6 = vld [vmem:[#allocation6 + $0x2078] sm:$0xff] }
 0x7e0   :  { %14919 = vmatpush1.bf16.msra.mxu0 %v15881_v53  ;;  %v16585_v53 = vcombine.low %v1131_v11, %v1147_v41  ;;  %v16617_v13 = vcombine.low %v1163_v6, %v1179_v59  ;;  %v1755_v30 = vld [vmem:[#allocation6 + $0x32f8] sm:$0xff] }
 0x7e1   :  { %14920 = vmatprep.subr.bf16.mxu0 %v15914_v17  ;;  %v17130_v17 = vcombine.high %v1675_v23, %v1691_v7  ;;  %v1275_v52 = vld [vmem:[#allocation6 + $0x23f8] sm:$0xff] }
 0x7e2   :  { %14960 = vmatpush1.bf16.msra.mxu1 %v16393_v26  ;;  %v16618_v26 = vcombine.high %v1163_v6, %v1179_v59  ;;  %v1771_v55 = vld [vmem:[#allocation6 + $0x3378] sm:$0xff] }
 0x7e3   :  { %14961 = vmatprep.subr.bf16.mxu1 %v16426_v54  ;;  %v1195_v54 = vld [vmem:[#allocation6 + $0x2178] sm:$0xff] }
 0x7e4   :  { %14921 = vmatpush1.bf16.msra.mxu0 %v15913_v37  ;;  %v17129_v37 = vcombine.low %v1675_v23, %v1691_v7  ;;  %v16649_v19 = vcombine.low %v1195_v54, %v1211_v24  ;;  %v1787_v43 = vld [vmem:[#allocation6 + $0x33f8] sm:$0xff] }
 0x7e5   :  { %14922 = vmatprep.subr.bf16.mxu0 %v15946_v40  ;;  %v17162_v40 = vcombine.high %v1707_v35, %v1723_v33  ;;  %v1819_v0 = vld [vmem:[#allocation6 + $0x34f8] sm:$0xff] }
 0x7e6   :  { %14962 = vmatpush1.bf16.msra.mxu1 %v16425_v38  ;;  %v16650_v38 = vcombine.high %v1195_v54, %v1211_v24  ;;  %v1323_v15 = vld [vmem:[#allocation6 + $0x2578] sm:$0xff]  ;;  %v15278_v54 = vrot.slane %v18137_v57, %v17912_v9 }
 0x7e7   :  { %14963 = vmatprep.subr.bf16.mxu1 %v16458_v42  ;;  %v1227_v42 = vld [vmem:[#allocation6 + $0x2278] sm:$0xff] }
 0x7e8   :  { %14923 = vmatpush1.bf16.msra.mxu0 %v15945_v22  ;;  %v17161_v22 = vcombine.low %v1707_v35, %v1723_v33  ;;  %v1355_v41 = vld [vmem:[#allocation6 + $0x2678] sm:$0xff] }
 0x7e9   :  { %14924 = vmatprep.subr.bf16.mxu0 %v15978_v51  ;;  %v17194_v51 = vcombine.high %v1739_v44, %v1755_v30  ;;  %v1899_v35 = vld [vmem:[#allocation6 + $0x3778] sm:$0xff] }
 0x7ea   :  { %14964 = vmatpush1.bf16.msra.mxu1 %v16457_v48  ;;  %v16682_v48 = vcombine.high %v1227_v42, %v1243_v34  ;;  %v1915_v33 = vld [vmem:[#allocation6 + $0x37f8] sm:$0xff] }
 0x7eb   :  { %14965 = vmatprep.subr.bf16.mxu1 %v16490_v50  ;;  %v1259_v50 = vld [vmem:[#allocation6 + $0x2378] sm:$0xff] }
 0x7ec   :  { %14925 = vmatpush1.bf16.msra.mxu0 %v15977_v62  ;;  %v16714_v61 = vcombine.high %v1259_v50, %v1275_v52  ;;  %v17226_v62 = vcombine.high %v1771_v55, %v1787_v43  ;;  %v16713_v56 = vcombine.low %v1259_v50, %v1275_v52  ;;  %v1931_v52 = vld [vmem:[#allocation6 + $0x3878] sm:$0xff] }
 0x7ed   :  { %14926 = vmatprep.subr.bf16.mxu0 %v16010_v2  ;;  %v1307_v2 = vld [vmem:[#allocation6 + $0x24f8] sm:$0xff] }
 0x7ee   :  { %14966 = vmatpush1.bf16.msra.mxu1 %v16489_v18  ;;  %v1291_v18 = vld [vmem:[#allocation6 + $0x2478] sm:$0xff] }
 0x7ef   :  { %14967 = vmatprep.subr.bf16.mxu1 %v16522_v63  ;;  %v1803_v63 = vld [vmem:[#allocation6 + $0x3478] sm:$0xff]  ;;  %v16746_v3 = vcombine.high %v1291_v18, %v1307_v2 }
 0x7f0   :  { %14927 = vmatpush1.bf16.msra.mxu0 %v16009_v28  ;;  %v1339_v28 = vld [vmem:[#allocation6 + $0x25f8] sm:$0xff]  ;;  %v17257_v12 = vcombine.low %v1803_v63, %v1819_v0 }
 0x7f1   :  { %14928 = vmatprep.subr.bf16.mxu0 %v16042_v5  ;;  %v1851_v5 = vld [vmem:[#allocation6 + $0x35f8] sm:$0xff]  ;;  %v16778_v10 = vcombine.high %v1323_v15, %v1339_v28 }
 0x7f2   :  { %14968 = vmatpush1.bf16.msra.mxu1 %v16521_v4  ;;  %v1835_v4 = vld [vmem:[#allocation6 + $0x3578] sm:$0xff] }
 0x7f3   :  { %14969 = vmatprep.subr.bf16.mxu1 %v16554_v8  ;;  %v16745_v8 = vcombine.low %v1291_v18, %v1307_v2  ;;  %v17290_v11 = vcombine.high %v1835_v4, %v1851_v5  ;;  %v17289_v6 = vcombine.low %v1835_v4, %v1851_v5  ;;  %v1451_v18 = vld [vmem:[#allocation6 + $0x2978] sm:$0xff] }
 0x7f4   :  { %14929 = vmatpush1.bf16.msra.mxu0 %v16041_v32  ;;  %v1371_v32 = vld [vmem:[#allocation6 + $0x26f8] sm:$0xff] }
 0x7f5   :  { %14930 = vmatprep.subr.bf16.mxu0 %v16074_v21  ;;  %v1883_v21 = vld [vmem:[#allocation6 + $0x36f8] sm:$0xff]  ;;  %v16810_v59 = vcombine.high %v1355_v41, %v1371_v32 }
 0x7f6   :  { %14970 = vmatpush1.bf16.msra.mxu1 %v16553_v14  ;;  %v1867_v14 = vld [vmem:[#allocation6 + $0x3678] sm:$0xff] }
 0x7f7   :  { %14971 = vmatprep.subr.bf16.mxu1 %v16586_v58  ;;  %v16777_v58 = vcombine.low %v1323_v15, %v1339_v28  ;;  %v17322_v7 = vcombine.high %v1867_v14, %v1883_v21  ;;  %v1467_v2 = vld [vmem:[#allocation6 + $0x29f8] sm:$0xff] }
 0x7f8   :  { %14931 = vmatpush1.bf16.msra.mxu0 %v16073_v25  ;;  %v1387_v25 = vld [vmem:[#allocation6 + $0x2778] sm:$0xff] }
 0x7f9   :  { %14982 = vmatprep.subr.bf16.mxu0 %v16618_v26  ;;  %v1483_v28 = vld [vmem:[#allocation6 + $0x2a78] sm:$0xff] }
 0x7fa   :  { %14972 = vmatpush1.bf16.msra.mxu1 %v16585_v53  ;;  %v1403_v53 = vld [vmem:[#allocation6 + $0x27f8] sm:$0xff] }
 0x7fb   :  { %15023 = vmatprep.subr.bf16.mxu1 %v17130_v17  ;;  %14933 = vmatmul.mubr.bf16.vlgmr.msra.gmra.mrb[120].mxu0 %v17833_v16  ;;  %v16681_v16 = vcombine.low %v1227_v42, %v1243_v34  ;;  %v16809_v42 = vcombine.low %v1355_v41, %v1371_v32  ;;  %v1499_v4 = vld [vmem:[#allocation6 + $0x2af8] sm:$0xff] }
 0x7fc   :  { %14983 = vmatpush1.bf16.msra.mxu0 %v16617_v13  ;;  %15014 = vmatprep.mubr.bf16.mxu0 %v17845_v27  ;;  %v17225_v27 = vcombine.low %v1771_v55, %v1787_v43  ;;  %v1947_v55 = vld [vmem:[#allocation6 + $0x38f8] sm:$0xff] }
 0x7fd   :  { %14974 = vmatmul.mubr.bf16.vlgmr.msra.gmra.mrb[120].mxu1 %v17839_v20  ;;  %14984 = vmatprep.subr.bf16.mxu0 %v16650_v38  ;;  %v17193_v20 = vcombine.low %v1739_v44, %v1755_v30  ;;  %v15282_v38 = vrot.slane %v18137_v57, %v17915_v1  ;;  %v17321_v30 = vcombine.low %v1867_v14, %v1883_v21  ;;  %v1995_v5 = vld [vmem:[#allocation6 + $0x3a78] sm:$0xff] }
 0x7fe   :  { %15024 = vmatpush1.bf16.msra.mxu1 %v17129_v37  ;;  %15055 = vmatprep.mubr.bf16.mxu1 %v17850_v29  ;;  %v17258_v29 = vcombine.high %v1803_v63, %v1819_v0  ;;  %v16841_v57 = vcombine.low %v1387_v25, %v1403_v53  ;;  %v1963_v63 = vld [vmem:[#allocation6 + $0x3978] sm:$0xff] }
 0x7ff   :  { %15025 = vmatprep.subr.bf16.mxu1 %v17162_v40  ;;  %v1979_v0 = vld [vmem:[#allocation6 + $0x39f8] sm:$0xff] }
 0x800   :  { %14985 = vmatpush1.bf16.msra.mxu0 %v16649_v19  ;;  %v16842_v19 = vcombine.high %v1387_v25, %v1403_v53  ;;  %v17418_v15 = vcombine.high %v1963_v63, %v1979_v0  ;;  %v1515_v32 = vld [vmem:[#allocation6 + $0x2b78] sm:$0xff] }
 0x801   :  { %14986 = vmatprep.subr.bf16.mxu0 %v16682_v48  ;;  %v17354_v48 = vcombine.high %v1899_v35, %v1915_v33  ;;  %v1531_v14 = vld [vmem:[#allocation6 + $0x2bf8] sm:$0xff] }
 0x802   :  { %15026 = vmatpush1.bf16.msra.mxu1 %v17161_v22  ;;  %v2027_v21 = vld [vmem:[#allocation6 + $0x3b78] sm:$0xff] }
 0x803   :  { %15027 = vmatprep.subr.bf16.mxu1 %v17194_v51  ;;  %v1419_v51 = vld [vmem:[#allocation6 + $0x2878] sm:$0xff] }
 0x804   :  { %14987 = vmatpush1.bf16.msra.mxu0 %v16681_v16  ;;  %v17353_v16 = vcombine.low %v1899_v35, %v1915_v33  ;;  %v1547_v25 = vld [vmem:[#allocation6 + $0x2c78] sm:$0xff] }
 0x805   :  { %14988 = vmatprep.subr.bf16.mxu0 %v16714_v61  ;;  %v1563_v53 = vld [vmem:[#allocation6 + $0x2cf8] sm:$0xff] }
 0x806   :  { %15028 = vmatpush1.bf16.msra.mxu1 %v17193_v20  ;;  %v17002_v35 = vcombine.high %v1547_v25, %v1563_v53 }
 0x807   :  { %15029 = vmatprep.subr.bf16.mxu1 %v17226_v62  ;;  %v17386_v62 = vcombine.high %v1931_v52, %v1947_v55 }
 0x808   :  { %14989 = vmatpush1.bf16.msra.mxu0 %v16713_v56 }
 0x809   :  { %14990 = vmatprep.subr.bf16.mxu0 %v16746_v3  ;;  %v17385_v3 = vcombine.low %v1931_v52, %v1947_v55  ;;  %v1643_v52 = vld [vmem:[#allocation6 + $0x2f78] sm:$0xff] }
 0x80a   :  { %15030 = vmatpush1.bf16.msra.mxu1 %v17225_v27  ;;  %v1659_v55 = vld [vmem:[#allocation6 + $0x2ff8] sm:$0xff] }
 0x80b   :  { %15031 = vmatprep.subr.bf16.mxu1 %v17258_v29  ;;  %v16906_v29 = vcombine.high %v1451_v18, %v1467_v2 }
 0x80c   :  { %14991 = vmatpush1.bf16.msra.mxu0 %v16745_v8  ;;  %v2011_v8 = vld [vmem:[#allocation6 + $0x3af8] sm:$0xff] }
 0x80d   :  { %14992 = vmatprep.subr.bf16.mxu0 %v16778_v10  ;;  %v17417_v10 = vcombine.low %v1963_v63, %v1979_v0  ;;  %v17450_v41 = vcombine.high %v1995_v5, %v2011_v8 }
 0x80e   :  { %15032 = vmatpush1.bf16.msra.mxu1 %v17257_v12  ;;  %v14688_v23 = vpop.f32.mrb[108].mxu0  ;;  %v16905_v12 = vcombine.low %v1451_v18, %v1467_v2 }
 0x80f   :  { %15033 = vmatprep.subr.bf16.mxu1 %v17290_v11  ;;  %v14689_v26 = vadd.f32 %v14688_v23, %v18149_v31  ;;  %v14690_v24 = vpop.f32.mrb[109].mxu0  ;;  %v16938_v11 = vcombine.high %v1483_v28, %v1499_v4  ;;  %v16970_v23 = vcombine.high %v1515_v32, %v1531_v14 }
 0x810   :  { %v14729_v17 = vpop.f32.mrb[108].mxu1  ;;  %v14691_v13 = vadd.f32 %v14690_v24, %v18151_v60  ;;  %v14692_v40 = vpop.f32.mrb[110].mxu0  ;;  %14993 = vmatpush1.bf16.msra.mxu0 %v16777_v58  ;;  %v1435_v60 = vld [vmem:[#allocation6 + $0x28f8] sm:$0xff] }
 0x811   :  { %v14731_v37 = vpop.f32.mrb[109].mxu1  ;;  %v14730_v34 = vadd.f32 %v14729_v17, %v14689_v26  ;;  %v14693_v31 = vpop.f32.mrb[111].mxu0  ;;  %14994 = vmatprep.subr.bf16.mxu0 %v16810_v59  ;;  %v16874_v20 = vcombine.high %v1419_v51, %v1435_v60  ;;  %v16873_v27 = vcombine.low %v1419_v51, %v1435_v60  ;;  %v2043_v58 = vld [vmem:[#allocation6 + $0x3bf8] sm:$0xff]  ;;  %v17449_v59 = vcombine.low %v1995_v5, %v2011_v8 }
 0x812   :  { %v14733_v44 = vpop.f32.mrb[110].mxu1  ;;  %15034 = vmatpush1.bf16.msra.mxu1 %v17289_v6  ;;  %v14732_v9 = vadd.f32 %v14731_v37, %v14691_v13  ;;  %v16937_v6 = vcombine.low %v1483_v28, %v1499_v4  ;;  %v2059_v26 = vld [vmem:[#allocation6 + $0x3c78] sm:$0xff]  ;;  %v17481_v24 = vcombine.low %v2027_v21, %v2043_v58 }
 0x813   :  { %v14734_v22 = vpop.f32.mrb[111].mxu1  ;;  %15035 = vmatprep.subr.bf16.mxu1 %v17322_v7  ;;  %v15357_v50 = vadd.f32 %v15278_v54, %v14730_v34  ;;  %v17482_v7 = vcombine.high %v2027_v21, %v2043_v58  ;;  %v2075_v17 = vld [vmem:[#allocation6 + $0x3cf8] sm:$0xff]  ;;  %v16969_v54 = vcombine.low %v1515_v32, %v1531_v14 }
 0x814   :  { %v15358_v1 = vadd.f32 %v15282_v38, %v14732_v9  ;;  %14995 = vmatpush1.bf16.msra.mxu0 %v16809_v42  ;;  %v17514_v33 = vcombine.high %v2059_v26, %v2075_v17  ;;  %v1579_v13 = vld [vmem:[#allocation6 + $0x2d78] sm:$0xff]  ;;  %v17001_v42 = vcombine.low %v1547_v25, %v1563_v53  ;;  %v17513_v34 = vcombine.low %v2059_v26, %v2075_v17 }
 0x815   :  { %v15389_v43 = vmax.f32 %v15357_v50, 0.0  ;;  %14996 = vmatprep.subr.bf16.mxu0 %v16842_v19  ;;  %v1595_v37 = vld [vmem:[#allocation6 + $0x2df8] sm:$0xff] }
 0x816   :  { %15036 = vmatpush1.bf16.msra.mxu1 %v17321_v30  ;;  %v15390_v61 = vmax.f32 %v15358_v1, 0.0  ;;  %v2091_v38 = vld [vmem:[#allocation6 + $0x3d78] sm:$0xff]  ;;  %v17034_v44 = vcombine.high %v1579_v13, %v1595_v37 }
 0x817   :  { %15037 = vmatprep.subr.bf16.mxu1 %v17354_v48  ;;  %v2107_v40 = vld [vmem:[#allocation6 + $0x3df8] sm:$0xff]  ;;  %v17033_v48 = vcombine.low %v1579_v13, %v1595_v37 }
 0x818   :  { %v17640_v56 = vpack.c.bf16 %v15390_v61, %v15389_v43  ;;  %14997 = vmatpush1.bf16.msra.mxu0 %v16841_v57  ;;  %v17546_v31 = vcombine.high %v2091_v38, %v2107_v40  ;;  %v1611_v30 = vld [vmem:[#allocation6 + $0x2e78] sm:$0xff]  ;;  %v17545_v51 = vcombine.low %v2091_v38, %v2107_v40 }
 0x819   :  { %14998 = vmatprep.subr.bf16.mxu0 %v16874_v20  ;;  %v1627_v19 = vld [vmem:[#allocation6 + $0x2ef8] sm:$0xff]  ;;  %v17098_v20 = vcombine.high %v1643_v52, %v1659_v55 }
 0x81a   :  { %15038 = vmatpush1.bf16.msra.mxu1 %v17353_v16  ;;  %15536 = vst [vmem:[#allocation9 + $0x68] sm:$0xff] %v17640_v56  ;;  %v2123_v9 = vld [vmem:[#allocation6 + $0x3e78] sm:$0xff]  ;;  %v17066_v60 = vcombine.high %v1611_v30, %v1627_v19  ;;  %v17065_v43 = vcombine.low %v1611_v30, %v1627_v19 }
 0x81b   :  { %15039 = vmatprep.subr.bf16.mxu1 %v17386_v62  ;;  %v2139_v22 = vld [vmem:[#allocation6 + $0x3ef8] sm:$0xff]  ;;  %v17097_v62 = vcombine.low %v1643_v52, %v1659_v55 }
 0x81c   :  { %14999 = vmatpush1.bf16.msra.mxu0 %v16873_v27  ;;  %v17578_v50 = vcombine.high %v2123_v9, %v2139_v22  ;;  %v2155_v1 = vld [vmem:[#allocation6 + $0x3f78] sm:$0xff]  ;;  %v17577_v16 = vcombine.low %v2123_v9, %v2139_v22 }
 0x81d   :  { %15000 = vmatprep.subr.bf16.mxu0 %v16906_v29  ;;  %v2171_v57 = vld [vmem:[#allocation6 + $0x3ff8] sm:$0xff] }
 0x81e   :  { %15040 = vmatpush1.bf16.msra.mxu1 %v17385_v3  ;;  %v17610_v61 = vcombine.high %v2155_v1, %v2171_v57  ;;  %v17609_v18 = vcombine.low %v2155_v1, %v2171_v57 }
 0x81f   :  { %15041 = vmatprep.subr.bf16.mxu1 %v17418_v15 }
 0x820   :  { %15001 = vmatpush1.bf16.msra.mxu0 %v16905_v12 }
 0x821   :  { %15002 = vmatprep.subr.bf16.mxu0 %v16938_v11 }
 0x822   :  { %15042 = vmatpush1.bf16.msra.mxu1 %v17417_v10  ;;  %v17660_v10 = vld [vmem:[#allocation8 + $0x18] sm:$0xff] }
 0x823   :  { %15043 = vmatprep.subr.bf16.mxu1 %v17450_v41  ;;  %v15286_v11 = vrot.slane %v17660_v10, %v17936_v45  ;;  %v15298_v22 = vrot.slane %v17660_v10, %v17965_v49 }
 0x824   :  { %15003 = vmatpush1.bf16.msra.mxu0 %v16937_v6 }
 0x825   :  { %15004 = vmatprep.subr.bf16.mxu0 %v16970_v23 }
 0x826   :  { %15044 = vmatpush1.bf16.msra.mxu1 %v17449_v59 }
 0x827   :  { %15045 = vmatprep.subr.bf16.mxu1 %v17482_v7 }
 0x828   :  { %15005 = vmatpush1.bf16.msra.mxu0 %v16969_v54 }
 0x829   :  { %15006 = vmatprep.subr.bf16.mxu0 %v17002_v35 }
 0x82a   :  { %15046 = vmatpush1.bf16.msra.mxu1 %v17481_v24 }
 0x82b   :  { %15047 = vmatprep.subr.bf16.mxu1 %v17514_v33 }
 0x82c   :  { %15007 = vmatpush1.bf16.msra.mxu0 %v17001_v42 }
 0x82d   :  { %15008 = vmatprep.subr.bf16.mxu0 %v17034_v44 }
 0x82e   :  { %15048 = vmatpush1.bf16.msra.mxu1 %v17513_v34 }
 0x82f   :  { %15049 = vmatprep.subr.bf16.mxu1 %v17546_v31  ;;  %v15294_v31 = vrot.slane %v17660_v10, %v17962_v46 }
 0x830   :  { %15009 = vmatpush1.bf16.msra.mxu0 %v17033_v48 }
 0x831   :  { %15010 = vmatprep.subr.bf16.mxu0 %v17066_v60 }
 0x832   :  { %15050 = vmatpush1.bf16.msra.mxu1 %v17545_v51 }
 0x833   :  { %15051 = vmatprep.subr.bf16.mxu1 %v17578_v50 }
 0x834   :  { %15011 = vmatpush1.bf16.msra.mxu0 %v17065_v43 }
 0x835   :  { %15012 = vmatprep.subr.bf16.mxu0 %v17098_v20 }
 0x836   :  { %15052 = vmatpush1.bf16.msra.mxu1 %v17577_v16 }
 0x837   :  { %15053 = vmatprep.subr.bf16.mxu1 %v17610_v61 }
 0x838   :  { %15013 = vmatpush1.bf16.msra.mxu0 %v17097_v62 }
 0x83a   :  { %15054 = vmatpush1.bf16.msra.mxu1 %v17609_v18 }
 0x83b   :  { %15015 = vmatmul.mubr.bf16.vlgmr.msra.gmra.mrb[124].mxu0 %v17857_v36 }
 0x83d   :  { %15056 = vmatmul.mubr.bf16.vlgmr.msra.gmra.mrb[124].mxu1 %v17861_v39  ;;  %v15290_v39 = vrot.slane %v17660_v10, %v17939_v47 }
 0x84e   :  { %v14770_v2 = vpop.f32.mrb[112].mxu0 }
 0x84f   :  { %v14772_v0 = vpop.f32.mrb[113].mxu0 }
 0x850   :  { %v14811_v63 = vpop.f32.mrb[112].mxu1  ;;  %v14774_v3 = vpop.f32.mrb[114].mxu0 }
 0x851   :  { %v14812_v56 = vadd.f32 %v14811_v63, %v14770_v2  ;;  %v14813_v27 = vpop.f32.mrb[113].mxu1  ;;  %v14775_v28 = vpop.f32.mrb[115].mxu0 }
 0x852   :  { %v14814_v29 = vadd.f32 %v14813_v27, %v14772_v0  ;;  %v14815_v15 = vpop.f32.mrb[114].mxu1 }
 0x853   :  { %v14816_v4 = vpop.f32.mrb[115].mxu1 }
 0x88e   :  { %v14852_v5 = vpop.f32.mrb[116].mxu0 }
 0x88f   :  { %v14853_v8 = vadd.f32 %v14852_v5, %v14812_v56  ;;  %v14854_v41 = vpop.f32.mrb[117].mxu0 }
 0x890   :  { %v14893_v12 = vpop.f32.mrb[116].mxu1  ;;  %v14855_v36 = vadd.f32 %v14854_v41, %v14814_v29  ;;  %v14856_v14 = vpop.f32.mrb[118].mxu0 }
 0x891   :  { %v14895_v32 = vpop.f32.mrb[117].mxu1  ;;  %v14894_v21 = vadd.f32 %v14893_v12, %v14853_v8  ;;  %v14857_v6 = vpop.f32.mrb[119].mxu0 }
 0x892   :  { %v14897_v58 = vpop.f32.mrb[118].mxu1  ;;  %v14896_v59 = vadd.f32 %v14895_v32, %v14855_v36 }
 0x893   :  { %v14898_v23 = vpop.f32.mrb[119].mxu1  ;;  %v15359_v7 = vadd.f32 %v15286_v11, %v14894_v21 }
 0x894   :  { %v15360_v25 = vadd.f32 %v15290_v39, %v14896_v59 }
 0x895   :  { %v15391_v53 = vmax.f32 %v15359_v7, 0.0 }
 0x896   :  { %v15392_v26 = vmax.f32 %v15360_v25, 0.0 }
 0x898   :  { %v17641_v17 = vpack.c.bf16 %v15392_v26, %v15391_v53 }
 0x89a   :  { %15537 = vst [vmem:[#allocation9 + $0x70] sm:$0xff] %v17641_v17 }
 0x8ce   :  { %v14934_v54 = vpop.f32.mrb[120].mxu0 }
 0x8cf   :  { %v14936_v45 = vpop.f32.mrb[121].mxu0 }
 0x8d0   :  { %v14975_v24 = vpop.f32.mrb[120].mxu1  ;;  %v14938_v13 = vpop.f32.mrb[122].mxu0 }
 0x8d1   :  { %v14976_v35 = vadd.f32 %v14975_v24, %v14934_v54  ;;  %v14977_v33 = vpop.f32.mrb[121].mxu1  ;;  %v14939_v38 = vpop.f32.mrb[123].mxu0 }
 0x8d2   :  { %v14978_v37 = vadd.f32 %v14977_v33, %v14936_v45  ;;  %v14979_v47 = vpop.f32.mrb[122].mxu1 }
 0x8d3   :  { %v14980_v40 = vpop.f32.mrb[123].mxu1 }
 0x90e   :  { %v15016_v42 = vpop.f32.mrb[124].mxu0 }
 0x90f   :  { %v15017_v34 = vadd.f32 %v15016_v42, %v14976_v35  ;;  %v15018_v30 = vpop.f32.mrb[125].mxu0 }
 0x910   :  { %v15057_v44 = vpop.f32.mrb[124].mxu1  ;;  %v15019_v19 = vadd.f32 %v15018_v30, %v14978_v37  ;;  %v15020_v48 = vpop.f32.mrb[126].mxu0 }
 0x911   :  { %v15059_v9 = vpop.f32.mrb[125].mxu1  ;;  %v15058_v51 = vadd.f32 %v15057_v44, %v15017_v34  ;;  %v15021_v50 = vpop.f32.mrb[127].mxu0 }
 0x912   :  { %v15061_v60 = vpop.f32.mrb[126].mxu1  ;;  %v15060_v52 = vadd.f32 %v15059_v9, %v15019_v19 }
 0x913   :  { %v15062_v55 = vpop.f32.mrb[127].mxu1  ;;  %v15361_v1 = vadd.f32 %v15294_v31, %v15058_v51 }
 0x914   :  { %v15362_v57 = vadd.f32 %v15298_v22, %v15060_v52 }
 0x915   :  { %v15393_v43 = vmax.f32 %v15361_v1, 0.0 }
 0x916   :  { %v15394_v16 = vmax.f32 %v15362_v57, 0.0 }
 0x918   :  { %v17642_v20 = vpack.c.bf16 %v15394_v16, %v15393_v43 }
 0x91a   :  { %15538 = vst [vmem:[#allocation9 + $0x78] sm:$0xff] %v17642_v20 }
 0x91b   :  { %17738 = shalt.err (!%p17735_p0)
}
 0x91c   :  { %s17739_s25 = scalar_lea.hbm %s18184_s3, 2048 }
 0x91d   :  { %p17740_p1 = scmp.ne.s32.totalorder %s18184_s3, %s17739_s25  ;;  %p17743_p2 = scmp.lt.u32.totalorder %s17739_s25, %s18184_s3 }
 0x91f   :  { %p17745_p3 = pnand %p17743_p2, %p17740_p1 }
 0x921   :  { %17748 = shalt.err (!%p17745_p3)
}
 0x922   :  { %15548 = dma.vmem_to_hbm [thread:$0]  %s15546_s21, 2048, %s18184_s3, [#allocation5]  }
 0x923   :  { %17753 = dma.done.wait [#allocation5], 2048  }
 0x924   :  { %17754 = vsyncadd [#allocation5], 4294965248 }
 0x925   :  { %15552 = vsyncpa [#allocation4], 1 }
 0x926   :  { %15553 = vsyncpa [#allocation7], 1 }
 0x927   :  { %15554 = vsyncpa [#allocation5], 1 }

</bundles_post_ra>
